<compile_context>
chip_gen: v6e
topology: v6e:2x2x1
jax: 0.10.0
libtpu: 0.0.40
codegen_flags: <defaults>
</compile_context>

<pallas_src>
import functools

import numpy as np

import jax
import jax.numpy as jnp
from jax.experimental import pallas as pl
from jax.experimental.pallas import tpu as pltpu

IMG = 16                      # input is (1, IMG, IMG)
LATENT = 32
BOTTLE = IMG // 8             # 2
C1, C2, C3 = 32, 64, 128
H1, H2, H3 = IMG // 2, IMG // 4, IMG // 8        # 8, 4, 2
M1, M2, M3 = H1 * H1, H2 * H2, H3 * H3           # 64, 16, 4
N_PIX = IMG * IMG                                # 256
BATCH = 2


# ---------------------------------------------------------------------------
# Constant gather / scatter matrices (numpy, built once at pack time).
# They encode padding + stride (and, for the transposed convs, the zero
# insertion), so the kernel only ever does plain matmuls.
# ---------------------------------------------------------------------------
def _enc_gather_matrix(h, w, k=3, stride=2, pad=1):
    """S[hi*w+wi, t*m + (oh*wo+ow)] = 1 iff Conv2d tap t reads that pixel."""
    ho, wo = h // stride, w // stride
    m = ho * wo
    s = np.zeros((h * w, k * k * m), np.float32)
    for ki in range(k):
        for kj in range(k):
            t = ki * k + kj
            for oh in range(ho):
                ih = stride * oh + ki - pad
                if ih < 0 or ih >= h:
                    continue
                for ow in range(wo):
                    iw = stride * ow + kj - pad
                    if iw < 0 or iw >= w:
                        continue
                    s[ih * w + iw, t * m + oh * wo + ow] = 1.0
    return s


def _dec_scatter_matrix(h, w, k=3, stride=2, pad=1, out_pad=1):
    """S[ih*w+iw, t*m + (oh*wo+ow)] = 1 iff ConvTranspose2d tap t scatters there."""
    ho = (h - 1) * stride - 2 * pad + k + out_pad
    wo = (w - 1) * stride - 2 * pad + k + out_pad
    m = ho * wo
    s = np.zeros((h * w, k * k * m), np.float32)
    for ki in range(k):
        for kj in range(k):
            t = ki * k + kj
            for ih in range(h):
                oh = stride * ih - pad + ki
                if oh < 0 or oh >= ho:
                    continue
                for iw in range(w):
                    ow = stride * iw - pad + kj
                    if ow < 0 or ow >= wo:
                        continue
                    s[ih * w + iw, t * m + oh * wo + ow] = 1.0
    return s


def _batch_block_diag(s, batch, n_taps=9):
    """(hw, 9*m) single-sample matrix -> (B*hw, 9*B*m) block-diagonal over batch.

    Row index is (b, q) b-major; column index is (t, b, p) t-major / b-major,
    matching activations held as (C, B*HW).  Grows O(B^2): keep B small.
    """
    hw, cols = s.shape
    m = cols // n_taps
    s3 = s.reshape(hw, n_taps, m)
    out = np.zeros((batch, hw, n_taps, batch, m), np.float32)
    for b in range(batch):
        out[b, :, :, b, :] = s3
    return out.reshape(batch * hw, n_taps * batch * m)


# ---------------------------------------------------------------------------
# Parameters (PyTorch layouts) and one-time packing into kernel layouts.
# ---------------------------------------------------------------------------
def init_params(key):
    def nrm(k, shape, scale=0.05):
        return scale * jax.random.normal(k, shape, dtype=jnp.float32)

    ks = jax.random.split(key, 18)
    flat = C3 * BOTTLE * BOTTLE                  # 512
    return {
        # encoder convs: PyTorch Conv2d weight layout (Cout, Cin, 3, 3)
        "c1_w": nrm(ks[0], (C1, 1, 3, 3)),   "c1_b": nrm(ks[1], (C1,)),
        "c2_w": nrm(ks[2], (C2, C1, 3, 3)),  "c2_b": nrm(ks[3], (C2,)),
        "c3_w": nrm(ks[4], (C3, C2, 3, 3)),  "c3_b": nrm(ks[5], (C3,)),
        # linears: PyTorch nn.Linear weight layout (out, in)
        "mu_w": nrm(ks[6], (LATENT, flat)),  "mu_b": nrm(ks[7], (LATENT,)),
        "lv_w": nrm(ks[8], (LATENT, flat)),  "lv_b": nrm(ks[9], (LATENT,)),
        "dec_w": nrm(ks[10], (flat, LATENT)), "dec_b": nrm(ks[11], (flat,)),
        # decoder: PyTorch ConvTranspose2d weight layout (Cin, Cout, 3, 3)
        "d1_w": nrm(ks[12], (C3, C2, 3, 3)), "d1_b": nrm(ks[13], (C2,)),
        "d2_w": nrm(ks[14], (C2, C1, 3, 3)), "d2_b": nrm(ks[15], (C1,)),
        "d3_w": nrm(ks[16], (C1, 1, 3, 3)),  "d3_b": nrm(ks[17], (1,)),
    }


def prepare_params(p, batch):
    """Pack PyTorch-layout params into matmul-ready kernel operands (run once)."""
    bf16 = jnp.bfloat16

    def enc_w(w):                      # (Cout,Cin,3,3) -> (Cout, 9*Cin), cols (t, ci)
        co, ci, k, _ = w.shape
        return jnp.transpose(w, (0, 2, 3, 1)).reshape(co, k * k * ci)

    def dec_w(w):                      # (Cin,Cout,3,3) -> (9*Cout, Cin), rows (t, co)
        ci, co, k, _ = w.shape
        return jnp.transpose(w, (2, 3, 1, 0)).reshape(k * k * co, ci)

    n_sp = M3                          # 4 bottleneck pixels
    # fc_mu / fc_logvar concatenated; packed as (C3, n_sp*2L), columns (p, out)
    wmu = p["mu_w"].reshape(LATENT, C3, n_sp)
    wlv = p["lv_w"].reshape(LATENT, C3, n_sp)
    ml = jnp.concatenate([wmu, wlv], axis=0)                      # (2L, C3, 4)
    ml_w = jnp.transpose(ml, (1, 2, 0)).reshape(C3, n_sp * 2 * LATENT)
    ml_b = jnp.concatenate([p["mu_b"], p["lv_b"]]).reshape(1, 2 * LATENT)
    # fc_decode: rows (p, c); bias tiled to the (b, p) column order
    dc_w = jnp.transpose(p["dec_w"].reshape(C3, n_sp, LATENT),
                         (1, 0, 2)).reshape(n_sp * C3, LATENT)
    dc_b = jnp.tile(p["dec_b"].reshape(C3, n_sp), (1, batch))     # (C3, B*4)

    return {
        # conv1 / deconv3 keep a SHARED (non block-diagonal) 0/1 matrix; the
        # middle layers use block-diagonal ones so the batch rides the lane axis.
        "e1_s": jnp.asarray(_enc_gather_matrix(IMG, IMG), bf16),
        "e1_w": enc_w(p["c1_w"]), "e1_b": p["c1_b"].reshape(-1, 1),
        "e2_s": jnp.asarray(_batch_block_diag(_enc_gather_matrix(H1, H1), batch), bf16),
        "e2_w": enc_w(p["c2_w"]), "e2_b": p["c2_b"].reshape(-1, 1),
        "e3_s": jnp.asarray(_batch_block_diag(_enc_gather_matrix(H2, H2), batch), bf16),
        "e3_w": enc_w(p["c3_w"]), "e3_b": p["c3_b"].reshape(-1, 1),
        "ml_w": ml_w, "ml_b": ml_b,
        "dc_w": dc_w, "dc_b": dc_b,
        "d1_s": jnp.asarray(_batch_block_diag(_dec_scatter_matrix(H3, H3), batch), bf16),
        "d1_w": dec_w(p["d1_w"]), "d1_b": p["d1_b"].reshape(-1, 1),
        "d2_s": jnp.asarray(_batch_block_diag(_dec_scatter_matrix(H2, H2), batch), bf16),
        "d2_w": dec_w(p["d2_w"]), "d2_b": p["d2_b"].reshape(-1, 1),
        "d3_s": jnp.asarray(_dec_scatter_matrix(H1, H1), bf16),
        "d3_w": dec_w(p["d3_w"]), "d3_b": p["d3_b"].reshape(1, 1),
    }


# ---------------------------------------------------------------------------
# In-kernel building blocks (2-D dots, static slices, elementwise only).
# Activations are (C, B*HW); constants are sliced from refs at point of use.
# ---------------------------------------------------------------------------
def _enc_conv(a, s_ref, w_ref, b_ref, *, cin, bm):
    """Conv2d(k=3, s=2, p=1) + ReLU on a (cin, B*hw_in) activation."""
    f32 = jnp.float32
    g = jnp.dot(a, s_ref[...].astype(f32), preferred_element_type=f32)   # (cin, 9*bm)
    acc = None
    for t in range(9):
        part = jnp.dot(w_ref[:, t * cin:(t + 1) * cin],
                       g[:, t * bm:(t + 1) * bm], preferred_element_type=f32)
        acc = part if acc is None else acc + part
    return jnp.maximum(acc + b_ref[...], 0.0)


def _dec_conv(a, s_ref, w_ref, b_ref, *, cout, bm):
    """ConvTranspose2d(k=3, s=2, p=1, op=1) pre-activation on (cin, B*hw_in)."""
    f32 = jnp.float32
    u = jnp.dot(w_ref[...], a, preferred_element_type=f32)               # (9*cout, B*hw_in)
    acc = None
    for t in range(9):
        part = jnp.dot(u[t * cout:(t + 1) * cout, :],
                       s_ref[:, t * bm:(t + 1) * bm].astype(f32),
                       preferred_element_type=f32)
        acc = part if acc is None else acc + part
    return acc + b_ref[...]


# ---------------------------------------------------------------------------
# The fused VAE kernel
# ---------------------------------------------------------------------------
def _vae_kernel(x_ref, eps_ref,
                e1s_ref, e1w_ref, e1b_ref,
                e2s_ref, e2w_ref, e2b_ref,
                e3s_ref, e3w_ref, e3b_ref,
                mlw_ref, mlb_ref, dcw_ref, dcb_ref,
                d1s_ref, d1w_ref, d1b_ref,
                d2s_ref, d2w_ref, d2b_ref,
                d3s_ref, d3w_ref, d3b_ref,
                xrec_ref, mu_ref, lv_ref,
                h1_scr, d0_scr, *, batch):
    f32 = jnp.float32

    # ----- encoder conv1 (Cin=1): shared gather, per-sample VPU tap accumulation
    r = jnp.dot(x_ref[...], e1s_ref[...].astype(f32),
                preferred_element_type=f32)                               # (B, 9*M1)
    e1b = e1b_ref[...]
    for b in range(batch):
        acc = None
        for t in range(9):
            part = e1w_ref[:, t:t + 1] * r[b:b + 1, t * M1:(t + 1) * M1]  # (C1, M1)
            acc = part if acc is None else acc + part
        h1_scr[:, b * M1:(b + 1) * M1] = jnp.maximum(acc + e1b, 0.0)
    h1 = h1_scr[...]                                                      # (C1, B*M1)

    # ----- encoder conv2 / conv3 (batch folded into the lane axis)
    h2 = _enc_conv(h1, e2s_ref, e2w_ref, e2b_ref, cin=C1, bm=batch * M2)  # (C2, B*M2)
    h3 = _enc_conv(h2, e3s_ref, e3w_ref, e3b_ref, cin=C2, bm=batch * M3)  # (C3, B*M3)

    # ----- fc_mu + fc_logvar: one dot (h3^T contraction handled by the MXU)
    t_rows = jax.lax.dot_general(h3, mlw_ref[...],
                                 (((0,), (0,)), ((), ())),
                                 preferred_element_type=f32)              # (B*4, 4*2L)
    mlb = mlb_ref[...]
    z_rows = []
    for b in range(batch):
        acc = None
        for sp in range(M3):
            sl = t_rows[b * M3 + sp:b * M3 + sp + 1,
                        sp * 2 * LATENT:(sp + 1) * 2 * LATENT]            # (1, 2L)
            acc = sl if acc is None else acc + sl
        mulv = acc + mlb                                                  # (1, 2L)
        mu_row = mulv[:, :LATENT]
        lv_row = mulv[:, LATENT:]
        mu_ref[b:b + 1, :] = mu_row                                       # lane-dense rows
        lv_ref[b:b + 1, :] = lv_row
        # reparameterize
        z_rows.append(mu_row + eps_ref[b:b + 1, :] * jnp.exp(0.5 * lv_row))
    z = jnp.concatenate(z_rows, axis=0)                                   # (B, L)

    # ----- fc_decode: one dot, then static column writes into a VMEM scratch
    col = jax.lax.dot_general(dcw_ref[...], z, (((1,), (1,)), ((), ())),
                              preferred_element_type=f32)                 # (4*C3, B)
    for b in range(batch):
        for sp in range(M3):
            d0_scr[:, b * M3 + sp:b * M3 + sp + 1] = \
                col[sp * C3:(sp + 1) * C3, b:b + 1]
    d0 = d0_scr[...] + dcb_ref[...]                                       # (C3, B*M3)

    # ----- decoder deconv1 / deconv2 (batch folded)
    t1 = jnp.maximum(_dec_conv(d0, d1s_ref, d1w_ref, d1b_ref,
                               cout=C2, bm=batch * M2), 0.0)              # (C2, B*M2)
    t2 = jnp.maximum(_dec_conv(t1, d2s_ref, d2w_ref, d2b_ref,
                               cout=C1, bm=batch * M1), 0.0)              # (C1, B*M1)

    # ----- decoder deconv3 (Cout=1): shared scatter, row-dense output writes
    u = jnp.dot(d3w_ref[...], t2, preferred_element_type=f32)             # (9, B*M1)
    d3b = d3b_ref[...]
    for b in range(batch):
        acc = None
        for t in range(9):
            part = jnp.dot(u[t:t + 1, b * M1:(b + 1) * M1],
                           d3s_ref[:, t * N_PIX:(t + 1) * N_PIX].astype(f32),
                           preferred_element_type=f32)                    # (1, 256)
            acc = part if acc is None else acc + part
        logits = acc + d3b
        # numerically stable sigmoid on the EUP: sigmoid(x) = 0.5*(tanh(x/2)+1)
        xrec_ref[b:b + 1, :] = 0.5 * (jnp.tanh(0.5 * logits) + 1.0)


def _full_spec(shape):
    zeros = (0,) * len(shape)
    return pl.BlockSpec(shape, lambda: zeros)


def vae_forward(prep, x_nchw, eps):
    """x_nchw: (B, 1, IMG, IMG) f32; eps: (B, LATENT) f32."""
    B = x_nchw.shape[0]
    x2 = x_nchw.reshape(B, N_PIX)                 # NCHW flatten (metadata only)

    order = ["e1_s", "e1_w", "e1_b", "e2_s", "e2_w", "e2_b",
             "e3_s", "e3_w", "e3_b", "ml_w", "ml_b", "dc_w", "dc_b",
             "d1_s", "d1_w", "d1_b", "d2_s", "d2_w", "d2_b",
             "d3_s", "d3_w", "d3_b"]
    args = [x2, eps] + [prep[k] for k in order]

    out_shape = (jax.ShapeDtypeStruct((B, N_PIX), jnp.float32),
                 jax.ShapeDtypeStruct((B, LATENT), jnp.float32),
                 jax.ShapeDtypeStruct((B, LATENT), jnp.float32))
    # grid=() : single invocation, all constants + activations VMEM-resident.
    # On v7x one could instead use grid=(B,) with dimension_semantics=("parallel",)
    # to put one sample on each TensorCore; at B=2 the lane-folded form is used.
    xrec_flat, mu, lv = pl.pallas_call(
        functools.partial(_vae_kernel, batch=B),
        out_shape=out_shape,
        in_specs=[_full_spec(a.shape) for a in args],
        out_specs=tuple(_full_spec(s.shape) for s in out_shape),
        scratch_shapes=[pltpu.VMEM((C1, B * M1), jnp.float32),   # h1 assembly
                        pltpu.VMEM((C3, B * M3), jnp.float32)],  # fc_decode output
    )(*args)

    return xrec_flat.reshape(B, 1, IMG, IMG), mu, lv


# ---------------------------------------------------------------------------
# Pure-JAX reference (exact PyTorch semantics) for a correctness check.
# ---------------------------------------------------------------------------
def _reference_forward(params, x, eps):
    dn = ("NCHW", "OIHW", "NCHW")
    hi = jax.lax.Precision.HIGHEST

    def conv(v, w, b):
        y = jax.lax.conv_general_dilated(v, w, (2, 2), ((1, 1), (1, 1)),
                                         dimension_numbers=dn, precision=hi)
        return y + b.reshape(1, -1, 1, 1)

    def convT(v, w, b):      # ConvTranspose2d(k=3, s=2, p=1, op=1)
        w_conv = jnp.transpose(w, (1, 0, 2, 3))[:, :, ::-1, ::-1]
        y = jax.lax.conv_general_dilated(v, w_conv, (1, 1), ((1, 2), (1, 2)),
                                         lhs_dilation=(2, 2),
                                         dimension_numbers=dn, precision=hi)
        return y + b.reshape(1, -1, 1, 1)

    h = jax.nn.relu(conv(x, params["c1_w"], params["c1_b"]))
    h = jax.nn.relu(conv(h, params["c2_w"], params["c2_b"]))
    h = jax.nn.relu(conv(h, params["c3_w"], params["c3_b"]))
    flat = h.reshape(h.shape[0], -1)
    mu = jnp.dot(flat, params["mu_w"].T, precision=hi) + params["mu_b"]
    logvar = jnp.dot(flat, params["lv_w"].T, precision=hi) + params["lv_b"]
    z = mu + eps * jnp.exp(0.5 * logvar)
    d = jnp.dot(z, params["dec_w"].T, precision=hi) + params["dec_b"]
    d = d.reshape(-1, C3, BOTTLE, BOTTLE)
    d = jax.nn.relu(convT(d, params["d1_w"], params["d1_b"]))
    d = jax.nn.relu(convT(d, params["d2_w"], params["d2_b"]))
    d = jax.nn.sigmoid(convT(d, params["d3_w"], params["d3_b"]))
    return d, mu, logvar


if __name__ == "__main__":
    key = jax.random.PRNGKey(0)
    k_param, k_x, k_eps = jax.random.split(key, 3)

    params = init_params(k_param)
    prep = prepare_params(params, BATCH)           # one-time weight/constant packing
    x = jax.random.uniform(k_x, (BATCH, 1, IMG, IMG), dtype=jnp.float32)
    eps = jax.random.normal(k_eps, (BATCH, LATENT), dtype=jnp.float32)

    fwd = jax.jit(vae_forward)
    x_rec, mu, logvar = fwd(prep, x, eps)
    jax.block_until_ready((x_rec, mu, logvar))

    assert x_rec.shape == (BATCH, 1, IMG, IMG)
    assert mu.shape == (BATCH, LATENT) and logvar.shape == (BATCH, LATENT)
    assert bool(jnp.all(jnp.isfinite(x_rec)))

    # Numerical check against a plain-JAX reference with PyTorch semantics.
    ref_x, ref_mu, ref_lv = jax.jit(_reference_forward)(params, x, eps)
    for got, want, name in ((x_rec, ref_x, "x_rec"), (mu, ref_mu, "mu"),
                            (logvar, ref_lv, "logvar")):
        assert bool(jnp.allclose(got, want, atol=3e-3, rtol=3e-3)), \
            f"{name} mismatch vs reference"

    print("KERNEL_OK")
</pallas_src>

<mosaic_0001>
module attributes {stable_mosaic.version = 11 : i64} {
  func.func @_vae_kernel(%arg0: memref<2x256xf32, #tpu.memory_space<vmem>>, %arg1: memref<2x32xf32, #tpu.memory_space<vmem>>, %arg2: memref<256x576xbf16, #tpu.memory_space<vmem>>, %arg3: memref<32x9xf32, #tpu.memory_space<vmem>>, %arg4: memref<32x1xf32, #tpu.memory_space<vmem>>, %arg5: memref<128x288xbf16, #tpu.memory_space<vmem>>, %arg6: memref<64x288xf32, #tpu.memory_space<vmem>>, %arg7: memref<64x1xf32, #tpu.memory_space<vmem>>, %arg8: memref<32x72xbf16, #tpu.memory_space<vmem>>, %arg9: memref<128x576xf32, #tpu.memory_space<vmem>>, %arg10: memref<128x1xf32, #tpu.memory_space<vmem>>, %arg11: memref<128x256xf32, #tpu.memory_space<vmem>>, %arg12: memref<1x64xf32, #tpu.memory_space<vmem>>, %arg13: memref<512x32xf32, #tpu.memory_space<vmem>>, %arg14: memref<128x8xf32, #tpu.memory_space<vmem>>, %arg15: memref<8x288xbf16, #tpu.memory_space<vmem>>, %arg16: memref<576x128xf32, #tpu.memory_space<vmem>>, %arg17: memref<64x1xf32, #tpu.memory_space<vmem>>, %arg18: memref<32x1152xbf16, #tpu.memory_space<vmem>>, %arg19: memref<288x64xf32, #tpu.memory_space<vmem>>, %arg20: memref<32x1xf32, #tpu.memory_space<vmem>>, %arg21: memref<64x2304xbf16, #tpu.memory_space<vmem>>, %arg22: memref<9x32xf32, #tpu.memory_space<vmem>>, %arg23: memref<1x1xf32, #tpu.memory_space<vmem>>, %arg24: memref<2x256xf32, #tpu.memory_space<vmem>>, %arg25: memref<2x32xf32, #tpu.memory_space<vmem>>, %arg26: memref<2x32xf32, #tpu.memory_space<vmem>>, %arg27: memref<32x128xf32, #tpu.memory_space<vmem>>, %arg28: memref<128x8xf32, #tpu.memory_space<vmem>>) attributes {dimension_semantics = [], scalar_prefetch = 0 : i64, scratch_operands = 2 : i64, tpu.core_type = #tpu.core_type<tc>} {
    %c0 = arith.constant 0 : index
    %c0_0 = arith.constant 0 : index
    %0 = vector.load %arg0[%c0, %c0_0] : memref<2x256xf32, #tpu.memory_space<vmem>>, vector<2x256xf32>
    %c0_1 = arith.constant 0 : index
    %c0_2 = arith.constant 0 : index
    %1 = vector.load %arg2[%c0_1, %c0_2] : memref<256x576xbf16, #tpu.memory_space<vmem>>, vector<256x576xbf16>
    %2 = arith.extf %1 : vector<256x576xbf16> to vector<256x576xf32>
    %cst = arith.constant dense<0.000000e+00> : vector<2x576xf32>
    %3 = tpu.matmul %0, %2, %cst {dimension_numbers = #tpu.dot_dimension_numbers<[1], [0], [0], [1], [0, 0, 1, 1], [], []>} : vector<2x256xf32>, vector<256x576xf32>, vector<2x576xf32> -> vector<2x576xf32>
    %c0_3 = arith.constant 0 : index
    %c0_4 = arith.constant 0 : index
    %4 = vector.load %arg4[%c0_3, %c0_4] : memref<32x1xf32, #tpu.memory_space<vmem>>, vector<32x1xf32>
    %c0_5 = arith.constant 0 : index
    %c0_6 = arith.constant 0 : index
    %5 = vector.load %arg3[%c0_5, %c0_6] : memref<32x9xf32, #tpu.memory_space<vmem>>, vector<32x1xf32>
    %6 = vector.extract_strided_slice %3 {offsets = [0, 0], sizes = [1, 64], strides = [1, 1]} : vector<2x576xf32> to vector<1x64xf32>
    %7 = vector.broadcast %5 : vector<32x1xf32> to vector<32x64xf32>
    %8 = vector.broadcast %6 : vector<1x64xf32> to vector<32x64xf32>
    %9 = arith.mulf %7, %8 : vector<32x64xf32>
    %c0_7 = arith.constant 0 : index
    %c1 = arith.constant 1 : index
    %10 = vector.load %arg3[%c0_7, %c1] : memref<32x9xf32, #tpu.memory_space<vmem>>, vector<32x1xf32>
    %11 = vector.extract_strided_slice %3 {offsets = [0, 64], sizes = [1, 64], strides = [1, 1]} : vector<2x576xf32> to vector<1x64xf32>
    %12 = vector.broadcast %10 : vector<32x1xf32> to vector<32x64xf32>
    %13 = vector.broadcast %11 : vector<1x64xf32> to vector<32x64xf32>
    %14 = arith.mulf %12, %13 : vector<32x64xf32>
    %15 = arith.addf %9, %14 : vector<32x64xf32>
    %c0_8 = arith.constant 0 : index
    %c2 = arith.constant 2 : index
    %16 = vector.load %arg3[%c0_8, %c2] : memref<32x9xf32, #tpu.memory_space<vmem>>, vector<32x1xf32>
    %17 = vector.extract_strided_slice %3 {offsets = [0, 128], sizes = [1, 64], strides = [1, 1]} : vector<2x576xf32> to vector<1x64xf32>
    %18 = vector.broadcast %16 : vector<32x1xf32> to vector<32x64xf32>
    %19 = vector.broadcast %17 : vector<1x64xf32> to vector<32x64xf32>
    %20 = arith.mulf %18, %19 : vector<32x64xf32>
    %21 = arith.addf %15, %20 : vector<32x64xf32>
    %c0_9 = arith.constant 0 : index
    %c3 = arith.constant 3 : index
    %22 = vector.load %arg3[%c0_9, %c3] : memref<32x9xf32, #tpu.memory_space<vmem>>, vector<32x1xf32>
    %23 = vector.extract_strided_slice %3 {offsets = [0, 192], sizes = [1, 64], strides = [1, 1]} : vector<2x576xf32> to vector<1x64xf32>
    %24 = vector.broadcast %22 : vector<32x1xf32> to vector<32x64xf32>
    %25 = vector.broadcast %23 : vector<1x64xf32> to vector<32x64xf32>
    %26 = arith.mulf %24, %25 : vector<32x64xf32>
    %27 = arith.addf %21, %26 : vector<32x64xf32>
    %c0_10 = arith.constant 0 : index
    %c4 = arith.constant 4 : index
    %28 = vector.load %arg3[%c0_10, %c4] : memref<32x9xf32, #tpu.memory_space<vmem>>, vector<32x1xf32>
    %29 = vector.extract_strided_slice %3 {offsets = [0, 256], sizes = [1, 64], strides = [1, 1]} : vector<2x576xf32> to vector<1x64xf32>
    %30 = vector.broadcast %28 : vector<32x1xf32> to vector<32x64xf32>
    %31 = vector.broadcast %29 : vector<1x64xf32> to vector<32x64xf32>
    %32 = arith.mulf %30, %31 : vector<32x64xf32>
    %33 = arith.addf %27, %32 : vector<32x64xf32>
    %c0_11 = arith.constant 0 : index
    %c5 = arith.constant 5 : index
    %34 = vector.load %arg3[%c0_11, %c5] : memref<32x9xf32, #tpu.memory_space<vmem>>, vector<32x1xf32>
    %35 = vector.extract_strided_slice %3 {offsets = [0, 320], sizes = [1, 64], strides = [1, 1]} : vector<2x576xf32> to vector<1x64xf32>
    %36 = vector.broadcast %34 : vector<32x1xf32> to vector<32x64xf32>
    %37 = vector.broadcast %35 : vector<1x64xf32> to vector<32x64xf32>
    %38 = arith.mulf %36, %37 : vector<32x64xf32>
    %39 = arith.addf %33, %38 : vector<32x64xf32>
    %c0_12 = arith.constant 0 : index
    %c6 = arith.constant 6 : index
    %40 = vector.load %arg3[%c0_12, %c6] : memref<32x9xf32, #tpu.memory_space<vmem>>, vector<32x1xf32>
    %41 = vector.extract_strided_slice %3 {offsets = [0, 384], sizes = [1, 64], strides = [1, 1]} : vector<2x576xf32> to vector<1x64xf32>
    %42 = vector.broadcast %40 : vector<32x1xf32> to vector<32x64xf32>
    %43 = vector.broadcast %41 : vector<1x64xf32> to vector<32x64xf32>
    %44 = arith.mulf %42, %43 : vector<32x64xf32>
    %45 = arith.addf %39, %44 : vector<32x64xf32>
    %c0_13 = arith.constant 0 : index
    %c7 = arith.constant 7 : index
    %46 = vector.load %arg3[%c0_13, %c7] : memref<32x9xf32, #tpu.memory_space<vmem>>, vector<32x1xf32>
    %47 = vector.extract_strided_slice %3 {offsets = [0, 448], sizes = [1, 64], strides = [1, 1]} : vector<2x576xf32> to vector<1x64xf32>
    %48 = vector.broadcast %46 : vector<32x1xf32> to vector<32x64xf32>
    %49 = vector.broadcast %47 : vector<1x64xf32> to vector<32x64xf32>
    %50 = arith.mulf %48, %49 : vector<32x64xf32>
    %51 = arith.addf %45, %50 : vector<32x64xf32>
    %c0_14 = arith.constant 0 : index
    %c8 = arith.constant 8 : index
    %52 = vector.load %arg3[%c0_14, %c8] : memref<32x9xf32, #tpu.memory_space<vmem>>, vector<32x1xf32>
    %53 = vector.extract_strided_slice %3 {offsets = [0, 512], sizes = [1, 64], strides = [1, 1]} : vector<2x576xf32> to vector<1x64xf32>
    %54 = vector.broadcast %52 : vector<32x1xf32> to vector<32x64xf32>
    %55 = vector.broadcast %53 : vector<1x64xf32> to vector<32x64xf32>
    %56 = arith.mulf %54, %55 : vector<32x64xf32>
    %57 = arith.addf %51, %56 : vector<32x64xf32>
    %58 = vector.broadcast %4 : vector<32x1xf32> to vector<32x64xf32>
    %59 = arith.addf %57, %58 : vector<32x64xf32>
    %cst_15 = arith.constant 0.000000e+00 : f32
    %60 = vector.broadcast %cst_15 : f32 to vector<32x64xf32>
    %61 = arith.maximumf %59, %60 : vector<32x64xf32>
    %c0_16 = arith.constant 0 : index
    %c0_17 = arith.constant 0 : index
    %62 = vector.load %arg27[%c0_16, %c0_17] : memref<32x128xf32, #tpu.memory_space<vmem>>, vector<32x64xf32>
    tpu.vector_store %arg27[%c0_16, %c0_17], %61 {strides = array<i32>} : memref<32x128xf32, #tpu.memory_space<vmem>>, vector<32x64xf32>,
    %c0_18 = arith.constant 0 : index
    %c0_19 = arith.constant 0 : index
    %63 = vector.load %arg3[%c0_18, %c0_19] : memref<32x9xf32, #tpu.memory_space<vmem>>, vector<32x1xf32>
    %64 = vector.extract_strided_slice %3 {offsets = [1, 0], sizes = [1, 64], strides = [1, 1]} : vector<2x576xf32> to vector<1x64xf32>
    %65 = vector.broadcast %63 : vector<32x1xf32> to vector<32x64xf32>
    %66 = vector.broadcast %64 : vector<1x64xf32> to vector<32x64xf32>
    %67 = arith.mulf %65, %66 : vector<32x64xf32>
    %c0_20 = arith.constant 0 : index
    %c1_21 = arith.constant 1 : index
    %68 = vector.load %arg3[%c0_20, %c1_21] : memref<32x9xf32, #tpu.memory_space<vmem>>, vector<32x1xf32>
    %69 = vector.extract_strided_slice %3 {offsets = [1, 64], sizes = [1, 64], strides = [1, 1]} : vector<2x576xf32> to vector<1x64xf32>
    %70 = vector.broadcast %68 : vector<32x1xf32> to vector<32x64xf32>
    %71 = vector.broadcast %69 : vector<1x64xf32> to vector<32x64xf32>
    %72 = arith.mulf %70, %71 : vector<32x64xf32>
    %73 = arith.addf %67, %72 : vector<32x64xf32>
    %c0_22 = arith.constant 0 : index
    %c2_23 = arith.constant 2 : index
    %74 = vector.load %arg3[%c0_22, %c2_23] : memref<32x9xf32, #tpu.memory_space<vmem>>, vector<32x1xf32>
    %75 = vector.extract_strided_slice %3 {offsets = [1, 128], sizes = [1, 64], strides = [1, 1]} : vector<2x576xf32> to vector<1x64xf32>
    %76 = vector.broadcast %74 : vector<32x1xf32> to vector<32x64xf32>
    %77 = vector.broadcast %75 : vector<1x64xf32> to vector<32x64xf32>
    %78 = arith.mulf %76, %77 : vector<32x64xf32>
    %79 = arith.addf %73, %78 : vector<32x64xf32>
    %c0_24 = arith.constant 0 : index
    %c3_25 = arith.constant 3 : index
    %80 = vector.load %arg3[%c0_24, %c3_25] : memref<32x9xf32, #tpu.memory_space<vmem>>, vector<32x1xf32>
    %81 = vector.extract_strided_slice %3 {offsets = [1, 192], sizes = [1, 64], strides = [1, 1]} : vector<2x576xf32> to vector<1x64xf32>
    %82 = vector.broadcast %80 : vector<32x1xf32> to vector<32x64xf32>
    %83 = vector.broadcast %81 : vector<1x64xf32> to vector<32x64xf32>
    %84 = arith.mulf %82, %83 : vector<32x64xf32>
    %85 = arith.addf %79, %84 : vector<32x64xf32>
    %c0_26 = arith.constant 0 : index
    %c4_27 = arith.constant 4 : index
    %86 = vector.load %arg3[%c0_26, %c4_27] : memref<32x9xf32, #tpu.memory_space<vmem>>, vector<32x1xf32>
    %87 = vector.extract_strided_slice %3 {offsets = [1, 256], sizes = [1, 64], strides = [1, 1]} : vector<2x576xf32> to vector<1x64xf32>
    %88 = vector.broadcast %86 : vector<32x1xf32> to vector<32x64xf32>
    %89 = vector.broadcast %87 : vector<1x64xf32> to vector<32x64xf32>
    %90 = arith.mulf %88, %89 : vector<32x64xf32>
    %91 = arith.addf %85, %90 : vector<32x64xf32>
    %c0_28 = arith.constant 0 : index
    %c5_29 = arith.constant 5 : index
    %92 = vector.load %arg3[%c0_28, %c5_29] : memref<32x9xf32, #tpu.memory_space<vmem>>, vector<32x1xf32>
    %93 = vector.extract_strided_slice %3 {offsets = [1, 320], sizes = [1, 64], strides = [1, 1]} : vector<2x576xf32> to vector<1x64xf32>
    %94 = vector.broadcast %92 : vector<32x1xf32> to vector<32x64xf32>
    %95 = vector.broadcast %93 : vector<1x64xf32> to vector<32x64xf32>
    %96 = arith.mulf %94, %95 : vector<32x64xf32>
    %97 = arith.addf %91, %96 : vector<32x64xf32>
    %c0_30 = arith.constant 0 : index
    %c6_31 = arith.constant 6 : index
    %98 = vector.load %arg3[%c0_30, %c6_31] : memref<32x9xf32, #tpu.memory_space<vmem>>, vector<32x1xf32>
    %99 = vector.extract_strided_slice %3 {offsets = [1, 384], sizes = [1, 64], strides = [1, 1]} : vector<2x576xf32> to vector<1x64xf32>
    %100 = vector.broadcast %98 : vector<32x1xf32> to vector<32x64xf32>
    %101 = vector.broadcast %99 : vector<1x64xf32> to vector<32x64xf32>
    %102 = arith.mulf %100, %101 : vector<32x64xf32>
    %103 = arith.addf %97, %102 : vector<32x64xf32>
    %c0_32 = arith.constant 0 : index
    %c7_33 = arith.constant 7 : index
    %104 = vector.load %arg3[%c0_32, %c7_33] : memref<32x9xf32, #tpu.memory_space<vmem>>, vector<32x1xf32>
    %105 = vector.extract_strided_slice %3 {offsets = [1, 448], sizes = [1, 64], strides = [1, 1]} : vector<2x576xf32> to vector<1x64xf32>
    %106 = vector.broadcast %104 : vector<32x1xf32> to vector<32x64xf32>
    %107 = vector.broadcast %105 : vector<1x64xf32> to vector<32x64xf32>
    %108 = arith.mulf %106, %107 : vector<32x64xf32>
    %109 = arith.addf %103, %108 : vector<32x64xf32>
    %c0_34 = arith.constant 0 : index
    %c8_35 = arith.constant 8 : index
    %110 = vector.load %arg3[%c0_34, %c8_35] : memref<32x9xf32, #tpu.memory_space<vmem>>, vector<32x1xf32>
    %111 = vector.extract_strided_slice %3 {offsets = [1, 512], sizes = [1, 64], strides = [1, 1]} : vector<2x576xf32> to vector<1x64xf32>
    %112 = vector.broadcast %110 : vector<32x1xf32> to vector<32x64xf32>
    %113 = vector.broadcast %111 : vector<1x64xf32> to vector<32x64xf32>
    %114 = arith.mulf %112, %113 : vector<32x64xf32>
    %115 = arith.addf %109, %114 : vector<32x64xf32>
    %116 = vector.broadcast %4 : vector<32x1xf32> to vector<32x64xf32>
    %117 = arith.addf %115, %116 : vector<32x64xf32>
    %cst_36 = arith.constant 0.000000e+00 : f32
    %118 = vector.broadcast %cst_36 : f32 to vector<32x64xf32>
    %119 = arith.maximumf %117, %118 : vector<32x64xf32>
    %c0_37 = arith.constant 0 : index
    %c64 = arith.constant 64 : index
    %120 = vector.load %arg27[%c0_37, %c64] : memref<32x128xf32, #tpu.memory_space<vmem>>, vector<32x64xf32>
    tpu.vector_store %arg27[%c0_37, %c64], %119 {strides = array<i32>} : memref<32x128xf32, #tpu.memory_space<vmem>>, vector<32x64xf32>,
    %c0_38 = arith.constant 0 : index
    %c0_39 = arith.constant 0 : index
    %121 = vector.load %arg27[%c0_38, %c0_39] : memref<32x128xf32, #tpu.memory_space<vmem>>, vector<32x128xf32>
    %c0_40 = arith.constant 0 : index
    %c0_41 = arith.constant 0 : index
    %122 = vector.load %arg5[%c0_40, %c0_41] : memref<128x288xbf16, #tpu.memory_space<vmem>>, vector<128x288xbf16>
    %123 = arith.extf %122 : vector<128x288xbf16> to vector<128x288xf32>
    %cst_42 = arith.constant dense<0.000000e+00> : vector<32x288xf32>
    %124 = tpu.matmul %121, %123, %cst_42 {dimension_numbers = #tpu.dot_dimension_numbers<[1], [0], [0], [1], [0, 0, 1, 1], [], []>} : vector<32x128xf32>, vector<128x288xf32>, vector<32x288xf32> -> vector<32x288xf32>
    %c0_43 = arith.constant 0 : index
    %c0_44 = arith.constant 0 : index
    %125 = vector.load %arg6[%c0_43, %c0_44] : memref<64x288xf32, #tpu.memory_space<vmem>>, vector<64x32xf32>
    %126 = vector.extract_strided_slice %124 {offsets = [0, 0], sizes = [32, 32], strides = [1, 1]} : vector<32x288xf32> to vector<32x32xf32>
    %cst_45 = arith.constant dense<0.000000e+00> : vector<64x32xf32>
    %127 = tpu.matmul %125, %126, %cst_45 {dimension_numbers = #tpu.dot_dimension_numbers<[1], [0], [0], [1], [0, 0, 1, 1], [], []>} : vector<64x32xf32>, vector<32x32xf32>, vector<64x32xf32> -> vector<64x32xf32>
    %c0_46 = arith.constant 0 : index
    %c32 = arith.constant 32 : index
    %128 = vector.load %arg6[%c0_46, %c32] : memref<64x288xf32, #tpu.memory_space<vmem>>, vector<64x32xf32>
    %129 = vector.extract_strided_slice %124 {offsets = [0, 32], sizes = [32, 32], strides = [1, 1]} : vector<32x288xf32> to vector<32x32xf32>
    %cst_47 = arith.constant dense<0.000000e+00> : vector<64x32xf32>
    %130 = tpu.matmul %128, %129, %cst_47 {dimension_numbers = #tpu.dot_dimension_numbers<[1], [0], [0], [1], [0, 0, 1, 1], [], []>} : vector<64x32xf32>, vector<32x32xf32>, vector<64x32xf32> -> vector<64x32xf32>
    %131 = arith.addf %127, %130 : vector<64x32xf32>
    %c0_48 = arith.constant 0 : index
    %c64_49 = arith.constant 64 : index
    %132 = vector.load %arg6[%c0_48, %c64_49] : memref<64x288xf32, #tpu.memory_space<vmem>>, vector<64x32xf32>
    %133 = vector.extract_strided_slice %124 {offsets = [0, 64], sizes = [32, 32], strides = [1, 1]} : vector<32x288xf32> to vector<32x32xf32>
    %cst_50 = arith.constant dense<0.000000e+00> : vector<64x32xf32>
    %134 = tpu.matmul %132, %133, %cst_50 {dimension_numbers = #tpu.dot_dimension_numbers<[1], [0], [0], [1], [0, 0, 1, 1], [], []>} : vector<64x32xf32>, vector<32x32xf32>, vector<64x32xf32> -> vector<64x32xf32>
    %135 = arith.addf %131, %134 : vector<64x32xf32>
    %c0_51 = arith.constant 0 : index
    %c96 = arith.constant 96 : index
    %136 = vector.load %arg6[%c0_51, %c96] : memref<64x288xf32, #tpu.memory_space<vmem>>, vector<64x32xf32>
    %137 = vector.extract_strided_slice %124 {offsets = [0, 96], sizes = [32, 32], strides = [1, 1]} : vector<32x288xf32> to vector<32x32xf32>
    %cst_52 = arith.constant dense<0.000000e+00> : vector<64x32xf32>
    %138 = tpu.matmul %136, %137, %cst_52 {dimension_numbers = #tpu.dot_dimension_numbers<[1], [0], [0], [1], [0, 0, 1, 1], [], []>} : vector<64x32xf32>, vector<32x32xf32>, vector<64x32xf32> -> vector<64x32xf32>
    %139 = arith.addf %135, %138 : vector<64x32xf32>
    %c0_53 = arith.constant 0 : index
    %c128 = arith.constant 128 : index
    %140 = vector.load %arg6[%c0_53, %c128] : memref<64x288xf32, #tpu.memory_space<vmem>>, vector<64x32xf32>
    %141 = vector.extract_strided_slice %124 {offsets = [0, 128], sizes = [32, 32], strides = [1, 1]} : vector<32x288xf32> to vector<32x32xf32>
    %cst_54 = arith.constant dense<0.000000e+00> : vector<64x32xf32>
    %142 = tpu.matmul %140, %141, %cst_54 {dimension_numbers = #tpu.dot_dimension_numbers<[1], [0], [0], [1], [0, 0, 1, 1], [], []>} : vector<64x32xf32>, vector<32x32xf32>, vector<64x32xf32> -> vector<64x32xf32>
    %143 = arith.addf %139, %142 : vector<64x32xf32>
    %c0_55 = arith.constant 0 : index
    %c160 = arith.constant 160 : index
    %144 = vector.load %arg6[%c0_55, %c160] : memref<64x288xf32, #tpu.memory_space<vmem>>, vector<64x32xf32>
    %145 = vector.extract_strided_slice %124 {offsets = [0, 160], sizes = [32, 32], strides = [1, 1]} : vector<32x288xf32> to vector<32x32xf32>
    %cst_56 = arith.constant dense<0.000000e+00> : vector<64x32xf32>
    %146 = tpu.matmul %144, %145, %cst_56 {dimension_numbers = #tpu.dot_dimension_numbers<[1], [0], [0], [1], [0, 0, 1, 1], [], []>} : vector<64x32xf32>, vector<32x32xf32>, vector<64x32xf32> -> vector<64x32xf32>
    %147 = arith.addf %143, %146 : vector<64x32xf32>
    %c0_57 = arith.constant 0 : index
    %c192 = arith.constant 192 : index
    %148 = vector.load %arg6[%c0_57, %c192] : memref<64x288xf32, #tpu.memory_space<vmem>>, vector<64x32xf32>
    %149 = vector.extract_strided_slice %124 {offsets = [0, 192], sizes = [32, 32], strides = [1, 1]} : vector<32x288xf32> to vector<32x32xf32>
    %cst_58 = arith.constant dense<0.000000e+00> : vector<64x32xf32>
    %150 = tpu.matmul %148, %149, %cst_58 {dimension_numbers = #tpu.dot_dimension_numbers<[1], [0], [0], [1], [0, 0, 1, 1], [], []>} : vector<64x32xf32>, vector<32x32xf32>, vector<64x32xf32> -> vector<64x32xf32>
    %151 = arith.addf %147, %150 : vector<64x32xf32>
    %c0_59 = arith.constant 0 : index
    %c224 = arith.constant 224 : index
    %152 = vector.load %arg6[%c0_59, %c224] : memref<64x288xf32, #tpu.memory_space<vmem>>, vector<64x32xf32>
    %153 = vector.extract_strided_slice %124 {offsets = [0, 224], sizes = [32, 32], strides = [1, 1]} : vector<32x288xf32> to vector<32x32xf32>
    %cst_60 = arith.constant dense<0.000000e+00> : vector<64x32xf32>
    %154 = tpu.matmul %152, %153, %cst_60 {dimension_numbers = #tpu.dot_dimension_numbers<[1], [0], [0], [1], [0, 0, 1, 1], [], []>} : vector<64x32xf32>, vector<32x32xf32>, vector<64x32xf32> -> vector<64x32xf32>
    %155 = arith.addf %151, %154 : vector<64x32xf32>
    %c0_61 = arith.constant 0 : index
    %c256 = arith.constant 256 : index
    %156 = vector.load %arg6[%c0_61, %c256] : memref<64x288xf32, #tpu.memory_space<vmem>>, vector<64x32xf32>
    %157 = vector.extract_strided_slice %124 {offsets = [0, 256], sizes = [32, 32], strides = [1, 1]} : vector<32x288xf32> to vector<32x32xf32>
    %cst_62 = arith.constant dense<0.000000e+00> : vector<64x32xf32>
    %158 = tpu.matmul %156, %157, %cst_62 {dimension_numbers = #tpu.dot_dimension_numbers<[1], [0], [0], [1], [0, 0, 1, 1], [], []>} : vector<64x32xf32>, vector<32x32xf32>, vector<64x32xf32> -> vector<64x32xf32>
    %159 = arith.addf %155, %158 : vector<64x32xf32>
    %c0_63 = arith.constant 0 : index
    %c0_64 = arith.constant 0 : index
    %160 = vector.load %arg7[%c0_63, %c0_64] : memref<64x1xf32, #tpu.memory_space<vmem>>, vector<64x1xf32>
    %161 = vector.broadcast %160 : vector<64x1xf32> to vector<64x32xf32>
    %162 = arith.addf %159, %161 : vector<64x32xf32>
    %cst_65 = arith.constant 0.000000e+00 : f32
    %163 = vector.broadcast %cst_65 : f32 to vector<64x32xf32>
    %164 = arith.maximumf %162, %163 : vector<64x32xf32>
    %c0_66 = arith.constant 0 : index
    %c0_67 = arith.constant 0 : index
    %165 = vector.load %arg8[%c0_66, %c0_67] : memref<32x72xbf16, #tpu.memory_space<vmem>>, vector<32x72xbf16>
    %166 = arith.extf %165 : vector<32x72xbf16> to vector<32x72xf32>
    %cst_68 = arith.constant dense<0.000000e+00> : vector<64x72xf32>
    %167 = tpu.matmul %164, %166, %cst_68 {dimension_numbers = #tpu.dot_dimension_numbers<[1], [0], [0], [1], [0, 0, 1, 1], [], []>} : vector<64x32xf32>, vector<32x72xf32>, vector<64x72xf32> -> vector<64x72xf32>
    %c0_69 = arith.constant 0 : index
    %c0_70 = arith.constant 0 : index
    %168 = vector.load %arg9[%c0_69, %c0_70] : memref<128x576xf32, #tpu.memory_space<vmem>>, vector<128x64xf32>
    %169 = vector.extract_strided_slice %167 {offsets = [0, 0], sizes = [64, 8], strides = [1, 1]} : vector<64x72xf32> to vector<64x8xf32>
    %cst_71 = arith.constant dense<0.000000e+00> : vector<128x8xf32>
    %170 = tpu.matmul %168, %169, %cst_71 {dimension_numbers = #tpu.dot_dimension_numbers<[1], [0], [0], [1], [0, 0, 1, 1], [], []>} : vector<128x64xf32>, vector<64x8xf32>, vector<128x8xf32> -> vector<128x8xf32>
    %c0_72 = arith.constant 0 : index
    %c64_73 = arith.constant 64 : index
    %171 = vector.load %arg9[%c0_72, %c64_73] : memref<128x576xf32, #tpu.memory_space<vmem>>, vector<128x64xf32>
    %172 = vector.extract_strided_slice %167 {offsets = [0, 8], sizes = [64, 8], strides = [1, 1]} : vector<64x72xf32> to vector<64x8xf32>
    %cst_74 = arith.constant dense<0.000000e+00> : vector<128x8xf32>
    %173 = tpu.matmul %171, %172, %cst_74 {dimension_numbers = #tpu.dot_dimension_numbers<[1], [0], [0], [1], [0, 0, 1, 1], [], []>} : vector<128x64xf32>, vector<64x8xf32>, vector<128x8xf32> -> vector<128x8xf32>
    %174 = arith.addf %170, %173 : vector<128x8xf32>
    %c0_75 = arith.constant 0 : index
    %c128_76 = arith.constant 128 : index
    %175 = vector.load %arg9[%c0_75, %c128_76] : memref<128x576xf32, #tpu.memory_space<vmem>>, vector<128x64xf32>
    %176 = vector.extract_strided_slice %167 {offsets = [0, 16], sizes = [64, 8], strides = [1, 1]} : vector<64x72xf32> to vector<64x8xf32>
    %cst_77 = arith.constant dense<0.000000e+00> : vector<128x8xf32>
    %177 = tpu.matmul %175, %176, %cst_77 {dimension_numbers = #tpu.dot_dimension_numbers<[1], [0], [0], [1], [0, 0, 1, 1], [], []>} : vector<128x64xf32>, vector<64x8xf32>, vector<128x8xf32> -> vector<128x8xf32>
    %178 = arith.addf %174, %177 : vector<128x8xf32>
    %c0_78 = arith.constant 0 : index
    %c192_79 = arith.constant 192 : index
    %179 = vector.load %arg9[%c0_78, %c192_79] : memref<128x576xf32, #tpu.memory_space<vmem>>, vector<128x64xf32>
    %180 = vector.extract_strided_slice %167 {offsets = [0, 24], sizes = [64, 8], strides = [1, 1]} : vector<64x72xf32> to vector<64x8xf32>
    %cst_80 = arith.constant dense<0.000000e+00> : vector<128x8xf32>
    %181 = tpu.matmul %179, %180, %cst_80 {dimension_numbers = #tpu.dot_dimension_numbers<[1], [0], [0], [1], [0, 0, 1, 1], [], []>} : vector<128x64xf32>, vector<64x8xf32>, vector<128x8xf32> -> vector<128x8xf32>
    %182 = arith.addf %178, %181 : vector<128x8xf32>
    %c0_81 = arith.constant 0 : index
    %c256_82 = arith.constant 256 : index
    %183 = vector.load %arg9[%c0_81, %c256_82] : memref<128x576xf32, #tpu.memory_space<vmem>>, vector<128x64xf32>
    %184 = vector.extract_strided_slice %167 {offsets = [0, 32], sizes = [64, 8], strides = [1, 1]} : vector<64x72xf32> to vector<64x8xf32>
    %cst_83 = arith.constant dense<0.000000e+00> : vector<128x8xf32>
    %185 = tpu.matmul %183, %184, %cst_83 {dimension_numbers = #tpu.dot_dimension_numbers<[1], [0], [0], [1], [0, 0, 1, 1], [], []>} : vector<128x64xf32>, vector<64x8xf32>, vector<128x8xf32> -> vector<128x8xf32>
    %186 = arith.addf %182, %185 : vector<128x8xf32>
    %c0_84 = arith.constant 0 : index
    %c320 = arith.constant 320 : index
    %187 = vector.load %arg9[%c0_84, %c320] : memref<128x576xf32, #tpu.memory_space<vmem>>, vector<128x64xf32>
    %188 = vector.extract_strided_slice %167 {offsets = [0, 40], sizes = [64, 8], strides = [1, 1]} : vector<64x72xf32> to vector<64x8xf32>
    %cst_85 = arith.constant dense<0.000000e+00> : vector<128x8xf32>
    %189 = tpu.matmul %187, %188, %cst_85 {dimension_numbers = #tpu.dot_dimension_numbers<[1], [0], [0], [1], [0, 0, 1, 1], [], []>} : vector<128x64xf32>, vector<64x8xf32>, vector<128x8xf32> -> vector<128x8xf32>
    %190 = arith.addf %186, %189 : vector<128x8xf32>
    %c0_86 = arith.constant 0 : index
    %c384 = arith.constant 384 : index
    %191 = vector.load %arg9[%c0_86, %c384] : memref<128x576xf32, #tpu.memory_space<vmem>>, vector<128x64xf32>
    %192 = vector.extract_strided_slice %167 {offsets = [0, 48], sizes = [64, 8], strides = [1, 1]} : vector<64x72xf32> to vector<64x8xf32>
    %cst_87 = arith.constant dense<0.000000e+00> : vector<128x8xf32>
    %193 = tpu.matmul %191, %192, %cst_87 {dimension_numbers = #tpu.dot_dimension_numbers<[1], [0], [0], [1], [0, 0, 1, 1], [], []>} : vector<128x64xf32>, vector<64x8xf32>, vector<128x8xf32> -> vector<128x8xf32>
    %194 = arith.addf %190, %193 : vector<128x8xf32>
    %c0_88 = arith.constant 0 : index
    %c448 = arith.constant 448 : index
    %195 = vector.load %arg9[%c0_88, %c448] : memref<128x576xf32, #tpu.memory_space<vmem>>, vector<128x64xf32>
    %196 = vector.extract_strided_slice %167 {offsets = [0, 56], sizes = [64, 8], strides = [1, 1]} : vector<64x72xf32> to vector<64x8xf32>
    %cst_89 = arith.constant dense<0.000000e+00> : vector<128x8xf32>
    %197 = tpu.matmul %195, %196, %cst_89 {dimension_numbers = #tpu.dot_dimension_numbers<[1], [0], [0], [1], [0, 0, 1, 1], [], []>} : vector<128x64xf32>, vector<64x8xf32>, vector<128x8xf32> -> vector<128x8xf32>
    %198 = arith.addf %194, %197 : vector<128x8xf32>
    %c0_90 = arith.constant 0 : index
    %c512 = arith.constant 512 : index
    %199 = vector.load %arg9[%c0_90, %c512] : memref<128x576xf32, #tpu.memory_space<vmem>>, vector<128x64xf32>
    %200 = vector.extract_strided_slice %167 {offsets = [0, 64], sizes = [64, 8], strides = [1, 1]} : vector<64x72xf32> to vector<64x8xf32>
    %cst_91 = arith.constant dense<0.000000e+00> : vector<128x8xf32>
    %201 = tpu.matmul %199, %200, %cst_91 {dimension_numbers = #tpu.dot_dimension_numbers<[1], [0], [0], [1], [0, 0, 1, 1], [], []>} : vector<128x64xf32>, vector<64x8xf32>, vector<128x8xf32> -> vector<128x8xf32>
    %202 = arith.addf %198, %201 : vector<128x8xf32>
    %c0_92 = arith.constant 0 : index
    %c0_93 = arith.constant 0 : index
    %203 = vector.load %arg10[%c0_92, %c0_93] : memref<128x1xf32, #tpu.memory_space<vmem>>, vector<128x1xf32>
    %204 = vector.broadcast %203 : vector<128x1xf32> to vector<128x8xf32>
    %205 = arith.addf %202, %204 : vector<128x8xf32>
    %cst_94 = arith.constant 0.000000e+00 : f32
    %206 = vector.broadcast %cst_94 : f32 to vector<128x8xf32>
    %207 = arith.maximumf %205, %206 : vector<128x8xf32>
    %c0_95 = arith.constant 0 : index
    %c0_96 = arith.constant 0 : index
    %208 = vector.load %arg11[%c0_95, %c0_96] : memref<128x256xf32, #tpu.memory_space<vmem>>, vector<128x256xf32>
    %cst_97 = arith.constant dense<0.000000e+00> : vector<8x256xf32>
    %209 = tpu.matmul %207, %208, %cst_97 {dimension_numbers = #tpu.dot_dimension_numbers<[0], [0], [1], [1], [0, 1, 1, 1], [], []>} : vector<128x8xf32>, vector<128x256xf32>, vector<8x256xf32> -> vector<8x256xf32>
    %c0_98 = arith.constant 0 : index
    %c0_99 = arith.constant 0 : index
    %210 = vector.load %arg12[%c0_98, %c0_99] : memref<1x64xf32, #tpu.memory_space<vmem>>, vector<1x64xf32>
    %211 = vector.extract_strided_slice %209 {offsets = [0, 0], sizes = [1, 64], strides = [1, 1]} : vector<8x256xf32> to vector<1x64xf32>
    %212 = vector.extract_strided_slice %209 {offsets = [1, 64], sizes = [1, 64], strides = [1, 1]} : vector<8x256xf32> to vector<1x64xf32>
    %213 = arith.addf %211, %212 : vector<1x64xf32>
    %214 = vector.extract_strided_slice %209 {offsets = [2, 128], sizes = [1, 64], strides = [1, 1]} : vector<8x256xf32> to vector<1x64xf32>
    %215 = arith.addf %213, %214 : vector<1x64xf32>
    %216 = vector.extract_strided_slice %209 {offsets = [3, 192], sizes = [1, 64], strides = [1, 1]} : vector<8x256xf32> to vector<1x64xf32>
    %217 = arith.addf %215, %216 : vector<1x64xf32>
    %218 = arith.addf %217, %210 : vector<1x64xf32>
    %219 = vector.extract_strided_slice %218 {offsets = [0, 0], sizes = [1, 32], strides = [1, 1]} : vector<1x64xf32> to vector<1x32xf32>
    %220 = vector.extract_strided_slice %218 {offsets = [0, 32], sizes = [1, 32], strides = [1, 1]} : vector<1x64xf32> to vector<1x32xf32>
    %c0_100 = arith.constant 0 : index
    %c0_101 = arith.constant 0 : index
    %221 = vector.load %arg25[%c0_100, %c0_101] : memref<2x32xf32, #tpu.memory_space<vmem>>, vector<1x32xf32>
    tpu.vector_store %arg25[%c0_100, %c0_101], %219 {strides = array<i32>} : memref<2x32xf32, #tpu.memory_space<vmem>>, vector<1x32xf32>,
    %c0_102 = arith.constant 0 : index
    %c0_103 = arith.constant 0 : index
    %222 = vector.load %arg26[%c0_102, %c0_103] : memref<2x32xf32, #tpu.memory_space<vmem>>, vector<1x32xf32>
    tpu.vector_store %arg26[%c0_102, %c0_103], %220 {strides = array<i32>} : memref<2x32xf32, #tpu.memory_space<vmem>>, vector<1x32xf32>,
    %c0_104 = arith.constant 0 : index
    %c0_105 = arith.constant 0 : index
    %223 = vector.load %arg1[%c0_104, %c0_105] : memref<2x32xf32, #tpu.memory_space<vmem>>, vector<1x32xf32>
    %cst_106 = arith.constant 5.000000e-01 : f32
    %224 = vector.broadcast %cst_106 : f32 to vector<1x32xf32>
    %225 = arith.mulf %224, %220 : vector<1x32xf32>
    %226 = math.exp %225 : vector<1x32xf32>
    %227 = arith.mulf %223, %226 : vector<1x32xf32>
    %228 = arith.addf %219, %227 : vector<1x32xf32>
    %229 = vector.extract_strided_slice %209 {offsets = [4, 0], sizes = [1, 64], strides = [1, 1]} : vector<8x256xf32> to vector<1x64xf32>
    %230 = vector.extract_strided_slice %209 {offsets = [5, 64], sizes = [1, 64], strides = [1, 1]} : vector<8x256xf32> to vector<1x64xf32>
    %231 = arith.addf %229, %230 : vector<1x64xf32>
    %232 = vector.extract_strided_slice %209 {offsets = [6, 128], sizes = [1, 64], strides = [1, 1]} : vector<8x256xf32> to vector<1x64xf32>
    %233 = arith.addf %231, %232 : vector<1x64xf32>
    %234 = vector.extract_strided_slice %209 {offsets = [7, 192], sizes = [1, 64], strides = [1, 1]} : vector<8x256xf32> to vector<1x64xf32>
    %235 = arith.addf %233, %234 : vector<1x64xf32>
    %236 = arith.addf %235, %210 : vector<1x64xf32>
    %237 = vector.extract_strided_slice %236 {offsets = [0, 0], sizes = [1, 32], strides = [1, 1]} : vector<1x64xf32> to vector<1x32xf32>
    %238 = vector.extract_strided_slice %236 {offsets = [0, 32], sizes = [1, 32], strides = [1, 1]} : vector<1x64xf32> to vector<1x32xf32>
    %c1_107 = arith.constant 1 : index
    %c0_108 = arith.constant 0 : index
    %239 = vector.load %arg25[%c1_107, %c0_108] : memref<2x32xf32, #tpu.memory_space<vmem>>, vector<1x32xf32>
    tpu.vector_store %arg25[%c1_107, %c0_108], %237 {strides = array<i32>} : memref<2x32xf32, #tpu.memory_space<vmem>>, vector<1x32xf32>,
    %c1_109 = arith.constant 1 : index
    %c0_110 = arith.constant 0 : index
    %240 = vector.load %arg26[%c1_109, %c0_110] : memref<2x32xf32, #tpu.memory_space<vmem>>, vector<1x32xf32>
    tpu.vector_store %arg26[%c1_109, %c0_110], %238 {strides = array<i32>} : memref<2x32xf32, #tpu.memory_space<vmem>>, vector<1x32xf32>,
    %c1_111 = arith.constant 1 : index
    %c0_112 = arith.constant 0 : index
    %241 = vector.load %arg1[%c1_111, %c0_112] : memref<2x32xf32, #tpu.memory_space<vmem>>, vector<1x32xf32>
    %cst_113 = arith.constant 5.000000e-01 : f32
    %242 = vector.broadcast %cst_113 : f32 to vector<1x32xf32>
    %243 = arith.mulf %242, %238 : vector<1x32xf32>
    %244 = math.exp %243 : vector<1x32xf32>
    %245 = arith.mulf %241, %244 : vector<1x32xf32>
    %246 = arith.addf %237, %245 : vector<1x32xf32>
    %247 = tpu.concatenate %228, %246 in 0 : vector<1x32xf32>, vector<1x32xf32> -> vector<2x32xf32>
    %c0_114 = arith.constant 0 : index
    %c0_115 = arith.constant 0 : index
    %248 = vector.load %arg13[%c0_114, %c0_115] : memref<512x32xf32, #tpu.memory_space<vmem>>, vector<512x32xf32>
    %cst_116 = arith.constant dense<0.000000e+00> : vector<512x2xf32>
    %249 = tpu.matmul %248, %247, %cst_116 {dimension_numbers = #tpu.dot_dimension_numbers<[1], [1], [0], [0], [0, 0, 1, 0], [], []>} : vector<512x32xf32>, vector<2x32xf32>, vector<512x2xf32> -> vector<512x2xf32>
    %250 = vector.extract_strided_slice %249 {offsets = [0, 0], sizes = [128, 1], strides = [1, 1]} : vector<512x2xf32> to vector<128x1xf32>
    %c0_117 = arith.constant 0 : index
    %c0_118 = arith.constant 0 : index
    %251 = vector.load %arg28[%c0_117, %c0_118] : memref<128x8xf32, #tpu.memory_space<vmem>>, vector<128x1xf32>
    tpu.vector_store %arg28[%c0_117, %c0_118], %250 {strides = array<i32>} : memref<128x8xf32, #tpu.memory_space<vmem>>, vector<128x1xf32>,
    %252 = vector.extract_strided_slice %249 {offsets = [128, 0], sizes = [128, 1], strides = [1, 1]} : vector<512x2xf32> to vector<128x1xf32>
    %c0_119 = arith.constant 0 : index
    %c1_120 = arith.constant 1 : index
    %253 = vector.load %arg28[%c0_119, %c1_120] : memref<128x8xf32, #tpu.memory_space<vmem>>, vector<128x1xf32>
    tpu.vector_store %arg28[%c0_119, %c1_120], %252 {strides = array<i32>} : memref<128x8xf32, #tpu.memory_space<vmem>>, vector<128x1xf32>,
    %254 = vector.extract_strided_slice %249 {offsets = [256, 0], sizes = [128, 1], strides = [1, 1]} : vector<512x2xf32> to vector<128x1xf32>
    %c0_121 = arith.constant 0 : index
    %c2_122 = arith.constant 2 : index
    %255 = vector.load %arg28[%c0_121, %c2_122] : memref<128x8xf32, #tpu.memory_space<vmem>>, vector<128x1xf32>
    tpu.vector_store %arg28[%c0_121, %c2_122], %254 {strides = array<i32>} : memref<128x8xf32, #tpu.memory_space<vmem>>, vector<128x1xf32>,
    %256 = vector.extract_strided_slice %249 {offsets = [384, 0], sizes = [128, 1], strides = [1, 1]} : vector<512x2xf32> to vector<128x1xf32>
    %c0_123 = arith.constant 0 : index
    %c3_124 = arith.constant 3 : index
    %257 = vector.load %arg28[%c0_123, %c3_124] : memref<128x8xf32, #tpu.memory_space<vmem>>, vector<128x1xf32>
    tpu.vector_store %arg28[%c0_123, %c3_124], %256 {strides = array<i32>} : memref<128x8xf32, #tpu.memory_space<vmem>>, vector<128x1xf32>,
    %258 = vector.extract_strided_slice %249 {offsets = [0, 1], sizes = [128, 1], strides = [1, 1]} : vector<512x2xf32> to vector<128x1xf32>
    %c0_125 = arith.constant 0 : index
    %c4_126 = arith.constant 4 : index
    %259 = vector.load %arg28[%c0_125, %c4_126] : memref<128x8xf32, #tpu.memory_space<vmem>>, vector<128x1xf32>
    tpu.vector_store %arg28[%c0_125, %c4_126], %258 {strides = array<i32>} : memref<128x8xf32, #tpu.memory_space<vmem>>, vector<128x1xf32>,
    %260 = vector.extract_strided_slice %249 {offsets = [128, 1], sizes = [128, 1], strides = [1, 1]} : vector<512x2xf32> to vector<128x1xf32>
    %c0_127 = arith.constant 0 : index
    %c5_128 = arith.constant 5 : index
    %261 = vector.load %arg28[%c0_127, %c5_128] : memref<128x8xf32, #tpu.memory_space<vmem>>, vector<128x1xf32>
    tpu.vector_store %arg28[%c0_127, %c5_128], %260 {strides = array<i32>} : memref<128x8xf32, #tpu.memory_space<vmem>>, vector<128x1xf32>,
    %262 = vector.extract_strided_slice %249 {offsets = [256, 1], sizes = [128, 1], strides = [1, 1]} : vector<512x2xf32> to vector<128x1xf32>
    %c0_129 = arith.constant 0 : index
    %c6_130 = arith.constant 6 : index
    %263 = vector.load %arg28[%c0_129, %c6_130] : memref<128x8xf32, #tpu.memory_space<vmem>>, vector<128x1xf32>
    tpu.vector_store %arg28[%c0_129, %c6_130], %262 {strides = array<i32>} : memref<128x8xf32, #tpu.memory_space<vmem>>, vector<128x1xf32>,
    %264 = vector.extract_strided_slice %249 {offsets = [384, 1], sizes = [128, 1], strides = [1, 1]} : vector<512x2xf32> to vector<128x1xf32>
    %c0_131 = arith.constant 0 : index
    %c7_132 = arith.constant 7 : index
    %265 = vector.load %arg28[%c0_131, %c7_132] : memref<128x8xf32, #tpu.memory_space<vmem>>, vector<128x1xf32>
    tpu.vector_store %arg28[%c0_131, %c7_132], %264 {strides = array<i32>} : memref<128x8xf32, #tpu.memory_space<vmem>>, vector<128x1xf32>,
    %c0_133 = arith.constant 0 : index
    %c0_134 = arith.constant 0 : index
    %266 = vector.load %arg28[%c0_133, %c0_134] : memref<128x8xf32, #tpu.memory_space<vmem>>, vector<128x8xf32>
    %c0_135 = arith.constant 0 : index
    %c0_136 = arith.constant 0 : index
    %267 = vector.load %arg14[%c0_135, %c0_136] : memref<128x8xf32, #tpu.memory_space<vmem>>, vector<128x8xf32>
    %268 = arith.addf %266, %267 : vector<128x8xf32>
    %c0_137 = arith.constant 0 : index
    %c0_138 = arith.constant 0 : index
    %269 = vector.load %arg16[%c0_137, %c0_138] : memref<576x128xf32, #tpu.memory_space<vmem>>, vector<576x128xf32>
    %cst_139 = arith.constant dense<0.000000e+00> : vector<576x8xf32>
    %270 = tpu.matmul %269, %268, %cst_139 {dimension_numbers = #tpu.dot_dimension_numbers<[1], [0], [0], [1], [0, 0, 1, 1], [], []>} : vector<576x128xf32>, vector<128x8xf32>, vector<576x8xf32> -> vector<576x8xf32>
    %271 = vector.extract_strided_slice %270 {offsets = [0, 0], sizes = [64, 8], strides = [1, 1]} : vector<576x8xf32> to vector<64x8xf32>
    %c0_140 = arith.constant 0 : index
    %c0_141 = arith.constant 0 : index
    %272 = vector.load %arg15[%c0_140, %c0_141] : memref<8x288xbf16, #tpu.memory_space<vmem>>, vector<8x32xbf16>
    %273 = arith.extf %272 : vector<8x32xbf16> to vector<8x32xf32>
    %cst_142 = arith.constant dense<0.000000e+00> : vector<64x32xf32>
    %274 = tpu.matmul %271, %273, %cst_142 {dimension_numbers = #tpu.dot_dimension_numbers<[1], [0], [0], [1], [0, 0, 1, 1], [], []>} : vector<64x8xf32>, vector<8x32xf32>, vector<64x32xf32> -> vector<64x32xf32>
    %275 = vector.extract_strided_slice %270 {offsets = [64, 0], sizes = [64, 8], strides = [1, 1]} : vector<576x8xf32> to vector<64x8xf32>
    %c0_143 = arith.constant 0 : index
    %c32_144 = arith.constant 32 : index
    %276 = vector.load %arg15[%c0_143, %c32_144] : memref<8x288xbf16, #tpu.memory_space<vmem>>, vector<8x32xbf16>
    %277 = arith.extf %276 : vector<8x32xbf16> to vector<8x32xf32>
    %cst_145 = arith.constant dense<0.000000e+00> : vector<64x32xf32>
    %278 = tpu.matmul %275, %277, %cst_145 {dimension_numbers = #tpu.dot_dimension_numbers<[1], [0], [0], [1], [0, 0, 1, 1], [], []>} : vector<64x8xf32>, vector<8x32xf32>, vector<64x32xf32> -> vector<64x32xf32>
    %279 = arith.addf %274, %278 : vector<64x32xf32>
    %280 = vector.extract_strided_slice %270 {offsets = [128, 0], sizes = [64, 8], strides = [1, 1]} : vector<576x8xf32> to vector<64x8xf32>
    %c0_146 = arith.constant 0 : index
    %c64_147 = arith.constant 64 : index
    %281 = vector.load %arg15[%c0_146, %c64_147] : memref<8x288xbf16, #tpu.memory_space<vmem>>, vector<8x32xbf16>
    %282 = arith.extf %281 : vector<8x32xbf16> to vector<8x32xf32>
    %cst_148 = arith.constant dense<0.000000e+00> : vector<64x32xf32>
    %283 = tpu.matmul %280, %282, %cst_148 {dimension_numbers = #tpu.dot_dimension_numbers<[1], [0], [0], [1], [0, 0, 1, 1], [], []>} : vector<64x8xf32>, vector<8x32xf32>, vector<64x32xf32> -> vector<64x32xf32>
    %284 = arith.addf %279, %283 : vector<64x32xf32>
    %285 = vector.extract_strided_slice %270 {offsets = [192, 0], sizes = [64, 8], strides = [1, 1]} : vector<576x8xf32> to vector<64x8xf32>
    %c0_149 = arith.constant 0 : index
    %c96_150 = arith.constant 96 : index
    %286 = vector.load %arg15[%c0_149, %c96_150] : memref<8x288xbf16, #tpu.memory_space<vmem>>, vector<8x32xbf16>
    %287 = arith.extf %286 : vector<8x32xbf16> to vector<8x32xf32>
    %cst_151 = arith.constant dense<0.000000e+00> : vector<64x32xf32>
    %288 = tpu.matmul %285, %287, %cst_151 {dimension_numbers = #tpu.dot_dimension_numbers<[1], [0], [0], [1], [0, 0, 1, 1], [], []>} : vector<64x8xf32>, vector<8x32xf32>, vector<64x32xf32> -> vector<64x32xf32>
    %289 = arith.addf %284, %288 : vector<64x32xf32>
    %290 = vector.extract_strided_slice %270 {offsets = [256, 0], sizes = [64, 8], strides = [1, 1]} : vector<576x8xf32> to vector<64x8xf32>
    %c0_152 = arith.constant 0 : index
    %c128_153 = arith.constant 128 : index
    %291 = vector.load %arg15[%c0_152, %c128_153] : memref<8x288xbf16, #tpu.memory_space<vmem>>, vector<8x32xbf16>
    %292 = arith.extf %291 : vector<8x32xbf16> to vector<8x32xf32>
    %cst_154 = arith.constant dense<0.000000e+00> : vector<64x32xf32>
    %293 = tpu.matmul %290, %292, %cst_154 {dimension_numbers = #tpu.dot_dimension_numbers<[1], [0], [0], [1], [0, 0, 1, 1], [], []>} : vector<64x8xf32>, vector<8x32xf32>, vector<64x32xf32> -> vector<64x32xf32>
    %294 = arith.addf %289, %293 : vector<64x32xf32>
    %295 = vector.extract_strided_slice %270 {offsets = [320, 0], sizes = [64, 8], strides = [1, 1]} : vector<576x8xf32> to vector<64x8xf32>
    %c0_155 = arith.constant 0 : index
    %c160_156 = arith.constant 160 : index
    %296 = vector.load %arg15[%c0_155, %c160_156] : memref<8x288xbf16, #tpu.memory_space<vmem>>, vector<8x32xbf16>
    %297 = arith.extf %296 : vector<8x32xbf16> to vector<8x32xf32>
    %cst_157 = arith.constant dense<0.000000e+00> : vector<64x32xf32>
    %298 = tpu.matmul %295, %297, %cst_157 {dimension_numbers = #tpu.dot_dimension_numbers<[1], [0], [0], [1], [0, 0, 1, 1], [], []>} : vector<64x8xf32>, vector<8x32xf32>, vector<64x32xf32> -> vector<64x32xf32>
    %299 = arith.addf %294, %298 : vector<64x32xf32>
    %300 = vector.extract_strided_slice %270 {offsets = [384, 0], sizes = [64, 8], strides = [1, 1]} : vector<576x8xf32> to vector<64x8xf32>
    %c0_158 = arith.constant 0 : index
    %c192_159 = arith.constant 192 : index
    %301 = vector.load %arg15[%c0_158, %c192_159] : memref<8x288xbf16, #tpu.memory_space<vmem>>, vector<8x32xbf16>
    %302 = arith.extf %301 : vector<8x32xbf16> to vector<8x32xf32>
    %cst_160 = arith.constant dense<0.000000e+00> : vector<64x32xf32>
    %303 = tpu.matmul %300, %302, %cst_160 {dimension_numbers = #tpu.dot_dimension_numbers<[1], [0], [0], [1], [0, 0, 1, 1], [], []>} : vector<64x8xf32>, vector<8x32xf32>, vector<64x32xf32> -> vector<64x32xf32>
    %304 = arith.addf %299, %303 : vector<64x32xf32>
    %305 = vector.extract_strided_slice %270 {offsets = [448, 0], sizes = [64, 8], strides = [1, 1]} : vector<576x8xf32> to vector<64x8xf32>
    %c0_161 = arith.constant 0 : index
    %c224_162 = arith.constant 224 : index
    %306 = vector.load %arg15[%c0_161, %c224_162] : memref<8x288xbf16, #tpu.memory_space<vmem>>, vector<8x32xbf16>
    %307 = arith.extf %306 : vector<8x32xbf16> to vector<8x32xf32>
    %cst_163 = arith.constant dense<0.000000e+00> : vector<64x32xf32>
    %308 = tpu.matmul %305, %307, %cst_163 {dimension_numbers = #tpu.dot_dimension_numbers<[1], [0], [0], [1], [0, 0, 1, 1], [], []>} : vector<64x8xf32>, vector<8x32xf32>, vector<64x32xf32> -> vector<64x32xf32>
    %309 = arith.addf %304, %308 : vector<64x32xf32>
    %310 = vector.extract_strided_slice %270 {offsets = [512, 0], sizes = [64, 8], strides = [1, 1]} : vector<576x8xf32> to vector<64x8xf32>
    %c0_164 = arith.constant 0 : index
    %c256_165 = arith.constant 256 : index
    %311 = vector.load %arg15[%c0_164, %c256_165] : memref<8x288xbf16, #tpu.memory_space<vmem>>, vector<8x32xbf16>
    %312 = arith.extf %311 : vector<8x32xbf16> to vector<8x32xf32>
    %cst_166 = arith.constant dense<0.000000e+00> : vector<64x32xf32>
    %313 = tpu.matmul %310, %312, %cst_166 {dimension_numbers = #tpu.dot_dimension_numbers<[1], [0], [0], [1], [0, 0, 1, 1], [], []>} : vector<64x8xf32>, vector<8x32xf32>, vector<64x32xf32> -> vector<64x32xf32>
    %314 = arith.addf %309, %313 : vector<64x32xf32>
    %c0_167 = arith.constant 0 : index
    %c0_168 = arith.constant 0 : index
    %315 = vector.load %arg17[%c0_167, %c0_168] : memref<64x1xf32, #tpu.memory_space<vmem>>, vector<64x1xf32>
    %316 = vector.broadcast %315 : vector<64x1xf32> to vector<64x32xf32>
    %317 = arith.addf %314, %316 : vector<64x32xf32>
    %cst_169 = arith.constant 0.000000e+00 : f32
    %318 = vector.broadcast %cst_169 : f32 to vector<64x32xf32>
    %319 = arith.maximumf %317, %318 : vector<64x32xf32>
    %c0_170 = arith.constant 0 : index
    %c0_171 = arith.constant 0 : index
    %320 = vector.load %arg19[%c0_170, %c0_171] : memref<288x64xf32, #tpu.memory_space<vmem>>, vector<288x64xf32>
    %cst_172 = arith.constant dense<0.000000e+00> : vector<288x32xf32>
    %321 = tpu.matmul %320, %319, %cst_172 {dimension_numbers = #tpu.dot_dimension_numbers<[1], [0], [0], [1], [0, 0, 1, 1], [], []>} : vector<288x64xf32>, vector<64x32xf32>, vector<288x32xf32> -> vector<288x32xf32>
    %322 = vector.extract_strided_slice %321 {offsets = [0, 0], sizes = [32, 32], strides = [1, 1]} : vector<288x32xf32> to vector<32x32xf32>
    %c0_173 = arith.constant 0 : index
    %c0_174 = arith.constant 0 : index
    %323 = vector.load %arg18[%c0_173, %c0_174] : memref<32x1152xbf16, #tpu.memory_space<vmem>>, vector<32x128xbf16>
    %324 = arith.extf %323 : vector<32x128xbf16> to vector<32x128xf32>
    %cst_175 = arith.constant dense<0.000000e+00> : vector<32x128xf32>
    %325 = tpu.matmul %322, %324, %cst_175 {dimension_numbers = #tpu.dot_dimension_numbers<[1], [0], [0], [1], [0, 0, 1, 1], [], []>} : vector<32x32xf32>, vector<32x128xf32>, vector<32x128xf32> -> vector<32x128xf32>
    %326 = vector.extract_strided_slice %321 {offsets = [32, 0], sizes = [32, 32], strides = [1, 1]} : vector<288x32xf32> to vector<32x32xf32>
    %c0_176 = arith.constant 0 : index
    %c128_177 = arith.constant 128 : index
    %327 = vector.load %arg18[%c0_176, %c128_177] : memref<32x1152xbf16, #tpu.memory_space<vmem>>, vector<32x128xbf16>
    %328 = arith.extf %327 : vector<32x128xbf16> to vector<32x128xf32>
    %cst_178 = arith.constant dense<0.000000e+00> : vector<32x128xf32>
    %329 = tpu.matmul %326, %328, %cst_178 {dimension_numbers = #tpu.dot_dimension_numbers<[1], [0], [0], [1], [0, 0, 1, 1], [], []>} : vector<32x32xf32>, vector<32x128xf32>, vector<32x128xf32> -> vector<32x128xf32>
    %330 = arith.addf %325, %329 : vector<32x128xf32>
    %331 = vector.extract_strided_slice %321 {offsets = [64, 0], sizes = [32, 32], strides = [1, 1]} : vector<288x32xf32> to vector<32x32xf32>
    %c0_179 = arith.constant 0 : index
    %c256_180 = arith.constant 256 : index
    %332 = vector.load %arg18[%c0_179, %c256_180] : memref<32x1152xbf16, #tpu.memory_space<vmem>>, vector<32x128xbf16>
    %333 = arith.extf %332 : vector<32x128xbf16> to vector<32x128xf32>
    %cst_181 = arith.constant dense<0.000000e+00> : vector<32x128xf32>
    %334 = tpu.matmul %331, %333, %cst_181 {dimension_numbers = #tpu.dot_dimension_numbers<[1], [0], [0], [1], [0, 0, 1, 1], [], []>} : vector<32x32xf32>, vector<32x128xf32>, vector<32x128xf32> -> vector<32x128xf32>
    %335 = arith.addf %330, %334 : vector<32x128xf32>
    %336 = vector.extract_strided_slice %321 {offsets = [96, 0], sizes = [32, 32], strides = [1, 1]} : vector<288x32xf32> to vector<32x32xf32>
    %c0_182 = arith.constant 0 : index
    %c384_183 = arith.constant 384 : index
    %337 = vector.load %arg18[%c0_182, %c384_183] : memref<32x1152xbf16, #tpu.memory_space<vmem>>, vector<32x128xbf16>
    %338 = arith.extf %337 : vector<32x128xbf16> to vector<32x128xf32>
    %cst_184 = arith.constant dense<0.000000e+00> : vector<32x128xf32>
    %339 = tpu.matmul %336, %338, %cst_184 {dimension_numbers = #tpu.dot_dimension_numbers<[1], [0], [0], [1], [0, 0, 1, 1], [], []>} : vector<32x32xf32>, vector<32x128xf32>, vector<32x128xf32> -> vector<32x128xf32>
    %340 = arith.addf %335, %339 : vector<32x128xf32>
    %341 = vector.extract_strided_slice %321 {offsets = [128, 0], sizes = [32, 32], strides = [1, 1]} : vector<288x32xf32> to vector<32x32xf32>
    %c0_185 = arith.constant 0 : index
    %c512_186 = arith.constant 512 : index
    %342 = vector.load %arg18[%c0_185, %c512_186] : memref<32x1152xbf16, #tpu.memory_space<vmem>>, vector<32x128xbf16>
    %343 = arith.extf %342 : vector<32x128xbf16> to vector<32x128xf32>
    %cst_187 = arith.constant dense<0.000000e+00> : vector<32x128xf32>
    %344 = tpu.matmul %341, %343, %cst_187 {dimension_numbers = #tpu.dot_dimension_numbers<[1], [0], [0], [1], [0, 0, 1, 1], [], []>} : vector<32x32xf32>, vector<32x128xf32>, vector<32x128xf32> -> vector<32x128xf32>
    %345 = arith.addf %340, %344 : vector<32x128xf32>
    %346 = vector.extract_strided_slice %321 {offsets = [160, 0], sizes = [32, 32], strides = [1, 1]} : vector<288x32xf32> to vector<32x32xf32>
    %c0_188 = arith.constant 0 : index
    %c640 = arith.constant 640 : index
    %347 = vector.load %arg18[%c0_188, %c640] : memref<32x1152xbf16, #tpu.memory_space<vmem>>, vector<32x128xbf16>
    %348 = arith.extf %347 : vector<32x128xbf16> to vector<32x128xf32>
    %cst_189 = arith.constant dense<0.000000e+00> : vector<32x128xf32>
    %349 = tpu.matmul %346, %348, %cst_189 {dimension_numbers = #tpu.dot_dimension_numbers<[1], [0], [0], [1], [0, 0, 1, 1], [], []>} : vector<32x32xf32>, vector<32x128xf32>, vector<32x128xf32> -> vector<32x128xf32>
    %350 = arith.addf %345, %349 : vector<32x128xf32>
    %351 = vector.extract_strided_slice %321 {offsets = [192, 0], sizes = [32, 32], strides = [1, 1]} : vector<288x32xf32> to vector<32x32xf32>
    %c0_190 = arith.constant 0 : index
    %c768 = arith.constant 768 : index
    %352 = vector.load %arg18[%c0_190, %c768] : memref<32x1152xbf16, #tpu.memory_space<vmem>>, vector<32x128xbf16>
    %353 = arith.extf %352 : vector<32x128xbf16> to vector<32x128xf32>
    %cst_191 = arith.constant dense<0.000000e+00> : vector<32x128xf32>
    %354 = tpu.matmul %351, %353, %cst_191 {dimension_numbers = #tpu.dot_dimension_numbers<[1], [0], [0], [1], [0, 0, 1, 1], [], []>} : vector<32x32xf32>, vector<32x128xf32>, vector<32x128xf32> -> vector<32x128xf32>
    %355 = arith.addf %350, %354 : vector<32x128xf32>
    %356 = vector.extract_strided_slice %321 {offsets = [224, 0], sizes = [32, 32], strides = [1, 1]} : vector<288x32xf32> to vector<32x32xf32>
    %c0_192 = arith.constant 0 : index
    %c896 = arith.constant 896 : index
    %357 = vector.load %arg18[%c0_192, %c896] : memref<32x1152xbf16, #tpu.memory_space<vmem>>, vector<32x128xbf16>
    %358 = arith.extf %357 : vector<32x128xbf16> to vector<32x128xf32>
    %cst_193 = arith.constant dense<0.000000e+00> : vector<32x128xf32>
    %359 = tpu.matmul %356, %358, %cst_193 {dimension_numbers = #tpu.dot_dimension_numbers<[1], [0], [0], [1], [0, 0, 1, 1], [], []>} : vector<32x32xf32>, vector<32x128xf32>, vector<32x128xf32> -> vector<32x128xf32>
    %360 = arith.addf %355, %359 : vector<32x128xf32>
    %361 = vector.extract_strided_slice %321 {offsets = [256, 0], sizes = [32, 32], strides = [1, 1]} : vector<288x32xf32> to vector<32x32xf32>
    %c0_194 = arith.constant 0 : index
    %c1024 = arith.constant 1024 : index
    %362 = vector.load %arg18[%c0_194, %c1024] : memref<32x1152xbf16, #tpu.memory_space<vmem>>, vector<32x128xbf16>
    %363 = arith.extf %362 : vector<32x128xbf16> to vector<32x128xf32>
    %cst_195 = arith.constant dense<0.000000e+00> : vector<32x128xf32>
    %364 = tpu.matmul %361, %363, %cst_195 {dimension_numbers = #tpu.dot_dimension_numbers<[1], [0], [0], [1], [0, 0, 1, 1], [], []>} : vector<32x32xf32>, vector<32x128xf32>, vector<32x128xf32> -> vector<32x128xf32>
    %365 = arith.addf %360, %364 : vector<32x128xf32>
    %c0_196 = arith.constant 0 : index
    %c0_197 = arith.constant 0 : index
    %366 = vector.load %arg20[%c0_196, %c0_197] : memref<32x1xf32, #tpu.memory_space<vmem>>, vector<32x1xf32>
    %367 = vector.broadcast %366 : vector<32x1xf32> to vector<32x128xf32>
    %368 = arith.addf %365, %367 : vector<32x128xf32>
    %cst_198 = arith.constant 0.000000e+00 : f32
    %369 = vector.broadcast %cst_198 : f32 to vector<32x128xf32>
    %370 = arith.maximumf %368, %369 : vector<32x128xf32>
    %c0_199 = arith.constant 0 : index
    %c0_200 = arith.constant 0 : index
    %371 = vector.load %arg22[%c0_199, %c0_200] : memref<9x32xf32, #tpu.memory_space<vmem>>, vector<9x32xf32>
    %cst_201 = arith.constant dense<0.000000e+00> : vector<9x128xf32>
    %372 = tpu.matmul %371, %370, %cst_201 {dimension_numbers = #tpu.dot_dimension_numbers<[1], [0], [0], [1], [0, 0, 1, 1], [], []>} : vector<9x32xf32>, vector<32x128xf32>, vector<9x128xf32> -> vector<9x128xf32>
    %c0_202 = arith.constant 0 : index
    %c0_203 = arith.constant 0 : index
    %373 = vector.load %arg23[%c0_202, %c0_203] : memref<1x1xf32, #tpu.memory_space<vmem>>, vector<1x1xf32>
    %374 = vector.extract_strided_slice %372 {offsets = [0, 0], sizes = [1, 64], strides = [1, 1]} : vector<9x128xf32> to vector<1x64xf32>
    %c0_204 = arith.constant 0 : index
    %c0_205 = arith.constant 0 : index
    %375 = vector.load %arg21[%c0_204, %c0_205] : memref<64x2304xbf16, #tpu.memory_space<vmem>>, vector<64x256xbf16>
    %376 = arith.extf %375 : vector<64x256xbf16> to vector<64x256xf32>
    %cst_206 = arith.constant dense<0.000000e+00> : vector<1x256xf32>
    %377 = tpu.matmul %374, %376, %cst_206 {dimension_numbers = #tpu.dot_dimension_numbers<[1], [0], [0], [1], [0, 0, 1, 1], [], []>} : vector<1x64xf32>, vector<64x256xf32>, vector<1x256xf32> -> vector<1x256xf32>
    %378 = vector.extract_strided_slice %372 {offsets = [1, 0], sizes = [1, 64], strides = [1, 1]} : vector<9x128xf32> to vector<1x64xf32>
    %c0_207 = arith.constant 0 : index
    %c256_208 = arith.constant 256 : index
    %379 = vector.load %arg21[%c0_207, %c256_208] : memref<64x2304xbf16, #tpu.memory_space<vmem>>, vector<64x256xbf16>
    %380 = arith.extf %379 : vector<64x256xbf16> to vector<64x256xf32>
    %cst_209 = arith.constant dense<0.000000e+00> : vector<1x256xf32>
    %381 = tpu.matmul %378, %380, %cst_209 {dimension_numbers = #tpu.dot_dimension_numbers<[1], [0], [0], [1], [0, 0, 1, 1], [], []>} : vector<1x64xf32>, vector<64x256xf32>, vector<1x256xf32> -> vector<1x256xf32>
    %382 = arith.addf %377, %381 : vector<1x256xf32>
    %383 = vector.extract_strided_slice %372 {offsets = [2, 0], sizes = [1, 64], strides = [1, 1]} : vector<9x128xf32> to vector<1x64xf32>
    %c0_210 = arith.constant 0 : index
    %c512_211 = arith.constant 512 : index
    %384 = vector.load %arg21[%c0_210, %c512_211] : memref<64x2304xbf16, #tpu.memory_space<vmem>>, vector<64x256xbf16>
    %385 = arith.extf %384 : vector<64x256xbf16> to vector<64x256xf32>
    %cst_212 = arith.constant dense<0.000000e+00> : vector<1x256xf32>
    %386 = tpu.matmul %383, %385, %cst_212 {dimension_numbers = #tpu.dot_dimension_numbers<[1], [0], [0], [1], [0, 0, 1, 1], [], []>} : vector<1x64xf32>, vector<64x256xf32>, vector<1x256xf32> -> vector<1x256xf32>
    %387 = arith.addf %382, %386 : vector<1x256xf32>
    %388 = vector.extract_strided_slice %372 {offsets = [3, 0], sizes = [1, 64], strides = [1, 1]} : vector<9x128xf32> to vector<1x64xf32>
    %c0_213 = arith.constant 0 : index
    %c768_214 = arith.constant 768 : index
    %389 = vector.load %arg21[%c0_213, %c768_214] : memref<64x2304xbf16, #tpu.memory_space<vmem>>, vector<64x256xbf16>
    %390 = arith.extf %389 : vector<64x256xbf16> to vector<64x256xf32>
    %cst_215 = arith.constant dense<0.000000e+00> : vector<1x256xf32>
    %391 = tpu.matmul %388, %390, %cst_215 {dimension_numbers = #tpu.dot_dimension_numbers<[1], [0], [0], [1], [0, 0, 1, 1], [], []>} : vector<1x64xf32>, vector<64x256xf32>, vector<1x256xf32> -> vector<1x256xf32>
    %392 = arith.addf %387, %391 : vector<1x256xf32>
    %393 = vector.extract_strided_slice %372 {offsets = [4, 0], sizes = [1, 64], strides = [1, 1]} : vector<9x128xf32> to vector<1x64xf32>
    %c0_216 = arith.constant 0 : index
    %c1024_217 = arith.constant 1024 : index
    %394 = vector.load %arg21[%c0_216, %c1024_217] : memref<64x2304xbf16, #tpu.memory_space<vmem>>, vector<64x256xbf16>
    %395 = arith.extf %394 : vector<64x256xbf16> to vector<64x256xf32>
    %cst_218 = arith.constant dense<0.000000e+00> : vector<1x256xf32>
    %396 = tpu.matmul %393, %395, %cst_218 {dimension_numbers = #tpu.dot_dimension_numbers<[1], [0], [0], [1], [0, 0, 1, 1], [], []>} : vector<1x64xf32>, vector<64x256xf32>, vector<1x256xf32> -> vector<1x256xf32>
    %397 = arith.addf %392, %396 : vector<1x256xf32>
    %398 = vector.extract_strided_slice %372 {offsets = [5, 0], sizes = [1, 64], strides = [1, 1]} : vector<9x128xf32> to vector<1x64xf32>
    %c0_219 = arith.constant 0 : index
    %c1280 = arith.constant 1280 : index
    %399 = vector.load %arg21[%c0_219, %c1280] : memref<64x2304xbf16, #tpu.memory_space<vmem>>, vector<64x256xbf16>
    %400 = arith.extf %399 : vector<64x256xbf16> to vector<64x256xf32>
    %cst_220 = arith.constant dense<0.000000e+00> : vector<1x256xf32>
    %401 = tpu.matmul %398, %400, %cst_220 {dimension_numbers = #tpu.dot_dimension_numbers<[1], [0], [0], [1], [0, 0, 1, 1], [], []>} : vector<1x64xf32>, vector<64x256xf32>, vector<1x256xf32> -> vector<1x256xf32>
    %402 = arith.addf %397, %401 : vector<1x256xf32>
    %403 = vector.extract_strided_slice %372 {offsets = [6, 0], sizes = [1, 64], strides = [1, 1]} : vector<9x128xf32> to vector<1x64xf32>
    %c0_221 = arith.constant 0 : index
    %c1536 = arith.constant 1536 : index
    %404 = vector.load %arg21[%c0_221, %c1536] : memref<64x2304xbf16, #tpu.memory_space<vmem>>, vector<64x256xbf16>
    %405 = arith.extf %404 : vector<64x256xbf16> to vector<64x256xf32>
    %cst_222 = arith.constant dense<0.000000e+00> : vector<1x256xf32>
    %406 = tpu.matmul %403, %405, %cst_222 {dimension_numbers = #tpu.dot_dimension_numbers<[1], [0], [0], [1], [0, 0, 1, 1], [], []>} : vector<1x64xf32>, vector<64x256xf32>, vector<1x256xf32> -> vector<1x256xf32>
    %407 = arith.addf %402, %406 : vector<1x256xf32>
    %408 = vector.extract_strided_slice %372 {offsets = [7, 0], sizes = [1, 64], strides = [1, 1]} : vector<9x128xf32> to vector<1x64xf32>
    %c0_223 = arith.constant 0 : index
    %c1792 = arith.constant 1792 : index
    %409 = vector.load %arg21[%c0_223, %c1792] : memref<64x2304xbf16, #tpu.memory_space<vmem>>, vector<64x256xbf16>
    %410 = arith.extf %409 : vector<64x256xbf16> to vector<64x256xf32>
    %cst_224 = arith.constant dense<0.000000e+00> : vector<1x256xf32>
    %411 = tpu.matmul %408, %410, %cst_224 {dimension_numbers = #tpu.dot_dimension_numbers<[1], [0], [0], [1], [0, 0, 1, 1], [], []>} : vector<1x64xf32>, vector<64x256xf32>, vector<1x256xf32> -> vector<1x256xf32>
    %412 = arith.addf %407, %411 : vector<1x256xf32>
    %413 = vector.extract_strided_slice %372 {offsets = [8, 0], sizes = [1, 64], strides = [1, 1]} : vector<9x128xf32> to vector<1x64xf32>
    %c0_225 = arith.constant 0 : index
    %c2048 = arith.constant 2048 : index
    %414 = vector.load %arg21[%c0_225, %c2048] : memref<64x2304xbf16, #tpu.memory_space<vmem>>, vector<64x256xbf16>
    %415 = arith.extf %414 : vector<64x256xbf16> to vector<64x256xf32>
    %cst_226 = arith.constant dense<0.000000e+00> : vector<1x256xf32>
    %416 = tpu.matmul %413, %415, %cst_226 {dimension_numbers = #tpu.dot_dimension_numbers<[1], [0], [0], [1], [0, 0, 1, 1], [], []>} : vector<1x64xf32>, vector<64x256xf32>, vector<1x256xf32> -> vector<1x256xf32>
    %417 = arith.addf %412, %416 : vector<1x256xf32>
    %418 = vector.broadcast %373 : vector<1x1xf32> to vector<1x256xf32>
    %419 = arith.addf %417, %418 : vector<1x256xf32>
    %cst_227 = arith.constant 5.000000e-01 : f32
    %420 = vector.broadcast %cst_227 : f32 to vector<1x256xf32>
    %421 = arith.mulf %420, %419 : vector<1x256xf32>
    %422 = math.tanh %421 : vector<1x256xf32>
    %cst_228 = arith.constant 1.000000e+00 : f32
    %423 = vector.broadcast %cst_228 : f32 to vector<1x256xf32>
    %424 = arith.addf %422, %423 : vector<1x256xf32>
    %cst_229 = arith.constant 5.000000e-01 : f32
    %425 = vector.broadcast %cst_229 : f32 to vector<1x256xf32>
    %426 = arith.mulf %425, %424 : vector<1x256xf32>
    %c0_230 = arith.constant 0 : index
    %c0_231 = arith.constant 0 : index
    %427 = vector.load %arg24[%c0_230, %c0_231] : memref<2x256xf32, #tpu.memory_space<vmem>>, vector<1x256xf32>
    tpu.vector_store %arg24[%c0_230, %c0_231], %426 {strides = array<i32>} : memref<2x256xf32, #tpu.memory_space<vmem>>, vector<1x256xf32>,
    %428 = vector.extract_strided_slice %372 {offsets = [0, 64], sizes = [1, 64], strides = [1, 1]} : vector<9x128xf32> to vector<1x64xf32>
    %c0_232 = arith.constant 0 : index
    %c0_233 = arith.constant 0 : index
    %429 = vector.load %arg21[%c0_232, %c0_233] : memref<64x2304xbf16, #tpu.memory_space<vmem>>, vector<64x256xbf16>
    %430 = arith.extf %429 : vector<64x256xbf16> to vector<64x256xf32>
    %cst_234 = arith.constant dense<0.000000e+00> : vector<1x256xf32>
    %431 = tpu.matmul %428, %430, %cst_234 {dimension_numbers = #tpu.dot_dimension_numbers<[1], [0], [0], [1], [0, 0, 1, 1], [], []>} : vector<1x64xf32>, vector<64x256xf32>, vector<1x256xf32> -> vector<1x256xf32>
    %432 = vector.extract_strided_slice %372 {offsets = [1, 64], sizes = [1, 64], strides = [1, 1]} : vector<9x128xf32> to vector<1x64xf32>
    %c0_235 = arith.constant 0 : index
    %c256_236 = arith.constant 256 : index
    %433 = vector.load %arg21[%c0_235, %c256_236] : memref<64x2304xbf16, #tpu.memory_space<vmem>>, vector<64x256xbf16>
    %434 = arith.extf %433 : vector<64x256xbf16> to vector<64x256xf32>
    %cst_237 = arith.constant dense<0.000000e+00> : vector<1x256xf32>
    %435 = tpu.matmul %432, %434, %cst_237 {dimension_numbers = #tpu.dot_dimension_numbers<[1], [0], [0], [1], [0, 0, 1, 1], [], []>} : vector<1x64xf32>, vector<64x256xf32>, vector<1x256xf32> -> vector<1x256xf32>
    %436 = arith.addf %431, %435 : vector<1x256xf32>
    %437 = vector.extract_strided_slice %372 {offsets = [2, 64], sizes = [1, 64], strides = [1, 1]} : vector<9x128xf32> to vector<1x64xf32>
    %c0_238 = arith.constant 0 : index
    %c512_239 = arith.constant 512 : index
    %438 = vector.load %arg21[%c0_238, %c512_239] : memref<64x2304xbf16, #tpu.memory_space<vmem>>, vector<64x256xbf16>
    %439 = arith.extf %438 : vector<64x256xbf16> to vector<64x256xf32>
    %cst_240 = arith.constant dense<0.000000e+00> : vector<1x256xf32>
    %440 = tpu.matmul %437, %439, %cst_240 {dimension_numbers = #tpu.dot_dimension_numbers<[1], [0], [0], [1], [0, 0, 1, 1], [], []>} : vector<1x64xf32>, vector<64x256xf32>, vector<1x256xf32> -> vector<1x256xf32>
    %441 = arith.addf %436, %440 : vector<1x256xf32>
    %442 = vector.extract_strided_slice %372 {offsets = [3, 64], sizes = [1, 64], strides = [1, 1]} : vector<9x128xf32> to vector<1x64xf32>
    %c0_241 = arith.constant 0 : index
    %c768_242 = arith.constant 768 : index
    %443 = vector.load %arg21[%c0_241, %c768_242] : memref<64x2304xbf16, #tpu.memory_space<vmem>>, vector<64x256xbf16>
    %444 = arith.extf %443 : vector<64x256xbf16> to vector<64x256xf32>
    %cst_243 = arith.constant dense<0.000000e+00> : vector<1x256xf32>
    %445 = tpu.matmul %442, %444, %cst_243 {dimension_numbers = #tpu.dot_dimension_numbers<[1], [0], [0], [1], [0, 0, 1, 1], [], []>} : vector<1x64xf32>, vector<64x256xf32>, vector<1x256xf32> -> vector<1x256xf32>
    %446 = arith.addf %441, %445 : vector<1x256xf32>
    %447 = vector.extract_strided_slice %372 {offsets = [4, 64], sizes = [1, 64], strides = [1, 1]} : vector<9x128xf32> to vector<1x64xf32>
    %c0_244 = arith.constant 0 : index
    %c1024_245 = arith.constant 1024 : index
    %448 = vector.load %arg21[%c0_244, %c1024_245] : memref<64x2304xbf16, #tpu.memory_space<vmem>>, vector<64x256xbf16>
    %449 = arith.extf %448 : vector<64x256xbf16> to vector<64x256xf32>
    %cst_246 = arith.constant dense<0.000000e+00> : vector<1x256xf32>
    %450 = tpu.matmul %447, %449, %cst_246 {dimension_numbers = #tpu.dot_dimension_numbers<[1], [0], [0], [1], [0, 0, 1, 1], [], []>} : vector<1x64xf32>, vector<64x256xf32>, vector<1x256xf32> -> vector<1x256xf32>
    %451 = arith.addf %446, %450 : vector<1x256xf32>
    %452 = vector.extract_strided_slice %372 {offsets = [5, 64], sizes = [1, 64], strides = [1, 1]} : vector<9x128xf32> to vector<1x64xf32>
    %c0_247 = arith.constant 0 : index
    %c1280_248 = arith.constant 1280 : index
    %453 = vector.load %arg21[%c0_247, %c1280_248] : memref<64x2304xbf16, #tpu.memory_space<vmem>>, vector<64x256xbf16>
    %454 = arith.extf %453 : vector<64x256xbf16> to vector<64x256xf32>
    %cst_249 = arith.constant dense<0.000000e+00> : vector<1x256xf32>
    %455 = tpu.matmul %452, %454, %cst_249 {dimension_numbers = #tpu.dot_dimension_numbers<[1], [0], [0], [1], [0, 0, 1, 1], [], []>} : vector<1x64xf32>, vector<64x256xf32>, vector<1x256xf32> -> vector<1x256xf32>
    %456 = arith.addf %451, %455 : vector<1x256xf32>
    %457 = vector.extract_strided_slice %372 {offsets = [6, 64], sizes = [1, 64], strides = [1, 1]} : vector<9x128xf32> to vector<1x64xf32>
    %c0_250 = arith.constant 0 : index
    %c1536_251 = arith.constant 1536 : index
    %458 = vector.load %arg21[%c0_250, %c1536_251] : memref<64x2304xbf16, #tpu.memory_space<vmem>>, vector<64x256xbf16>
    %459 = arith.extf %458 : vector<64x256xbf16> to vector<64x256xf32>
    %cst_252 = arith.constant dense<0.000000e+00> : vector<1x256xf32>
    %460 = tpu.matmul %457, %459, %cst_252 {dimension_numbers = #tpu.dot_dimension_numbers<[1], [0], [0], [1], [0, 0, 1, 1], [], []>} : vector<1x64xf32>, vector<64x256xf32>, vector<1x256xf32> -> vector<1x256xf32>
    %461 = arith.addf %456, %460 : vector<1x256xf32>
    %462 = vector.extract_strided_slice %372 {offsets = [7, 64], sizes = [1, 64], strides = [1, 1]} : vector<9x128xf32> to vector<1x64xf32>
    %c0_253 = arith.constant 0 : index
    %c1792_254 = arith.constant 1792 : index
    %463 = vector.load %arg21[%c0_253, %c1792_254] : memref<64x2304xbf16, #tpu.memory_space<vmem>>, vector<64x256xbf16>
    %464 = arith.extf %463 : vector<64x256xbf16> to vector<64x256xf32>
    %cst_255 = arith.constant dense<0.000000e+00> : vector<1x256xf32>
    %465 = tpu.matmul %462, %464, %cst_255 {dimension_numbers = #tpu.dot_dimension_numbers<[1], [0], [0], [1], [0, 0, 1, 1], [], []>} : vector<1x64xf32>, vector<64x256xf32>, vector<1x256xf32> -> vector<1x256xf32>
    %466 = arith.addf %461, %465 : vector<1x256xf32>
    %467 = vector.extract_strided_slice %372 {offsets = [8, 64], sizes = [1, 64], strides = [1, 1]} : vector<9x128xf32> to vector<1x64xf32>
    %c0_256 = arith.constant 0 : index
    %c2048_257 = arith.constant 2048 : index
    %468 = vector.load %arg21[%c0_256, %c2048_257] : memref<64x2304xbf16, #tpu.memory_space<vmem>>, vector<64x256xbf16>
    %469 = arith.extf %468 : vector<64x256xbf16> to vector<64x256xf32>
    %cst_258 = arith.constant dense<0.000000e+00> : vector<1x256xf32>
    %470 = tpu.matmul %467, %469, %cst_258 {dimension_numbers = #tpu.dot_dimension_numbers<[1], [0], [0], [1], [0, 0, 1, 1], [], []>} : vector<1x64xf32>, vector<64x256xf32>, vector<1x256xf32> -> vector<1x256xf32>
    %471 = arith.addf %466, %470 : vector<1x256xf32>
    %472 = vector.broadcast %373 : vector<1x1xf32> to vector<1x256xf32>
    %473 = arith.addf %471, %472 : vector<1x256xf32>
    %cst_259 = arith.constant 5.000000e-01 : f32
    %474 = vector.broadcast %cst_259 : f32 to vector<1x256xf32>
    %475 = arith.mulf %474, %473 : vector<1x256xf32>
    %476 = math.tanh %475 : vector<1x256xf32>
    %cst_260 = arith.constant 1.000000e+00 : f32
    %477 = vector.broadcast %cst_260 : f32 to vector<1x256xf32>
    %478 = arith.addf %476, %477 : vector<1x256xf32>
    %cst_261 = arith.constant 5.000000e-01 : f32
    %479 = vector.broadcast %cst_261 : f32 to vector<1x256xf32>
    %480 = arith.mulf %479, %478 : vector<1x256xf32>
    %c1_262 = arith.constant 1 : index
    %c0_263 = arith.constant 0 : index
    %481 = vector.load %arg24[%c1_262, %c0_263] : memref<2x256xf32, #tpu.memory_space<vmem>>, vector<1x256xf32>
    tpu.vector_store %arg24[%c1_262, %c0_263], %480 {strides = array<i32>} : memref<2x256xf32, #tpu.memory_space<vmem>>, vector<1x256xf32>,
    return
  }
}

</mosaic_0001>

<bundles_post_ra>
// kernel: vae_forward.1
= control target key start
LH: loop header
LB: loop body
LE: loop exit
PB: predicated region body
PF: predicated region fallthrough
CT: control target
= control target key end

     0   :  { %s20325_s0 = inlined_call_operand.vmem [shape: f32[2,256], index: 0, kind: input, shape index: {}]   ;;  %s20326_s1 = inlined_call_operand.vmem [shape: f32[2,32], index: 1, kind: input, shape index: {}]   ;;  %s20327_s2 = inlined_call_operand.vmem [shape: bf16[256,576], index: 2, kind: input, shape index: {}]   ;;  %s20328_s3 = inlined_call_operand.vmem [shape: f32[32,9], index: 3, kind: input, shape index: {}]   ;;  %s20329_s4 = inlined_call_operand.vmem [shape: f32[32,1], index: 4, kind: input, shape index: {}]   ;;  %s20330_s5 = inlined_call_operand.vmem [shape: bf16[128,288], index: 5, kind: input, shape index: {}]   ;;  %s20331_s6 = inlined_call_operand.vmem [shape: f32[64,288], index: 6, kind: input, shape index: {}]   ;;  %s20332_s7 = inlined_call_operand.vmem [shape: f32[64,1], index: 7, kind: input, shape index: {}]   ;;  %s20333_s8 = inlined_call_operand.vmem [shape: bf16[32,72], index: 8, kind: input, shape index: {}]   ;;  %s20334_s9 = inlined_call_operand.vmem [shape: f32[128,576], index: 9, kind: input, shape index: {}]   ;;  %s20335_s10 = inlined_call_operand.vmem [shape: f32[128,1], index: 10, kind: input, shape index: {}]   ;;  %s20336_s11 = inlined_call_operand.vmem [shape: f32[128,256], index: 11, kind: input, shape index: {}]   ;;  %s20337_s12 = inlined_call_operand.vmem [shape: f32[1,64], index: 12, kind: input, shape index: {}]   ;;  %s20338_s13 = inlined_call_operand.vmem [shape: f32[512,32], index: 13, kind: input, shape index: {}]   ;;  %s20339_s14 = inlined_call_operand.vmem [shape: f32[128,8], index: 14, kind: input, shape index: {}]   ;;  %s20340_s15 = inlined_call_operand.vmem [shape: bf16[8,288], index: 15, kind: input, shape index: {}]   ;;  %s20341_s16 = inlined_call_operand.vmem [shape: f32[576,128], index: 16, kind: input, shape index: {}]   ;;  %s20342_s17 = inlined_call_operand.vmem [shape: f32[64,1], index: 17, kind: input, shape index: {}]   ;;  %s20343_s18 = inlined_call_operand.vmem [shape: bf16[32,1152], index: 18, kind: input, shape index: {}]   ;;  %s20344_s19 = inlined_call_operand.vmem [shape: f32[288,64], index: 19, kind: input, shape index: {}]   ;;  %s20345_s20 = inlined_call_operand.vmem [shape: f32[32,1], index: 20, kind: input, shape index: {}]   ;;  %s20346_s21 = inlined_call_operand.vmem [shape: bf16[64,2304], index: 21, kind: input, shape index: {}]   ;;  %s20347_s22 = inlined_call_operand.vmem [shape: f32[9,32], index: 22, kind: input, shape index: {}]   ;;  %s20348_s23 = inlined_call_operand.<no memory space> [shape: f32[1,1], index: 23, kind: input, shape index: {}]   ;;  %s20349_s24 = inlined_call_operand.vmem [shape: f32[2,256], index: 24, kind: output, shape index: {0}]   ;;  %s20350_s25 = inlined_call_operand.hbm [shape: f32[2,32], index: 25, kind: output, shape index: {1}]   ;;  %s20351_s26 = inlined_call_operand.hbm [shape: f32[2,32], index: 26, kind: output, shape index: {2}]  }
   0x1   :  { %20539 = sst [smem:[#allocation35_spill]] %s20325_s0  ;;  %v32_v0 = vstv %s20348_s23 }
   0x2   :  { %20540 = sst [smem:[#allocation36_spill]] %s20326_s1  ;;  %33 = vst [vmem:[#allocation4] sm:$0x1] %v32_v0 }
   0x3   :  { %20541 = sst [smem:[#allocation37_spill]] %s20327_s2 }
   0x4   :  { %20542 = sst [smem:[#allocation38_spill]] %s20328_s3 }
   0x5   :  { %20543 = sst [smem:[#allocation39_spill]] %s20329_s4 }
   0x6   :  { %20544 = sst [smem:[#allocation40_spill]] %s20330_s5 }
   0x7   :  { %20545 = sst [smem:[#allocation41_spill]] %s20331_s6 }
   0x8   :  { %20546 = sst [smem:[#allocation42_spill]] %s20332_s7 }
   0x9   :  { %20547 = sst [smem:[#allocation43_spill]] %s20333_s8 }
   0xa   :  { %20548 = sst [smem:[#allocation44_spill]] %s20334_s9 }
   0xb   :  { %20549 = sst [smem:[#allocation45_spill]] %s20335_s10 }
   0xc   :  { %34 = vsyncpa [#allocation6], 0  ;;  %s20550_s8 = sld [smem:[#allocation38_spill]]  ;;  %v14528_v4 = vmov 3   ;;  %v14529_v25 = vmov 1   ;;  %v14530_v41 = vmov 5  }
   0xd   :  { %s20551_s0 = sld [smem:[#allocation37_spill]]  ;;  %14414 = vset.pattern.permute.xlu1 %v14528_v4  ;;  %14416 = vset.pattern.permute.xlu0 %v14528_v4 }
  0x12   :  { %v14697_v1 = vld [vmem:[%s20550_s8] sm:$0xff]  ;;  %v14729_v19 = vld [vmem:[%s20550_s8 + $0x10] sm:$0xff]  ;;  %v14768_v52 = vld [vmem:[%s20550_s8 + $0x18] sm:$0xff] }
  0x13   :  { %v130_v2 = vld [vmem:[%s20551_s0 + $0x12c] sm:$0xff]  ;;  %v131_v3 = vld [vmem:[%s20551_s0 + $0x134] sm:$0xff]  ;;  %v128_v10 = vld [vmem:[%s20551_s0 + $0x120] sm:$0xff]  ;;  %1006 = vperm.xlu1 %14414, %v14697_v1  }
  0x14   :  { %v257_v5 = vunpack.c.h.bf16 %v130_v2  ;;  %v259_v6 = vunpack.c.h.bf16 %v131_v3  ;;  %v256_v7 = vunpack.c.l.bf16 %v130_v2  ;;  %v258_v8 = vunpack.c.l.bf16 %v131_v3  ;;  %v127_v9 = vld [vmem:[%s20551_s0 + $0x118] sm:$0xff]  ;;  %v124_v14 = vld [vmem:[%s20551_s0 + $0x104] sm:$0xff]  ;;  %v125_v15 = vld [vmem:[%s20551_s0 + $0x10c] sm:$0xff] }
  0x15   :  { %v252_v11 = vunpack.c.h.bf16 %v127_v9  ;;  %v254_v12 = vunpack.c.h.bf16 %v128_v10  ;;  %v251_v13 = vunpack.c.l.bf16 %v127_v9  ;;  %v253_v16 = vunpack.c.l.bf16 %v128_v10  ;;  %v121_v17 = vld [vmem:[%s20551_s0 + $0xf0] sm:$0xff]  ;;  %v122_v18 = vld [vmem:[%s20551_s0 + $0xf8] sm:$0xff]  ;;  %v119_v28 = vld [vmem:[%s20551_s0 + $0xe4] sm:$0xff] }
  0x16   :  { %352 = vmatprep.subr.mxu0 %v257_v5  ;;  %423 = vmatprep.subr.mxu1 %v259_v6  ;;  %v247_v20 = vunpack.c.h.bf16 %v124_v14  ;;  %v249_v21 = vunpack.c.h.bf16 %v125_v15  ;;  %v246_v22 = vunpack.c.l.bf16 %v124_v14  ;;  %v248_v23 = vunpack.c.l.bf16 %v125_v15  ;;  %v118_v24 = vld [vmem:[%s20551_s0 + $0xdc] sm:$0xff]  ;;  %v115_v32 = vld [vmem:[%s20551_s0 + $0xc8] sm:$0xff]  ;;  %v116_v33 = vld [vmem:[%s20551_s0 + $0xd0] sm:$0xff] }
  0x17   :  { %353 = vmatpush1.msra.mxu0 %v256_v7  ;;  %424 = vmatpush1.msra.mxu1 %v258_v8  ;;  %v242_v26 = vunpack.c.h.bf16 %v121_v17  ;;  %v244_v27 = vunpack.c.h.bf16 %v122_v18  ;;  %v241_v29 = vunpack.c.l.bf16 %v121_v17  ;;  %v243_v30 = vunpack.c.l.bf16 %v122_v18  ;;  %v112_v37 = vld [vmem:[%s20551_s0 + $0xb4] sm:$0xff]  ;;  %v113_v38 = vld [vmem:[%s20551_s0 + $0xbc] sm:$0xff]  ;;  %v110_v47 = vld [vmem:[%s20551_s0 + $0xa8] sm:$0xff] }
  0x18   :  { %354 = vmatprep.subr.mxu0 %v252_v11  ;;  %425 = vmatprep.subr.mxu1 %v254_v12  ;;  %v237_v31 = vunpack.c.h.bf16 %v118_v24  ;;  %v239_v34 = vunpack.c.h.bf16 %v119_v28  ;;  %v236_v35 = vunpack.c.l.bf16 %v118_v24  ;;  %v238_v36 = vunpack.c.l.bf16 %v119_v28  ;;  %v109_v46 = vld [vmem:[%s20551_s0 + $0xa0] sm:$0xff]  ;;  %v106_v50 = vld [vmem:[%s20551_s0 + $0x8c] sm:$0xff]  ;;  %v107_v51 = vld [vmem:[%s20551_s0 + $0x94] sm:$0xff] }
  0x19   :  { %14415 = vset.pattern.permute.xlu1 %v14529_v25  ;;  %355 = vmatpush1.msra.mxu0 %v251_v13  ;;  %v232_v39 = vunpack.c.h.bf16 %v115_v32  ;;  %v234_v40 = vunpack.c.h.bf16 %v116_v33  ;;  %v231_v42 = vunpack.c.l.bf16 %v115_v32  ;;  %v233_v43 = vunpack.c.l.bf16 %v116_v33  ;;  %v103_v57 = vld [vmem:[%s20551_s0 + $0x78] sm:$0xff]  ;;  %v104_v60 = vld [vmem:[%s20551_s0 + $0x80] sm:$0xff]  ;;  %v101_v2 = vld [vmem:[%s20551_s0 + $0x6c] sm:$0xff] }
  0x1a   :  { %426 = vmatpush1.msra.mxu1 %v253_v16  ;;  %946 = vperm.xlu1 %14415, %v14729_v19   ;;  %v227_v44 = vunpack.c.h.bf16 %v112_v37  ;;  %v229_v45 = vunpack.c.h.bf16 %v113_v38  ;;  %v226_v48 = vunpack.c.l.bf16 %v112_v37  ;;  %v228_v49 = vunpack.c.l.bf16 %v113_v38  ;;  %v100_v0 = vld [vmem:[%s20551_s0 + $0x64] sm:$0xff]  ;;  %v97_v8 = vld [vmem:[%s20551_s0 + $0x50] sm:$0xff]  ;;  %v98_v9 = vld [vmem:[%s20551_s0 + $0x58] sm:$0xff] }
  0x1b   :  { %356 = vmatprep.subr.mxu0 %v247_v20  ;;  %427 = vmatprep.subr.mxu1 %v249_v21  ;;  %v222_v53 = vunpack.c.h.bf16 %v109_v46  ;;  %v224_v54 = vunpack.c.h.bf16 %v110_v47  ;;  %v221_v55 = vunpack.c.l.bf16 %v109_v46  ;;  %v223_v56 = vunpack.c.l.bf16 %v110_v47  ;;  %v14787_v5 = vld [vmem:[%s20550_s8 + $0x8] sm:$0xff]  ;;  %v94_v16 = vld [vmem:[%s20551_s0 + $0x3c] sm:$0xff]  ;;  %v88_v28 = vld [vmem:[%s20551_s0 + $0x14] sm:$0xff] }
  0x1c   :  { %357 = vmatpush1.msra.mxu0 %v246_v22  ;;  %428 = vmatpush1.msra.mxu1 %v248_v23  ;;  %v217_v58 = vunpack.c.h.bf16 %v106_v50  ;;  %v219_v59 = vunpack.c.h.bf16 %v107_v51  ;;  %v216_v61 = vunpack.c.l.bf16 %v106_v50  ;;  %v218_v62 = vunpack.c.l.bf16 %v107_v51  ;;  %v95_v17 = vld [vmem:[%s20551_s0 + $0x44] sm:$0xff]  ;;  %v92_v22 = vld [vmem:[%s20551_s0 + $0x30] sm:$0xff] }
  0x1d   :  { %358 = vmatprep.subr.mxu0 %v242_v26  ;;  %429 = vmatprep.subr.mxu1 %v244_v27  ;;  %v212_v63 = vunpack.c.h.bf16 %v103_v57  ;;  %v214_v3 = vunpack.c.h.bf16 %v104_v60  ;;  %v211_v6 = vunpack.c.l.bf16 %v103_v57  ;;  %v213_v7 = vunpack.c.l.bf16 %v104_v60  ;;  %v91_v21 = vld [vmem:[%s20551_s0 + $0x28] sm:$0xff] }
  0x1e   :  { %359 = vmatpush1.msra.mxu0 %v241_v29  ;;  %430 = vmatpush1.msra.mxu1 %v243_v30  ;;  %v207_v10 = vunpack.c.h.bf16 %v100_v0  ;;  %v209_v11 = vunpack.c.h.bf16 %v101_v2  ;;  %v206_v12 = vunpack.c.l.bf16 %v100_v0  ;;  %v208_v13 = vunpack.c.l.bf16 %v101_v2 }
  0x1f   :  { %14417 = vset.pattern.permute.xlu1 %v14530_v41  ;;  %360 = vmatprep.subr.mxu0 %v237_v31  ;;  %v202_v14 = vunpack.c.h.bf16 %v97_v8  ;;  %v204_v15 = vunpack.c.h.bf16 %v98_v9  ;;  %v201_v18 = vunpack.c.l.bf16 %v97_v8  ;;  %v203_v20 = vunpack.c.l.bf16 %v98_v9 }
  0x20   :  { %431 = vmatprep.subr.mxu1 %v239_v34  ;;  %1074 = vperm.xlu1 %14417, %v14697_v1   ;;  %v197_v23 = vunpack.c.h.bf16 %v94_v16  ;;  %v199_v24 = vunpack.c.h.bf16 %v95_v17  ;;  %v196_v26 = vunpack.c.l.bf16 %v94_v16  ;;  %v198_v27 = vunpack.c.l.bf16 %v95_v17 }
  0x21   :  { %361 = vmatpush1.msra.mxu0 %v236_v35  ;;  %432 = vmatpush1.msra.mxu1 %v238_v36 }
  0x22   :  { %362 = vmatprep.subr.mxu0 %v232_v39  ;;  %433 = vmatprep.subr.mxu1 %v234_v40 }
  0x23   :  { %363 = vmatpush1.msra.mxu0 %v231_v42  ;;  %434 = vmatpush1.msra.mxu1 %v233_v43 }
  0x24   :  { %364 = vmatprep.subr.mxu0 %v227_v44  ;;  %435 = vmatprep.subr.mxu1 %v229_v45 }
  0x25   :  { %14418 = vset.pattern.permute.xlu1 %v14529_v25  ;;  %365 = vmatpush1.msra.mxu0 %v226_v48 }
  0x26   :  { %436 = vmatpush1.msra.mxu1 %v228_v49  ;;  %950 = vperm.xlu1 %14418, %v14768_v52  }
  0x27   :  { %366 = vmatprep.subr.mxu0 %v222_v53  ;;  %437 = vmatprep.subr.mxu1 %v224_v54 }
  0x28   :  { %367 = vmatpush1.msra.mxu0 %v221_v55  ;;  %438 = vmatpush1.msra.mxu1 %v223_v56 }
  0x29   :  { %368 = vmatprep.subr.mxu0 %v217_v58  ;;  %439 = vmatprep.subr.mxu1 %v219_v59 }
  0x2a   :  { %369 = vmatpush1.msra.mxu0 %v216_v61  ;;  %440 = vmatpush1.msra.mxu1 %v218_v62 }
  0x2b   :  { %14420 = vset.pattern.permute.xlu1 %v14530_v41  ;;  %370 = vmatprep.subr.mxu0 %v212_v63 }
  0x2c   :  { %441 = vmatprep.subr.mxu1 %v214_v3  ;;  %1078 = vperm.xlu1 %14420, %v14787_v5  }
  0x2d   :  { %371 = vmatpush1.msra.mxu0 %v211_v6  ;;  %442 = vmatpush1.msra.mxu1 %v213_v7 }
  0x2e   :  { %372 = vmatprep.subr.mxu0 %v207_v10  ;;  %443 = vmatprep.subr.mxu1 %v209_v11 }
  0x2f   :  { %373 = vmatpush1.msra.mxu0 %v206_v12  ;;  %444 = vmatpush1.msra.mxu1 %v208_v13 }
  0x30   :  { %374 = vmatprep.subr.mxu0 %v202_v14  ;;  %445 = vmatprep.subr.mxu1 %v204_v15 }
  0x31   :  { %35 = vsyncpa [#allocation8], 0  ;;  %14421 = vset.pattern.permute.xlu1 %v14528_v4  ;;  %375 = vmatpush1.msra.mxu0 %v201_v18  ;;  %v192_v29 = vunpack.c.h.bf16 %v91_v21  ;;  %v194_v30 = vunpack.c.h.bf16 %v92_v22  ;;  %v89_v31 = vld [vmem:[%s20551_s0 + $0x1c] sm:$0xff]  ;;  %v191_v32 = vunpack.c.l.bf16 %v91_v21  ;;  %v193_v33 = vunpack.c.l.bf16 %v92_v22  ;;  %v86_v36 = vld [vmem:[%s20551_s0 + $0x8] sm:$0xff]  ;;  %s20552_s27 = sld [smem:[#allocation35_spill]]  ;;  %s14537_s1 = smov 64  }
  0x32   :  { %446 = vmatpush1.msra.mxu1 %v203_v20  ;;  %1018 = vperm.xlu1 %14421, %v14768_v52   ;;  %v187_v34 = vunpack.c.h.bf16 %v88_v28  ;;  %v85_v35 = vld [vmem:[%s20551_s0] sm:$0xff]  ;;  %v189_v37 = vunpack.c.h.bf16 %v89_v31  ;;  %v186_v38 = vunpack.c.l.bf16 %v88_v28  ;;  %v188_v39 = vunpack.c.l.bf16 %v89_v31  ;;  %v178_v40 = vld [vmem:[%s20551_s0 + $0x26c] sm:$0xff]  ;;  %v179_v42 = vld [vmem:[%s20551_s0 + $0x274] sm:$0xff]  ;;  %s20553_s9 = sld [smem:[#allocation39_spill]]  ;;  %s14539_s7 = smov 96  }
  0x33   :  { %376 = vmatprep.subr.mxu0 %v197_v23  ;;  %447 = vmatprep.subr.mxu1 %v199_v24  ;;  %v182_v43 = vunpack.c.h.bf16 %v85_v35  ;;  %v184_v44 = vunpack.c.h.bf16 %v86_v36  ;;  %v181_v45 = vunpack.c.l.bf16 %v85_v35  ;;  %v183_v46 = vunpack.c.l.bf16 %v86_v36  ;;  %v175_v47 = vld [vmem:[%s20551_s0 + $0x258] sm:$0xff]  ;;  %v176_v50 = vld [vmem:[%s20551_s0 + $0x260] sm:$0xff]  ;;  %v173_v56 = vld [vmem:[%s20551_s0 + $0x24c] sm:$0xff]  ;;  %s20556_s23 = sld [smem:[#allocation40_spill]]  ;;  %s14540_s4 = smov 32  }
  0x34   :  { %377 = vmatpush1.msra.mxu0 %v196_v26  ;;  %448 = vmatpush1.msra.mxu1 %v198_v27  ;;  %v337_v48 = vunpack.c.h.bf16 %v178_v40  ;;  %v339_v49 = vunpack.c.h.bf16 %v179_v42  ;;  %v336_v51 = vunpack.c.l.bf16 %v178_v40  ;;  %v172_v53 = vld [vmem:[%s20551_s0 + $0x244] sm:$0xff]  ;;  %v338_v54 = vunpack.c.l.bf16 %v179_v42  ;;  %v169_v61 = vld [vmem:[%s20551_s0 + $0x230] sm:$0xff]  ;;  %v170_v63 = vld [vmem:[%s20551_s0 + $0x238] sm:$0xff]  ;;  %s20557_s3 = sld [smem:[#allocation41_spill]]  ;;  %s14542_s10 = smov 120  }
  0x35   :  { %378 = vmatprep.subr.mxu0 %v192_v29  ;;  %449 = vmatprep.subr.mxu1 %v194_v30  ;;  %v332_v55 = vunpack.c.h.bf16 %v175_v47  ;;  %v334_v57 = vunpack.c.h.bf16 %v176_v50  ;;  %v331_v58 = vunpack.c.l.bf16 %v175_v47  ;;  %v333_v59 = vunpack.c.l.bf16 %v176_v50  ;;  %v166_v3 = vld [vmem:[%s20551_s0 + $0x21c] sm:$0xff]  ;;  %v167_v7 = vld [vmem:[%s20551_s0 + $0x224] sm:$0xff]  ;;  %v164_v14 = vld [vmem:[%s20551_s0 + $0x210] sm:$0xff]  ;;  %s20558_s5 = sld [smem:[#allocation42_spill]]  ;;  %s14544_s2 = smov 88  }
  0x36   :  { %379 = vmatpush1.msra.mxu0 %v191_v32  ;;  %450 = vmatpush1.msra.mxu1 %v193_v33  ;;  %v327_v60 = vunpack.c.h.bf16 %v172_v53  ;;  %v329_v62 = vunpack.c.h.bf16 %v173_v56  ;;  %v326_v0 = vunpack.c.l.bf16 %v172_v53  ;;  %v328_v2 = vunpack.c.l.bf16 %v173_v56  ;;  %v163_v13 = vld [vmem:[%s20551_s0 + $0x208] sm:$0xff]  ;;  %v160_v21 = vld [vmem:[%s20551_s0 + $0x1f4] sm:$0xff]  ;;  %v161_v22 = vld [vmem:[%s20551_s0 + $0x1fc] sm:$0xff]  ;;  %s20560_s6 = sld [smem:[#allocation44_spill]] }
  0x37   :  { %14422 = vset.pattern.permute.xlu1 %v14530_v41  ;;  %380 = vmatprep.subr.mxu0 %v187_v34  ;;  %v322_v6 = vunpack.c.h.bf16 %v169_v61  ;;  %v324_v8 = vunpack.c.h.bf16 %v170_v63  ;;  %v321_v9 = vunpack.c.l.bf16 %v169_v61  ;;  %v14531_v10 = vmov 7   ;;  %v157_v26 = vld [vmem:[%s20551_s0 + $0x1e0] sm:$0xff]  ;;  %v158_v27 = vld [vmem:[%s20551_s0 + $0x1e8] sm:$0xff] }
  0x38   :  { %451 = vmatprep.subr.mxu1 %v189_v37  ;;  %1082 = vperm.xlu1 %14422, %v14729_v19   ;;  %v323_v11 = vunpack.c.l.bf16 %v170_v63  ;;  %v317_v12 = vunpack.c.h.bf16 %v166_v3  ;;  %v319_v15 = vunpack.c.h.bf16 %v167_v7  ;;  %v316_v16 = vunpack.c.l.bf16 %v166_v3  ;;  %v154_v35 = vld [vmem:[%s20551_s0 + $0x1cc] sm:$0xff]  ;;  %v155_v37 = vld [vmem:[%s20551_s0 + $0x1d4] sm:$0xff]  ;;  %v152_v42 = vld [vmem:[%s20551_s0 + $0x1c0] sm:$0xff] }
  0x39   :  { %381 = vmatpush1.msra.mxu0 %v186_v38  ;;  %452 = vmatpush1.msra.mxu1 %v188_v39  ;;  %v318_v17 = vunpack.c.l.bf16 %v167_v7  ;;  %v312_v18 = vunpack.c.h.bf16 %v163_v13  ;;  %v314_v20 = vunpack.c.h.bf16 %v164_v14  ;;  %v311_v23 = vunpack.c.l.bf16 %v163_v13  ;;  %v151_v39 = vld [vmem:[%s20551_s0 + $0x1b8] sm:$0xff]  ;;  %v140_v7 = vld [vmem:[%s20551_s0 + $0x170] sm:$0xff] }
  0x3a   :  { %382 = vmatprep.subr.mxu0 %v182_v43  ;;  %453 = vmatprep.subr.mxu1 %v184_v44  ;;  %v313_v24 = vunpack.c.l.bf16 %v164_v14  ;;  %v14532_v28 = vmov 0   ;;  %v307_v29 = vunpack.c.h.bf16 %v160_v21  ;;  %v309_v30 = vunpack.c.h.bf16 %v161_v22 }
  0x3b   :  { %383 = vmatpush1.msra.mxu0 %v181_v45  ;;  %454 = vmatpush1.msra.mxu1 %v183_v46  ;;  %v306_v31 = vunpack.c.l.bf16 %v160_v21  ;;  %v308_v32 = vunpack.c.l.bf16 %v161_v22  ;;  %v302_v33 = vunpack.c.h.bf16 %v157_v26  ;;  %v304_v34 = vunpack.c.h.bf16 %v158_v27  ;;  %v134_v21 = vld [vmem:[%s20551_s0 + $0x148] sm:$0xff] }
  0x3c   :  { %384 = vmatprep.subr.mxu0 %v337_v48  ;;  %455 = vmatprep.subr.mxu1 %v339_v49  ;;  %v301_v36 = vunpack.c.l.bf16 %v157_v26  ;;  %v303_v38 = vunpack.c.l.bf16 %v158_v27  ;;  %v297_v40 = vunpack.c.h.bf16 %v154_v35  ;;  %v299_v43 = vunpack.c.h.bf16 %v155_v37  ;;  %v148_v48 = vld [vmem:[%s20551_s0 + $0x1a4] sm:$0xff] }
  0x3d   :  { %1086 = vperm.xlu1 %14422, %v14768_v52   ;;  %385 = vmatpush2.msra.mxu0 %v336_v51  ;;  %v296_v44 = vunpack.c.l.bf16 %v154_v35  ;;  %v14533_v45 = vmov 2   ;;  %v298_v46 = vunpack.c.l.bf16 %v155_v37  ;;  %v292_v47 = vunpack.c.h.bf16 %v151_v39  ;;  %v149_v51 = vld [vmem:[%s20551_s0 + $0x1ac] sm:$0xff]  ;;  %v174_v37 = vld [vmem:[%s20551_s0 + $0x240] ss:$20 sps:$4 sm:$0xff]  }
  0x3e   :  { %456 = vmatpush2.msra.mxu1 %v338_v54  ;;  %386 = vmatprep.subr.mxu0 %v332_v55  ;;  %v294_v49 = vunpack.c.h.bf16 %v152_v42  ;;  %v291_v50 = vunpack.c.l.bf16 %v151_v39  ;;  %v293_v53 = vunpack.c.l.bf16 %v152_v42  ;;  %v287_v54 = vunpack.c.h.bf16 %v148_v48  ;;  %v145_v55 = vld [vmem:[%s20551_s0 + $0x190] sm:$0xff] }
  0x3f   :  { %457 = vmatprep.subr.mxu1 %v334_v57  ;;  %387 = vmatpush2.msra.mxu0 %v331_v58  ;;  %v289_v56 = vunpack.c.h.bf16 %v149_v51  ;;  %v146_v57 = vld [vmem:[%s20551_s0 + $0x198] sm:$0xff]  ;;  %v286_v58 = vunpack.c.l.bf16 %v148_v48  ;;  %v282_v61 = vunpack.c.h.bf16 %v145_v55  ;;  %v274_v14 = vunpack.c.h.bf16 %v140_v7  ;;  %v126_v39 = vld [vmem:[%s20551_s0 + $0x100] ss:$20 sps:$4 sm:$0xff]  }
  0x40   :  { %458 = vmatpush2.msra.mxu1 %v333_v59  ;;  %388 = vmatprep.subr.mxu0 %v327_v60  ;;  %v142_v59 = vld [vmem:[%s20551_s0 + $0x17c] sm:$0xff]  ;;  %v288_v60 = vunpack.c.l.bf16 %v149_v51  ;;  %v284_v63 = vunpack.c.h.bf16 %v146_v57  ;;  %v264_v27 = vunpack.c.h.bf16 %v134_v21  ;;  %v330_v42 = vunpack.c.h.bf16 %v174_v37 }
  0x41   :  { %459 = vmatprep.subr.mxu1 %v329_v62  ;;  %14423 = vset.pattern.permute.xlu1 %v14531_v10  ;;  %v143_v62 = vld [vmem:[%s20551_s0 + $0x184] sm:$0xff]  ;;  %v277_v3 = vunpack.c.h.bf16 %v142_v59  ;;  %v245_v48 = vunpack.c.l.bf16 %v126_v39  ;;  %vm900_vm0 = vcmask 523264   ;;  %vm1233_vm1 = vcmask 1048064  }
  0x42   :  { %389 = vmatpush2.msra.mxu0 %v326_v0  ;;  %460 = vmatpush2.msra.mxu1 %v328_v2  ;;  %v281_v0 = vunpack.c.l.bf16 %v145_v55  ;;  %v283_v2 = vunpack.c.l.bf16 %v146_v57  ;;  %vm1544_vm2 = vcmask 261120   ;;  %vm5540_vm3 = vcmask 253952  }
  0x43   :  { %1154 = vperm.xlu1 %14423, %v14768_v52   ;;  %390 = vmatprep.subr.mxu0 %v322_v6  ;;  %v139_v6 = vld [vmem:[%s20551_s0 + $0x168] sm:$0xff]  ;;  %vm5564_vm4 = vcmask 258052   ;;  %vm5588_vm5 = vcmask 1040384   ;;  %vm6234_vm6 = vcmask 7168   ;;  %vm6315_vm7 = vcmask 15368  }
  0x44   :  { %461 = vmatprep.subr.mxu1 %v324_v8  ;;  %391 = vmatpush2.msra.mxu0 %v321_v9  ;;  %v276_v8 = vunpack.c.l.bf16 %v142_v59  ;;  %v278_v9 = vunpack.c.l.bf16 %v143_v62  ;;  %v272_v13 = vunpack.c.h.bf16 %v139_v6  ;;  %vm6396_vm8 = vcmask 23568  }
  0x45   :  { %462 = vmatpush2.msra.mxu1 %v323_v11  ;;  %392 = vmatprep.subr.mxu0 %v317_v12  ;;  %v136_v11 = vld [vmem:[%s20551_s0 + $0x154] sm:$0xff]  ;;  %v137_v12 = vld [vmem:[%s20551_s0 + $0x15c] sm:$0xff]  ;;  %vm6477_vm9 = vcmask 31768   ;;  %vm6558_vm10 = vcmask 39968   ;;  %vm6623_vm11 = vcmask 48168   ;;  %vm6688_vm12 = vcmask 56368  }
  0x46   :  { %463 = vmatprep.subr.mxu1 %v319_v15  ;;  %393 = vmatpush2.msra.mxu0 %v316_v16  ;;  %v271_v15 = vunpack.c.l.bf16 %v139_v6  ;;  %v273_v16 = vunpack.c.l.bf16 %v140_v7  ;;  %v266_v22 = vunpack.c.l.bf16 %v136_v11  ;;  %vm6753_vm13 = vcmask 64568  }
  0x47   :  { %464 = vmatpush2.msra.mxu1 %v318_v17  ;;  %14424 = vset.pattern.permute.xlu1 %v14532_v28  ;;  %v267_v17 = vunpack.c.h.bf16 %v136_v11  ;;  %v144_v11 = vld [vmem:[%s20551_s0 + $0x178] ss:$20 sps:$4 sm:$0xff]   ;;  %vm7321_vm14 = vcmask 64512  }
  0x48   :  { %394 = vmatprep.subr.mxu0 %v312_v18  ;;  %465 = vmatprep.subr.mxu1 %v314_v20  ;;  %v269_v18 = vunpack.c.h.bf16 %v137_v12  ;;  %v133_v20 = vld [vmem:[%s20551_s0 + $0x140] sm:$0xff] }
  0x49   :  { %911 = vperm.xlu1 %14424, %v14697_v1   ;;  %395 = vmatpush2.msra.mxu0 %v311_v23  ;;  %v268_v23 = vunpack.c.l.bf16 %v137_v12  ;;  %v262_v26 = vunpack.c.h.bf16 %v133_v20  ;;  %v96_v12 = vld [vmem:[%s20551_s0 + $0x38] ss:$20 sps:$4 sm:$0xff]  }
  0x4a   :  { %466 = vmatpush2.msra.mxu1 %v313_v24  ;;  %1010 = vperm.xlu0 %14416, %v14787_v5   ;;  %v14940_v24 = vld.sshfl [vmem:[%s20552_s27] sm:$0x33 pattern:$0x76325410]  ;;  %s14546_s27 = smov 72  }
  0x4b   :  { %396 = vmatprep.subr.mxu0 %v307_v29  ;;  %467 = vmatprep.subr.mxu1 %v309_v30  ;;  %v261_v29 = vunpack.c.l.bf16 %v133_v20  ;;  %v349_v30 = vcombine.high %v14940_v24, %v14940_v24  ;;  %v195_v20 = vunpack.c.l.bf16 %v96_v12 }
  0x4c   :  { %397 = vmatpush2.msra.mxu0 %v306_v31  ;;  %468 = vmatpush2.msra.mxu1 %v308_v32  ;;  %v263_v31 = vunpack.c.l.bf16 %v134_v21  ;;  %v180_v32 = vld [vmem:[%s20551_s0 + $0x268] ss:$20 sps:$4 sm:$0xff]  }
  0x4d   :  { %398 = vmatprep.subr.mxu0 %v302_v33  ;;  %469 = vmatprep.subr.mxu1 %v304_v34  ;;  %v14534_v33 = vmov 4   ;;  %v132_v34 = vld [vmem:[%s20551_s0 + $0x128] ss:$20 sps:$4 sm:$0xff]   ;;  %v340_v35 = vunpack.c.h.bf16 %v180_v32 }
  0x4e   :  { %14425 = vset.pattern.permute.xlu1 %v14533_v45  ;;  %399 = vmatpush2.msra.mxu0 %v301_v36  ;;  %v260_v36 = vunpack.c.h.bf16 %v132_v34 }
  0x4f   :  { %470 = vmatpush2.msra.mxu1 %v303_v38  ;;  %1014 = vperm.xlu0 %14416, %v14729_v19   ;;  %v335_v38 = vunpack.c.l.bf16 %v180_v32 }
  0x50   :  { %978 = vperm.xlu1 %14425, %v14697_v1   ;;  %400 = vmatprep.subr.mxu0 %v297_v40  ;;  %v255_v40 = vunpack.c.l.bf16 %v132_v34 }
  0x51   :  { %471 = vmatprep.subr.mxu1 %v299_v43  ;;  %401 = vmatpush2.msra.mxu0 %v296_v44  ;;  %v250_v43 = vunpack.c.h.bf16 %v126_v39  ;;  %v168_v44 = vld [vmem:[%s20551_s0 + $0x218] ss:$20 sps:$4 sm:$0xff]  }
  0x52   :  { %472 = vmatpush2.msra.mxu1 %v298_v46  ;;  %402 = vmatprep.subr.mxu0 %v292_v47  ;;  %v325_v46 = vunpack.c.l.bf16 %v174_v37  ;;  %v120_v47 = vld [vmem:[%s20551_s0 + $0xd8] ss:$20 sps:$4 sm:$0xff]   ;;  %v315_v51 = vunpack.c.l.bf16 %v168_v44 }
  0x53   :  { %473 = vmatprep.subr.mxu1 %v294_v49  ;;  %403 = vmatpush2.msra.mxu0 %v291_v50  ;;  %v320_v49 = vunpack.c.h.bf16 %v168_v44  ;;  %v240_v50 = vunpack.c.h.bf16 %v120_v47  ;;  %v235_v55 = vunpack.c.l.bf16 %v120_v47 }
  0x54   :  { %474 = vmatpush2.msra.mxu1 %v293_v53  ;;  %14419 = vset.pattern.permute.xlu0 %v14529_v25  ;;  %v279_v25 = vunpack.c.h.bf16 %v143_v62  ;;  %v162_v53 = vld [vmem:[%s20551_s0 + $0x1f0] ss:$20 sps:$4 sm:$0xff]  }
  0x55   :  { %14426 = vset.pattern.permute.xlu1 %v14528_v4  ;;  %404 = vmatprep.subr.mxu0 %v287_v54  ;;  %v114_v54 = vld [vmem:[%s20551_s0 + $0xb0] ss:$20 sps:$4 sm:$0xff]   ;;  %v305_v59 = vunpack.c.l.bf16 %v162_v53 }
  0x56   :  { %475 = vmatprep.subr.mxu1 %v289_v56  ;;  %938 = vperm.xlu0 %14419, %v14697_v1   ;;  %v310_v56 = vunpack.c.h.bf16 %v162_v53  ;;  %v230_v57 = vunpack.c.h.bf16 %v114_v54  ;;  %v225_v62 = vunpack.c.l.bf16 %v114_v54 }
  0x57   :  { %669 = vperm.xlu1 %14426, %v14697_v1   ;;  %405 = vmatpush2.msra.mxu0 %v286_v58  ;;  %v14535_v58 = vmov 6  }
  0x58   :  { %476 = vmatpush2.msra.mxu1 %v288_v60  ;;  %406 = vmatprep.subr.mxu0 %v282_v61  ;;  %v156_v60 = vld [vmem:[%s20551_s0 + $0x1c8] ss:$20 sps:$4 sm:$0xff]  }
  0x59   :  { %477 = vmatprep.subr.mxu1 %v284_v63  ;;  %407 = vmatpush2.msra.mxu0 %v281_v0  ;;  %v108_v61 = vld [vmem:[%s20551_s0 + $0x88] ss:$20 sps:$4 sm:$0xff]   ;;  %v300_v63 = vunpack.c.h.bf16 %v156_v60 }
  0x5a   :  { %478 = vmatpush2.msra.mxu1 %v283_v2  ;;  %408 = vmatprep.subr.mxu0 %v277_v3  ;;  %v220_v0 = vunpack.c.h.bf16 %v108_v61  ;;  %v295_v2 = vunpack.c.l.bf16 %v156_v60  ;;  %v150_v3 = vld [vmem:[%s20551_s0 + $0x1a0] ss:$20 sps:$4 sm:$0xff]   ;;  %v215_v6 = vunpack.c.l.bf16 %v108_v61 }
  0x5b   :  { %479 = vmatprep.subr.mxu1 %v279_v25  ;;  %942 = vperm.xlu0 %14419, %v14787_v5   ;;  %v102_v25 = vld [vmem:[%s20551_s0 + $0x60] ss:$20 sps:$4 sm:$0xff]   ;;  %v290_v7 = vunpack.c.h.bf16 %v150_v3 }
  0x5c   :  { %14427 = vset.pattern.permute.xlu1 %v14533_v45  ;;  %409 = vmatpush2.msra.mxu0 %v276_v8  ;;  %v210_v8 = vunpack.c.h.bf16 %v102_v25 }
  0x5d   :  { %480 = vmatpush2.msra.mxu1 %v278_v9  ;;  %982 = vperm.xlu1 %14427, %v14787_v5   ;;  %v285_v9 = vunpack.c.l.bf16 %v150_v3 }
  0x5e   :  { %410 = vmatprep.subr.mxu0 %v272_v13  ;;  %481 = vmatprep.subr.mxu1 %v274_v14  ;;  %v205_v13 = vunpack.c.l.bf16 %v102_v25  ;;  %v280_v14 = vunpack.c.h.bf16 %v144_v11 }
  0x5f   :  { %411 = vmatpush2.msra.mxu0 %v271_v15  ;;  %482 = vmatpush2.msra.mxu1 %v273_v16  ;;  %v200_v15 = vunpack.c.h.bf16 %v96_v12  ;;  %v138_v16 = vld [vmem:[%s20551_s0 + $0x150] ss:$20 sps:$4 sm:$0xff]  }
  0x60   :  { %412 = vmatprep.subr.mxu0 %v267_v17  ;;  %483 = vmatprep.subr.mxu1 %v269_v18  ;;  %v275_v17 = vunpack.c.l.bf16 %v144_v11  ;;  %v90_v18 = vld [vmem:[%s20551_s0 + $0x10] ss:$20 sps:$4 sm:$0xff]   ;;  %v270_v21 = vunpack.c.h.bf16 %v138_v16  ;;  %s14552_s0 = smov 6  }
  0x61   :  { %601 = vperm.xlu0 %14419, %v14697_v1   ;;  %413 = vmatpush2.msra.mxu0 %v266_v22  ;;  %v190_v22 = vunpack.c.h.bf16 %v90_v18 }
  0x62   :  { %484 = vmatpush2.msra.mxu1 %v268_v23  ;;  %14428 = vset.pattern.permute.xlu1 %v14534_v33  ;;  %v265_v23 = vunpack.c.l.bf16 %v138_v16 }
  0x63   :  { %414 = vmatprep.subr.mxu0 %v262_v26  ;;  %485 = vmatprep.subr.mxu1 %v264_v27  ;;  %v185_v26 = vunpack.c.l.bf16 %v90_v18  ;;  %v14536_v27 = vmov 8  }
  0x64   :  { %1046 = vperm.xlu1 %14428, %v14697_v1   ;;  %415 = vmatpush2.msra.mxu0 %v261_v29 }
  0x65   :  { %416 = vmatprep.mubr.f32.mxu0 %v349_v30  ;;  %486 = vmatpush2.msra.mxu1 %v263_v31 }
  0x66   :  { %487 = vmatprep.mubr.f32.mxu1 %v349_v30  ;;  %417 = vmatmul.mubr.f32.vlgmr.msra.gmra.mxu0 %v14940_v24 }
  0x67   :  { %488 = vmatmul.mubr.f32.vlgmr.msra.gmra.mxu1 %v14940_v24  ;;  %605 = vperm.xlu0 %14419, %v14787_v5  }
  0x68   :  { %14429 = vset.pattern.permute.xlu1 %v14528_v4  ;;  %12470 = vmatprep.subr.mxu0 %v340_v35 }
  0x69   :  { %673 = vperm.xlu1 %14429, %v14787_v5   ;;  %12471 = vmatpush3.msra.mxu0 %v260_v36 }
  0x6a   :  { %12472 = vmatprep.subr.mxu0 %v335_v38  ;;  %558 = vmatprep.mubr.f32.mxu0 %v349_v30 }
  0x6b   :  { %609 = vperm.xlu0 %14419, %v14729_v19   ;;  %12473 = vmatpush3.msra.mxu0 %v255_v40 }
  0x6c   :  { %12474 = vmatprep.subr.mxu0 %v330_v42 }
  0x6d   :  { %14430 = vset.pattern.permute.xlu1 %v14530_v41  ;;  %12475 = vmatpush3.msra.mxu0 %v250_v43 }
  0x6e   :  { %737 = vperm.xlu1 %14430, %v14697_v1   ;;  %12476 = vmatprep.subr.mxu0 %v325_v46 }
  0x6f   :  { %613 = vperm.xlu0 %14419, %v14768_v52   ;;  %12477 = vmatpush3.msra.mxu0 %v245_v48 }
  0x70   :  { %12478 = vmatprep.subr.mxu0 %v320_v49 }
  0x71   :  { %12479 = vmatpush3.msra.mxu0 %v240_v50  ;;  %v20362_v50 = vlaneseq }
  0x72   :  { %14431 = vset.pattern.permute.xlu1 %v14532_v28  ;;  %12480 = vmatprep.subr.mxu0 %v315_v51 }
  0x73   :  { %14438 = vset.pattern.permute.xlu0 %v14535_v58  ;;  %921 = vperm.xlu1 %14431, %v14729_v19   ;;  %v15104_v54 = vshrl.u32 %v20362_v50, 7 }
  0x74   :  { %1118 = vperm.xlu0 %14438, %v14787_v5   ;;  %12481 = vmatpush3.msra.mxu0 %v235_v55 }
  0x75   :  { %12482 = vmatprep.subr.mxu0 %v310_v56  ;;  %20554 = vst [vmem:[#allocation11_spill] sm:$0xff] %v15104_v54  ;;  %v15109_v56 = vsub.s32 1, %v15104_v54 }
  0x76   :  { %12483 = vmatpush3.msra.mxu0 %v230_v57 }
  0x77   :  { %14432 = vset.pattern.permute.xlu1 %v14534_v33  ;;  %12484 = vmatprep.subr.mxu0 %v305_v59 }
  0x78   :  { %14441 = vset.pattern.permute.xlu0 %v14530_v41  ;;  %1050 = vperm.xlu1 %14432, %v14787_v5  }
  0x79   :  { %745 = vperm.xlu0 %14441, %v14729_v19   ;;  %12485 = vmatpush3.msra.mxu0 %v225_v62 }
  0x7a   :  { %12486 = vmatprep.subr.mxu0 %v300_v63 }
  0x7b   :  { %12487 = vmatpush3.msra.mxu0 %v220_v0 }
  0x7c   :  { %14433 = vset.pattern.permute.xlu1 %v14535_v58  ;;  %12488 = vmatprep.subr.mxu0 %v295_v2 }
  0x7d   :  { %14442 = vset.pattern.permute.xlu0 %v14531_v10  ;;  %1114 = vperm.xlu1 %14433, %v14697_v1  }
  0x7e   :  { %1142 = vperm.xlu0 %14442, %v14697_v1   ;;  %12489 = vmatpush3.msra.mxu0 %v215_v6 }
  0x7f   :  { %12490 = vmatprep.subr.mxu0 %v290_v7 }
  0x80   :  { %12491 = vmatpush3.msra.mxu0 %v210_v8 }
  0x81   :  { %14434 = vset.pattern.permute.xlu1 %v14528_v4  ;;  %12492 = vmatprep.subr.mxu0 %v285_v9 }
  0x82   :  { %1146 = vperm.xlu0 %14442, %v14787_v5   ;;  %677 = vperm.xlu1 %14434, %v14729_v19  }
  0x83   :  { %12493 = vmatpush3.msra.mxu0 %v205_v13 }
  0x84   :  { %12494 = vmatprep.subr.mxu0 %v280_v14 }
  0x85   :  { %12495 = vmatpush3.msra.mxu0 %v200_v15  ;;  %v15151_v15 = vsub.s32 0, %v15104_v54 }
  0x86   :  { %1150 = vperm.xlu0 %14442, %v14729_v19   ;;  %14435 = vset.pattern.permute.xlu1 %v14530_v41 }
  0x87   :  { %741 = vperm.xlu1 %14435, %v14787_v5   ;;  %12496 = vmatprep.subr.mxu0 %v275_v17  ;;  %20555 = vst [vmem:[#allocation12_spill] sm:$0xff] %v15151_v15 }
  0x88   :  { %12497 = vmatpush3.msra.mxu0 %v195_v20 }
  0x89   :  { %12498 = vmatprep.subr.mxu0 %v270_v21 }
  0x8a   :  { %805 = vperm.xlu0 %14442, %v14697_v1   ;;  %12499 = vmatpush3.msra.mxu0 %v190_v22 }
  0x8b   :  { %14436 = vset.pattern.permute.xlu1 %v14533_v45  ;;  %12500 = vmatprep.subr.mxu0 %v265_v23  ;;  %v567_v23 = vld [vmem:[%s20553_s9 + $0x18] sm:$0xff] }
  0x8c   :  { %990 = vperm.xlu1 %14436, %v14768_v52   ;;  %12501 = vmatpush3.msra.mxu0 %v185_v26 }
  0x8d   :  { %559 = vmatmul.mubr.f32.vlgmr.msra.gmra.mxu0 %v14940_v24 }
  0x8e   :  { %817 = vperm.xlu0 %14442, %v14768_v52   ;;  %v15067_v24 = vpop.permute.xlu1 %1006 }
  0x90   :  { %14437 = vset.pattern.permute.xlu1 %v14534_v33 }
  0x91   :  { %1054 = vperm.xlu1 %14437, %v14729_v19  }
  0x92   :  { %14450 = vset.pattern.permute.xlu0 %v14536_v27 }
  0x93   :  { %1186 = vperm.xlu0 %14450, %v14787_v5  }
  0x95   :  { %14439 = vset.pattern.permute.xlu1 %v14536_v27 }
  0x96   :  { %1182 = vperm.xlu1 %14439, %v14697_v1  }
  0x97   :  { %1194 = vperm.xlu0 %14450, %v14768_v52  }
  0x9a   :  { %14440 = vset.pattern.permute.xlu1 %v14528_v4  ;;  %v565_v4 = vld [vmem:[%s20553_s9 + $0x8] sm:$0xff] }
  0x9b   :  { %14452 = vset.pattern.permute.xlu0 %v14533_v45  ;;  %681 = vperm.xlu1 %14440, %v14768_v52  }
  0x9c   :  { %986 = vperm.xlu0 %14452, %v14729_v19  }
  0x9f   :  { %14443 = vset.pattern.permute.xlu1 %v14531_v10 }
  0xa0   :  { %641 = vperm.xlu0 %14452, %v14697_v1   ;;  %809 = vperm.xlu1 %14443, %v14787_v5   ;;  %v564_v1 = vld [vmem:[%s20553_s9] sm:$0xff] }
  0xa4   :  { %649 = vperm.xlu0 %14452, %v14729_v19   ;;  %14444 = vset.pattern.permute.xlu1 %v14534_v33 }
  0xa5   :  { %1058 = vperm.xlu1 %14444, %v14768_v52  }
  0xa8   :  { %14455 = vset.pattern.permute.xlu0 %v14532_v28 }
  0xa9   :  { %916 = vperm.xlu0 %14455, %v14787_v5   ;;  %14445 = vset.pattern.permute.xlu1 %v14535_v58 }
  0xaa   :  { %1122 = vperm.xlu1 %14445, %v14729_v19  }
  0xad   :  { %926 = vperm.xlu0 %14455, %v14768_v52  }
  0xae   :  { %14446 = vset.pattern.permute.xlu1 %v14530_v41  ;;  %v566_v41 = vld [vmem:[%s20553_s9 + $0x10] sm:$0xff] }
  0xaf   :  { %749 = vperm.xlu1 %14446, %v14768_v52  }
  0xb1   :  { %874 = vperm.xlu0 %14455, %v564_v1  }
  0xb3   :  { %14447 = vset.pattern.permute.xlu1 %v14531_v10  ;;  %v15072_v10 = vld [vmem:[%s20550_s8] sm:$0xff] }
  0xb4   :  { %813 = vperm.xlu1 %14447, %v14729_v19  }
  0xb5   :  { %879 = vperm.xlu0 %14455, %v565_v4  }
  0xb8   :  { %14448 = vset.pattern.permute.xlu1 %v14535_v58 }
  0xb9   :  { %1126 = vperm.xlu1 %14448, %v14768_v52   ;;  %v947_v52 = vpop.permute.xlu1 %946 }
  0xbd   :  { %14449 = vset.pattern.permute.xlu1 %v14536_v27  ;;  %v1075_v29 = vpop.permute.xlu1 %1074 }
  0xbe   :  { %1190 = vperm.xlu1 %14449, %v14729_v19  }
  0xc1   :  { %v951_v30 = vpop.permute.xlu1 %950 }
  0xc2   :  { %14451 = vset.pattern.permute.xlu1 %v14532_v28 }
  0xc3   :  { %884 = vperm.xlu1 %14451, %v566_v41  }
  0xc5   :  { %v1079_v31 = vpop.permute.xlu1 %1078  ;;  %v1011_v38 = vpop.permute.xlu0 %1010 }
  0xc7   :  { %574 = vperm.xlu1 %14451, %v15072_v10  }
  0xc9   :  { %v15081_v32 = vpop.permute.xlu1 %1018 }
  0xca   :  { %v15089_v40 = vpop.permute.xlu0 %1014 }
  0xcb   :  { %579 = vperm.xlu1 %14451, %v14787_v5  }
  0xcd   :  { %v1083_v34 = vpop.permute.xlu1 %1082 }
  0xcf   :  { %14453 = vset.pattern.permute.xlu1 %v14533_v45 }
  0xd0   :  { %645 = vperm.xlu1 %14453, %v14787_v5  }
  0xd1   :  { %v1087_v35 = vpop.permute.xlu1 %1086  ;;  %v939_v43 = vpop.permute.xlu0 %938 }
  0xd4   :  { %14454 = vset.pattern.permute.xlu1 %v14532_v28 }
  0xd5   :  { %584 = vperm.xlu1 %14454, %v14729_v19   ;;  %v15083_v36 = vpop.permute.xlu1 %1154 }
  0xd6   :  { %v943_v44 = vpop.permute.xlu0 %942 }
  0xd9   :  { %14456 = vset.pattern.permute.xlu1 %v14534_v33  ;;  %v15085_v37 = vpop.permute.xlu1 %911 }
  0xdc   :  { %v602_v47 = vpop.permute.xlu0 %601 }
  0xdd   :  { %v15087_v39 = vpop.permute.xlu1 %978 }
  0xe1   :  { %v15091_v42 = vpop.permute.xlu1 %669 }
  0xe2   :  { %v606_v49 = vpop.permute.xlu0 %605 }
  0xe5   :  { %v15093_v19 = vpop.permute.xlu1 %982 }
  0xe6   :  { %v15101_v53 = vpop.permute.xlu0 %609 }
  0xe9   :  { %v15095_v46 = vpop.permute.xlu1 %1046 }
  0xea   :  { %v15111_v57 = vpop.permute.xlu0 %613 }
  0xed   :  { %v15097_v48 = vpop.permute.xlu1 %673 }
  0xef   :  { %v15122_v2 = vpop.permute.xlu0 %1118 }
  0xf1   :  { %v15099_v51 = vpop.permute.xlu1 %737 }
  0xf4   :  { %v15138_v9 = vpop.permute.xlu0 %745 }
  0xf5   :  { %v15106_v55 = vpop.permute.xlu1 %921 }
  0xf9   :  { %v15116_v61 = vpop.permute.xlu1 %1050  ;;  %v1143_v18 = vpop.permute.xlu0 %1142 }
  0xfd   :  { %v15132_v7 = vpop.permute.xlu1 %1114  ;;  %v1147_v4 = vpop.permute.xlu0 %1146 }
 0x101   :  { %v15148_v14 = vpop.permute.xlu1 %677 }
 0x105   :  { %v742_v26 = vpop.permute.xlu1 %741 }
 0x126   :  { %v418_v59 = vpop.f32.mrf.mxu0 }
 0x127   :  { %v15114_v60 = vrot.slane %v418_v59, %v15109_v56  ;;  %v15119_v63 = vpop.f32.mrf.mxu1  ;;  %v15158_v20 = vrot.slane %v418_v59, %v15151_v15 }
 0x128   :  { %v15128_v3 = vrot.slane %v15119_v63, %v15109_v56  ;;  %v15134_v8 = vpop.f32.mrf.mxu0 }
 0x129   :  { %v954_v62 = vmul.f32 %v943_v44, %v15114_v60  ;;  %v953_v0 = vmul.f32 %v939_v43, %v15114_v60  ;;  %v955_v25 = vmul.f32 %v947_v52, %v15114_v60  ;;  %v956_v6 = vmul.f32 %v951_v30, %v15114_v60  ;;  %v15160_v21 = vpop.f32.mrf.mxu1  ;;  %v14482_v44 = vld [vmem:[%s20550_s8 + $0x8] sm:$0xff] }
 0x12a   :  { %v1089_v11 = vmul.f32 %v1075_v29, %v15128_v3  ;;  %v15143_v12 = vrot.slane %v15134_v8, %v15109_v56  ;;  %v1090_v13 = vmul.f32 %v1079_v31, %v15128_v3  ;;  %v1091_v16 = vmul.f32 %v1083_v34, %v15128_v3  ;;  %v15175_v29 = vpop.permute.xlu1 %990 }
 0x12b   :  { %963 = vrot.lane.b32.xlu1 %v954_v62, %s14537_s1  ;;  %961 = vrot.lane.b32.xlu0 %v953_v0, %s14537_s1  ;;  %v1092_v22 = vmul.f32 %v1087_v35, %v15128_v3  ;;  %v15169_v1 = vrot.slane %v15160_v21, %v15109_v56  ;;  %v616_v41 = vmul.f32 %v602_v47, %v15158_v20  ;;  %v14481_v35 = vld [vmem:[%s20550_s8 + $0x18] sm:$0xff]  ;;  %v1151_v47 = vpop.permute.xlu0 %1150 }
 0x12c   :  { %v1022_v17 = vmul.f32 %v1011_v38, %v15143_v12  ;;  %v1021_v30 = vmul.f32 %v15067_v24, %v15143_v12  ;;  %v617_v31 = vmul.f32 %v606_v49, %v15158_v20  ;;  %v1023_v38 = vmul.f32 %v15089_v40, %v15143_v12 }
 0x12d   :  { %v1158_v52 = vmul.f32 %v1147_v4, %v15169_v1  ;;  %v1024_v40 = vmul.f32 %v15081_v32, %v15143_v12  ;;  %v619_v49 = vmul.f32 %v15111_v57, %v15158_v20  ;;  %v1159_v32 = vmul.f32 %v1151_v47, %v15169_v1 }
 0x12e   :  { %v15182_v34 = vpop.permute.xlu1 %1054  ;;  %v1160_v57 = vmul.f32 %v15083_v36, %v15169_v1 }
 0x12f   :  { %965 = vrot.lane.b32.xlu1 %v955_v25, %s14537_s1  ;;  %967 = vrot.lane.b32.xlu0 %v956_v6, %s14537_s1  ;;  %v806_v0 = vpop.permute.xlu0 %805 }
 0x132   :  { %v15191_v24 = vpop.permute.xlu1 %1182 }
 0x133   :  { %1097 = vrot.lane.b32.xlu1 %v1089_v11, %s14537_s1  ;;  %1099 = vrot.lane.b32.xlu0 %v1090_v13, %s14537_s1  ;;  %v15231_v6 = vpop.permute.xlu0 %817 }
 0x136   :  { %v15199_v43 = vpop.permute.xlu1 %681 }
 0x137   :  { %1101 = vrot.lane.b32.xlu1 %v1091_v16, %s14537_s1  ;;  %1031 = vrot.lane.b32.xlu0 %v1022_v17, %s14537_s1 }
 0x13a   :  { %v15215_v59 = vpop.permute.xlu1 %809 }
 0x13b   :  { %1103 = vrot.lane.b32.xlu1 %v1092_v22, %s14537_s1  ;;  %889 = vperm.xlu0 %14455, %v567_v23  }
 0x13e   :  { %v15221_v25 = vpop.permute.xlu1 %1058 }
 0x13f   :  { %624 = vrot.lane.b32.xlu1 %v616_v41, %s14537_s1  ;;  %1167 = vrot.lane.b32.xlu0 %v1158_v52, %s14537_s1 }
 0x142   :  { %v15236_v13 = vpop.permute.xlu1 %1122 }
 0x143   :  { %1029 = vrot.lane.b32.xlu1 %v1021_v30, %s14537_s1  ;;  %626 = vrot.lane.b32.xlu0 %v617_v31, %s14537_s1 }
 0x146   :  { %v750_v16 = vpop.permute.xlu1 %749 }
 0x147   :  { %713 = vperm.xlu1 %14456, %v14787_v5   ;;  %589 = vperm.xlu0 %14455, %v14481_v35   ;;  %v1157_v5 = vmul.f32 %v1143_v18, %v15169_v1 }
 0x14a   :  { %v814_v18 = vpop.permute.xlu1 %813 }
 0x14b   :  { %14457 = vset.pattern.permute.xlu1 %v14535_v58  ;;  %14458 = vset.pattern.permute.xlu0 %v14534_v33 }
 0x14c   :  { %777 = vperm.xlu1 %14457, %v15072_v10   ;;  %709 = vperm.xlu0 %14458, %v15072_v10  }
 0x150   :  { %1033 = vrot.lane.b32.xlu1 %v1023_v38, %s14537_s1  ;;  %721 = vperm.xlu0 %14458, %v14481_v35  }
 0x151   :  { %14459 = vset.pattern.permute.xlu1 %v14533_v45  ;;  %v15210_v45 = vrot.slane %v15119_v63, %v15151_v15  ;;  %v15225_v63 = vrot.slane %v15134_v8, %v15151_v15  ;;  %v15245_v8 = vpop.permute.xlu0 %1186 }
 0x153   :  { %v753_v62 = vmul.f32 %v742_v26, %v15210_v45  ;;  %v685_v11 = vmul.f32 %v15097_v48, %v15225_v63  ;;  %v754_v36 = vmul.f32 %v15138_v9, %v15210_v45  ;;  %v618_v48 = vmul.f32 %v15101_v53, %v15158_v20 }
 0x154   :  { %1165 = vrot.lane.b32.xlu1 %v1157_v5, %s14537_s1  ;;  %14462 = vset.pattern.permute.xlu0 %v14535_v58  ;;  %v752_v9 = vmul.f32 %v15099_v51, %v15210_v45  ;;  %v684_v51 = vmul.f32 %v15091_v42, %v15225_v63  ;;  %v755_v52 = vmul.f32 %v750_v16, %v15210_v45 }
 0x155   :  { %781 = vperm.xlu0 %14462, %v14482_v44   ;;  %v15252_v17 = vpop.permute.xlu0 %1194  ;;  %v686_v30 = vmul.f32 %v15148_v14, %v15225_v63 }
 0x158   :  { %1035 = vrot.lane.b32.xlu1 %v1024_v40, %s14537_s1 }
 0x159   :  { %630 = vrot.lane.b32.xlu0 %v619_v49, %s14537_s1  ;;  %v987_v22 = vpop.permute.xlu0 %986 }
 0x15c   :  { %653 = vperm.xlu1 %14459, %v14481_v35  }
 0x15d   :  { %762 = vrot.lane.b32.xlu0 %v753_v62, %s14537_s1  ;;  %v15264_v53 = vpop.permute.xlu0 %641  ;;  %v933_v62 = vmul.f32 %v15114_v60, %v15085_v37 }
 0x160   :  { %1169 = vrot.lane.b32.xlu1 %v1159_v32, %s14537_s1  ;;  %v998_v32 = vmul.f32 %v15143_v12, %v15093_v19  ;;  %v999_v19 = vmul.f32 %v15143_v12, %v987_v22  ;;  %v1273_v22 = vld [vmem:[%s20556_s23 + $0xb0] ss:$12 sps:$4 sm:$0xff]  }
 0x161   :  { %14460 = vset.pattern.permute.xlu1 %v14534_v33  ;;  %789 = vperm.xlu0 %14462, %v14481_v35   ;;  %v14483_v33 = vld [vmem:[%s20550_s8 + $0x10] sm:$0xff]  ;;  %s20559_s8 = sld [smem:[#allocation43_spill]] }
 0x164   :  { %1171 = vrot.lane.b32.xlu1 %v1160_v57, %s14537_s1  ;;  %v997_v57 = vmul.f32 %v15143_v12, %v15087_v39  ;;  %v1272_v39 = vld [vmem:[%s20556_s23 + $0xb4] sm:$0xff] }
 0x165   :  { %694 = vrot.lane.b32.xlu0 %v685_v11, %s14537_s1  ;;  %v935_v11 = vmul.f32 %v15114_v60, %v15106_v55  ;;  %v1270_v55 = vld [vmem:[%s20556_s23 + $0xa8] sm:$0xff] }
 0x166   :  { %14465 = vset.pattern.permute.xlu0 %v14536_v27 }
 0x168   :  { %717 = vperm.xlu1 %14460, %v14483_v33  }
 0x169   :  { %764 = vrot.lane.b32.xlu0 %v754_v36, %s14537_s1 }
 0x16c   :  { %14461 = vset.pattern.permute.xlu1 %v14536_v27 }
 0x16d   :  { %845 = vperm.xlu1 %14461, %v15072_v10   ;;  %857 = vperm.xlu0 %14465, %v14481_v35   ;;  %v15260_v10 = vpop.permute.xlu1 %1126 }
 0x171   :  { %628 = vrot.lane.b32.xlu1 %v618_v48, %s14537_s1  ;;  %14467 = vset.pattern.permute.xlu0 %v14532_v28  ;;  %v15262_v23 = vpop.permute.xlu1 %1190 }
 0x172   :  { %14463 = vset.pattern.permute.xlu1 %v14535_v58  ;;  %v15269_v58 = vpop.permute.xlu0 %649 }
 0x175   :  { %760 = vrot.lane.b32.xlu1 %v752_v9, %s14537_s1  ;;  %v15267_v26 = vpop.permute.xlu1 %884 }
 0x176   :  { %v917_v41 = vpop.permute.xlu0 %916 }
 0x177   :  { %v934_v47 = vmul.f32 %v15114_v60, %v917_v41  ;;  %v1319_v41 = vunpack.c.l.bf16 %v1272_v39 }
 0x179   :  { %785 = vperm.xlu1 %14463, %v14483_v33   ;;  %v15274_v4 = vpop.permute.xlu1 %574 }
 0x17a   :  { %v927_v42 = vpop.permute.xlu0 %926 }
 0x17b   :  { %v936_v37 = vmul.f32 %v15114_v60, %v927_v42  ;;  %v1268_v60 = vld [vmem:[%s20556_s23 + $0x9c] sm:$0xff]  ;;  %v1316_v42 = vunpack.c.l.bf16 %v1270_v55 }
 0x17d   :  { %14464 = vset.pattern.permute.xlu1 %v14536_v27  ;;  %v15281_v27 = vrot.slane %v15160_v21, %v15151_v15  ;;  %v15285_v31 = vpop.permute.xlu1 %579  ;;  %v687_v21 = vmul.f32 %v15199_v43, %v15225_v63 }
 0x17e   :  { %849 = vperm.xlu1 %14464, %v14482_v44  }
 0x17f   :  { %v820_v35 = vmul.f32 %v806_v0, %v15281_v27  ;;  %v821_v14 = vmul.f32 %v15215_v59, %v15281_v27  ;;  %v822_v40 = vmul.f32 %v814_v18, %v15281_v27 }
 0x181   :  { %v15292_v38 = vpop.permute.xlu1 %645 }
 0x182   :  { %853 = vperm.xlu1 %14464, %v14483_v33   ;;  %v823_v33 = vmul.f32 %v15231_v6, %v15281_v27 }
 0x185   :  { %v15301_v44 = vpop.permute.xlu1 %584 }
 0x186   :  { %692 = vrot.lane.b32.xlu1 %v684_v51, %s14537_s1  ;;  %v1000_v51 = vmul.f32 %v15143_v12, %v15175_v29  ;;  %v1314_v29 = vunpack.c.h.bf16 %v1268_v60 }
 0x187   :  { %14466 = vset.pattern.permute.xlu1 %v14532_v28  ;;  %v15290_v28 = vpop.permute.xlu0 %874 }
 0x18a   :  { %766 = vrot.lane.b32.xlu1 %v755_v52, %s14537_s1  ;;  %v1320_v52 = vunpack.c.h.bf16 %v1272_v39  ;;  %v1260_v39 = vld [vmem:[%s20556_s23 + $0x6c] sm:$0xff] }
 0x18b   :  { %v15297_v5 = vpop.permute.xlu0 %879 }
 0x18c   :  { %1322 = vmatprep.subr.mxu1 %v1320_v52  ;;  %v1258_v52 = vld [vmem:[%s20556_s23 + $0x60] sm:$0xff] }
 0x18d   :  { %1323 = vmatpush1.msra.mxu1 %v1319_v41 }
 0x18e   :  { %696 = vrot.lane.b32.xlu1 %v686_v30, %s14537_s1 }
 0x192   :  { %828 = vrot.lane.b32.xlu1 %v820_v35, %s14537_s1  ;;  %v1317_v35 = vunpack.c.h.bf16 %v1270_v55  ;;  %v1066_v55 = vmul.f32 %v15128_v3, %v15116_v61  ;;  %v1302_v61 = vunpack.c.h.bf16 %v1260_v39 }
 0x194   :  { %1324 = vmatprep.subr.mxu1 %v1317_v35 }
 0x195   :  { %1325 = vmatpush1.msra.mxu1 %v1316_v42 }
 0x196   :  { %698 = vrot.lane.b32.xlu1 %v687_v21, %s14537_s1  ;;  %v1266_v21 = vld [vmem:[%s20556_s23 + $0x90] sm:$0xff]  ;;  %1326 = vmatprep.subr.mxu1 %v1314_v29  ;;  %v12502_v29 = vpop.f32.mrf.mxu0 }
 0x19a   :  { %830 = vrot.lane.b32.xlu1 %v821_v14, %s14537_s1  ;;  %v1269_v14 = vld [vmem:[%s20556_s23 + $0x98] ss:$12 sps:$4 sm:$0xff]  }
 0x19d   :  { %v964_v49 = vpop.permute.xlu1 %963  ;;  %v962_v0 = vpop.permute.xlu0 %961 }
 0x19e   :  { %v974_v43 = vadd.f32 %v964_v49, %v934_v47  ;;  %832 = vrot.lane.b32.xlu1 %v822_v40, %s14537_s1  ;;  %v973_v59 = vadd.f32 %v962_v0, %v933_v62  ;;  %v1321_v47 = vunpack.c.h.bf16 %v1273_v22  ;;  %v1313_v62 = vunpack.c.l.bf16 %v1268_v60  ;;  %v1264_v0 = vld [vmem:[%s20556_s23 + $0x84] sm:$0xff] }
 0x1a0   :  { %v1002_v36 = vadd.f32 %v998_v32, %v974_v43  ;;  %v15318_v48 = vadd.f32 %v997_v57, %v973_v59  ;;  %v1318_v43 = vunpack.c.l.bf16 %v1273_v22  ;;  %13217 = vmatprep.subr.mxu0 %v1321_v47  ;;  %v1311_v32 = vunpack.c.h.bf16 %v1266_v21  ;;  %1327 = vmatpush1.msra.mxu1 %v1313_v62  ;;  %v1261_v22 = vld [vmem:[%s20556_s23 + $0x68] ss:$12 sps:$4 sm:$0xff]  }
 0x1a1   :  { %v966_v16 = vpop.permute.xlu1 %965  ;;  %v968_v9 = vpop.permute.xlu0 %967  ;;  %v1315_v59 = vunpack.c.h.bf16 %v1269_v14  ;;  %13218 = vmatpush3.msra.mxu0 %v1321_v47  ;;  %v1310_v57 = vunpack.c.l.bf16 %v1266_v21  ;;  %v1301_v21 = vunpack.c.l.bf16 %v1260_v39  ;;  %v1134_v47 = vmul.f32 %v15169_v1, %v15122_v2 }
 0x1a2   :  { %v975_v18 = vadd.f32 %v966_v16, %v935_v11  ;;  %834 = vrot.lane.b32.xlu1 %v823_v33, %s14537_s1  ;;  %v976_v6 = vadd.f32 %v968_v9, %v936_v37  ;;  %v1262_v11 = vld [vmem:[%s20556_s23 + $0x78] sm:$0xff]  ;;  %v1265_v33 = vld [vmem:[%s20556_s23 + $0x80] ss:$12 sps:$4 sm:$0xff]   ;;  %13219 = vmatprep.subr.mxu0 %v1318_v43  ;;  %v1308_v16 = vunpack.c.h.bf16 %v1264_v0 }
 0x1a3   :  { %13220 = vmatpush3.msra.mxu0 %v1318_v43  ;;  %1328 = vmatprep.subr.mxu1 %v1311_v32  ;;  %v1304_v41 = vunpack.c.l.bf16 %v1262_v11  ;;  %v1299_v43 = vunpack.c.h.bf16 %v1258_v52  ;;  %v1298_v32 = vunpack.c.l.bf16 %v1258_v52 }
 0x1a4   :  { %v15336_v30 = vadd.f32 %v999_v19, %v975_v18  ;;  %v15346_v12 = vadd.f32 %v1000_v51, %v976_v6  ;;  %v1312_v18 = vunpack.c.l.bf16 %v1269_v14  ;;  %v1307_v19 = vunpack.c.l.bf16 %v1264_v0  ;;  %13221 = vmatprep.subr.mxu0 %v1315_v59  ;;  %1329 = vmatpush1.msra.mxu1 %v1310_v57  ;;  %v1256_v14 = vld [vmem:[%s20556_s23 + $0x54] sm:$0xff]  ;;  %v1257_v57 = vld [vmem:[%s20556_s23 + $0x50] ss:$12 sps:$4 sm:$0xff]  }
 0x1a5   :  { %v15344_v40 = vpop.permute.xlu1 %1097  ;;  %v1100_v49 = vpop.permute.xlu0 %1099  ;;  %v1305_v6 = vunpack.c.h.bf16 %v1262_v11  ;;  %v1309_v51 = vunpack.c.h.bf16 %v1265_v33  ;;  %13222 = vmatpush3.msra.mxu0 %v1315_v59  ;;  %1330 = vmatprep.subr.mxu1 %v1308_v16  ;;  %v1303_v0 = vunpack.c.h.bf16 %v1261_v22  ;;  %v1254_v59 = vld [vmem:[%s20556_s23 + $0x48] sm:$0xff]  ;;  %v1296_v2 = vunpack.c.h.bf16 %v1256_v14 }
 0x1a6   :  { %13223 = vmatprep.subr.mxu0 %v1312_v18  ;;  %1331 = vmatpush1.msra.mxu1 %v1307_v19  ;;  %v1295_v16 = vunpack.c.l.bf16 %v1256_v14  ;;  %v1293_v19 = vunpack.c.h.bf16 %v1254_v59  ;;  %v1297_v39 = vunpack.c.h.bf16 %v1257_v57 }
 0x1a7   :  { %13224 = vmatpush3.msra.mxu0 %v1312_v18  ;;  %1332 = vmatprep.subr.mxu1 %v1305_v6  ;;  %v1252_v18 = vld [vmem:[%s20556_s23 + $0x3c] sm:$0xff] }
 0x1a8   :  { %13225 = vmatprep.subr.mxu0 %v1309_v51  ;;  %1333 = vmatpush1.msra.mxu1 %v1304_v41  ;;  %v1294_v41 = vunpack.c.l.bf16 %v1257_v57 }
 0x1a9   :  { %v15357_v37 = vpop.permute.xlu1 %1101  ;;  %v1032_v9 = vpop.permute.xlu0 %1031  ;;  %13226 = vmatpush3.msra.mxu0 %v1309_v51  ;;  %1334 = vmatprep.subr.mxu1 %v1302_v61  ;;  %v1290_v51 = vunpack.c.h.bf16 %v1252_v18  ;;  %v1289_v61 = vunpack.c.l.bf16 %v1252_v18 }
 0x1aa   :  { %v1042_v60 = vadd.f32 %v1032_v9, %v1002_v36  ;;  %v1306_v36 = vunpack.c.l.bf16 %v1265_v33  ;;  %1335 = vmatpush1.msra.mxu1 %v1301_v21  ;;  %v12503_v9 = vpop.f32.mrf.mxu0 }
 0x1ab   :  { %1336 = vmatprep.subr.mxu1 %v1299_v43  ;;  %v15391_v52 = vadd.f32 %v12503_v9, %v12502_v29 }
 0x1ac   :  { %v1070_v42 = vadd.f32 %v1066_v55, %v1042_v60  ;;  %13227 = vmatprep.subr.mxu0 %v1306_v36  ;;  %1337 = vmatpush1.msra.mxu1 %v1298_v32  ;;  %v1292_v55 = vunpack.c.l.bf16 %v1254_v59  ;;  %v1250_v60 = vld [vmem:[%s20556_s23 + $0x30] sm:$0xff] }
 0x1ad   :  { %v15370_v35 = vpop.permute.xlu1 %1103  ;;  %13228 = vmatpush3.msra.mxu0 %v1306_v36  ;;  %1338 = vmatprep.subr.mxu1 %v1296_v2  ;;  %v1287_v21 = vunpack.c.h.bf16 %v1250_v60  ;;  %v15400_v29 = vrot.slane %v15391_v52, %v15109_v56 }
 0x1ae   :  { %v1110_v62 = vadd.f32 %v1100_v49, %v1070_v42  ;;  %v1300_v49 = vunpack.c.l.bf16 %v1261_v22  ;;  %13229 = vmatprep.subr.mxu0 %v1303_v0  ;;  %v1065_v22 = vmul.f32 %v15128_v3, %v15095_v46  ;;  %1339 = vmatpush1.msra.mxu1 %v1295_v16  ;;  %v1133_v46 = vmul.f32 %v15169_v1, %v15132_v7 }
 0x1af   :  { %13230 = vmatpush3.msra.mxu0 %v1303_v0  ;;  %1340 = vmatprep.subr.mxu1 %v1293_v19  ;;  %v1202_v0 = vmul.f32 %v15400_v29, %v15245_v8  ;;  %v1067_v7 = vmul.f32 %v15128_v3, %v15182_v34  ;;  %v1246_v8 = vld [vmem:[%s20556_s23 + $0x18] sm:$0xff] }
 0x1b0   :  { %v1138_v33 = vadd.f32 %v1134_v47, %v1110_v62  ;;  %13231 = vmatprep.subr.mxu0 %v1300_v49  ;;  %1341 = vmatpush1.msra.mxu1 %v1292_v55  ;;  %v1286_v47 = vunpack.c.l.bf16 %v1250_v60  ;;  %v1280_v19 = vunpack.c.l.bf16 %v1246_v8  ;;  %v1281_v34 = vunpack.c.h.bf16 %v1246_v8 }
 0x1b1   :  { %v15383_v11 = vpop.permute.xlu1 %624  ;;  %13232 = vmatpush3.msra.mxu0 %v1300_v49  ;;  %1342 = vmatprep.subr.mxu1 %v1290_v51  ;;  %v1135_v51 = vmul.f32 %v15169_v1, %v15236_v13 }
 0x1b2   :  { %13233 = vmatprep.subr.mxu0 %v1297_v39  ;;  %1343 = vmatpush1.msra.mxu1 %v1289_v61 }
 0x1b3   :  { %13234 = vmatpush3.msra.mxu0 %v1297_v39  ;;  %1344 = vmatprep.subr.mxu1 %v1287_v21 }
 0x1b4   :  { %13235 = vmatprep.subr.mxu0 %v1294_v41  ;;  %1345 = vmatpush1.msra.mxu1 %v1286_v47 }
 0x1b5   :  { %v1030_v6 = vpop.permute.xlu1 %1029  ;;  %13236 = vmatpush3.msra.mxu0 %v1294_v41  ;;  %v1249_v41 = vld [vmem:[%s20556_s23 + $0x20] ss:$12 sps:$4 sm:$0xff]  }
 0x1b6   :  { %v1041_v42 = vadd.f32 %v1030_v6, %v15318_v48  ;;  %v15396_v36 = vpop.permute.xlu0 %889  ;;  %v1201_v6 = vmul.f32 %v15400_v29, %v15191_v24  ;;  %v1285_v21 = vunpack.c.h.bf16 %v1249_v41 }
 0x1b8   :  { %v1069_v14 = vadd.f32 %v1065_v22, %v1041_v42  ;;  %v1242_v22 = vld [vmem:[%s20556_s23] sm:$0xff] }
 0x1b9   :  { %v1275_v47 = vunpack.c.h.bf16 %v1242_v22 }
 0x1ba   :  { %v1109_v48 = vadd.f32 %v15344_v40, %v1069_v14  ;;  %v1168_v62 = vpop.permute.xlu0 %1167  ;;  %v1248_v40 = vld [vmem:[%s20556_s23 + $0x24] sm:$0xff]  ;;  %v1274_v14 = vunpack.c.l.bf16 %v1242_v22 }
 0x1bb   :  { %v1178_v43 = vadd.f32 %v1168_v62, %v1138_v33  ;;  %v1253_v33 = vld [vmem:[%s20556_s23 + $0x38] ss:$12 sps:$4 sm:$0xff]   ;;  %v1283_v16 = vunpack.c.l.bf16 %v1248_v40  ;;  %v1284_v18 = vunpack.c.h.bf16 %v1248_v40 }
 0x1bc   :  { %v1137_v32 = vadd.f32 %v1133_v46, %v1109_v48  ;;  %v1291_v9 = vunpack.c.h.bf16 %v1253_v33  ;;  %v1288_v39 = vunpack.c.l.bf16 %v1253_v33  ;;  %v1282_v46 = vunpack.c.l.bf16 %v1249_v41 }
 0x1bd   :  { %v1206_v59 = vadd.f32 %v1202_v0, %v1178_v43  ;;  %1346 = vmatprep.subr.mxu1 %v1284_v18  ;;  %v20363_v43 = vmov 0.0  }
 0x1be   :  { %13237 = vmatprep.subr.mxu0 %v1291_v9  ;;  %1347 = vmatpush1.msra.mxu1 %v1283_v16  ;;  %v15445_v33 = vpop.permute.xlu0 %626 }
 0x1bf   :  { %13238 = vmatpush3.msra.mxu0 %v1291_v9  ;;  %1348 = vmatprep.subr.mxu1 %v1281_v34  ;;  %v1210_v18 = vadd.f32 %v1206_v59, %v15297_v5 }
 0x1c0   :  { %13239 = vmatprep.subr.mxu0 %v1288_v39  ;;  %1349 = vmatpush1.msra.mxu1 %v1280_v19 }
 0x1c1   :  { %13240 = vmatpush3.msra.mxu0 %v1288_v39  ;;  %1386 = vmatprep.mubr.f32.mxu1 %v20363_v43 }
 0x1c2   :  { %v15407_v57 = vpop.permute.xlu1 %713  ;;  %13241 = vmatprep.subr.mxu0 %v1285_v21  ;;  %v15454_v34 = vpop.permute.xlu0 %589 }
 0x1c3   :  { %13242 = vmatpush3.msra.mxu0 %v1285_v21 }
 0x1c4   :  { %13243 = vmatprep.subr.mxu0 %v1282_v46 }
 0x1c5   :  { %13244 = vmatpush3.msra.mxu0 %v1282_v46  ;;  %v15502_v46 = vld [vmem:[%s20557_s3 + $0x60] sm:$0xff] }
 0x1c7   :  { %v15409_v56 = vpop.permute.xlu1 %777 }
 0x1cb   :  { %v1034_v2 = vpop.permute.xlu1 %1033 }
 0x1cc   :  { %v1043_v49 = vadd.f32 %v1034_v2, %v15336_v30  ;;  %v1244_v30 = vld [vmem:[%s20556_s23 + $0xc] sm:$0xff] }
 0x1cd   :  { %v1277_v13 = vunpack.c.l.bf16 %v1244_v30  ;;  %v1278_v61 = vunpack.c.h.bf16 %v1244_v30 }
 0x1ce   :  { %v1071_v55 = vadd.f32 %v1067_v7, %v1043_v49 }
 0x1cf   :  { %v1166_v60 = vpop.permute.xlu1 %1165  ;;  %1350 = vmatprep.subr.mxu1 %v1278_v61 }
 0x1d0   :  { %v1177_v42 = vadd.f32 %v1166_v60, %v1137_v32  ;;  %v1111_v24 = vadd.f32 %v15357_v37, %v1071_v55  ;;  %1351 = vmatpush1.msra.mxu1 %v1277_v13  ;;  %v1245_v37 = vld [vmem:[%s20556_s23 + $0x8] ss:$12 sps:$4 sm:$0xff]   ;;  %v1068_v32 = vmul.f32 %v15128_v3, %v15221_v25  ;;  %v1136_v3 = vmul.f32 %v15169_v1, %v15260_v10  ;;  %s14543_s23 = smov 112  }
 0x1d1   :  { %1352 = vmatprep.subr.mxu1 %v1275_v47  ;;  %v1279_v40 = vunpack.c.h.bf16 %v1245_v37  ;;  %v1276_v8 = vunpack.c.l.bf16 %v1245_v37  ;;  %v1203_v55 = vmul.f32 %v15400_v29, %v15262_v23  ;;  %v15469_v23 = vld [vmem:[%s20557_s3] sm:$0xff]  ;;  %v15497_v47 = vld [vmem:[%s20557_s3 + $0x48] sm:$0xff] }
 0x1d2   :  { %v1205_v48 = vadd.f32 %v1201_v6, %v1177_v42  ;;  %v1139_v62 = vadd.f32 %v1135_v51, %v1111_v24  ;;  %1353 = vmatpush1.msra.mxu1 %v1274_v14  ;;  %v710_v51 = vpop.permute.xlu0 %709 }
 0x1d3   :  { %v1036_v0 = vpop.permute.xlu1 %1035  ;;  %13245 = vmatprep.subr.mxu0 %v1279_v40 }
 0x1d4   :  { %v1044_v7 = vadd.f32 %v1036_v0, %v15346_v12  ;;  %v1209_v2 = vadd.f32 %v1205_v48, %v15290_v28  ;;  %13246 = vmatpush3.msra.mxu0 %v1279_v40  ;;  %v1214_v12 = vmax.f32 %v1210_v18, 0.0  ;;  %v15516_v0 = vld [vmem:[%s20557_s3 + $0xa8] sm:$0xff]  ;;  %v660_v18 = vmul.f32 %v15225_v63, %v15264_v53 }
 0x1d5   :  { %13247 = vmatprep.subr.mxu0 %v1276_v8  ;;  %v661_v53 = vmul.f32 %v15225_v63, %v15292_v38 }
 0x1d6   :  { %v1072_v49 = vadd.f32 %v1068_v32, %v1044_v7  ;;  %v1213_v16 = vmax.f32 %v1209_v2, 0.0  ;;  %13248 = vmatpush3.msra.mxu0 %v1276_v8  ;;  %v15471_v13 = vpop.permute.xlu0 %721  ;;  %v15527_v7 = vld [vmem:[%s20557_s3 + $0x90] sm:$0xff]  ;;  %v596_v8 = vmul.f32 %v15158_v20, %v15274_v4 }
 0x1d7   :  { %v15448_v9 = vpop.permute.xlu1 %653 }
 0x1d8   :  { %1221 = vrot.lane.b32.xlu0 %v1213_v16, %s14537_s1  ;;  %v1112_v25 = vadd.f32 %v15370_v35, %v1072_v49  ;;  %v1204_v35 = vmul.f32 %v15400_v29, %v15252_v17  ;;  %v15481_v17 = vld [vmem:[%s20557_s3 + $0x18] sm:$0xff]  ;;  %v15486_v29 = vld [vmem:[%s20557_s3 + $0x30] sm:$0xff]  ;;  %v636_v49 = vadd.f32 %v15383_v11, %v596_v8 }
 0x1da   :  { %v1140_v19 = vadd.f32 %v1136_v3, %v1112_v25  ;;  %v15492_v14 = vpop.permute.xlu0 %781  ;;  %v597_v25 = vmul.f32 %v15158_v20, %v15285_v31 }
 0x1db   :  { %v1170_v39 = vpop.permute.xlu1 %1169 }
 0x1dc   :  { %v1179_v59 = vadd.f32 %v1170_v39, %v1139_v62  ;;  %1223 = vrot.lane.b32.xlu0 %v1214_v12, %s14537_s1  ;;  %v15511_v62 = vld [vmem:[%s20557_s3 + $0x78] sm:$0xff]  ;;  %v664_v12 = vadd.f32 %v660_v18, %v636_v49  ;;  %v637_v11 = vadd.f32 %v15445_v33, %v597_v25 }
 0x1de   :  { %v1207_v60 = vadd.f32 %v1203_v55, %v1179_v59  ;;  %v631_v37 = vpop.permute.xlu0 %630  ;;  %v598_v59 = vmul.f32 %v15158_v20, %v15301_v44  ;;  %v729_v44 = vmul.f32 %v15210_v45, %v15407_v57 }
 0x1df   :  { %v1172_v1 = vpop.permute.xlu1 %1171 }
 0x1e0   :  { %v1211_v10 = vadd.f32 %v1207_v60, %v15267_v26  ;;  %v1180_v6 = vadd.f32 %v1172_v1, %v1140_v19  ;;  %v728_v19 = vmul.f32 %v15210_v45, %v710_v51  ;;  %v665_v1 = vadd.f32 %v661_v53, %v637_v11 }
 0x1e1   :  { %v796_v51 = vmul.f32 %v15281_v27, %v15409_v56 }
 0x1e2   :  { %v1215_v30 = vmax.f32 %v1211_v10, 0.0  ;;  %v1208_v41 = vadd.f32 %v1204_v35, %v1180_v6  ;;  %v763_v2 = vpop.permute.xlu0 %762  ;;  %v662_v6 = vmul.f32 %v15225_v63, %v15269_v58  ;;  %v599_v58 = vmul.f32 %v15158_v20, %v15454_v34 }
 0x1e3   :  { %v15462_v22 = vpop.permute.xlu1 %717 }
 0x1e4   :  { %1225 = vrot.lane.b32.xlu1 %v1215_v30, %s14537_s1  ;;  %v1212_v42 = vadd.f32 %v1208_v41, %v15396_v36  ;;  %v863_v41 = vrot.slane %v15391_v52, %v15151_v15  ;;  %v639_v57 = vadd.f32 %v631_v37, %v599_v58  ;;  %v730_v52 = vmul.f32 %v15210_v45, %v15462_v22 }
 0x1e5   :  { %v731_v37 = vmul.f32 %v15210_v45, %v15471_v13  ;;  %v797_v22 = vmul.f32 %v15281_v27, %v15492_v14 }
 0x1e6   :  { %v1216_v24 = vmax.f32 %v1212_v42, 0.0  ;;  %v15546_v3 = vpop.permute.xlu0 %789  ;;  %v663_v42 = vmul.f32 %v15225_v63, %v15448_v9 }
 0x1e8   :  { %v15473_v61 = vpop.permute.xlu1 %845  ;;  %1227 = vrot.lane.b32.xlu0 %v1216_v24, %s14537_s1  ;;  %1512 = vrot.lane.b32.xlu1 %v15469_v23, %s14539_s7  ;;  %v667_v34 = vadd.f32 %v663_v42, %v639_v57 }
 0x1e9   :  { %v864_v8 = vmul.f32 %v863_v41, %v15473_v61 }
 0x1ea   :  { %v695_v55 = vpop.permute.xlu0 %694 }
 0x1eb   :  { %v705_v10 = vadd.f32 %v695_v55, %v665_v1  ;;  %v799_v55 = vmul.f32 %v15281_v27, %v15546_v3 }
 0x1ec   :  { %v629_v21 = vpop.permute.xlu1 %628  ;;  %1514 = vrot.lane.b32.xlu0 %v15481_v17, %s14539_s7  ;;  %1516 = vrot.lane.b32.xlu1 %v15486_v29, %s14539_s7 }
 0x1ed   :  { %v638_v33 = vadd.f32 %v629_v21, %v598_v59  ;;  %v733_v24 = vadd.f32 %v729_v44, %v705_v10 }
 0x1ef   :  { %v666_v30 = vadd.f32 %v662_v6, %v638_v33  ;;  %v773_v9 = vadd.f32 %v763_v2, %v733_v24 }
 0x1f0   :  { %v761_v48 = vpop.permute.xlu1 %760  ;;  %1518 = vrot.lane.b32.xlu0 %v15497_v47, %s14539_s7  ;;  %1520 = vrot.lane.b32.xlu1 %v15502_v46, %s14539_s7 }
 0x1f1   :  { %v801_v2 = vadd.f32 %v797_v22, %v773_v9  ;;  %v15677_v22 = vld [vmem:[%s20557_s3 + $0x20] sm:$0xff] }
 0x1f4   :  { %v15518_v32 = vpop.permute.xlu1 %785  ;;  %1522 = vrot.lane.b32.xlu0 %v15511_v62, %s14539_s7  ;;  %1526 = vrot.lane.b32.xlu1 %v15516_v0, %s14539_s7 }
 0x1f5   :  { %v798_v53 = vmul.f32 %v15281_v27, %v15518_v32 }
 0x1f8   :  { %1524 = vrot.lane.b32.xlu0 %v15527_v7, %s14539_s7  ;;  %1787 = vrot.lane.b32.xlu1 %v15469_v23, %s14537_s1 }
 0x1f9   :  { %v15533_v40 = vpop.permute.xlu1 %849 }
 0x1fa   :  { %v865_v45 = vmul.f32 %v863_v41, %v15533_v40 }
 0x1fc   :  { %1789 = vrot.lane.b32.xlu0 %v15481_v17, %s14537_s1  ;;  %1791 = vrot.lane.b32.xlu1 %v15486_v29, %s14537_s1 }
 0x1fd   :  { %v15542_v16 = vpop.permute.xlu1 %853 }
 0x1fe   :  { %v866_v1 = vmul.f32 %v863_v41, %v15542_v16 }
 0x200   :  { %1793 = vrot.lane.b32.xlu0 %v15497_v47, %s14537_s1  ;;  %1797 = vrot.lane.b32.xlu1 %v15511_v62, %s14537_s1 }
 0x201   :  { %v693_v4 = vpop.permute.xlu1 %692 }
 0x202   :  { %v704_v39 = vadd.f32 %v693_v4, %v664_v12  ;;  %v765_v12 = vpop.permute.xlu0 %764 }
 0x204   :  { %v732_v31 = vadd.f32 %v728_v19, %v704_v39  ;;  %1795 = vrot.lane.b32.xlu0 %v15502_v46, %s14537_s1  ;;  %1801 = vrot.lane.b32.xlu1 %v15516_v0, %s14537_s1 }
 0x205   :  { %v767_v60 = vpop.permute.xlu1 %766 }
 0x206   :  { %v772_v35 = vadd.f32 %v761_v48, %v732_v31  ;;  %v858_v6 = vpop.permute.xlu0 %857 }
 0x207   :  { %v867_v44 = vmul.f32 %v863_v41, %v858_v6 }
 0x208   :  { %1799 = vrot.lane.b32.xlu0 %v15527_v7, %s14537_s1  ;;  %1944 = vrot.lane.b32.xlu1 %v15469_v23, %s14540_s4  ;;  %v800_v48 = vadd.f32 %v796_v51, %v772_v35 }
 0x209   :  { %v697_v38 = vpop.permute.xlu1 %696 }
 0x20a   :  { %v706_v21 = vadd.f32 %v697_v38, %v666_v30 }
 0x20c   :  { %1946 = vrot.lane.b32.xlu0 %v15481_v17, %s14540_s4  ;;  %1948 = vrot.lane.b32.xlu1 %v15486_v29, %s14540_s4  ;;  %v734_v49 = vadd.f32 %v730_v52, %v706_v21 }
 0x20d   :  { %v829_v56 = vpop.permute.xlu1 %828 }
 0x20e   :  { %v840_v20 = vadd.f32 %v829_v56, %v800_v48  ;;  %v774_v11 = vadd.f32 %v765_v12, %v734_v49 }
 0x210   :  { %v868_v63 = vadd.f32 %v864_v8, %v840_v20  ;;  %1950 = vrot.lane.b32.xlu0 %v15497_v47, %s14540_s4  ;;  %1952 = vrot.lane.b32.xlu1 %v15502_v46, %s14540_s4  ;;  %v802_v14 = vadd.f32 %v798_v53, %v774_v11 }
 0x211   :  { %v699_v18 = vpop.permute.xlu1 %698 }
 0x212   :  { %v892_v61 = vadd.f32 %v15290_v28, %v868_v63  ;;  %v707_v25 = vadd.f32 %v699_v18, %v667_v34 }
 0x214   :  { %v735_v4 = vadd.f32 %v731_v37, %v707_v25  ;;  %v896_v19 = vmax.f32 %v892_v61, 0.0  ;;  %1954 = vrot.lane.b32.xlu0 %v15511_v62, %s14540_s4  ;;  %v15686_v61 = vld [vmem:[%s20557_s3 + $0x8] sm:$0xff]  ;;  %v15695_v25 = vld [vmem:[%s20557_s3 + $0x38] sm:$0xff] }
 0x215   :  { %v831_v39 = vpop.permute.xlu1 %830 }
 0x216   :  { %v841_v13 = vadd.f32 %v831_v39, %v801_v2  ;;  %901 = vst.msk [vmem:[#allocation2] sm:$0xff] %vm900_vm0, %v896_v19  ;;  %v775_v59 = vadd.f32 %v767_v60, %v735_v4  ;;  %v15710_v4 = vld [vmem:[%s20557_s3 + $0x50] sm:$0xff]  ;;  %v15719_v2 = vld [vmem:[%s20557_s3 + $0x68] sm:$0xff]  ;;  %v15730_v19 = vld [vmem:[%s20557_s3 + $0x80] sm:$0xff] }
 0x218   :  { %v869_v28 = vadd.f32 %v865_v45, %v841_v13  ;;  %v803_v32 = vadd.f32 %v799_v55, %v775_v59  ;;  %v15753_v13 = vld [vmem:[%s20557_s3 + $0xb0] sm:$0xff] }
 0x219   :  { %v833_v31 = vpop.permute.xlu1 %832 }
 0x21a   :  { %v893_v33 = vadd.f32 %v15297_v5, %v869_v28  ;;  %v842_v10 = vadd.f32 %v833_v31, %v802_v14  ;;  %v15758_v28 = vld [vmem:[%s20557_s3 + $0x98] sm:$0xff] }
 0x21c   :  { %v870_v35 = vadd.f32 %v866_v1, %v842_v10  ;;  %v897_v38 = vmax.f32 %v893_v33, 0.0 }
 0x21d   :  { %v835_v40 = vpop.permute.xlu1 %834 }
 0x21e   :  { %v894_v51 = vadd.f32 %v15267_v26, %v870_v35  ;;  %v843_v30 = vadd.f32 %v835_v40, %v803_v32  ;;  %902 = vst.msk [vmem:[#allocation2 + $0x8] sm:$0xff] %vm900_vm0, %v897_v38  ;;  %v2867_v35 = vld [vmem:[%s20558_s5 + $0x8] sm:$0xff]  ;;  %v2866_v38 = vld [vmem:[%s20558_s5] sm:$0xff] }
 0x21f   :  { %v2870_v40 = vld [vmem:[%s20558_s5 + $0x20] sm:$0xff] }
 0x220   :  { %v871_v60 = vadd.f32 %v867_v44, %v843_v30  ;;  %v898_v58 = vmax.f32 %v894_v51, 0.0  ;;  %v2868_v51 = vld [vmem:[%s20558_s5 + $0x10] sm:$0xff] }
 0x221   :  { %v2872_v30 = vld [vmem:[%s20558_s5 + $0x30] sm:$0xff] }
 0x222   :  { %v895_v27 = vadd.f32 %v15396_v36, %v871_v60  ;;  %903 = vst.msk [vmem:[#allocation2 + $0x10] sm:$0xff] %vm900_vm0, %v898_v58 }
 0x224   :  { %v899_v16 = vmax.f32 %v895_v27, 0.0  ;;  %v2869_v27 = vld [vmem:[%s20558_s5 + $0x18] sm:$0xff] }
 0x226   :  { %904 = vst.msk [vmem:[#allocation2 + $0x18] sm:$0xff] %vm900_vm0, %v899_v16 }
 0x24a   :  { %v1222_v5 = vpop.permute.xlu0 %1221 }
 0x24b   :  { %1234 = vst.msk [vmem:[#allocation2] sm:$0xff] %vm1233_vm1, %v1222_v5  ;;  %v2871_v5 = vld [vmem:[%s20558_s5 + $0x28] sm:$0xff] }
 0x24e   :  { %v1224_v3 = vpop.permute.xlu0 %1223 }
 0x24f   :  { %1235 = vst.msk [vmem:[#allocation2 + $0x8] sm:$0xff] %vm1233_vm1, %v1224_v3 }
 0x252   :  { %v1238_v26 = vld [vmem:[#allocation2] sm:$0xff] }
 0x253   :  { %1387 = vmatmul.mubr.f32.vlgmr.msra.gmra.mxu1 %v1238_v26  ;;  %13249 = vmatprep.mubr.f32.mxu0 %v1238_v26  ;;  %v2873_v26 = vld [vmem:[%s20558_s5 + $0x38] sm:$0xff]  ;;  %s20616_s5 = sld [smem:[#allocation45_spill]] }
 0x254   :  { %1392 = vmatprep.mubr.f32.mxu1 %v20363_v43 }
 0x256   :  { %v1226_v41 = vpop.permute.xlu1 %1225  ;;  %v1239_v42 = vld [vmem:[#allocation2 + $0x8] sm:$0xff] }
 0x257   :  { %1236 = vst.msk [vmem:[#allocation2 + $0x10] sm:$0xff] %vm1233_vm1, %v1226_v41  ;;  %1393 = vmatmul.mubr.f32.gmra.mxu1 %v1239_v42  ;;  %13250 = vmatmul.mubr.f32.vlgmr.msra.gmra.mxu0 %v1239_v42 }
 0x258   :  { %1398 = vmatprep.mubr.f32.mxu1 %v20363_v43 }
 0x25a   :  { %v1228_v36 = vpop.permute.xlu0 %1227  ;;  %v1513_v48 = vpop.permute.xlu1 %1512 }
 0x25b   :  { %1237 = vst.msk [vmem:[#allocation2 + $0x18] sm:$0xff] %vm1233_vm1, %v1228_v36 }
 0x25e   :  { %v1240_v24 = vld [vmem:[#allocation2 + $0x10] sm:$0xff]  ;;  %v15619_v57 = vpop.permute.xlu1 %1516  ;;  %v15705_v12 = vpop.permute.xlu0 %1514 }
 0x25f   :  { %1399 = vmatmul.mubr.f32.gmra.mxu1 %v1240_v24  ;;  %13252 = vmatprep.mubr.f32.mxu0 %v1240_v24 }
 0x260   :  { %1404 = vmatprep.mubr.f32.mxu1 %v20363_v43 }
 0x262   :  { %v1241_v21 = vld [vmem:[#allocation2 + $0x18] sm:$0xff]  ;;  %v15621_v56 = vpop.permute.xlu1 %1520  ;;  %v15721_v11 = vpop.permute.xlu0 %1518 }
 0x263   :  { %1405 = vmatmul.mubr.f32.gmra.mxu1 %v1241_v21  ;;  %13253 = vmatmul.mubr.f32.gmra.mxu0 %v1241_v21 }
 0x264   :  { %13263 = vmatprep.mubr.msk.f32.mxu1 %vm1544_vm2, %v1513_v48 }
 0x266   :  { %v15623_v52 = vpop.permute.xlu1 %1526  ;;  %v15738_v53 = vpop.permute.xlu0 %1522 }
 0x26a   :  { %v1788_v8 = vpop.permute.xlu1 %1787  ;;  %v15744_v45 = vpop.permute.xlu0 %1524 }
 0x26b   :  { %13303 = vmatprep.mubr.msk.f32.mxu0 %vm1544_vm2, %v1788_v8 }
 0x26e   :  { %v15764_v14 = vpop.permute.xlu0 %1789  ;;  %v15776_v31 = vpop.permute.xlu1 %1791 }
 0x272   :  { %v15770_v59 = vpop.permute.xlu0 %1793  ;;  %v15788_v1 = vpop.permute.xlu1 %1797 }
 0x276   :  { %v15782_v55 = vpop.permute.xlu0 %1795  ;;  %v15796_v10 = vpop.permute.xlu1 %1801 }
 0x27a   :  { %v15790_v33 = vpop.permute.xlu0 %1799  ;;  %v15809_v32 = vpop.permute.xlu1 %1944 }
 0x27e   :  { %v15802_v6 = vpop.permute.xlu0 %1946  ;;  %v15825_v60 = vpop.permute.xlu1 %1948 }
 0x282   :  { %v15817_v44 = vpop.permute.xlu0 %1950  ;;  %v15832_v16 = vpop.permute.xlu1 %1952 }
 0x286   :  { %v15827_v58 = vpop.permute.xlu0 %1954 }
 0x313   :  { %v15626_v20 = vpop.f32.mrf.mxu1 }
 0x314   :  { %1532 = vrot.lane.b32.xlu0 %v15626_v20, %s14539_s7 }
 0x315   :  { %v15630_v34 = vpop.f32.mrf.mxu1 }
 0x317   :  { %v15632_v49 = vpop.f32.mrf.mxu1 }
 0x318   :  { %1803 = vrot.lane.b32.xlu0 %v15626_v20, %s14537_s1  ;;  %1534 = vrot.lane.b32.xlu1 %v15632_v49, %s14539_s7 }
 0x319   :  { %v15642_v63 = vpop.f32.mrf.mxu1 }
 0x31c   :  { %1960 = vrot.lane.b32.xlu0 %v15626_v20, %s14540_s4  ;;  %1805 = vrot.lane.b32.xlu1 %v15632_v49, %s14537_s1 }
 0x31f   :  { %v15644_v9 = vpop.f32.mrf.mxu1 }
 0x320   :  { %1962 = vrot.lane.b32.xlu1 %v15632_v49, %s14540_s4  ;;  %1536 = vrot.lane.b32.xlu0 %v15644_v9, %s14539_s7 }
 0x321   :  { %v15650_v18 = vpop.f32.mrf.mxu1 }
 0x323   :  { %v15652_v37 = vpop.f32.mrf.mxu1 }
 0x324   :  { %1956 = vrot.lane.b32.xlu0 %v15527_v7, %s14540_s4  ;;  %1538 = vrot.lane.b32.xlu1 %v15652_v37, %s14539_s7 }
 0x325   :  { %v15732_v39 = vpop.f32.mrf.mxu1 }
 0x328   :  { %1807 = vrot.lane.b32.xlu0 %v15644_v9, %s14537_s1  ;;  %1958 = vrot.lane.b32.xlu1 %v15516_v0, %s14540_s4 }
 0x32c   :  { %1964 = vrot.lane.b32.xlu0 %v15644_v9, %s14540_s4  ;;  %2427 = vrot.lane.b32.xlu1 %v15650_v18, %s14537_s1 }
 0x330   :  { %2270 = vrot.lane.b32.xlu0 %v15650_v18, %s14539_s7  ;;  %2425 = vrot.lane.b32.xlu1 %v15642_v63, %s14537_s1 }
 0x334   :  { %2268 = vrot.lane.b32.xlu0 %v15642_v63, %s14539_s7  ;;  %1809 = vrot.lane.b32.xlu1 %v15652_v37, %s14537_s1 }
 0x338   :  { %2266 = vrot.lane.b32.xlu0 %v15630_v34, %s14539_s7  ;;  %2248 = vrot.lane.b32.xlu1 %v15677_v22, %s14539_s7 }
 0x33c   :  { %2246 = vrot.lane.b32.xlu0 %v15686_v61, %s14539_s7  ;;  %2407 = vrot.lane.b32.xlu1 %v15686_v61, %s14537_s1 }
 0x340   :  { %2423 = vrot.lane.b32.xlu0 %v15630_v34, %s14537_s1  ;;  %2250 = vrot.lane.b32.xlu1 %v15695_v25, %s14539_s7 }
 0x344   :  { %2409 = vrot.lane.b32.xlu0 %v15677_v22, %s14537_s1  ;;  %1966 = vrot.lane.b32.xlu1 %v15652_v37, %s14540_s4 }
 0x348   :  { %2252 = vrot.lane.b32.xlu0 %v15710_v4, %s14539_s7  ;;  %2411 = vrot.lane.b32.xlu1 %v15695_v25, %s14537_s1 }
 0x34c   :  { %2413 = vrot.lane.b32.xlu0 %v15710_v4, %s14537_s1  ;;  %2254 = vrot.lane.b32.xlu1 %v15719_v2, %s14539_s7 }
 0x350   :  { %2256 = vrot.lane.b32.xlu0 %v15730_v19, %s14539_s7  ;;  %2272 = vrot.lane.b32.xlu1 %v15732_v39, %s14539_s7 }
 0x354   :  { %2415 = vrot.lane.b32.xlu0 %v15719_v2, %s14537_s1  ;;  %2429 = vrot.lane.b32.xlu1 %v15732_v39, %s14537_s1 }
 0x358   :  { %2584 = vrot.lane.b32.xlu0 %v15650_v18, %s14540_s4  ;;  %2417 = vrot.lane.b32.xlu1 %v15730_v19, %s14537_s1 }
 0x35c   :  { %2260 = vrot.lane.b32.xlu0 %v15753_v13, %s14539_s7  ;;  %2258 = vrot.lane.b32.xlu1 %v15758_v28, %s14539_s7 }
 0x360   :  { %2419 = vrot.lane.b32.xlu0 %v15758_v28, %s14537_s1  ;;  %2582 = vrot.lane.b32.xlu1 %v15642_v63, %s14540_s4 }
 0x364   :  { %2580 = vrot.lane.b32.xlu0 %v15630_v34, %s14540_s4  ;;  %2586 = vrot.lane.b32.xlu1 %v15732_v39, %s14540_s4 }
 0x368   :  { %2421 = vrot.lane.b32.xlu1 %v15753_v13, %s14537_s1  ;;  %2566 = vrot.lane.b32.xlu0 %v15677_v22, %s14540_s4 }
 0x36c   :  { %2564 = vrot.lane.b32.xlu1 %v15686_v61, %s14540_s4  ;;  %2570 = vrot.lane.b32.xlu0 %v15710_v4, %s14540_s4 }
 0x370   :  { %2568 = vrot.lane.b32.xlu1 %v15695_v25, %s14540_s4  ;;  %2574 = vrot.lane.b32.xlu0 %v15730_v19, %s14540_s4 }
 0x374   :  { %2572 = vrot.lane.b32.xlu1 %v15719_v2, %s14540_s4  ;;  %2578 = vrot.lane.b32.xlu0 %v15753_v13, %s14540_s4 }
 0x378   :  { %2576 = vrot.lane.b32.xlu1 %v15758_v28, %s14540_s4  ;;  %2881 = vperm.xlu0 %14467, %v2867_v35  }
 0x37c   :  { %2876 = vperm.xlu1 %14466, %v2866_v38   ;;  %2896 = vperm.xlu0 %14467, %v2870_v40  }
 0x380   :  { %2886 = vperm.xlu1 %14466, %v2868_v51   ;;  %2906 = vperm.xlu0 %14467, %v2872_v30  }
 0x384   :  { %2891 = vperm.xlu1 %14466, %v2869_v27  }
 0x386   :  { %v1533_v3 = vpop.permute.xlu0 %1532 }
 0x388   :  { %2901 = vperm.xlu1 %14466, %v2871_v5  }
 0x38a   :  { %v1804_v41 = vpop.permute.xlu0 %1803  ;;  %v1535_v42 = vpop.permute.xlu1 %1534 }
 0x38c   :  { %2911 = vperm.xlu1 %14466, %v2873_v26  }
 0x38e   :  { %v15840_v36 = vpop.permute.xlu0 %1960  ;;  %v1806_v24 = vpop.permute.xlu1 %1805 }
 0x392   :  { %v15842_v21 = vpop.permute.xlu1 %1962  ;;  %v1537_v48 = vpop.permute.xlu0 %1536 }
 0x396   :  { %v15844_v8 = vpop.permute.xlu0 %1956  ;;  %v1539_v35 = vpop.permute.xlu1 %1538 }
 0x397   :  { %13255 = vmatprep.subr.mxu1 %v1539_v35 }
 0x398   :  { %13256 = vmatpush3.msra.mxu1 %v1539_v35  ;;  %v16058_v35 = vld [vmem:[%s20560_s6] sm:$0xff] }
 0x399   :  { %13257 = vmatprep.subr.mxu1 %v1537_v48  ;;  %3099 = vrot.lane.b32.xlu0 %v16058_v35, %s14537_s1 }
 0x39a   :  { %v1808_v38 = vpop.permute.xlu0 %1807  ;;  %13258 = vmatpush3.msra.mxu1 %v1537_v48  ;;  %v15846_v40 = vpop.permute.xlu1 %1958 }
 0x39b   :  { %13259 = vmatprep.subr.mxu1 %v1535_v42 }
 0x39c   :  { %13260 = vmatpush3.msra.mxu1 %v1535_v42  ;;  %v12469_v42 = vld [vmem:[%s20559_s8 + $0x8] sm:$0xff]  }
 0x39d   :  { %13261 = vmatprep.subr.mxu1 %v1533_v3 }
 0x39e   :  { %v15848_v51 = vpop.permute.xlu0 %1964  ;;  %13262 = vmatpush3.msra.mxu1 %v1533_v3  ;;  %v15850_v30 = vpop.permute.xlu1 %2427 }
 0x39f   :  { %13264 = vmatmul.mubr.msk.f32.vlgmr.msra.gmra.mxu1 %vm1544_vm2, %v15705_v12  ;;  %13275 = vmatprep.subr.mxu1 %v15652_v37 }
 0x3a0   :  { %13266 = vmatprep.mubr.msk.f32.mxu1 %vm1544_vm2, %v15619_v57  ;;  %13276 = vmatpush3.msra.mxu1 %v15652_v37 }
 0x3a1   :  { %13277 = vmatprep.subr.mxu1 %v15644_v9 }
 0x3a2   :  { %v15859_v27 = vpop.permute.xlu0 %2270  ;;  %13278 = vmatpush3.msra.mxu1 %v15644_v9  ;;  %v15862_v5 = vpop.permute.xlu1 %2425 }
 0x3a3   :  { %13267 = vmatmul.mubr.msk.f32.gmra.mxu1 %vm1544_vm2, %v15721_v11  ;;  %13279 = vmatprep.subr.mxu1 %v15632_v49 }
 0x3a4   :  { %13269 = vmatprep.mubr.msk.f32.mxu1 %vm1544_vm2, %v15621_v56  ;;  %13280 = vmatpush3.msra.mxu1 %v15632_v49 }
 0x3a5   :  { %13281 = vmatprep.subr.mxu1 %v15626_v20 }
 0x3a6   :  { %v15871_v57 = vpop.permute.xlu0 %2268  ;;  %13282 = vmatpush3.msra.mxu1 %v15626_v20  ;;  %v1810_v37 = vpop.permute.xlu1 %1809 }
 0x3a7   :  { %13270 = vmatmul.mubr.msk.f32.gmra.mxu1 %vm1544_vm2, %v15738_v53  ;;  %13295 = vmatprep.subr.mxu0 %v1810_v37 }
 0x3a8   :  { %13272 = vmatprep.mubr.msk.f32.mxu1 %vm1544_vm2, %v15744_v45  ;;  %13296 = vmatpush3.msra.mxu0 %v1810_v37  ;;  %v16114_v37 = vld [vmem:[%s20560_s6 + $0x140] sm:$0xff] }
 0x3a9   :  { %13297 = vmatprep.subr.mxu0 %v1808_v38  ;;  %20568 = vst [vmem:[#allocation20_spill] sm:$0xff] %v16114_v37 }
 0x3aa   :  { %v15878_v9 = vpop.permute.xlu0 %2266  ;;  %13298 = vmatpush3.msra.mxu0 %v1808_v38  ;;  %v15880_v56 = vpop.permute.xlu1 %2248  ;;  %v16063_v38 = vld [vmem:[%s20560_s6 + $0x28] sm:$0xff] }
 0x3ab   :  { %13273 = vmatmul.mubr.msk.f32.gmra.mxu1 %vm1544_vm2, %v15623_v52  ;;  %13299 = vmatprep.subr.mxu0 %v1806_v24  ;;  %20561 = vst [vmem:[#allocation13_spill] sm:$0xff] %v16063_v38 }
 0x3ac   :  { %13300 = vmatpush3.msra.mxu0 %v1806_v24  ;;  %13283 = vmatprep.mubr.msk.f32.mxu1 %vm1544_vm2, %v15469_v23  ;;  %v12467_v24 = vunpack.c.l.bf16 %v12469_v42 }
 0x3ad   :  { %13301 = vmatprep.subr.mxu0 %v1804_v41  ;;  %3101 = vrot.lane.b32.xlu1 %v16063_v38, %s14537_s1 }
 0x3ae   :  { %v15886_v20 = vpop.permute.xlu0 %2246  ;;  %13302 = vmatpush3.msra.mxu0 %v1804_v41  ;;  %v15888_v49 = vpop.permute.xlu1 %2407  ;;  %v2728_v41 = vld [vmem:[%s20557_s3 + $0xb8] sm:$0xff] }
 0x3af   :  { %13284 = vmatmul.mubr.msk.f32.vlgmr.msra.gmra.mxu1 %vm1544_vm2, %v15481_v17  ;;  %13304 = vmatmul.mubr.msk.f32.vlgmr.msra.gmra.mxu0 %vm1544_vm2, %v15764_v14 }
 0x3b0   :  { %13335 = vmatprep.subr.mxu0 %v15732_v39  ;;  %13306 = vmatprep.mubr.msk.f32.mxu0 %vm1544_vm2, %v15776_v31  ;;  %v2721_v31 = vld [vmem:[%s20557_s3 + $0x10] sm:$0xff] }
 0x3b1   :  { %13336 = vmatpush3.msra.mxu0 %v15732_v39  ;;  %13286 = vmatprep.mubr.msk.f32.mxu1 %vm1544_vm2, %v15486_v29 }
 0x3b2   :  { %13337 = vmatprep.subr.mxu0 %v15650_v18  ;;  %v15901_v23 = vpop.permute.xlu0 %2423  ;;  %v15903_v52 = vpop.permute.xlu1 %2250 }
 0x3b3   :  { %13338 = vmatpush3.msra.mxu0 %v15650_v18  ;;  %13287 = vmatmul.mubr.msk.f32.gmra.mxu1 %vm1544_vm2, %v15497_v47 }
 0x3b4   :  { %13307 = vmatmul.mubr.msk.f32.gmra.mxu0 %vm1544_vm2, %v15770_v59  ;;  %13339 = vmatprep.subr.mxu0 %v15642_v63 }
 0x3b5   :  { %13309 = vmatprep.mubr.msk.f32.mxu0 %vm1544_vm2, %v15782_v55  ;;  %13340 = vmatpush3.msra.mxu0 %v15642_v63  ;;  %v2722_v55 = vld [vmem:[%s20557_s3 + $0x28] sm:$0xff] }
 0x3b6   :  { %13341 = vmatprep.subr.mxu0 %v15630_v34  ;;  %v15915_v17 = vpop.permute.xlu0 %2409  ;;  %13289 = vmatprep.mubr.msk.f32.mxu1 %vm1544_vm2, %v15502_v46  ;;  %v1967_v29 = vpop.permute.xlu1 %1966 }
 0x3b7   :  { %13342 = vmatpush3.msra.mxu0 %v15630_v34  ;;  %13290 = vmatmul.mubr.msk.f32.gmra.mxu1 %vm1544_vm2, %v15511_v62 }
 0x3b8   :  { %13310 = vmatmul.mubr.msk.f32.gmra.mxu0 %vm1544_vm2, %v15788_v1  ;;  %13315 = vmatprep.subr.mxu1 %v1967_v29 }
 0x3b9   :  { %13312 = vmatprep.mubr.msk.f32.mxu0 %vm1544_vm2, %v15790_v33  ;;  %13316 = vmatpush3.msra.mxu1 %v1967_v29  ;;  %v2723_v33 = vld [vmem:[%s20557_s3 + $0x40] sm:$0xff]  ;;  %v16170_v29 = vld [vmem:[%s20560_s6 + $0x30] sm:$0xff] }
 0x3ba   :  { %13317 = vmatprep.subr.mxu1 %v15848_v51  ;;  %v15927_v47 = vpop.permute.xlu0 %2252  ;;  %13292 = vmatprep.mubr.msk.f32.mxu1 %vm1544_vm2, %v15527_v7  ;;  %v2412_v46 = vpop.permute.xlu1 %2411  ;;  %20576 = vst [vmem:[#allocation28_spill] sm:$0xff] %v16170_v29 }
 0x3bb   :  { %13318 = vmatpush3.msra.mxu1 %v15848_v51  ;;  %v16077_v51 = vld [vmem:[%s20560_s6 + $0x78] sm:$0xff] }
 0x3bc   :  { %13293 = vmatmul.mubr.msk.f32.gmra.mxu1 %vm1544_vm2, %v15516_v0  ;;  %13313 = vmatmul.mubr.msk.f32.gmra.mxu0 %vm1544_vm2, %v15796_v10  ;;  %20563 = vst [vmem:[#allocation15_spill] sm:$0xff] %v16077_v51 }
 0x3bd   :  { %13319 = vmatprep.subr.mxu1 %v15842_v21  ;;  %13323 = vmatprep.mubr.msk.f32.mxu1 %vm1544_vm2, %v15809_v32  ;;  %v2725_v32 = vld [vmem:[%s20557_s3 + $0x70] sm:$0xff] }
 0x3be   :  { %13320 = vmatpush3.msra.mxu1 %v15842_v21  ;;  %v15940_v62 = vpop.permute.xlu0 %2413  ;;  %13343 = vmatprep.mubr.msk.f32.mxu0 %vm1544_vm2, %v15686_v61  ;;  %v2255_v7 = vpop.permute.xlu1 %2254  ;;  %v12462_v21 = vld [vmem:[%s20559_s8] sm:$0xff]  }
 0x3bf   :  { %13321 = vmatprep.subr.mxu1 %v15840_v36  ;;  %v12464_v48 = vunpack.c.h.bf16 %v12462_v21  ;;  %3105 = vrot.lane.b32.xlu1 %v16077_v51, %s14537_s1 }
 0x3c0   :  { %13322 = vmatpush3.msra.mxu1 %v15840_v36  ;;  %13344 = vmatmul.mubr.msk.f32.vlgmr.msra.gmra.mxu0 %vm1544_vm2, %v15677_v22  ;;  %v13251_v22 = vpop.f32.mrf.mxu0  ;;  %v12468_v36 = vunpack.c.h.bf16 %v12469_v42 }
 0x3c1   :  { %13324 = vmatmul.mubr.msk.f32.vlgmr.msra.gmra.mxu1 %vm1544_vm2, %v15802_v6  ;;  %13346 = vmatprep.mubr.msk.f32.mxu0 %vm1544_vm2, %v15695_v25  ;;  %v2724_v6 = vld [vmem:[%s20557_s3 + $0x58] sm:$0xff] }
 0x3c2   :  { %13326 = vmatprep.mubr.msk.f32.mxu1 %vm1544_vm2, %v15825_v60  ;;  %v2257_v0 = vpop.permute.xlu0 %2256  ;;  %v2273_v34 = vpop.permute.xlu1 %2272 }
 0x3c3   :  { %13355 = vmatprep.subr.mxu1 %v2273_v34  ;;  %v1477_v12 = vpop.f32.mrf.mxu0 }
 0x3c4   :  { %13347 = vmatmul.mubr.msk.f32.gmra.mxu0 %vm1544_vm2, %v15710_v4  ;;  %13356 = vmatpush3.msra.mxu1 %v2273_v34 }
 0x3c5   :  { %13327 = vmatmul.mubr.msk.f32.gmra.mxu1 %vm1544_vm2, %v15817_v44  ;;  %13357 = vmatprep.subr.mxu1 %v15859_v27  ;;  %v13254_v11 = vpop.f32.mrf.mxu0 }
 0x3c6   :  { %13329 = vmatprep.mubr.msk.f32.mxu1 %vm1544_vm2, %v15832_v16  ;;  %v2416_v63 = vpop.permute.xlu0 %2415  ;;  %13358 = vmatpush3.msra.mxu1 %v15859_v27  ;;  %v2430_v18 = vpop.permute.xlu1 %2429  ;;  %v2727_v16 = vld [vmem:[%s20557_s3 + $0xa0] sm:$0xff]  ;;  %v16091_v27 = vld [vmem:[%s20560_s6 + $0xc8] sm:$0xff] }
 0x3c7   :  { %13349 = vmatprep.mubr.msk.f32.mxu0 %vm1544_vm2, %v15719_v2  ;;  %13359 = vmatprep.subr.mxu1 %v15871_v57  ;;  %v1487_v53 = vpop.f32.mrf.mxu0  ;;  %20565 = vst [vmem:[#allocation17_spill] sm:$0xff] %v16091_v27 }
 0x3c8   :  { %13350 = vmatmul.mubr.msk.f32.gmra.mxu0 %vm1544_vm2, %v15730_v19  ;;  %13375 = vmatprep.subr.mxu0 %v2430_v18 }
 0x3c9   :  { %13330 = vmatmul.mubr.msk.f32.gmra.mxu1 %vm1544_vm2, %v15827_v58  ;;  %13376 = vmatpush3.msra.mxu0 %v2430_v18  ;;  %v2726_v58 = vld [vmem:[%s20557_s3 + $0x88] sm:$0xff]  ;;  %s14541_s3 = smov 104  }
 0x3ca   :  { %13332 = vmatprep.mubr.msk.f32.mxu1 %vm1544_vm2, %v15844_v8  ;;  %13360 = vmatpush3.msra.mxu1 %v15871_v57  ;;  %v2585_v61 = vpop.permute.xlu0 %2584  ;;  %v2418_v25 = vpop.permute.xlu1 %2417  ;;  %v12463_v8 = vunpack.c.l.bf16 %v12462_v21  ;;  %v16105_v57 = vld [vmem:[%s20560_s6 + $0x118] sm:$0xff] }
 0x3cb   :  { %13361 = vmatprep.subr.mxu1 %v15878_v9  ;;  %13377 = vmatprep.subr.mxu0 %v15850_v30  ;;  %20567 = vst [vmem:[#allocation19_spill] sm:$0xff] %v16105_v57 }
 0x3cc   :  { %13362 = vmatpush3.msra.mxu1 %v15878_v9  ;;  %13352 = vmatprep.mubr.msk.f32.mxu0 %vm1544_vm2, %v15758_v28  ;;  %v16119_v9 = vld [vmem:[%s20560_s6 + $0x168] sm:$0xff] }
 0x3cd   :  { %13378 = vmatpush3.msra.mxu0 %v15850_v30  ;;  %13333 = vmatmul.mubr.msk.f32.gmra.mxu1 %vm1544_vm2, %v15846_v40  ;;  %v16072_v40 = vld [vmem:[%s20560_s6 + $0x50] sm:$0xff]  ;;  %v16086_v30 = vld [vmem:[%s20560_s6 + $0xa0] sm:$0xff]  ;;  %20569 = vst [vmem:[#allocation21_spill] sm:$0xff] %v16119_v9 }
 0x3ce   :  { %13353 = vmatmul.mubr.msk.f32.gmra.mxu0 %vm1544_vm2, %v15753_v13  ;;  %13379 = vmatprep.subr.mxu0 %v15862_v5  ;;  %v2261_v4 = vpop.permute.xlu0 %2260  ;;  %v2259_v2 = vpop.permute.xlu1 %2258  ;;  %20562 = vst [vmem:[#allocation14_spill] sm:$0xff] %v16072_v40  ;;  %20564 = vst [vmem:[#allocation16_spill] sm:$0xff] %v16086_v30 }
 0x3cf   :  { %13363 = vmatprep.mubr.msk.f32.mxu1 %vm1544_vm2, %v15886_v20  ;;  %13380 = vmatpush3.msra.mxu0 %v15862_v5  ;;  %v16100_v5 = vld [vmem:[%s20560_s6 + $0xf0] sm:$0xff]  ;;  %v16133_v20 = vld [vmem:[%s20560_s6 + $0x1b8] sm:$0xff] }
 0x3d0   :  { %13383 = vmatprep.mubr.msk.f32.mxu0 %vm1544_vm2, %v15888_v49  ;;  %13381 = vmatprep.subr.mxu0 %v15901_v23  ;;  %20566 = vst [vmem:[#allocation18_spill] sm:$0xff] %v16100_v5  ;;  %20571 = vst [vmem:[#allocation23_spill] sm:$0xff] %v16133_v20  ;;  %v16142_v49 = vld [vmem:[%s20560_s6 + $0x1e0] sm:$0xff] }
 0x3d1   :  { %13382 = vmatpush3.msra.mxu0 %v15901_v23  ;;  %13364 = vmatmul.mubr.msk.f32.vlgmr.msra.gmra.mxu1 %vm1544_vm2, %v15880_v56  ;;  %v16128_v56 = vld [vmem:[%s20560_s6 + $0x190] sm:$0xff]  ;;  %20572 = vst [vmem:[#allocation24_spill] sm:$0xff] %v16142_v49  ;;  %v16147_v23 = vld [vmem:[%s20560_s6 + $0x208] sm:$0xff] }
 0x3d2   :  { %13384 = vmatmul.mubr.msk.f32.vlgmr.msra.gmra.mxu0 %vm1544_vm2, %v15915_v17  ;;  %13415 = vmatprep.subr.mxu0 %v13254_v11  ;;  %v2420_v19 = vpop.permute.xlu0 %2419  ;;  %v2583_v39 = vpop.permute.xlu1 %2582  ;;  %20570 = vst [vmem:[#allocation22_spill] sm:$0xff] %v16128_v56  ;;  %20573 = vst [vmem:[#allocation25_spill] sm:$0xff] %v16147_v23  ;;  %v16161_v17 = vld [vmem:[%s20560_s6 + $0x258] sm:$0xff] }
 0x3d3   :  { %13366 = vmatprep.mubr.msk.f32.mxu1 %vm1544_vm2, %v15903_v52  ;;  %13386 = vmatprep.mubr.msk.f32.mxu0 %vm1544_vm2, %v2412_v46  ;;  %v16156_v52 = vld [vmem:[%s20560_s6 + $0x230] sm:$0xff]  ;;  %20575 = vst [vmem:[#allocation27_spill] sm:$0xff] %v16161_v17 }
 0x3d4   :  { %13416 = vmatpush3.msra.mxu0 %v13254_v11  ;;  %3103 = vrot.lane.b32.xlu0 %v16072_v40, %s14537_s1  ;;  %20574 = vst [vmem:[#allocation26_spill] sm:$0xff] %v16156_v52 }
 0x3d5   :  { %13417 = vmatprep.subr.mxu0 %v1487_v53  ;;  %13367 = vmatmul.mubr.msk.f32.gmra.mxu1 %vm1544_vm2, %v15927_v47  ;;  %v16175_v47 = vld [vmem:[%s20560_s6 + $0x8] sm:$0xff] }
 0x3d6   :  { %13418 = vmatpush3.msra.mxu0 %v1487_v53  ;;  %13369 = vmatprep.mubr.msk.f32.mxu1 %vm1544_vm2, %v2255_v7  ;;  %v2581_v45 = vpop.permute.xlu0 %2580  ;;  %v2587_v13 = vpop.permute.xlu1 %2586  ;;  %20577 = vst [vmem:[#allocation29_spill] sm:$0xff] %v16175_v47 }
 0x3d7   :  { %13387 = vmatmul.mubr.msk.f32.gmra.mxu0 %vm1544_vm2, %v15940_v62  ;;  %13419 = vmatprep.subr.mxu0 %v13251_v22 }
 0x3d8   :  { %13389 = vmatprep.mubr.msk.f32.mxu0 %vm1544_vm2, %v2416_v63  ;;  %13420 = vmatpush3.msra.mxu0 %v13251_v22 }
 0x3d9   :  { %13421 = vmatprep.subr.mxu0 %v1477_v12  ;;  %13370 = vmatmul.mubr.msk.f32.gmra.mxu1 %vm1544_vm2, %v2257_v0 }
 0x3da   :  { %13422 = vmatpush3.msra.mxu0 %v1477_v12  ;;  %13395 = vmatprep.subr.mxu1 %v2587_v13  ;;  %v2422_v28 = vpop.permute.xlu1 %2421  ;;  %v2567_v14 = vpop.permute.xlu0 %2566 }
 0x3db   :  { %13390 = vmatmul.mubr.msk.f32.gmra.mxu0 %vm1544_vm2, %v2418_v25  ;;  %13372 = vmatprep.mubr.msk.f32.mxu1 %vm1544_vm2, %v2259_v2 }
 0x3dc   :  { %13392 = vmatprep.mubr.msk.f32.mxu0 %vm1544_vm2, %v2420_v19  ;;  %13396 = vmatpush3.msra.mxu1 %v2587_v13 }
 0x3dd   :  { %13397 = vmatprep.subr.mxu1 %v2585_v61  ;;  %13373 = vmatmul.mubr.msk.f32.gmra.mxu1 %vm1544_vm2, %v2261_v4 }
 0x3de   :  { %13398 = vmatpush3.msra.mxu1 %v2585_v61  ;;  %v2565_v59 = vpop.permute.xlu1 %2564  ;;  %v2571_v1 = vpop.permute.xlu0 %2570  ;;  %3107 = vrot.lane.b32.xlu0 %v16086_v30, %s14537_s1 }
 0x3df   :  { %13393 = vmatmul.mubr.msk.f32.gmra.mxu0 %vm1544_vm2, %v2422_v28  ;;  %13399 = vmatprep.subr.mxu1 %v2583_v39 }
 0x3e0   :  { %13400 = vmatpush3.msra.mxu1 %v2583_v39  ;;  %13403 = vmatprep.mubr.msk.f32.mxu1 %vm1544_vm2, %v2565_v59 }
 0x3e1   :  { %13401 = vmatprep.subr.mxu1 %v2581_v45  ;;  %13423 = vmatprep.mubr.msk.f32.mxu0 %vm1544_vm2, %v2721_v31 }
 0x3e2   :  { %13402 = vmatpush3.msra.mxu1 %v2581_v45  ;;  %v2569_v10 = vpop.permute.xlu1 %2568  ;;  %v2575_v60 = vpop.permute.xlu0 %2574  ;;  %3109 = vrot.lane.b32.xlu1 %v16091_v27, %s14537_s1 }
 0x3e3   :  { %13404 = vmatmul.mubr.msk.f32.vlgmr.msra.gmra.mxu1 %vm1544_vm2, %v2567_v14  ;;  %13424 = vmatmul.mubr.msk.f32.vlgmr.msra.gmra.mxu0 %vm1544_vm2, %v2722_v55 }
 0x3e4   :  { %13406 = vmatprep.mubr.msk.f32.mxu1 %vm1544_vm2, %v2569_v10  ;;  %13426 = vmatprep.mubr.msk.f32.mxu0 %vm1544_vm2, %v2723_v33 }
 0x3e5   :  { %13435 = vmatprep.subr.mxu1 %v12468_v36  ;;  %3111 = vrot.lane.b32.xlu0 %v16100_v5, %s14537_s1 }
 0x3e6   :  { %v2573_v44 = vpop.permute.xlu1 %2572  ;;  %v2579_v26 = vpop.permute.xlu0 %2578  ;;  %13436 = vmatpush3.msra.mxu1 %v12468_v36  ;;  %3113 = vrot.lane.b32.xlu1 %v16105_v57, %s14537_s1 }
 0x3e7   :  { %13407 = vmatmul.mubr.msk.f32.gmra.mxu1 %vm1544_vm2, %v2571_v1  ;;  %13427 = vmatmul.mubr.msk.f32.gmra.mxu0 %vm1544_vm2, %v2724_v6 }
 0x3e8   :  { %13409 = vmatprep.mubr.msk.f32.mxu1 %vm1544_vm2, %v2573_v44  ;;  %13429 = vmatprep.mubr.msk.f32.mxu0 %vm1544_vm2, %v2725_v32 }
 0x3e9   :  { %13437 = vmatprep.subr.mxu1 %v12467_v24  ;;  %3115 = vrot.lane.b32.xlu0 %v16114_v37, %s14537_s1 }
 0x3ea   :  { %v2577_v3 = vpop.permute.xlu1 %2576  ;;  %13438 = vmatpush3.msra.mxu1 %v12467_v24  ;;  %3117 = vrot.lane.b32.xlu1 %v16119_v9, %s14537_s1 }
 0x3eb   :  { %13410 = vmatmul.mubr.msk.f32.gmra.mxu1 %vm1544_vm2, %v2575_v60  ;;  %13430 = vmatmul.mubr.msk.f32.gmra.mxu0 %vm1544_vm2, %v2726_v58 }
 0x3ec   :  { %13412 = vmatprep.mubr.msk.f32.mxu1 %vm1544_vm2, %v2577_v3  ;;  %13432 = vmatprep.mubr.msk.f32.mxu0 %vm1544_vm2, %v2727_v16 }
 0x3ed   :  { %13439 = vmatprep.subr.mxu1 %v12464_v48  ;;  %3119 = vrot.lane.b32.xlu0 %v16128_v56, %s14537_s1 }
 0x3ee   :  { %13440 = vmatpush3.msra.mxu1 %v12464_v48  ;;  %3121 = vrot.lane.b32.xlu1 %v16133_v20, %s14537_s1 }
 0x3ef   :  { %13413 = vmatmul.mubr.msk.f32.gmra.mxu1 %vm1544_vm2, %v2579_v26  ;;  %13433 = vmatmul.mubr.msk.f32.gmra.mxu0 %vm1544_vm2, %v2728_v41 }
 0x3f0   :  { %13441 = vmatprep.subr.mxu1 %v12463_v8 }
 0x3f1   :  { %13442 = vmatpush3.msra.mxu1 %v12463_v8  ;;  %3123 = vrot.lane.b32.xlu0 %v16142_v49, %s14537_s1 }
 0x3f2   :  { %3125 = vrot.lane.b32.xlu1 %v16147_v23, %s14537_s1 }
 0x3f5   :  { %3127 = vrot.lane.b32.xlu0 %v16156_v52, %s14537_s1 }
 0x3f6   :  { %3129 = vrot.lane.b32.xlu1 %v16161_v17, %s14537_s1 }
 0x3f9   :  { %3768 = vrot.lane.b32.xlu0 %v16170_v29, %s14537_s1 }
 0x3fa   :  { %3766 = vrot.lane.b32.xlu1 %v16175_v47, %s14537_s1 }
 0x45f   :  { %v13265_v46 = vpop.f32.mrf.mxu1 }
 0x461   :  { %v1627_v62 = vpop.f32.mrf.mxu1 }
 0x463   :  { %v13268_v7 = vpop.f32.mrf.mxu1 }
 0x465   :  { %v1637_v0 = vpop.f32.mrf.mxu1 }
 0x467   :  { %v13271_v34 = vpop.f32.mrf.mxu1 }
 0x469   :  { %v1647_v63 = vpop.f32.mrf.mxu1 }
 0x46b   :  { %v16181_v18 = vpop.f32.mrf.mxu1 }
 0x46d   :  { %v16183_v22 = vpop.f32.mrf.mxu1 }
 0x46f   :  { %v13285_v61 = vpop.f32.mrf.mxu1  ;;  %v13305_v25 = vpop.f32.mrf.mxu0 }
 0x470   :  { %v1754_v8 = vadd.f32 %v13285_v61, %v13265_v46 }
 0x471   :  { %v1748_v12 = vpop.f32.mrf.mxu1  ;;  %v1897_v4 = vpop.f32.mrf.mxu0 }
 0x472   :  { %v1749_v54 = vadd.f32 %v1748_v12, %v1627_v62  ;;  %v1937_v47 = vadd.f32 %v13305_v25, %v1754_v8  ;;  %v2877_v12 = vpop.permute.xlu1 %2876 }
 0x473   :  { %v13288_v2 = vpop.f32.mrf.mxu1 }
 0x474   :  { %v13308_v11 = vpop.f32.mrf.mxu0  ;;  %v1764_v17 = vadd.f32 %v13288_v2, %v13268_v7  ;;  %v1936_v49 = vadd.f32 %v1897_v4, %v1749_v54 }
 0x475   :  { %v1758_v19 = vpop.f32.mrf.mxu1 }
 0x476   :  { %v1907_v39 = vpop.f32.mrf.mxu0  ;;  %v1759_v20 = vadd.f32 %v1758_v19, %v1637_v0  ;;  %v1939_v5 = vadd.f32 %v13308_v11, %v1764_v17 }
 0x477   :  { %v13291_v53 = vpop.f32.mrf.mxu1 }
 0x478   :  { %v13311_v45 = vpop.f32.mrf.mxu0  ;;  %v1774_v9 = vadd.f32 %v13291_v53, %v13271_v34  ;;  %v1938_v61 = vadd.f32 %v1907_v39, %v1759_v20 }
 0x479   :  { %v1768_v13 = vpop.f32.mrf.mxu1 }
 0x47a   :  { %v1917_v28 = vpop.f32.mrf.mxu0  ;;  %v1769_v30 = vadd.f32 %v1768_v13, %v1647_v63  ;;  %v1941_v38 = vadd.f32 %v13311_v45, %v1774_v9  ;;  %v2887_v45 = vpop.permute.xlu1 %2886 }
 0x47c   :  { %v13294_v14 = vpop.f32.mrf.mxu1  ;;  %v13314_v59 = vpop.f32.mrf.mxu0  ;;  %v1940_v34 = vadd.f32 %v1917_v28, %v1769_v30 }
 0x47d   :  { %v1784_v2 = vadd.f32 %v13294_v14, %v16181_v18 }
 0x47e   :  { %v1778_v31 = vpop.f32.mrf.mxu1  ;;  %v16185_v55 = vpop.f32.mrf.mxu0 }
 0x47f   :  { %v1779_v4 = vadd.f32 %v1778_v31, %v16183_v22 }
 0x480   :  { %v13345_v1 = vpop.f32.mrf.mxu0 }
 0x481   :  { %v13325_v33 = vpop.f32.mrf.mxu1  ;;  %v1942_v18 = vadd.f32 %v16185_v55, %v1779_v4 }
 0x482   :  { %v2199_v10 = vpop.f32.mrf.mxu0  ;;  %v2094_v56 = vadd.f32 %v13325_v33, %v1937_v47 }
 0x483   :  { %v2054_v6 = vpop.f32.mrf.mxu1 }
 0x484   :  { %v13348_v32 = vpop.f32.mrf.mxu0  ;;  %v2093_v27 = vadd.f32 %v2054_v6, %v1936_v49  ;;  %v2239_v40 = vadd.f32 %v13345_v1, %v2094_v56 }
 0x485   :  { %v13328_v44 = vpop.f32.mrf.mxu1 }
 0x486   :  { %v2209_v60 = vpop.f32.mrf.mxu0  ;;  %v2096_v62 = vadd.f32 %v13328_v44, %v1939_v5  ;;  %v2238_v54 = vadd.f32 %v2199_v10, %v2093_v27  ;;  %v1943_v5 = vadd.f32 %v13314_v59, %v1784_v2 }
 0x487   :  { %v2064_v58 = vpop.f32.mrf.mxu1 }
 0x488   :  { %v13351_v16 = vpop.f32.mrf.mxu0  ;;  %v2095_v0 = vadd.f32 %v2064_v58, %v1938_v61  ;;  %v2241_v11 = vadd.f32 %v13348_v32, %v2096_v62  ;;  %v2882_v58 = vpop.permute.xlu0 %2881 }
 0x489   :  { %v13331_v3 = vpop.f32.mrf.mxu1 }
 0x48a   :  { %v2219_v26 = vpop.f32.mrf.mxu0  ;;  %v2098_v17 = vadd.f32 %v13331_v3, %v1941_v38  ;;  %v2240_v39 = vadd.f32 %v2209_v60, %v2095_v0  ;;  %v2892_v60 = vpop.permute.xlu1 %2891 }
 0x48b   :  { %v2074_v41 = vpop.f32.mrf.mxu1 }
 0x48c   :  { %v2097_v20 = vadd.f32 %v2074_v41, %v1940_v34  ;;  %v2243_v27 = vadd.f32 %v13351_v16, %v2098_v17  ;;  %v2897_v4 = vpop.permute.xlu0 %2896 }
 0x48d   :  { %v13334_v42 = vpop.f32.mrf.mxu1 }
 0x48e   :  { %v16187_v36 = vpop.f32.mrf.mxu0  ;;  %v2100_v30 = vadd.f32 %v13334_v42, %v1943_v5  ;;  %v2242_v14 = vadd.f32 %v2219_v26, %v2097_v20 }
 0x48f   :  { %v2084_v24 = vpop.f32.mrf.mxu1 }
 0x490   :  { %v16189_v21 = vpop.f32.mrf.mxu0  ;;  %v2099_v31 = vadd.f32 %v2084_v24, %v1942_v18  ;;  %v2245_v55 = vadd.f32 %v16187_v36, %v2100_v30 }
 0x491   :  { %v13365_v48 = vpop.f32.mrf.mxu1 }
 0x492   :  { %v13385_v50 = vpop.f32.mrf.mxu0  ;;  %v2400_v47 = vadd.f32 %v13365_v48, %v2239_v40 }
 0x493   :  { %v2360_v43 = vpop.f32.mrf.mxu1 }
 0x494   :  { %v2517_v15 = vpop.f32.mrf.mxu0  ;;  %v2399_v19 = vadd.f32 %v2360_v43, %v2238_v54  ;;  %v2557_v9 = vadd.f32 %v13385_v50, %v2400_v47 }
 0x495   :  { %v13368_v29 = vpop.f32.mrf.mxu1 }
 0x496   :  { %v2402_v53 = vadd.f32 %v13368_v29, %v2241_v11  ;;  %v2556_v28 = vadd.f32 %v2517_v15, %v2399_v19 }
 0x497   :  { %v13388_v52 = vpop.f32.mrf.mxu0  ;;  %v2370_v23 = vpop.f32.mrf.mxu1 }
 0x498   :  { %v2401_v22 = vadd.f32 %v2370_v23, %v2240_v39  ;;  %v2559_v10 = vadd.f32 %v13388_v52, %v2402_v53  ;;  %v2244_v23 = vadd.f32 %v16189_v21, %v2099_v31 }
 0x499   :  { %v2527_v37 = vpop.f32.mrf.mxu0  ;;  %v13371_v57 = vpop.f32.mrf.mxu1 }
 0x49a   :  { %v2404_v1 = vadd.f32 %v13371_v57, %v2243_v27  ;;  %v2558_v44 = vadd.f32 %v2527_v37, %v2401_v22 }
 0x49b   :  { %v13391_v51 = vpop.f32.mrf.mxu0  ;;  %v2380_v46 = vpop.f32.mrf.mxu1 }
 0x49c   :  { %v2403_v50 = vadd.f32 %v2380_v46, %v2242_v14  ;;  %v2561_v3 = vadd.f32 %v13391_v51, %v2404_v1  ;;  %v2902_v51 = vpop.permute.xlu1 %2901 }
 0x49d   :  { %v2537_v25 = vpop.f32.mrf.mxu0  ;;  %v13374_v7 = vpop.f32.mrf.mxu1 }
 0x49e   :  { %v2406_v42 = vadd.f32 %v13374_v7, %v2245_v55  ;;  %v2560_v8 = vadd.f32 %v2537_v25, %v2403_v50 }
 0x49f   :  { %v13394_v49 = vpop.f32.mrf.mxu0  ;;  %v2390_v63 = vpop.f32.mrf.mxu1 }
 0x4a0   :  { %v2405_v62 = vadd.f32 %v2390_v63, %v2244_v23  ;;  %v2563_v21 = vadd.f32 %v13394_v49, %v2406_v42  ;;  %v20580_v23 = vld [vmem:[#allocation15_spill] sm:$0xff] }
 0x4a1   :  { %v2547_v56 = vpop.f32.mrf.mxu0  ;;  %v20584_v42 = vld [vmem:[#allocation19_spill] sm:$0xff] }
 0x4a2   :  { %v2562_v63 = vadd.f32 %v2547_v56, %v2405_v62  ;;  %v20589_v62 = vld [vmem:[#allocation24_spill] sm:$0xff] }
 0x4a3   :  { %v13405_v13 = vpop.f32.mrf.mxu1  ;;  %v13425_v40 = vpop.f32.mrf.mxu0 }
 0x4a4   :  { %v2714_v38 = vadd.f32 %v13405_v13, %v2557_v9 }
 0x4a5   :  { %v2674_v43 = vpop.f32.mrf.mxu1  ;;  %v2819_v33 = vpop.f32.mrf.mxu0 }
 0x4a6   :  { %v2859_v59 = vadd.f32 %v13425_v40, %v2714_v38  ;;  %v2713_v6 = vadd.f32 %v2674_v43, %v2556_v28  ;;  %v2907_v28 = vpop.permute.xlu0 %2906 }
 0x4a7   :  { %v13408_v29 = vpop.f32.mrf.mxu1  ;;  %v13428_v32 = vpop.f32.mrf.mxu0 }
 0x4a8   :  { %v2858_v16 = vadd.f32 %v2819_v33, %v2713_v6  ;;  %v2716_v15 = vadd.f32 %v13408_v29, %v2559_v10  ;;  %v2915_v26 = vadd.f32 %v2882_v58, %v2859_v59  ;;  %v20578_v58 = vld [vmem:[#allocation13_spill] sm:$0xff] }
 0x4a9   :  { %v2684_v57 = vpop.f32.mrf.mxu1  ;;  %v2829_v41 = vpop.f32.mrf.mxu0 }
 0x4aa   :  { %v2914_v52 = vadd.f32 %v2877_v12, %v2858_v16  ;;  %v2715_v24 = vadd.f32 %v2684_v57, %v2558_v44  ;;  %v2861_v48 = vadd.f32 %v13428_v32, %v2716_v15  ;;  %v2923_v54 = vmax.f32 %v2915_v26, 0.0  ;;  %v3100_v1 = vpop.permute.xlu0 %3099  ;;  %v20579_v16 = vld [vmem:[#allocation14_spill] sm:$0xff]  ;;  %v20582_v26 = vld [vmem:[#allocation17_spill] sm:$0xff] }
 0x4ab   :  { %v13411_v46 = vpop.f32.mrf.mxu1  ;;  %v13431_v61 = vpop.f32.mrf.mxu0  ;;  %13471 = vmatprep.mubr.msk.f32.mxu0 %vm900_vm0, %v3100_v1  ;;  %v16526_v1 = vld [vmem:[%s20560_s6 + $0x60] sm:$0xff] }
 0x4ac   :  { %v2922_v36 = vmax.f32 %v2914_v52, 0.0  ;;  %v2718_v37 = vadd.f32 %v13411_v46, %v2561_v3  ;;  %v2860_v2 = vadd.f32 %v2829_v41, %v2715_v24  ;;  %v2917_v0 = vadd.f32 %v2892_v60, %v2861_v48  ;;  %v20581_v3 = vld [vmem:[#allocation16_spill] sm:$0xff]  ;;  %v20583_v41 = vld [vmem:[#allocation18_spill] sm:$0xff]  ;;  %v20586_v48 = vld [vmem:[#allocation21_spill] sm:$0xff] }
 0x4ad   :  { %v2694_v47 = vpop.f32.mrf.mxu1  ;;  %v2839_v34 = vpop.f32.mrf.mxu0  ;;  %v20585_v52 = vld [vmem:[#allocation20_spill] sm:$0xff]  ;;  %v20588_v46 = vld [vmem:[#allocation23_spill] sm:$0xff]  ;;  %20596 = vst [vmem:[#allocation16_spill] sm:$0xff] %v16526_v1 }
 0x4ae   :  { %v2916_v17 = vadd.f32 %v2887_v45, %v2860_v2  ;;  %v2717_v11 = vadd.f32 %v2694_v47, %v2560_v8  ;;  %v2863_v7 = vadd.f32 %v13431_v61, %v2718_v37  ;;  %13443 = vmatprep.mubr.msk.f32.mxu1 %vm1544_vm2, %v2922_v36  ;;  %v2925_v39 = vmax.f32 %v2917_v0, 0.0  ;;  %v2912_v45 = vpop.permute.xlu1 %2911  ;;  %v20587_v8 = vld [vmem:[#allocation22_spill] sm:$0xff]  ;;  %v20590_v37 = vld [vmem:[#allocation25_spill] sm:$0xff]  ;;  %v20592_v47 = vld [vmem:[#allocation27_spill] sm:$0xff] }
 0x4af   :  { %v13414_v12 = vpop.f32.mrf.mxu1  ;;  %13444 = vmatmul.mubr.msk.f32.vlgmr.msra.gmra.mxu1 %vm1544_vm2, %v2923_v54  ;;  %v13434_v25 = vpop.f32.mrf.mxu0  ;;  %v16338_v36 = vld [vmem:[%s20560_s6 + $0x80] sm:$0xff]  ;;  %v16351_v0 = vld [vmem:[%s20560_s6 + $0xd0] sm:$0xff] }
 0x4b0   :  { %v2924_v19 = vmax.f32 %v2916_v17, 0.0  ;;  %v2720_v20 = vadd.f32 %v13414_v12, %v2563_v21  ;;  %v2862_v5 = vadd.f32 %v2839_v34, %v2717_v11  ;;  %v2919_v9 = vadd.f32 %v2902_v51, %v2863_v7  ;;  %v20591_v2 = vld [vmem:[#allocation26_spill] sm:$0xff]  ;;  %v16373_v51 = vld [vmem:[%s20560_s6 + $0xa8] sm:$0xff]  ;;  %v16389_v11 = vpop.permute.xlu0 %3103 }
 0x4b1   :  { %v2704_v53 = vpop.f32.mrf.mxu1  ;;  %v2849_v18 = vpop.f32.mrf.mxu0  ;;  %v16358_v34 = vld [vmem:[%s20560_s6 + $0x58] sm:$0xff]  ;;  %v16368_v21 = vld [vmem:[%s20560_s6 + $0x120] sm:$0xff]  ;;  %v16403_v12 = vld [vmem:[%s20560_s6 + $0x148] sm:$0xff] }
 0x4b2   :  { %v2918_v49 = vadd.f32 %v2897_v4, %v2862_v5  ;;  %v2719_v27 = vadd.f32 %v2704_v53, %v2562_v63  ;;  %v2865_v13 = vadd.f32 %v13434_v25, %v2720_v20  ;;  %13446 = vmatprep.mubr.msk.f32.mxu1 %vm1544_vm2, %v2924_v19  ;;  %v2927_v22 = vmax.f32 %v2919_v9, 0.0  ;;  %v16225_v6 = vpop.permute.xlu1 %3101  ;;  %v16382_v4 = vld [vmem:[%s20560_s6 + $0x170] sm:$0xff]  ;;  %v16387_v17 = vld [vmem:[%s20560_s6 + $0xf8] sm:$0xff]  ;;  %v16424_v19 = vld [vmem:[%s20560_s6 + $0x1c0] sm:$0xff] }
 0x4b3   :  { %13447 = vmatmul.mubr.msk.f32.gmra.mxu1 %vm1544_vm2, %v2925_v39  ;;  %v16398_v7 = vld [vmem:[%s20560_s6 + $0x198] sm:$0xff]  ;;  %v16435_v5 = vld [vmem:[%s20560_s6 + $0x1e8] sm:$0xff]  ;;  %v16444_v39 = vld [vmem:[%s20560_s6 + $0x210] sm:$0xff] }
 0x4b4   :  { %v2926_v40 = vmax.f32 %v2918_v49, 0.0  ;;  %v2864_v30 = vadd.f32 %v2849_v18, %v2719_v27  ;;  %v2921_v56 = vadd.f32 %v2912_v45, %v2865_v13  ;;  %v16407_v25 = vpop.permute.xlu0 %3107  ;;  %v16461_v18 = vld [vmem:[%s20560_s6 + $0x238] sm:$0xff]  ;;  %v16470_v49 = vld [vmem:[%s20560_s6 + $0x260] sm:$0xff]  ;;  %v16491_v45 = vld [vmem:[%s20560_s6 + $0x10] sm:$0xff] }
 0x4b5   :  { %20593 = vst [vmem:[#allocation13_spill] sm:$0xff] %v16491_v45 }
 0x4b6   :  { %v2920_v38 = vadd.f32 %v2907_v28, %v2864_v30  ;;  %13449 = vmatprep.mubr.msk.f32.mxu1 %vm1544_vm2, %v2926_v40  ;;  %v2929_v31 = vmax.f32 %v2921_v56, 0.0  ;;  %v16242_v55 = vpop.permute.xlu1 %3105  ;;  %v16508_v56 = vld [vmem:[%s20560_s6 + $0x38] sm:$0xff] }
 0x4b7   :  { %13450 = vmatmul.mubr.msk.f32.gmra.mxu1 %vm1544_vm2, %v2927_v22  ;;  %20594 = vst [vmem:[#allocation14_spill] sm:$0xff] %v16508_v56 }
 0x4b8   :  { %v2928_v14 = vmax.f32 %v2920_v38, 0.0  ;;  %v16415_v63 = vpop.permute.xlu0 %3111  ;;  %v16517_v38 = vld [vmem:[%s20560_s6 + $0x88] sm:$0xff] }
 0x4b9   :  { %20595 = vst [vmem:[#allocation15_spill] sm:$0xff] %v16517_v38 }
 0x4ba   :  { %13452 = vmatprep.mubr.msk.f32.mxu1 %vm1544_vm2, %v2928_v14  ;;  %v16254_v44 = vpop.permute.xlu1 %3109 }
 0x4bb   :  { %13453 = vmatmul.mubr.msk.f32.gmra.mxu1 %vm1544_vm2, %v2929_v31 }
 0x4bc   :  { %13511 = vmatprep.mubr.msk.f32.mxu1 %vm900_vm0, %v16058_v35  ;;  %v16428_v20 = vpop.permute.xlu0 %3115 }
 0x4be   :  { %v16270_v60 = vpop.permute.xlu1 %3113 }
 0x4c0   :  { %v16446_v9 = vpop.permute.xlu0 %3119 }
 0x4c2   :  { %v16283_v15 = vpop.permute.xlu1 %3117 }
 0x4c4   :  { %v16454_v53 = vpop.permute.xlu0 %3123 }
 0x4c6   :  { %v16299_v57 = vpop.permute.xlu1 %3121 }
 0x4c8   :  { %v16472_v27 = vpop.permute.xlu0 %3127 }
 0x4ca   :  { %v16311_v24 = vpop.permute.xlu1 %3125 }
 0x4cc   :  { %v16480_v13 = vpop.permute.xlu0 %3768 }
 0x4ce   :  { %v16327_v61 = vpop.permute.xlu1 %3129 }
 0x4d2   :  { %v3767_v54 = vpop.permute.xlu1 %3766 }
 0x56f   :  { %v16207_v43 = vpop.f32.mrf.mxu1 }
 0x570   :  { %3800 = vrot.lane.b32.xlu1 %v16207_v43, %s14541_s3  ;;  %3141 = vrot.lane.b32.xlu0 %v16207_v43, %s14542_s10 }
 0x571   :  { %v16213_v33 = vpop.f32.mrf.mxu1 }
 0x573   :  { %v16215_v10 = vpop.f32.mrf.mxu1 }
 0x574   :  { %3535 = vrot.lane.b32.xlu0 %v16207_v43, %s14543_s23  ;;  %3139 = vrot.lane.b32.xlu1 %v16213_v33, %s14542_s10 }
 0x575   :  { %v16221_v35 = vpop.f32.mrf.mxu1 }
 0x577   :  { %v16223_v59 = vpop.f32.mrf.mxu1 }
 0x578   :  { %4033 = vrot.lane.b32.xlu0 %v16207_v43, %s14539_s7  ;;  %3533 = vrot.lane.b32.xlu1 %v16213_v33, %s14543_s23 }
 0x579   :  { %v16231_v50 = vpop.f32.mrf.mxu1 }
 0x57b   :  { %v16233_v29 = vpop.f32.mrf.mxu1 }
 0x57c   :  { %3798 = vrot.lane.b32.xlu1 %v16213_v33, %s14541_s3  ;;  %3145 = vrot.lane.b32.xlu0 %v16215_v10, %s14542_s10 }
 0x57d   :  { %13495 = vmatprep.subr.mxu1 %v16233_v29  ;;  %v16240_v32 = vpop.f32.mrf.mxu1 }
 0x57e   :  { %13496 = vmatpush3.msra.mxu1 %v16233_v29 }
 0x57f   :  { %13497 = vmatprep.subr.mxu1 %v16240_v32 }
 0x580   :  { %13498 = vmatpush3.msra.mxu1 %v16240_v32  ;;  %3804 = vrot.lane.b32.xlu1 %v16215_v10, %s14541_s3 }
 0x581   :  { %3539 = vrot.lane.b32.xlu0 %v16215_v10, %s14543_s23  ;;  %13499 = vmatprep.subr.mxu1 %v16223_v59 }
 0x582   :  { %13500 = vmatpush3.msra.mxu1 %v16223_v59 }
 0x583   :  { %13501 = vmatprep.subr.mxu1 %v16231_v50 }
 0x584   :  { %13502 = vmatpush3.msra.mxu1 %v16231_v50  ;;  %3143 = vrot.lane.b32.xlu1 %v16221_v35, %s14542_s10 }
 0x585   :  { %4037 = vrot.lane.b32.xlu0 %v16215_v10, %s14539_s7  ;;  %13503 = vmatprep.subr.mxu1 %v16215_v10 }
 0x586   :  { %13504 = vmatpush3.msra.mxu1 %v16215_v10 }
 0x587   :  { %13505 = vmatprep.subr.mxu1 %v16221_v35 }
 0x588   :  { %13506 = vmatpush3.msra.mxu1 %v16221_v35  ;;  %3537 = vrot.lane.b32.xlu1 %v16221_v35, %s14543_s23 }
 0x589   :  { %4035 = vrot.lane.b32.xlu0 %v16221_v35, %s14539_s7  ;;  %13507 = vmatprep.subr.mxu1 %v16207_v43 }
 0x58a   :  { %13508 = vmatpush3.msra.mxu1 %v16207_v43 }
 0x58b   :  { %13509 = vmatprep.subr.mxu1 %v16213_v33 }
 0x58c   :  { %13510 = vmatpush3.msra.mxu1 %v16213_v33  ;;  %3802 = vrot.lane.b32.xlu1 %v16221_v35, %s14541_s3 }
 0x58d   :  { %3149 = vrot.lane.b32.xlu0 %v16223_v59, %s14542_s10  ;;  %13512 = vmatmul.mubr.msk.f32.vlgmr.msra.gmra.mxu1 %vm900_vm0, %v20578_v58  ;;  %v16535_v58 = vld [vmem:[%s20560_s6 + $0xd8] sm:$0xff] }
 0x58e   :  { %13514 = vmatprep.mubr.msk.f32.mxu1 %vm900_vm0, %v20579_v16  ;;  %20597 = vst [vmem:[#allocation17_spill] sm:$0xff] %v16535_v58 }
 0x590   :  { %3808 = vrot.lane.b32.xlu1 %v16223_v59, %s14541_s3 }
 0x591   :  { %3543 = vrot.lane.b32.xlu0 %v16223_v59, %s14543_s23  ;;  %13515 = vmatmul.mubr.msk.f32.gmra.mxu1 %vm900_vm0, %v20580_v23 }
 0x592   :  { %13517 = vmatprep.mubr.msk.f32.mxu1 %vm900_vm0, %v20581_v3  ;;  %v16544_v3 = vld [vmem:[%s20560_s6 + $0xb0] sm:$0xff] }
 0x593   :  { %20598 = vst [vmem:[#allocation18_spill] sm:$0xff] %v16544_v3 }
 0x594   :  { %3147 = vrot.lane.b32.xlu1 %v16231_v50, %s14542_s10 }
 0x595   :  { %4041 = vrot.lane.b32.xlu0 %v16223_v59, %s14539_s7  ;;  %13518 = vmatmul.mubr.msk.f32.gmra.mxu1 %vm900_vm0, %v20582_v26  ;;  %v16553_v26 = vld [vmem:[%s20560_s6 + $0x128] sm:$0xff] }
 0x596   :  { %13520 = vmatprep.mubr.msk.f32.mxu1 %vm900_vm0, %v20583_v41  ;;  %20599 = vst [vmem:[#allocation19_spill] sm:$0xff] %v16553_v26 }
 0x598   :  { %3541 = vrot.lane.b32.xlu1 %v16231_v50, %s14543_s23 }
 0x599   :  { %4039 = vrot.lane.b32.xlu0 %v16231_v50, %s14539_s7  ;;  %13521 = vmatmul.mubr.msk.f32.gmra.mxu1 %vm900_vm0, %v20584_v42  ;;  %v16560_v42 = vld [vmem:[%s20560_s6 + $0x100] sm:$0xff] }
 0x59a   :  { %13523 = vmatprep.mubr.msk.f32.mxu1 %vm900_vm0, %v20585_v52  ;;  %20600 = vst [vmem:[#allocation20_spill] sm:$0xff] %v16560_v42 }
 0x59c   :  { %3806 = vrot.lane.b32.xlu1 %v16231_v50, %s14541_s3 }
 0x59d   :  { %3153 = vrot.lane.b32.xlu0 %v16233_v29, %s14542_s10  ;;  %13524 = vmatmul.mubr.msk.f32.gmra.mxu1 %vm900_vm0, %v20586_v48  ;;  %v16571_v48 = vld [vmem:[%s20560_s6 + $0x178] sm:$0xff] }
 0x59e   :  { %13526 = vmatprep.mubr.msk.f32.mxu1 %vm900_vm0, %v20587_v8  ;;  %20601 = vst [vmem:[#allocation21_spill] sm:$0xff] %v16571_v48 }
 0x5a0   :  { %3151 = vrot.lane.b32.xlu1 %v16240_v32, %s14542_s10  ;;  %s14545_s10 = smov 80  }
 0x5a1   :  { %3547 = vrot.lane.b32.xlu0 %v16233_v29, %s14543_s23  ;;  %13527 = vmatmul.mubr.msk.f32.gmra.mxu1 %vm900_vm0, %v20588_v46  ;;  %v16576_v46 = vld [vmem:[%s20560_s6 + $0x150] sm:$0xff] }
 0x5a2   :  { %13529 = vmatprep.mubr.msk.f32.mxu1 %vm900_vm0, %v20589_v62  ;;  %20602 = vst [vmem:[#allocation22_spill] sm:$0xff] %v16576_v46 }
 0x5a4   :  { %4031 = vrot.lane.b32.xlu1 %v16213_v33, %s14539_s7 }
 0x5a5   :  { %3812 = vrot.lane.b32.xlu0 %v16233_v29, %s14541_s3  ;;  %13530 = vmatmul.mubr.msk.f32.gmra.mxu1 %vm900_vm0, %v20590_v37 }
 0x5a6   :  { %13532 = vmatprep.mubr.msk.f32.mxu1 %vm900_vm0, %v20591_v2 }
 0x5a8   :  { %3772 = vrot.lane.b32.xlu1 %v16338_v36, %s14537_s1 }
 0x5a9   :  { %4045 = vrot.lane.b32.xlu0 %v16233_v29, %s14539_s7  ;;  %13533 = vmatmul.mubr.msk.f32.gmra.mxu1 %vm900_vm0, %v20592_v47 }
 0x5aa   :  { %13591 = vmatprep.mubr.msk.f32.mxu1 %vm900_vm0, %v3767_v54  ;;  %v16595_v54 = vld [vmem:[%s20560_s6 + $0x1a0] sm:$0xff] }
 0x5ab   :  { %20603 = vst [vmem:[#allocation23_spill] sm:$0xff] %v16595_v54 }
 0x5ac   :  { %3776 = vrot.lane.b32.xlu1 %v16351_v0, %s14537_s1 }
 0x5ad   :  { %3770 = vrot.lane.b32.xlu0 %v16358_v34, %s14537_s1 }
 0x5b0   :  { %3780 = vrot.lane.b32.xlu1 %v16368_v21, %s14537_s1 }
 0x5b1   :  { %3774 = vrot.lane.b32.xlu0 %v16373_v51, %s14537_s1 }
 0x5b4   :  { %3784 = vrot.lane.b32.xlu1 %v16382_v4, %s14537_s1 }
 0x5b5   :  { %3778 = vrot.lane.b32.xlu0 %v16387_v17, %s14537_s1 }
 0x5b8   :  { %3786 = vrot.lane.b32.xlu1 %v16398_v7, %s14537_s1 }
 0x5b9   :  { %3782 = vrot.lane.b32.xlu0 %v16403_v12, %s14537_s1 }
 0x5bc   :  { %4306 = vrot.lane.b32.xlu1 %v16223_v59, %s14544_s2 }
 0x5bd   :  { %4310 = vrot.lane.b32.xlu0 %v16233_v29, %s14544_s2 }
 0x5c0   :  { %3545 = vrot.lane.b32.xlu1 %v16240_v32, %s14543_s23  ;;  %s20686_s23 = sld [smem:[#allocation36_spill]] }
 0x5c1   :  { %4543 = vrot.lane.b32.xlu0 %v16233_v29, %s14545_s10 }
 0x5c4   :  { %4304 = vrot.lane.b32.xlu1 %v16231_v50, %s14544_s2 }
 0x5c5   :  { %3788 = vrot.lane.b32.xlu0 %v16424_v19, %s14537_s1 }
 0x5c8   :  { %3790 = vrot.lane.b32.xlu1 %v16435_v5, %s14537_s1 }
 0x5c9   :  { %4539 = vrot.lane.b32.xlu0 %v16223_v59, %s14545_s10 }
 0x5cc   :  { %4302 = vrot.lane.b32.xlu1 %v16215_v10, %s14544_s2 }
 0x5cd   :  { %3792 = vrot.lane.b32.xlu0 %v16444_v39, %s14537_s1 }
 0x5d0   :  { %4300 = vrot.lane.b32.xlu1 %v16221_v35, %s14544_s2 }
 0x5d1   :  { %4537 = vrot.lane.b32.xlu0 %v16231_v50, %s14545_s10 }
 0x5d4   :  { %3794 = vrot.lane.b32.xlu1 %v16461_v18, %s14537_s1 }
 0x5d5   :  { %4535 = vrot.lane.b32.xlu0 %v16215_v10, %s14545_s10 }
 0x5d8   :  { %4298 = vrot.lane.b32.xlu1 %v16207_v43, %s14544_s2 }
 0x5d9   :  { %3796 = vrot.lane.b32.xlu0 %v16470_v49, %s14537_s1 }
 0x5dc   :  { %3810 = vrot.lane.b32.xlu1 %v16240_v32, %s14541_s3 }
 0x5dd   :  { %4533 = vrot.lane.b32.xlu0 %v16221_v35, %s14545_s10 }
 0x5e0   :  { %4296 = vrot.lane.b32.xlu1 %v16213_v33, %s14544_s2 }
 0x5e1   :  { %4043 = vrot.lane.b32.xlu0 %v16240_v32, %s14539_s7 }
 0x5e2   :  { %v16493_v40 = vpop.permute.xlu1 %3800  ;;  %v16495_v30 = vpop.permute.xlu0 %3141 }
 0x5e4   :  { %4264 = vrot.lane.b32.xlu1 %v16491_v45, %s14537_s1 }
 0x5e5   :  { %4531 = vrot.lane.b32.xlu0 %v16207_v43, %s14545_s10 }
 0x5e6   :  { %v16501_v28 = vpop.permute.xlu0 %3535  ;;  %v16503_v22 = vpop.permute.xlu1 %3139 }
 0x5e8   :  { %4529 = vrot.lane.b32.xlu1 %v16213_v33, %s14545_s10 }
 0x5e9   :  { %4266 = vrot.lane.b32.xlu0 %v16508_v56, %s14537_s1 }
 0x5ea   :  { %v16519_v14 = vpop.permute.xlu0 %4033  ;;  %v16521_v31 = vpop.permute.xlu1 %3533 }
 0x5ec   :  { %4270 = vrot.lane.b32.xlu1 %v16517_v38, %s14537_s1 }
 0x5ed   :  { %4268 = vrot.lane.b32.xlu0 %v16526_v1, %s14537_s1 }
 0x5ee   :  { %v16537_v16 = vpop.permute.xlu1 %3798  ;;  %v16539_v23 = vpop.permute.xlu0 %3145 }
 0x5f0   :  { %4274 = vrot.lane.b32.xlu1 %v16535_v58, %s14537_s1  ;;  %v16614_v58 = vld [vmem:[%s20560_s6 + $0x1c8] sm:$0xff] }
 0x5f1   :  { %4272 = vrot.lane.b32.xlu0 %v16544_v3, %s14537_s1  ;;  %20604 = vst [vmem:[#allocation24_spill] sm:$0xff] %v16614_v58  ;;  %v16625_v3 = vld [vmem:[%s20560_s6 + $0x1f0] sm:$0xff] }
 0x5f2   :  { %v16555_v41 = vpop.permute.xlu1 %3804  ;;  %20605 = vst [vmem:[#allocation25_spill] sm:$0xff] %v16625_v3 }
 0x5f3   :  { %v16562_v52 = vpop.permute.xlu0 %3539 }
 0x5f4   :  { %4278 = vrot.lane.b32.xlu1 %v16553_v26, %s14537_s1 }
 0x5f5   :  { %4276 = vrot.lane.b32.xlu0 %v16560_v42, %s14537_s1 }
 0x5f6   :  { %v3144_v8 = vpop.permute.xlu1 %3143 }
 0x5f7   :  { %v16578_v62 = vpop.permute.xlu0 %4037 }
 0x5f8   :  { %4282 = vrot.lane.b32.xlu1 %v16571_v48, %s14537_s1 }
 0x5f9   :  { %4280 = vrot.lane.b32.xlu0 %v16576_v46, %s14537_s1 }
 0x5fa   :  { %v16584_v37 = vpop.permute.xlu1 %3537 }
 0x5fb   :  { %v16586_v2 = vpop.permute.xlu0 %4035 }
 0x5fc   :  { %4308 = vrot.lane.b32.xlu1 %v16240_v32, %s14544_s2 }
 0x5fd   :  { %4808 = vrot.lane.b32.xlu0 %v16233_v29, %s14546_s27 }
 0x5fe   :  { %v16597_v47 = vpop.permute.xlu1 %3802 }
 0x5ff   :  { %v3150_v48 = vpop.permute.xlu0 %3149 }
 0x600   :  { %4284 = vrot.lane.b32.xlu1 %v16595_v54, %s14537_s1 }
 0x601   :  { %4541 = vrot.lane.b32.xlu0 %v16240_v32, %s14545_s10 }
 0x602   :  { %v16603_v46 = vpop.permute.xlu1 %3808 }
 0x603   :  { %v16605_v26 = vpop.permute.xlu0 %3543 }
 0x604   :  { %4804 = vrot.lane.b32.xlu1 %v16223_v59, %s14546_s27 }
 0x605   :  { %5041 = vrot.lane.b32.xlu0 %v16233_v29, %s14537_s1 }
 0x606   :  { %v3148_v42 = vpop.permute.xlu1 %3147 }
 0x607   :  { %v16616_v54 = vpop.permute.xlu0 %4041 }
 0x608   :  { %4802 = vrot.lane.b32.xlu1 %v16231_v50, %s14546_s27 }
 0x609   :  { %4286 = vrot.lane.b32.xlu0 %v16614_v58, %s14537_s1  ;;  %v16640_v58 = vld [vmem:[%s20560_s6 + $0x218] sm:$0xff] }
 0x60a   :  { %v16627_v29 = vpop.permute.xlu1 %3541  ;;  %20606 = vst [vmem:[#allocation26_spill] sm:$0xff] %v16640_v58 }
 0x60b   :  { %v16629_v38 = vpop.permute.xlu0 %4039 }
 0x60c   :  { %4288 = vrot.lane.b32.xlu1 %v16625_v3, %s14537_s1 }
 0x60d   :  { %5037 = vrot.lane.b32.xlu0 %v16223_v59, %s14537_s1  ;;  %v16653_v59 = vld [vmem:[%s20560_s6 + $0x240] sm:$0xff] }
 0x60e   :  { %v16635_v1 = vpop.permute.xlu1 %3806 }
 0x60f   :  { %v3154_v56 = vpop.permute.xlu0 %3153 }
 0x610   :  { %13455 = vmatprep.subr.mxu0 %v3154_v56  ;;  %4800 = vrot.lane.b32.xlu1 %v16215_v10, %s14546_s27 }
 0x611   :  { %13456 = vmatpush3.msra.mxu0 %v3154_v56  ;;  %4290 = vrot.lane.b32.xlu0 %v16640_v58, %s14537_s1 }
 0x612   :  { %v3152_v3 = vpop.permute.xlu1 %3151 }
 0x613   :  { %v3548_v45 = vpop.permute.xlu0 %3547  ;;  %13457 = vmatprep.subr.mxu0 %v3152_v3 }
 0x614   :  { %4798 = vrot.lane.b32.xlu1 %v16221_v35, %s14546_s27  ;;  %13458 = vmatpush3.msra.mxu0 %v3152_v3  ;;  %v16667_v3 = vld [vmem:[%s20560_s6 + $0x268] sm:$0xff] }
 0x615   :  { %5035 = vrot.lane.b32.xlu0 %v16231_v50, %s14537_s1  ;;  %13459 = vmatprep.subr.mxu0 %v3150_v48 }
 0x616   :  { %13460 = vmatpush3.msra.mxu0 %v3150_v48  ;;  %v16655_v56 = vpop.permute.xlu1 %4031 }
 0x617   :  { %v3813_v58 = vpop.permute.xlu0 %3812  ;;  %13461 = vmatprep.subr.mxu0 %v3148_v42 }
 0x618   :  { %13575 = vmatprep.subr.mxu1 %v3813_v58  ;;  %4292 = vrot.lane.b32.xlu1 %v16653_v59, %s14537_s1 }
 0x619   :  { %5033 = vrot.lane.b32.xlu0 %v16215_v10, %s14537_s1  ;;  %13462 = vmatpush3.msra.mxu0 %v3148_v42 }
 0x61a   :  { %13576 = vmatpush3.msra.mxu1 %v3813_v58  ;;  %13463 = vmatprep.subr.mxu0 %v16539_v23  ;;  %v16662_v50 = vpop.permute.xlu1 %3772 }
 0x61b   :  { %v16669_v48 = vpop.permute.xlu0 %4045  ;;  %13464 = vmatpush3.msra.mxu0 %v16539_v23 }
 0x61c   :  { %13465 = vmatprep.subr.mxu0 %v3144_v8  ;;  %4806 = vrot.lane.b32.xlu1 %v16240_v32, %s14546_s27 }
 0x61d   :  { %4294 = vrot.lane.b32.xlu0 %v16667_v3, %s14537_s1  ;;  %13466 = vmatpush3.msra.mxu0 %v3144_v8 }
 0x61e   :  { %13467 = vmatprep.subr.mxu0 %v16495_v30  ;;  %v16677_v10 = vpop.permute.xlu1 %3776 }
 0x61f   :  { %v16679_v58 = vpop.permute.xlu0 %3770  ;;  %13468 = vmatpush3.msra.mxu0 %v16495_v30 }
 0x620   :  { %13469 = vmatprep.subr.mxu0 %v16503_v22  ;;  %4796 = vrot.lane.b32.xlu1 %v16207_v43, %s14546_s27 }
 0x621   :  { %5039 = vrot.lane.b32.xlu0 %v16240_v32, %s14537_s1  ;;  %13470 = vmatpush3.msra.mxu0 %v16503_v22  ;;  %v16703_v32 = vld [vmem:[%s20560_s6 + $0x18] sm:$0xff] }
 0x622   :  { %13472 = vmatmul.mubr.msk.f32.vlgmr.msra.gmra.mxu0 %vm900_vm0, %v16225_v6  ;;  %13535 = vmatprep.subr.mxu0 %v3548_v45  ;;  %v16690_v23 = vpop.permute.xlu1 %3780 }
 0x623   :  { %v16692_v42 = vpop.permute.xlu0 %3774  ;;  %13474 = vmatprep.mubr.msk.f32.mxu0 %vm900_vm0, %v16389_v11  ;;  %13536 = vmatpush3.msra.mxu0 %v3548_v45  ;;  %v16766_v45 = vld [vmem:[%s20560_s6 + $0xb8] sm:$0xff] }
 0x624   :  { %4794 = vrot.lane.b32.xlu1 %v16213_v33, %s14546_s27  ;;  %s14549_s27 = smov 4  }
 0x625   :  { %5031 = vrot.lane.b32.xlu0 %v16221_v35, %s14537_s1 }
 0x626   :  { %13475 = vmatmul.mubr.msk.f32.gmra.mxu0 %vm900_vm0, %v16242_v55  ;;  %v16707_v6 = vpop.permute.xlu1 %3784  ;;  %v16724_v55 = vld [vmem:[%s20560_s6 + $0x40] sm:$0xff] }
 0x627   :  { %v16709_v30 = vpop.permute.xlu0 %3778  ;;  %13477 = vmatprep.mubr.msk.f32.mxu0 %vm900_vm0, %v16407_v25  ;;  %v16746_v25 = vld [vmem:[%s20560_s6 + $0x68] sm:$0xff] }
 0x628   :  { %4762 = vrot.lane.b32.xlu1 %v16703_v32, %s14537_s1 }
 0x629   :  { %5029 = vrot.lane.b32.xlu0 %v16207_v43, %s14537_s1  ;;  %v16737_v43 = vld [vmem:[%s20560_s6 + $0x90] sm:$0xff] }
 0x62a   :  { %13478 = vmatmul.mubr.msk.f32.gmra.mxu0 %vm900_vm0, %v16254_v44  ;;  %v16719_v35 = vpop.permute.xlu1 %3786 }
 0x62b   :  { %v16726_v11 = vpop.permute.xlu0 %3782  ;;  %13480 = vmatprep.mubr.msk.f32.mxu0 %vm900_vm0, %v16415_v63 }
 0x62c   :  { %5027 = vrot.lane.b32.xlu1 %v16213_v33, %s14537_s1  ;;  %v16759_v33 = vld [vmem:[%s20560_s6 + $0xe0] sm:$0xff] }
 0x62d   :  { %4764 = vrot.lane.b32.xlu0 %v16724_v55, %s14537_s1 }
 0x62e   :  { %13481 = vmatmul.mubr.msk.f32.gmra.mxu0 %vm900_vm0, %v16270_v60  ;;  %v16741_v44 = vpop.permute.xlu1 %4306 }
 0x62f   :  { %v16748_v63 = vpop.permute.xlu0 %4310  ;;  %13483 = vmatprep.mubr.msk.f32.mxu0 %vm900_vm0, %v16428_v20 }
 0x630   :  { %4768 = vrot.lane.b32.xlu1 %v16737_v43, %s14537_s1 }
 0x631   :  { %4766 = vrot.lane.b32.xlu0 %v16746_v25, %s14537_s1 }
 0x632   :  { %13484 = vmatmul.mubr.msk.f32.gmra.mxu0 %vm900_vm0, %v16283_v15  ;;  %v3546_v60 = vpop.permute.xlu1 %3545  ;;  %v16780_v15 = vld [vmem:[%s20560_s6 + $0x130] sm:$0xff] }
 0x633   :  { %v16768_v20 = vpop.permute.xlu0 %4543  ;;  %13486 = vmatprep.mubr.msk.f32.mxu0 %vm900_vm0, %v16446_v9  ;;  %13537 = vmatprep.subr.mxu0 %v3546_v60  ;;  %v16789_v9 = vld [vmem:[%s20560_s6 + $0x108] sm:$0xff] }
 0x634   :  { %4772 = vrot.lane.b32.xlu1 %v16759_v33, %s14537_s1  ;;  %13538 = vmatpush3.msra.mxu0 %v3546_v60 }
 0x635   :  { %4770 = vrot.lane.b32.xlu0 %v16766_v45, %s14537_s1  ;;  %13539 = vmatprep.subr.mxu0 %v16605_v26 }
 0x636   :  { %13487 = vmatmul.mubr.msk.f32.gmra.mxu0 %vm900_vm0, %v16299_v57  ;;  %v16784_v22 = vpop.permute.xlu1 %4304  ;;  %v16805_v57 = vld [vmem:[%s20560_s6 + $0x180] sm:$0xff] }
 0x637   :  { %v16791_v8 = vpop.permute.xlu0 %3788  ;;  %13489 = vmatprep.mubr.msk.f32.mxu0 %vm900_vm0, %v16454_v53  ;;  %13540 = vmatpush3.msra.mxu0 %v16605_v26  ;;  %20607 = vst [vmem:[#allocation27_spill] sm:$0xff] %v16805_v57  ;;  %v16815_v26 = vld [vmem:[%s20560_s6 + $0x158] sm:$0xff] }
 0x638   :  { %13541 = vmatprep.subr.mxu0 %v16627_v29  ;;  %4776 = vrot.lane.b32.xlu1 %v16780_v15, %s14537_s1 }
 0x639   :  { %4774 = vrot.lane.b32.xlu0 %v16789_v9, %s14537_s1  ;;  %13542 = vmatpush3.msra.mxu0 %v16627_v29 }
 0x63a   :  { %13490 = vmatmul.mubr.msk.f32.gmra.mxu0 %vm900_vm0, %v16311_v24  ;;  %13543 = vmatprep.subr.mxu0 %v16562_v52  ;;  %v16810_v53 = vpop.permute.xlu1 %3790  ;;  %v16831_v24 = vld [vmem:[%s20560_s6 + $0x1d0] sm:$0xff] }
 0x63b   :  { %v16817_v60 = vpop.permute.xlu0 %4539  ;;  %13492 = vmatprep.mubr.msk.f32.mxu0 %vm900_vm0, %v16472_v27  ;;  %13544 = vmatpush3.msra.mxu0 %v16562_v52  ;;  %20608 = vst [vmem:[#allocation30_spill] sm:$0xff] %v16831_v24  ;;  %v16841_v52 = vld [vmem:[%s20560_s6 + $0x1a8] sm:$0xff] }
 0x63c   :  { %13545 = vmatprep.subr.mxu0 %v16584_v37  ;;  %4780 = vrot.lane.b32.xlu1 %v16805_v57, %s14537_s1  ;;  %20609 = vst [vmem:[#allocation31_spill] sm:$0xff] %v16841_v52  ;;  %v20612_v57 = vld [vmem:[#allocation28_spill] sm:$0xff] }
 0x63d   :  { %4778 = vrot.lane.b32.xlu0 %v16815_v26, %s14537_s1  ;;  %13546 = vmatpush3.msra.mxu0 %v16584_v37  ;;  %v20610_v37 = vld [vmem:[#allocation29_spill] sm:$0xff] }
 0x63e   :  { %13493 = vmatmul.mubr.msk.f32.gmra.mxu0 %vm900_vm0, %v16327_v61  ;;  %13547 = vmatprep.subr.mxu0 %v16501_v28  ;;  %v16836_v27 = vpop.permute.xlu1 %4302  ;;  %v16857_v61 = vld [vmem:[%s20560_s6 + $0x220] sm:$0xff] }
 0x63f   :  { %v16843_v29 = vpop.permute.xlu0 %3792  ;;  %13548 = vmatpush3.msra.mxu0 %v16501_v28  ;;  %13551 = vmatprep.mubr.msk.f32.mxu0 %vm900_vm0, %v20610_v37  ;;  %20611 = vst [vmem:[#allocation29_spill] sm:$0xff] %v16857_v61  ;;  %v16867_v37 = vld [vmem:[%s20560_s6 + $0x1f8] sm:$0xff] }
 0x640   :  { %13549 = vmatprep.subr.mxu0 %v16521_v31  ;;  %4784 = vrot.lane.b32.xlu1 %v16831_v24, %s14537_s1  ;;  %20613 = vst [vmem:[#allocation28_spill] sm:$0xff] %v16867_v37 }
 0x641   :  { %4782 = vrot.lane.b32.xlu0 %v16841_v52, %s14537_s1  ;;  %13550 = vmatpush3.msra.mxu0 %v16521_v31  ;;  %v16881_v31 = vld [vmem:[%s20560_s6 + $0x270] sm:$0xff] }
 0x642   :  { %13552 = vmatmul.mubr.msk.f32.vlgmr.msra.gmra.mxu0 %vm900_vm0, %v20612_v57  ;;  %13615 = vmatprep.subr.mxu0 %v16669_v48  ;;  %v16862_v28 = vpop.permute.xlu1 %4300  ;;  %20614 = vst [vmem:[#allocation32_spill] sm:$0xff] %v16881_v31 }
 0x643   :  { %v16869_v24 = vpop.permute.xlu0 %4537  ;;  %13616 = vmatpush3.msra.mxu0 %v16669_v48  ;;  %13554 = vmatprep.mubr.msk.f32.mxu0 %vm900_vm0, %v16358_v34  ;;  %v16890_v34 = vld [vmem:[%s20560_s6 + $0x248] sm:$0xff] }
 0x644   :  { %4788 = vrot.lane.b32.xlu1 %v16857_v61, %s14537_s1  ;;  %20615 = vst [vmem:[#allocation33_spill] sm:$0xff] %v16890_v34 }
 0x645   :  { %4786 = vrot.lane.b32.xlu0 %v16867_v37, %s14537_s1  ;;  %v5260_v37 = vld [vmem:[%s20616_s5] sm:$0xff] }
 0x646   :  { %13555 = vmatmul.mubr.msk.f32.gmra.mxu0 %vm900_vm0, %v16338_v36  ;;  %v16885_v57 = vpop.permute.xlu1 %3794  ;;  %v5261_v36 = vld [vmem:[%s20616_s5 + $0x8] sm:$0xff] }
 0x647   :  { %v16892_v48 = vpop.permute.xlu0 %4535  ;;  %13557 = vmatprep.mubr.msk.f32.mxu0 %vm900_vm0, %v16373_v51 }
 0x648   :  { %4792 = vrot.lane.b32.xlu1 %v16881_v31, %s14537_s1  ;;  %v5263_v31 = vld [vmem:[%s20616_s5 + $0x18] sm:$0xff] }
 0x649   :  { %4790 = vrot.lane.b32.xlu0 %v16890_v34, %s14537_s1  ;;  %v5262_v34 = vld [vmem:[%s20616_s5 + $0x10] sm:$0xff] }
 0x64a   :  { %13558 = vmatmul.mubr.msk.f32.gmra.mxu0 %vm900_vm0, %v16351_v0  ;;  %v16905_v61 = vpop.permute.xlu1 %4298 }
 0x64b   :  { %v16910_v51 = vpop.permute.xlu0 %3796  ;;  %13560 = vmatprep.mubr.msk.f32.mxu0 %vm900_vm0, %v16387_v17 }
 0x64c   :  { %5283 = vperm.xlu1 %14466, %v5261_v36  }
 0x64d   :  { %5278 = vperm.xlu0 %14467, %v5260_v37  }
 0x64e   :  { %13561 = vmatmul.mubr.msk.f32.gmra.mxu0 %vm900_vm0, %v16368_v21  ;;  %v3811_v0 = vpop.permute.xlu1 %3810  ;;  %v5265_v21 = vld [vmem:[%s20616_s5 + $0x28] sm:$0xff] }
 0x64f   :  { %v16922_v52 = vpop.permute.xlu0 %4533  ;;  %13577 = vmatprep.subr.mxu1 %v3811_v0  ;;  %13563 = vmatprep.mubr.msk.f32.mxu0 %vm900_vm0, %v16403_v12  ;;  %v5264_v12 = vld [vmem:[%s20616_s5 + $0x20] sm:$0xff] }
 0x650   :  { %5293 = vperm.xlu1 %14466, %v5263_v31   ;;  %13578 = vmatpush3.msra.mxu1 %v3811_v0  ;;  %v20622_v0 = vld [vmem:[#allocation17_spill] sm:$0xff] }
 0x651   :  { %5288 = vperm.xlu0 %14467, %v5262_v34   ;;  %13579 = vmatprep.subr.mxu1 %v16603_v46  ;;  %v20621_v34 = vld [vmem:[#allocation18_spill] sm:$0xff] }
 0x652   :  { %13564 = vmatmul.mubr.msk.f32.gmra.mxu0 %vm900_vm0, %v16382_v4  ;;  %v16932_v17 = vpop.permute.xlu1 %4296  ;;  %13580 = vmatpush3.msra.mxu1 %v16603_v46 }
 0x653   :  { %v4044_v37 = vpop.permute.xlu0 %4043  ;;  %13581 = vmatprep.subr.mxu1 %v16635_v1  ;;  %13566 = vmatprep.mubr.msk.f32.mxu0 %vm900_vm0, %v16398_v7  ;;  %v5266_v7 = vld [vmem:[%s20616_s5 + $0x30] sm:$0xff] }
 0x654   :  { %13617 = vmatprep.subr.mxu0 %v4044_v37  ;;  %5303 = vperm.xlu1 %14466, %v5265_v21   ;;  %v20623_v21 = vld [vmem:[#allocation20_spill] sm:$0xff] }
 0x655   :  { %5298 = vperm.xlu0 %14467, %v5264_v12   ;;  %13582 = vmatpush3.msra.mxu1 %v16635_v1  ;;  %v5267_v1 = vld [vmem:[%s20616_s5 + $0x38] sm:$0xff] }
 0x656   :  { %13618 = vmatpush3.msra.mxu0 %v4044_v37  ;;  %13583 = vmatprep.subr.mxu1 %v16555_v41  ;;  %v16943_v4 = vpop.permute.xlu1 %4264 }
 0x657   :  { %13567 = vmatmul.mubr.msk.f32.gmra.mxu0 %vm900_vm0, %v16424_v19  ;;  %13619 = vmatprep.subr.mxu0 %v16616_v54  ;;  %v16948_v46 = vpop.permute.xlu0 %4531 }
 0x658   :  { %13620 = vmatpush3.msra.mxu0 %v16616_v54  ;;  %13584 = vmatpush3.msra.mxu1 %v16555_v41  ;;  %v5268_v41 = vld [vmem:[%s20616_s5 + $0x40] sm:$0xff] }
 0x659   :  { %13585 = vmatprep.subr.mxu1 %v16597_v47  ;;  %13621 = vmatprep.subr.mxu0 %v16629_v38 }
 0x65a   :  { %5308 = vperm.xlu0 %14467, %v5266_v7   ;;  %5313 = vperm.xlu1 %14466, %v5267_v1   ;;  %v16960_v19 = vpop.permute.xlu1 %4529  ;;  %v20628_v1 = vld [vmem:[#allocation24_spill] sm:$0xff] }
 0x65b   :  { %13569 = vmatprep.mubr.msk.f32.mxu0 %vm900_vm0, %v16435_v5  ;;  %13586 = vmatpush3.msra.mxu1 %v16597_v47  ;;  %v16965_v31 = vpop.permute.xlu0 %4266  ;;  %v5269_v5 = vld [vmem:[%s20616_s5 + $0x48] sm:$0xff]  ;;  %v20618_v47 = vld [vmem:[#allocation14_spill] sm:$0xff] }
 0x65c   :  { %13622 = vmatpush3.msra.mxu0 %v16629_v38  ;;  %13587 = vmatprep.subr.mxu1 %v16493_v40 }
 0x65d   :  { %13570 = vmatmul.mubr.msk.f32.gmra.mxu0 %vm900_vm0, %v16444_v39  ;;  %13623 = vmatprep.subr.mxu0 %v16578_v62 }
 0x65e   :  { %13624 = vmatpush3.msra.mxu0 %v16578_v62  ;;  %13588 = vmatpush3.msra.mxu1 %v16493_v40  ;;  %v16980_v38 = vpop.permute.xlu1 %4270  ;;  %v5270_v62 = vld [vmem:[%s20616_s5 + $0x50] sm:$0xff] }
 0x65f   :  { %13589 = vmatprep.subr.mxu1 %v16537_v16  ;;  %13625 = vmatprep.subr.mxu0 %v16586_v2  ;;  %v16984_v39 = vpop.permute.xlu0 %4268 }
 0x660   :  { %5318 = vperm.xlu0 %14467, %v5268_v41   ;;  %5323 = vperm.xlu1 %14466, %v5269_v5   ;;  %v5011_v5 = vld [vmem:[%s20560_s6 + $0x20] sm:$0xff] }
 0x661   :  { %13572 = vmatprep.mubr.msk.f32.mxu0 %vm900_vm0, %v16461_v18  ;;  %13590 = vmatpush3.msra.mxu1 %v16537_v16  ;;  %v5271_v18 = vld [vmem:[%s20616_s5 + $0x58] sm:$0xff]  ;;  %v5272_v16 = vld [vmem:[%s20616_s5 + $0x60] sm:$0xff] }
 0x662   :  { %13626 = vmatpush3.msra.mxu0 %v16586_v2  ;;  %13592 = vmatmul.mubr.msk.f32.vlgmr.msra.gmra.mxu1 %vm900_vm0, %v16480_v13  ;;  %v16992_v40 = vpop.permute.xlu1 %4274  ;;  %v5273_v2 = vld [vmem:[%s20616_s5 + $0x68] sm:$0xff] }
 0x663   :  { %13573 = vmatmul.mubr.msk.f32.gmra.mxu0 %vm900_vm0, %v16470_v49  ;;  %13627 = vmatprep.subr.mxu0 %v16519_v14  ;;  %v17000_v54 = vpop.permute.xlu0 %4272 }
 0x664   :  { %13655 = vmatprep.subr.mxu1 %v16748_v63  ;;  %13628 = vmatpush3.msra.mxu0 %v16519_v14  ;;  %v20617_v14 = vld [vmem:[#allocation13_spill] sm:$0xff] }
 0x665   :  { %13594 = vmatprep.mubr.msk.f32.mxu1 %vm900_vm0, %v16679_v58  ;;  %13656 = vmatpush3.msra.mxu1 %v16748_v63  ;;  %v20619_v58 = vld [vmem:[#allocation16_spill] sm:$0xff] }
 0x666   :  { %13629 = vmatprep.subr.mxu0 %v16655_v56  ;;  %5328 = vperm.xlu0 %14467, %v5270_v62   ;;  %v17011_v49 = vpop.permute.xlu1 %4278  ;;  %v5274_v63 = vld [vmem:[%s20616_s5 + $0x70] sm:$0xff] }
 0x667   :  { %5333 = vperm.xlu1 %14466, %v5271_v18   ;;  %13630 = vmatpush3.msra.mxu0 %v16655_v56  ;;  %v17014_v13 = vpop.permute.xlu0 %4276  ;;  %v5013_v62 = vld [vmem:[%s20560_s6 + $0x70] sm:$0xff] }
 0x668   :  { %13631 = vmatprep.mubr.msk.f32.mxu0 %vm900_vm0, %v20617_v14  ;;  %13595 = vmatmul.mubr.msk.f32.gmra.mxu1 %vm900_vm0, %v16662_v50 }
 0x669   :  { %13632 = vmatmul.mubr.msk.f32.vlgmr.msra.gmra.mxu0 %vm900_vm0, %v20618_v47  ;;  %13695 = vmatprep.subr.mxu0 %v16768_v20  ;;  %v5017_v47 = vld [vmem:[%s20560_s6 + $0x110] sm:$0xff] }
 0x66a   :  { %13696 = vmatpush3.msra.mxu0 %v16768_v20  ;;  %13597 = vmatprep.mubr.msk.f32.mxu1 %vm900_vm0, %v16692_v42  ;;  %v17032_v56 = vpop.permute.xlu1 %4282  ;;  %v5275_v42 = vld [vmem:[%s20616_s5 + $0x78] sm:$0xff]  ;;  %v20620_v20 = vld [vmem:[#allocation15_spill] sm:$0xff] }
 0x66b   :  { %5338 = vperm.xlu0 %14467, %v5272_v16   ;;  %5343 = vperm.xlu1 %14466, %v5273_v2   ;;  %v17034_v50 = vpop.permute.xlu0 %4280  ;;  %v5016_v2 = vld [vmem:[%s20560_s6 + $0xe8] sm:$0xff] }
 0x66c   :  { %13634 = vmatprep.mubr.msk.f32.mxu0 %vm900_vm0, %v20619_v58  ;;  %13598 = vmatmul.mubr.msk.f32.gmra.mxu1 %vm900_vm0, %v16677_v10  ;;  %v5019_v58 = vld [vmem:[%s20560_s6 + $0x160] sm:$0xff] }
 0x66d   :  { %13635 = vmatmul.mubr.msk.f32.gmra.mxu0 %vm900_vm0, %v20620_v20  ;;  %13600 = vmatprep.mubr.msk.f32.mxu1 %vm900_vm0, %v16709_v30 }
 0x66e   :  { %13637 = vmatprep.mubr.msk.f32.mxu0 %vm900_vm0, %v20621_v34  ;;  %v4309_v36 = vpop.permute.xlu1 %4308  ;;  %v5021_v34 = vld [vmem:[%s20560_s6 + $0x1b0] sm:$0xff] }
 0x66f   :  { %5348 = vperm.xlu0 %14467, %v5274_v63   ;;  %5353 = vperm.xlu1 %14466, %v5275_v42   ;;  %v17052_v10 = vpop.permute.xlu0 %4808  ;;  %v5020_v42 = vld [vmem:[%s20560_s6 + $0x188] sm:$0xff] }
 0x670   :  { %13601 = vmatmul.mubr.msk.f32.gmra.mxu1 %vm900_vm0, %v16690_v23  ;;  %13657 = vmatprep.subr.mxu1 %v4309_v36  ;;  %v20624_v23 = vld [vmem:[#allocation19_spill] sm:$0xff] }
 0x671   :  { %13638 = vmatmul.mubr.msk.f32.gmra.mxu0 %vm900_vm0, %v20622_v0  ;;  %13603 = vmatprep.mubr.msk.f32.mxu1 %vm900_vm0, %v16726_v11  ;;  %v20625_v11 = vld [vmem:[#allocation22_spill] sm:$0xff] }
 0x672   :  { %13640 = vmatprep.mubr.msk.f32.mxu0 %vm900_vm0, %v20623_v21  ;;  %13658 = vmatpush3.msra.mxu1 %v4309_v36  ;;  %v17062_v30 = vpop.permute.xlu1 %4284  ;;  %v5023_v0 = vld [vmem:[%s20560_s6 + $0x200] sm:$0xff] }
 0x673   :  { %13659 = vmatprep.subr.mxu1 %v16741_v44  ;;  %v4542_v12 = vpop.permute.xlu0 %4541 }
 0x674   :  { %13604 = vmatmul.mubr.msk.f32.gmra.mxu1 %vm900_vm0, %v16707_v6  ;;  %13697 = vmatprep.subr.mxu0 %v4542_v12  ;;  %v20626_v6 = vld [vmem:[#allocation21_spill] sm:$0xff] }
 0x675   :  { %13641 = vmatmul.mubr.msk.f32.gmra.mxu0 %vm900_vm0, %v20624_v23  ;;  %13606 = vmatprep.mubr.msk.f32.mxu1 %vm900_vm0, %v16719_v35  ;;  %v20627_v35 = vld [vmem:[#allocation23_spill] sm:$0xff]  ;;  %v5025_v23 = vld [vmem:[%s20560_s6 + $0x250] sm:$0xff] }
 0x676   :  { %13643 = vmatprep.mubr.msk.f32.mxu0 %vm900_vm0, %v20625_v11  ;;  %13660 = vmatpush3.msra.mxu1 %v16741_v44  ;;  %v17074_v37 = vpop.permute.xlu1 %4804  ;;  %v5026_v11 = vld [vmem:[%s20560_s6 + $0x278] sm:$0xff] }
 0x677   :  { %13661 = vmatprep.subr.mxu1 %v16784_v22  ;;  %13698 = vmatpush3.msra.mxu0 %v4542_v12  ;;  %v5042_v7 = vpop.permute.xlu0 %5041 }
 0x678   :  { %13607 = vmatmul.mubr.msk.f32.gmra.mxu1 %vm900_vm0, %v16791_v8  ;;  %13699 = vmatprep.subr.mxu0 %v16817_v60 }
 0x679   :  { %13644 = vmatmul.mubr.msk.f32.gmra.mxu0 %vm900_vm0, %v20626_v6  ;;  %13609 = vmatprep.mubr.msk.f32.mxu1 %vm900_vm0, %v16810_v53  ;;  %v13513_v6 = vpop.f32.mrf.mxu1 }
 0x67a   :  { %13646 = vmatprep.mubr.msk.f32.mxu0 %vm900_vm0, %v20627_v35  ;;  %13662 = vmatpush3.msra.mxu1 %v16784_v22  ;;  %v17087_v44 = vpop.permute.xlu1 %4802  ;;  %v20629_v22 = vld [vmem:[#allocation25_spill] sm:$0xff] }
 0x67b   :  { %13663 = vmatprep.subr.mxu1 %v16836_v27  ;;  %13700 = vmatpush3.msra.mxu0 %v16817_v60  ;;  %v17091_v8 = vpop.permute.xlu0 %4286 }
 0x67c   :  { %13610 = vmatmul.mubr.msk.f32.gmra.mxu1 %vm900_vm0, %v16843_v29  ;;  %13701 = vmatprep.subr.mxu0 %v16869_v24  ;;  %v20630_v29 = vld [vmem:[#allocation26_spill] sm:$0xff] }
 0x67d   :  { %13647 = vmatmul.mubr.msk.f32.gmra.mxu0 %vm900_vm0, %v20628_v1  ;;  %13612 = vmatprep.mubr.msk.f32.mxu1 %vm900_vm0, %v16885_v57 }
 0x67e   :  { %13664 = vmatpush3.msra.mxu1 %v16836_v27  ;;  %13649 = vmatprep.mubr.msk.f32.mxu0 %vm900_vm0, %v20629_v22  ;;  %v17103_v53 = vpop.permute.xlu1 %4288 }
 0x67f   :  { %13665 = vmatprep.subr.mxu1 %v16862_v28  ;;  %13702 = vmatpush3.msra.mxu0 %v16869_v24  ;;  %v17107_v60 = vpop.permute.xlu0 %5037 }
 0x680   :  { %13666 = vmatpush3.msra.mxu1 %v16862_v28  ;;  %13703 = vmatprep.subr.mxu0 %v16892_v48 }
 0x681   :  { %13613 = vmatmul.mubr.msk.f32.gmra.mxu1 %vm900_vm0, %v16910_v51  ;;  %13650 = vmatmul.mubr.msk.f32.gmra.mxu0 %vm900_vm0, %v20630_v29  ;;  %v20633_v51 = vld [vmem:[#allocation30_spill] sm:$0xff] }
 0x682   :  { %13667 = vmatprep.subr.mxu1 %v16905_v61  ;;  %13704 = vmatpush3.msra.mxu0 %v16892_v48  ;;  %v17117_v27 = vpop.permute.xlu1 %4800 }
 0x683   :  { %13668 = vmatpush3.msra.mxu1 %v16905_v61  ;;  %13671 = vmatprep.mubr.msk.f32.mxu1 %vm900_vm0, %v16943_v4  ;;  %v17122_v24 = vpop.permute.xlu0 %4290 }
 0x684   :  { %13669 = vmatprep.subr.mxu1 %v16932_v17  ;;  %13705 = vmatprep.subr.mxu0 %v16922_v52 }
 0x685   :  { %13652 = vmatprep.mubr.msk.f32.mxu0 %vm900_vm0, %v16653_v59  ;;  %13670 = vmatpush3.msra.mxu1 %v16932_v17  ;;  %v20634_v17 = vld [vmem:[#allocation28_spill] sm:$0xff] }
 0x686   :  { %13706 = vmatpush3.msra.mxu0 %v16922_v52  ;;  %13672 = vmatmul.mubr.msk.f32.vlgmr.msra.gmra.mxu1 %vm900_vm0, %v16965_v31  ;;  %v17132_v61 = vpop.permute.xlu1 %4798  ;;  %v20636_v31 = vld [vmem:[#allocation33_spill] sm:$0xff] }
 0x687   :  { %13653 = vmatmul.mubr.msk.f32.gmra.mxu0 %vm900_vm0, %v16667_v3  ;;  %13707 = vmatprep.subr.mxu0 %v16948_v46  ;;  %v5036_v28 = vpop.permute.xlu0 %5035 }
 0x688   :  { %13735 = vmatprep.subr.mxu1 %v17052_v10  ;;  %13708 = vmatpush3.msra.mxu0 %v16948_v46 }
 0x689   :  { %13674 = vmatprep.mubr.msk.f32.mxu1 %vm900_vm0, %v16984_v39  ;;  %13736 = vmatpush3.msra.mxu1 %v17052_v10  ;;  %v20637_v39 = vld [vmem:[#allocation32_spill] sm:$0xff]  ;;  %v5022_v10 = vld [vmem:[%s20560_s6 + $0x1d8] sm:$0xff] }
 0x68a   :  { %13709 = vmatprep.subr.mxu0 %v16960_v19  ;;  %13711 = vmatprep.mubr.msk.f32.mxu0 %vm900_vm0, %v16703_v32  ;;  %v4293_v59 = vpop.permute.xlu1 %4292 }
 0x68b   :  { %13710 = vmatpush3.msra.mxu0 %v16960_v19  ;;  %13675 = vmatmul.mubr.msk.f32.gmra.mxu1 %vm900_vm0, %v16980_v38  ;;  %v5034_v3 = vpop.permute.xlu0 %5033  ;;  %v20635_v19 = vld [vmem:[#allocation29_spill] sm:$0xff] }
 0x68c   :  { %13712 = vmatmul.mubr.msk.f32.vlgmr.msra.gmra.mxu0 %vm900_vm0, %v16724_v55  ;;  %13775 = vmatprep.subr.mxu0 %v5042_v7 }
 0x68d   :  { %13776 = vmatpush3.msra.mxu0 %v5042_v7  ;;  %13677 = vmatprep.mubr.msk.f32.mxu1 %vm900_vm0, %v17000_v54 }
 0x68e   :  { %13714 = vmatprep.mubr.msk.f32.mxu0 %vm900_vm0, %v16746_v25  ;;  %v4807_v52 = vpop.permute.xlu1 %4806 }
 0x68f   :  { %13678 = vmatmul.mubr.msk.f32.gmra.mxu1 %vm900_vm0, %v16992_v40  ;;  %v4295_v32 = vpop.permute.xlu0 %4294  ;;  %13737 = vmatprep.subr.mxu1 %v4807_v52  ;;  %v5012_v40 = vld [vmem:[%s20560_s6 + $0x48] sm:$0xff] }
 0x690   :  { %13715 = vmatmul.mubr.msk.f32.gmra.mxu0 %vm900_vm0, %v16737_v43  ;;  %13680 = vmatprep.mubr.msk.f32.mxu1 %vm900_vm0, %v17014_v13  ;;  %v5015_v13 = vld [vmem:[%s20560_s6 + $0xc0] sm:$0xff] }
 0x691   :  { %13717 = vmatprep.mubr.msk.f32.mxu0 %vm900_vm0, %v16766_v45  ;;  %13738 = vmatpush3.msra.mxu1 %v4807_v52 }
 0x692   :  { %13739 = vmatprep.subr.mxu1 %v17074_v37  ;;  %v4797_v55 = vpop.permute.xlu1 %4796 }
 0x693   :  { %13681 = vmatmul.mubr.msk.f32.gmra.mxu1 %vm900_vm0, %v17011_v49  ;;  %v5040_v25 = vpop.permute.xlu0 %5039  ;;  %v5014_v49 = vld [vmem:[%s20560_s6 + $0x98] sm:$0xff] }
 0x694   :  { %13718 = vmatmul.mubr.msk.f32.gmra.mxu0 %vm900_vm0, %v16759_v33  ;;  %13683 = vmatprep.mubr.msk.f32.mxu1 %vm900_vm0, %v17034_v50  ;;  %v5018_v50 = vld [vmem:[%s20560_s6 + $0x138] sm:$0xff] }
 0x695   :  { %13720 = vmatprep.mubr.msk.f32.mxu0 %vm900_vm0, %v16789_v9  ;;  %13740 = vmatpush3.msra.mxu1 %v17074_v37  ;;  %v20638_v37 = vmov 0.0  }
 0x696   :  { %13741 = vmatprep.subr.mxu1 %v17087_v44  ;;  %13777 = vmatprep.subr.mxu0 %v5040_v25  ;;  %v4795_v43 = vpop.permute.xlu1 %4794 }
 0x697   :  { %13684 = vmatmul.mubr.msk.f32.gmra.mxu1 %vm900_vm0, %v17032_v56  ;;  %13778 = vmatpush3.msra.mxu0 %v5040_v25  ;;  %v5032_v45 = vpop.permute.xlu0 %5031 }
 0x698   :  { %13721 = vmatmul.mubr.msk.f32.gmra.mxu0 %vm900_vm0, %v16780_v15  ;;  %13686 = vmatprep.mubr.msk.f32.mxu1 %vm900_vm0, %v17062_v30  ;;  %v20631_v15 = vld [vmem:[#allocation27_spill] sm:$0xff] }
 0x699   :  { %13723 = vmatprep.mubr.msk.f32.mxu0 %vm900_vm0, %v16815_v26  ;;  %13742 = vmatpush3.msra.mxu1 %v17087_v44  ;;  %v20632_v26 = vld [vmem:[#allocation31_spill] sm:$0xff] }
 0x69a   :  { %13743 = vmatprep.subr.mxu1 %v17117_v27  ;;  %13779 = vmatprep.subr.mxu0 %v17107_v60  ;;  %v4763_v33 = vpop.permute.xlu1 %4762  ;;  %v5024_v30 = vld [vmem:[%s20560_s6 + $0x228] sm:$0xff]  ;;  %s14551_s6 = smov 5  }
 0x69b   :  { %13687 = vmatmul.mubr.msk.f32.gmra.mxu1 %vm900_vm0, %v17091_v8  ;;  %13780 = vmatpush3.msra.mxu0 %v17107_v60  ;;  %v5030_v9 = vpop.permute.xlu0 %5029  ;;  %v17293_v8 = vpop.f32.mrf.mxu1 }
 0x69c   :  { %13724 = vmatmul.mubr.msk.f32.gmra.mxu0 %vm900_vm0, %v20631_v15  ;;  %13689 = vmatprep.mubr.msk.f32.mxu1 %vm900_vm0, %v17103_v53 }
 0x69d   :  { %13726 = vmatprep.mubr.msk.f32.mxu0 %vm900_vm0, %v20632_v26  ;;  %13744 = vmatpush3.msra.mxu1 %v17117_v27  ;;  %v13516_v53 = vpop.f32.mrf.mxu1 }
 0x69e   :  { %13745 = vmatprep.subr.mxu1 %v17132_v61  ;;  %13781 = vmatprep.subr.mxu0 %v5036_v28  ;;  %v5028_v57 = vpop.permute.xlu1 %5027 }
 0x69f   :  { %13690 = vmatmul.mubr.msk.f32.gmra.mxu1 %vm900_vm0, %v17122_v24  ;;  %13782 = vmatpush3.msra.mxu0 %v5036_v28  ;;  %v4765_v48 = vpop.permute.xlu0 %4764  ;;  %v17299_v27 = vpop.f32.mrf.mxu1 }
 0x6a0   :  { %13727 = vmatmul.mubr.msk.f32.gmra.mxu0 %vm900_vm0, %v20633_v51  ;;  %13692 = vmatprep.mubr.msk.f32.mxu1 %vm900_vm0, %v4293_v59 }
 0x6a1   :  { %13729 = vmatprep.mubr.msk.f32.mxu0 %vm900_vm0, %v20634_v17  ;;  %13746 = vmatpush3.msra.mxu1 %v17132_v61  ;;  %v13519_v28 = vpop.f32.mrf.mxu1 }
 0x6a2   :  { %13747 = vmatprep.subr.mxu1 %v4797_v55  ;;  %13783 = vmatprep.subr.mxu0 %v5034_v3  ;;  %v4769_v4 = vpop.permute.xlu1 %4768 }
 0x6a3   :  { %13693 = vmatmul.mubr.msk.f32.gmra.mxu1 %vm900_vm0, %v4295_v32  ;;  %13784 = vmatpush3.msra.mxu0 %v5034_v3  ;;  %v4767_v46 = vpop.permute.xlu0 %4766  ;;  %v17305_v52 = vpop.f32.mrf.mxu1 }
 0x6a4   :  { %13730 = vmatmul.mubr.msk.f32.gmra.mxu0 %vm900_vm0, %v20635_v19  ;;  %13748 = vmatpush3.msra.mxu1 %v4797_v55 }
 0x6a5   :  { %13749 = vmatprep.subr.mxu1 %v4795_v43  ;;  %13785 = vmatprep.subr.mxu0 %v5032_v45  ;;  %v13522_v25 = vpop.f32.mrf.mxu1 }
 0x6a6   :  { %13732 = vmatprep.mubr.msk.f32.mxu0 %vm900_vm0, %v20636_v31  ;;  %13750 = vmatpush3.msra.mxu1 %v4795_v43  ;;  %v4773_v41 = vpop.permute.xlu1 %4772 }
 0x6a7   :  { %13786 = vmatpush3.msra.mxu0 %v5032_v45  ;;  %13751 = vmatprep.mubr.msk.f32.mxu1 %vm900_vm0, %v4763_v33  ;;  %v4771_v38 = vpop.permute.xlu0 %4770  ;;  %v17311_v33 = vpop.f32.mrf.mxu1 }
 0x6a8   :  { %13733 = vmatmul.mubr.msk.f32.gmra.mxu0 %vm900_vm0, %v20637_v39  ;;  %13787 = vmatprep.subr.mxu0 %v5030_v9 }
 0x6a9   :  { %13788 = vmatpush3.msra.mxu0 %v5030_v9  ;;  %13752 = vmatmul.mubr.msk.f32.vlgmr.msra.gmra.mxu1 %vm900_vm0, %v4765_v48 }
 0x6aa   :  { %13789 = vmatprep.subr.mxu0 %v5028_v57  ;;  %13791 = vmatprep.mubr.msk.f32.mxu0 %vm900_vm0, %v5011_v5  ;;  %v4777_v54 = vpop.permute.xlu1 %4776 }
 0x6ab   :  { %13790 = vmatpush3.msra.mxu0 %v5028_v57  ;;  %13754 = vmatprep.mubr.msk.f32.mxu1 %vm900_vm0, %v4767_v46  ;;  %v4775_v18 = vpop.permute.xlu0 %4774  ;;  %v13525_v57 = vpop.f32.mrf.mxu1 }
 0x6ac   :  { %13792 = vmatmul.mubr.msk.f32.vlgmr.msra.gmra.mxu0 %vm900_vm0, %v5012_v40 }
 0x6ad   :  { %13755 = vmatmul.mubr.msk.f32.gmra.mxu1 %vm900_vm0, %v4769_v4  ;;  %13794 = vmatprep.mubr.msk.f32.mxu0 %vm900_vm0, %v5013_v62  ;;  %v17319_v46 = vpop.f32.mrf.mxu1 }
 0x6ae   :  { %13757 = vmatprep.mubr.msk.f32.mxu1 %vm900_vm0, %v4771_v38  ;;  %v4781_v16 = vpop.permute.xlu1 %4780 }
 0x6af   :  { %v4779_v14 = vpop.permute.xlu0 %4778  ;;  %v13528_v38 = vpop.f32.mrf.mxu1 }
 0x6b0   :  { %13795 = vmatmul.mubr.msk.f32.gmra.mxu0 %vm900_vm0, %v5014_v49 }
 0x6b1   :  { %13758 = vmatmul.mubr.msk.f32.gmra.mxu1 %vm900_vm0, %v4773_v41  ;;  %13797 = vmatprep.mubr.msk.f32.mxu0 %vm900_vm0, %v5015_v13 }
 0x6b2   :  { %13760 = vmatprep.mubr.msk.f32.mxu1 %vm900_vm0, %v4775_v18  ;;  %v4785_v63 = vpop.permute.xlu1 %4784  ;;  %v17325_v18 = vpop.f32.mrf.mxu1 }
 0x6b3   :  { %v4783_v56 = vpop.permute.xlu0 %4782 }
 0x6b4   :  { %13798 = vmatmul.mubr.msk.f32.gmra.mxu0 %vm900_vm0, %v5016_v2  ;;  %v13531_v2 = vpop.f32.mrf.mxu1 }
 0x6b5   :  { %13761 = vmatmul.mubr.msk.f32.gmra.mxu1 %vm900_vm0, %v4777_v54  ;;  %13800 = vmatprep.mubr.msk.f32.mxu0 %vm900_vm0, %v5017_v47 }
 0x6b6   :  { %13763 = vmatprep.mubr.msk.f32.mxu1 %vm900_vm0, %v4779_v14  ;;  %v4789_v36 = vpop.permute.xlu1 %4788 }
 0x6b7   :  { %v4787_v20 = vpop.permute.xlu0 %4786 }
 0x6b8   :  { %13801 = vmatmul.mubr.msk.f32.gmra.mxu0 %vm900_vm0, %v5018_v50 }
 0x6b9   :  { %13764 = vmatmul.mubr.msk.f32.gmra.mxu1 %vm900_vm0, %v4781_v16  ;;  %13803 = vmatprep.mubr.msk.f32.mxu0 %vm900_vm0, %v5019_v58 }
 0x6ba   :  { %13766 = vmatprep.mubr.msk.f32.mxu1 %vm900_vm0, %v4783_v56  ;;  %v4793_v12 = vpop.permute.xlu1 %4792 }
 0x6bb   :  { %v4791_v21 = vpop.permute.xlu0 %4790 }
 0x6bc   :  { %13804 = vmatmul.mubr.msk.f32.gmra.mxu0 %vm900_vm0, %v5020_v42 }
 0x6bd   :  { %13767 = vmatmul.mubr.msk.f32.gmra.mxu1 %vm900_vm0, %v4785_v63  ;;  %13806 = vmatprep.mubr.msk.f32.mxu0 %vm900_vm0, %v5021_v34  ;;  %v17331_v63 = vpop.f32.mrf.mxu1 }
 0x6be   :  { %13769 = vmatprep.mubr.msk.f32.mxu1 %vm900_vm0, %v4787_v20  ;;  %20641 = vst [vmem:[#allocation16_spill] sm:$0xff] %v17331_v63 }
 0x6c0   :  { %13807 = vmatmul.mubr.msk.f32.gmra.mxu0 %vm900_vm0, %v5022_v10 }
 0x6c1   :  { %13770 = vmatmul.mubr.msk.f32.gmra.mxu1 %vm900_vm0, %v4789_v36  ;;  %13809 = vmatprep.mubr.msk.f32.mxu0 %vm900_vm0, %v5023_v0  ;;  %v13534_v36 = vpop.f32.mrf.mxu1 }
 0x6c2   :  { %13772 = vmatprep.mubr.msk.f32.mxu1 %vm900_vm0, %v4791_v21 }
 0x6c4   :  { %13810 = vmatmul.mubr.msk.f32.gmra.mxu0 %vm900_vm0, %v5024_v30  ;;  %v17339_v30 = vpop.f32.mrf.mxu1 }
 0x6c5   :  { %13773 = vmatmul.mubr.msk.f32.gmra.mxu1 %vm900_vm0, %v4793_v12  ;;  %13812 = vmatprep.mubr.msk.f32.mxu0 %vm900_vm0, %v5025_v23  ;;  %20643 = vst [vmem:[#allocation18_spill] sm:$0xff] %v17339_v30 }
 0x6c6   :  { %5516 = vmatprep.mubr.f32.mxu1 %v20638_v37 }
 0x6c8   :  { %13813 = vmatmul.mubr.msk.f32.gmra.mxu0 %vm900_vm0, %v5026_v11 }
 0x6e2   :  { %v13473_v7 = vpop.f32.mrf.mxu0 }
 0x6e3   :  { %v3444_v15 = vadd.f32 %v13513_v6, %v13473_v7 }
 0x6e4   :  { %v17291_v35 = vpop.f32.mrf.mxu0 }
 0x6e6   :  { %v13476_v44 = vpop.f32.mrf.mxu0 }
 0x6e7   :  { %v3454_v17 = vadd.f32 %v13516_v53, %v13476_v44 }
 0x6e8   :  { %v17295_v1 = vpop.f32.mrf.mxu0 }
 0x6ea   :  { %v13479_v22 = vpop.f32.mrf.mxu0 }
 0x6eb   :  { %v3464_v41 = vadd.f32 %v13519_v28, %v13479_v22 }
 0x6ec   :  { %v17297_v60 = vpop.f32.mrf.mxu0 }
 0x6ee   :  { %v13482_v29 = vpop.f32.mrf.mxu0 }
 0x6ef   :  { %v3474_v62 = vadd.f32 %v13522_v25, %v13482_v29 }
 0x6f0   :  { %v17301_v24 = vpop.f32.mrf.mxu0 }
 0x6f2   :  { %v13485_v61 = vpop.f32.mrf.mxu0 }
 0x6f3   :  { %v3484_v14 = vadd.f32 %v13525_v57, %v13485_v61 }
 0x6f4   :  { %v17303_v59 = vpop.f32.mrf.mxu0 }
 0x6f6   :  { %v13488_v3 = vpop.f32.mrf.mxu0 }
 0x6f7   :  { %v3494_v50 = vadd.f32 %v13528_v38, %v13488_v3 }
 0x6f8   :  { %v17307_v32 = vpop.f32.mrf.mxu0 }
 0x6fa   :  { %v13491_v55 = vpop.f32.mrf.mxu0 }
 0x6fb   :  { %v3504_v34 = vadd.f32 %v13531_v2, %v13491_v55 }
 0x6fc   :  { %v17309_v43 = vpop.f32.mrf.mxu0 }
 0x6fd   :  { %20639 = vst [vmem:[#allocation13_spill] sm:$0xff] %v17309_v43 }
 0x6fe   :  { %v13494_v45 = vpop.f32.mrf.mxu0 }
 0x6ff   :  { %v3514_v12 = vadd.f32 %v13534_v36, %v13494_v45 }
 0x700   :  { %v17313_v9 = vpop.f32.mrf.mxu0 }
 0x701   :  { %20640 = vst [vmem:[#allocation14_spill] sm:$0xff] %v17313_v9 }
 0x702   :  { %v13553_v26 = vpop.f32.mrf.mxu0 }
 0x703   :  { %v17315_v48 = vadd.f32 %v13553_v26, %v3444_v15 }
 0x704   :  { %v17317_v51 = vpop.f32.mrf.mxu0 }
 0x706   :  { %v13556_v4 = vpop.f32.mrf.mxu0 }
 0x707   :  { %v3753_v19 = vadd.f32 %v13556_v4, %v3454_v17 }
 0x708   :  { %v17321_v31 = vpop.f32.mrf.mxu0 }
 0x70a   :  { %v13559_v5 = vpop.f32.mrf.mxu0 }
 0x70b   :  { %v3755_v39 = vadd.f32 %v13559_v5, %v3464_v41  ;;  %v5418_v41 = vld [vmem:[%s20336_s11 + $0xf0] sm:$0xff]  ;;  %v5417_v5 = vld [vmem:[%s20336_s11 + $0xe8] sm:$0xff] }
 0x70c   :  { %v17323_v40 = vpop.f32.mrf.mxu0 }
 0x70e   :  { %v13562_v54 = vpop.f32.mrf.mxu0 }
 0x70f   :  { %v3757_v49 = vadd.f32 %v13562_v54, %v3474_v62  ;;  %v5416_v62 = vld [vmem:[%s20336_s11 + $0xe0] sm:$0xff] }
 0x710   :  { %v17327_v13 = vpop.f32.mrf.mxu0 }
 0x712   :  { %v13565_v16 = vpop.f32.mrf.mxu0 }
 0x713   :  { %v3759_v47 = vadd.f32 %v13565_v16, %v3484_v14  ;;  %v5414_v16 = vld [vmem:[%s20336_s11 + $0xd0] sm:$0xff] }
 0x714   :  { %v17329_v56 = vpop.f32.mrf.mxu0 }
 0x717   :  { %v13568_v58 = vpop.f32.mrf.mxu0 }
 0x718   :  { %v3761_v42 = vadd.f32 %v13568_v58, %v3494_v50  ;;  %v5413_v58 = vld [vmem:[%s20336_s11 + $0xc8] sm:$0xff] }
 0x719   :  { %v17333_v20 = vpop.f32.mrf.mxu0 }
 0x71d   :  { %v13571_v10 = vpop.f32.mrf.mxu0 }
 0x71e   :  { %v17335_v0 = vadd.f32 %v13571_v10, %v3504_v34  ;;  %v5412_v10 = vld [vmem:[%s20336_s11 + $0xc0] sm:$0xff] }
 0x71f   :  { %v17337_v21 = vpop.f32.mrf.mxu0 }
 0x720   :  { %20642 = vst [vmem:[#allocation15_spill] sm:$0xff] %v17337_v21 }
 0x722   :  { %v17341_v23 = vpop.f32.mrf.mxu1 }
 0x723   :  { %v13574_v11 = vpop.f32.mrf.mxu0 }
 0x724   :  { %v17343_v7 = vadd.f32 %v13574_v11, %v3514_v12  ;;  %v17345_v6 = vpop.f32.mrf.mxu1 }
 0x725   :  { %v17347_v44 = vpop.f32.mrf.mxu0 }
 0x726   :  { %20644 = vst [vmem:[#allocation17_spill] sm:$0xff] %v17347_v44 }
 0x728   :  { %v13596_v22 = vpop.f32.mrf.mxu1 }
 0x729   :  { %v4002_v53 = vadd.f32 %v13596_v22, %v3753_v19  ;;  %v17349_v29 = vpop.f32.mrf.mxu0  ;;  %v5419_v19 = vld [vmem:[%s20336_s11 + $0xf8] sm:$0xff]  ;;  %v5410_v22 = vld [vmem:[%s20336_s11 + $0xb0] sm:$0xff] }
 0x72a   :  { %v17351_v61 = vpop.f32.mrf.mxu1  ;;  %5452 = vmatprep.subr.mxu1 %v5419_v19 }
 0x72b   :  { %v17353_v28 = vpop.f32.mrf.mxu0  ;;  %5453 = vmatpush1.msra.mxu1 %v5418_v41  ;;  %v5406_v41 = vld [vmem:[%s20336_s11 + $0x90] sm:$0xff] }
 0x72c   :  { %v13599_v3 = vpop.f32.mrf.mxu1  ;;  %5454 = vmatprep.subr.mxu1 %v5417_v5 }
 0x72d   :  { %v4004_v55 = vadd.f32 %v13599_v3, %v3755_v39  ;;  %v13636_v25 = vpop.f32.mrf.mxu0  ;;  %5455 = vmatpush1.msra.mxu1 %v5416_v62 }
 0x72e   :  { %v17355_v45 = vadd.f32 %v13636_v25, %v4002_v53  ;;  %v17357_v15 = vpop.f32.mrf.mxu1 }
 0x72f   :  { %v17359_v26 = vpop.f32.mrf.mxu0 }
 0x730   :  { %v13602_v57 = vpop.f32.mrf.mxu1 }
 0x731   :  { %v4006_v17 = vadd.f32 %v13602_v57, %v3757_v49  ;;  %v13639_v4 = vpop.f32.mrf.mxu0  ;;  %v5415_v49 = vld [vmem:[%s20336_s11 + $0xd8] sm:$0xff] }
 0x732   :  { %v17370_v38 = vadd.f32 %v13639_v4, %v4004_v55  ;;  %v17372_v39 = vpop.f32.mrf.mxu1  ;;  %5456 = vmatprep.subr.mxu1 %v5415_v49  ;;  %v5409_v55 = vld [vmem:[%s20336_s11 + $0xa8] sm:$0xff] }
 0x733   :  { %v17377_v54 = vpop.f32.mrf.mxu0  ;;  %5457 = vmatpush1.msra.mxu1 %v5414_v16  ;;  %v5405_v49 = vld [vmem:[%s20336_s11 + $0x88] sm:$0xff] }
 0x734   :  { %v13605_v14 = vpop.f32.mrf.mxu1  ;;  %5458 = vmatprep.subr.mxu1 %v5413_v58  ;;  %v5402_v58 = vld [vmem:[%s20336_s11 + $0x70] sm:$0xff] }
 0x735   :  { %v4008_v2 = vadd.f32 %v13605_v14, %v3759_v47  ;;  %v13642_v50 = vpop.f32.mrf.mxu0  ;;  %v5411_v47 = vld [vmem:[%s20336_s11 + $0xb8] sm:$0xff]  ;;  %5459 = vmatpush1.msra.mxu1 %v5412_v10 }
 0x736   :  { %v17388_v34 = vadd.f32 %v13642_v50, %v4006_v17  ;;  %v17390_v36 = vpop.f32.mrf.mxu1  ;;  %5460 = vmatprep.subr.mxu1 %v5411_v47  ;;  %v5408_v17 = vld [vmem:[%s20336_s11 + $0xa0] sm:$0xff] }
 0x737   :  { %v17395_v12 = vpop.f32.mrf.mxu0  ;;  %5461 = vmatpush1.msra.mxu1 %v5410_v22 }
 0x738   :  { %v13608_v11 = vpop.f32.mrf.mxu1  ;;  %5462 = vmatprep.subr.mxu1 %v5409_v55 }
 0x739   :  { %v4010_v53 = vadd.f32 %v13608_v11, %v3761_v42  ;;  %v13645_v3 = vpop.f32.mrf.mxu0  ;;  %v5407_v42 = vld [vmem:[%s20336_s11 + $0x98] sm:$0xff]  ;;  %5463 = vmatpush1.msra.mxu1 %v5408_v17  ;;  %v5401_v11 = vld [vmem:[%s20336_s11 + $0x68] sm:$0xff] }
 0x73a   :  { %v17406_v25 = vadd.f32 %v13645_v3, %v4008_v2  ;;  %v17408_v57 = vpop.f32.mrf.mxu1  ;;  %5464 = vmatprep.subr.mxu1 %v5407_v42  ;;  %v5404_v2 = vld [vmem:[%s20336_s11 + $0x80] sm:$0xff]  ;;  %v5399_v42 = vld [vmem:[%s20336_s11 + $0x58] sm:$0xff] }
 0x73b   :  { %v17413_v4 = vpop.f32.mrf.mxu0  ;;  %5465 = vmatpush1.msra.mxu1 %v5406_v41  ;;  %v5400_v3 = vld [vmem:[%s20336_s11 + $0x60] sm:$0xff] }
 0x73c   :  { %v13611_v19 = vpop.f32.mrf.mxu1  ;;  %5466 = vmatprep.subr.mxu1 %v5405_v49  ;;  %v5395_v49 = vld [vmem:[%s20336_s11 + $0x38] sm:$0xff] }
 0x73d   :  { %v4012_v5 = vadd.f32 %v13611_v19, %v17335_v0  ;;  %v13648_v62 = vpop.f32.mrf.mxu0  ;;  %v5403_v0 = vld [vmem:[%s20336_s11 + $0x78] sm:$0xff]  ;;  %5467 = vmatpush1.msra.mxu1 %v5404_v2  ;;  %v5397_v19 = vld [vmem:[%s20336_s11 + $0x48] sm:$0xff] }
 0x73e   :  { %v17425_v14 = vadd.f32 %v13648_v62, %v4010_v53  ;;  %v17427_v16 = vpop.f32.mrf.mxu1  ;;  %5468 = vmatprep.subr.mxu1 %v5403_v0 }
 0x73f   :  { %20646 = vst [vmem:[#allocation19_spill] sm:$0xff] %v17427_v16  ;;  %v17432_v50 = vpop.f32.mrf.mxu0  ;;  %5469 = vmatpush1.msra.mxu1 %v5402_v58  ;;  %v5394_v58 = vld [vmem:[%s20336_s11 + $0x30] sm:$0xff]  ;;  %v3439_v16 = vadd.f32 %v17293_v8, %v17291_v35 }
 0x740   :  { %20645 = vst [vmem:[#allocation20_spill] sm:$0xff] %v17425_v14  ;;  %20647 = vst [vmem:[#allocation22_spill] sm:$0xff] %v17432_v50  ;;  %5470 = vmatprep.subr.mxu1 %v5401_v11  ;;  %v5392_v11 = vld [vmem:[%s20336_s11 + $0x20] sm:$0xff] }
 0x741   :  { %v13614_v10 = vpop.f32.mrf.mxu1  ;;  %v13651_v47 = vpop.f32.mrf.mxu0  ;;  %5471 = vmatpush1.msra.mxu1 %v5400_v3  ;;  %v5391_v3 = vld [vmem:[%s20336_s11 + $0x18] sm:$0xff]  ;;  %v3750_v43 = vadd.f32 %v17317_v51, %v3439_v16 }
 0x742   :  { %v4014_v22 = vadd.f32 %v13614_v10, %v17343_v7  ;;  %v17444_v53 = vadd.f32 %v13651_v47, %v4012_v5  ;;  %v5398_v7 = vld [vmem:[%s20336_s11 + $0x50] sm:$0xff]  ;;  %5472 = vmatprep.subr.mxu1 %v5399_v42  ;;  %v5396_v5 = vld [vmem:[%s20336_s11 + $0x40] sm:$0xff]  ;;  %v5393_v47 = vld [vmem:[%s20336_s11 + $0x28] sm:$0xff] }
 0x743   :  { %v17449_v55 = vpop.f32.mrf.mxu1  ;;  %v17451_v17 = vpop.f32.mrf.mxu0  ;;  %5473 = vmatpush1.msra.mxu1 %v5398_v7  ;;  %v5390_v7 = vld [vmem:[%s20336_s11 + $0x10] sm:$0xff] }
 0x744   :  { %20648 = vst [vmem:[#allocation21_spill] sm:$0xff] %v17444_v53  ;;  %20649 = vst [vmem:[#allocation23_spill] sm:$0xff] %v17449_v55  ;;  %5474 = vmatprep.subr.mxu1 %v5397_v19 }
 0x745   :  { %20650 = vst [vmem:[#allocation24_spill] sm:$0xff] %v17451_v17  ;;  %5475 = vmatpush1.msra.mxu1 %v5396_v5  ;;  %v5389_v5 = vld [vmem:[%s20336_s11 + $0x8] sm:$0xff] }
 0x746   :  { %v13673_v41 = vpop.f32.mrf.mxu1  ;;  %5476 = vmatprep.subr.mxu1 %v5395_v49  ;;  %v5388_v49 = vld [vmem:[%s20336_s11] sm:$0xff]  ;;  %s14547_s11 = smov 3  }
 0x747   :  { %v13654_v62 = vpop.f32.mrf.mxu0  ;;  %5477 = vmatpush1.msra.mxu1 %v5394_v58 }
 0x748   :  { %v17468_v2 = vadd.f32 %v13654_v62, %v4014_v22  ;;  %v4418_v0 = vpop.f32.mrf.mxu1  ;;  %5478 = vmatprep.subr.mxu1 %v5393_v47 }
 0x749   :  { %v17473_v10 = vpop.f32.mrf.mxu0  ;;  %5479 = vmatpush1.msra.mxu1 %v5392_v11 }
 0x74a   :  { %20651 = vst [vmem:[#allocation25_spill] sm:$0xff] %v17468_v2  ;;  %20652 = vst [vmem:[#allocation26_spill] sm:$0xff] %v17473_v10  ;;  %5480 = vmatprep.subr.mxu1 %v5391_v3 }
 0x74b   :  { %v17481_v22 = vpop.f32.mrf.mxu1  ;;  %5481 = vmatpush1.msra.mxu1 %v5390_v7 }
 0x74c   :  { %v13713_v42 = vpop.f32.mrf.mxu0  ;;  %5482 = vmatprep.subr.mxu1 %v5389_v5 }
 0x74d   :  { %v4428_v19 = vpop.f32.mrf.mxu1  ;;  %5483 = vmatpush1.msra.mxu1 %v5388_v49 }
 0x74e   :  { %v4667_v62 = vpop.f32.mrf.mxu0 }
 0x74f   :  { %v17495_v58 = vpop.f32.mrf.mxu1 }
 0x750   :  { %v13716_v47 = vpop.f32.mrf.mxu0 }
 0x751   :  { %v17497_v37 = vpop.f32.mrf.mxu1 }
 0x752   :  { %v4677_v2 = vpop.f32.mrf.mxu0 }
 0x753   :  { %v17499_v11 = vpop.f32.mrf.mxu1 }
 0x754   :  { %v17501_v10 = vpop.f32.mrf.mxu0 }
 0x755   :  { %v17503_v53 = vpop.f32.mrf.mxu1 }
 0x756   :  { %v17505_v3 = vpop.f32.mrf.mxu0 }
 0x757   :  { %v17507_v55 = vpop.f32.mrf.mxu1 }
 0x758   :  { %20653 = vst [vmem:[#allocation27_spill] sm:$0xff] %v17507_v55  ;;  %v17509_v44 = vpop.f32.mrf.mxu0 }
 0x759   :  { %v17511_v30 = vpop.f32.mrf.mxu1 }
 0x75a   :  { %v17513_v7 = vpop.f32.mrf.mxu0 }
 0x75b   :  { %v17515_v5 = vpop.f32.mrf.mxu1 }
 0x75c   :  { %20654 = vst [vmem:[#allocation31_spill] sm:$0xff] %v17515_v5  ;;  %v17517_v49 = vpop.f32.mrf.mxu0  ;;  %v4000_v5 = vadd.f32 %v17341_v23, %v17315_v48 }
 0x75d   :  { %20655 = vst [vmem:[#allocation30_spill] sm:$0xff] %v17517_v49  ;;  %v17519_v9 = vpop.f32.mrf.mxu1 }
 0x75e   :  { %20656 = vst [vmem:[#allocation28_spill] sm:$0xff] %v17519_v9  ;;  %v17521_v17 = vpop.f32.mrf.mxu0  ;;  %v3449_v9 = vadd.f32 %v17299_v27, %v17295_v1  ;;  %v4249_v35 = vadd.f32 %v17349_v29, %v4000_v5 }
 0x75f   :  { %v17523_v14 = vpop.f32.mrf.mxu1 }
 0x760   :  { %20657 = vst [vmem:[#allocation29_spill] sm:$0xff] %v17523_v14  ;;  %v17527_v21 = vpop.f32.mrf.mxu0  ;;  %v3999_v14 = vadd.f32 %v17345_v6, %v3750_v43  ;;  %v3752_v8 = vadd.f32 %v17321_v31, %v3449_v9  ;;  %v3459_v43 = vadd.f32 %v17305_v52, %v17297_v60  ;;  %v4500_v60 = vadd.f32 %v17481_v22, %v17355_v45 }
 0x761   :  { %20658 = vst [vmem:[#allocation33_spill] sm:$0xff] %v17527_v21  ;;  %v17529_v63 = vpop.f32.mrf.mxu1 }
 0x762   :  { %20659 = vst [vmem:[#allocation32_spill] sm:$0xff] %v17529_v63  ;;  %v17532_v50 = vpop.f32.mrf.mxu0  ;;  %v4248_v51 = vadd.f32 %v17353_v28, %v3999_v14  ;;  %v4498_v63 = vadd.f32 %v13673_v41, %v4249_v35  ;;  %v4001_v48 = vadd.f32 %v17351_v61, %v3752_v8  ;;  %v3754_v14 = vadd.f32 %v17323_v40, %v3459_v43  ;;  %v5279_v8 = vpop.permute.xlu0 %5278 }
 0x763   :  { %v17536_v49 = vpop.f32.mrf.mxu1  ;;  %v4749_v40 = vadd.f32 %v13716_v47, %v4500_v60 }
 0x764   :  { %20660 = vst [vmem:[#allocation34_spill] sm:$0xff] %v17536_v49  ;;  %v17541_v55 = vpop.f32.mrf.mxu0  ;;  %v4497_v23 = vadd.f32 %v4418_v0, %v4248_v51  ;;  %v4747_v1 = vadd.f32 %v13713_v42, %v4498_v63  ;;  %v4250_v6 = vadd.f32 %v17359_v26, %v4001_v48  ;;  %v4003_v35 = vadd.f32 %v17357_v15, %v3754_v14 }
 0x765   :  { %v17548_v21 = vpop.f32.mrf.mxu1  ;;  %v3469_v15 = vadd.f32 %v17311_v33, %v17301_v24  ;;  %v4502_v24 = vadd.f32 %v17495_v58, %v17370_v38 }
 0x766   :  { %v17546_v16 = vpop.f32.mrf.mxu0  ;;  %v4746_v9 = vadd.f32 %v4667_v62, %v4497_v23  ;;  %v4499_v41 = vadd.f32 %v4428_v19, %v4250_v6  ;;  %v4252_v51 = vadd.f32 %v17377_v54, %v4003_v35  ;;  %v5289_v47 = vpop.permute.xlu0 %5288 }
 0x768   :  { %v17551_v49 = vpop.f32.mrf.mxu0  ;;  %v4748_v63 = vadd.f32 %v4677_v2, %v4499_v41  ;;  %v4501_v2 = vadd.f32 %v17497_v37, %v4252_v51 }
 0x769   :  { %v13753_v27 = vpop.f32.mrf.mxu1 }
 0x76a   :  { %v17556_v31 = vpop.f32.mrf.mxu0  ;;  %v4996_v29 = vadd.f32 %v13753_v27, %v4747_v1  ;;  %v5284_v27 = vpop.permute.xlu1 %5283  ;;  %v4750_v14 = vadd.f32 %v17505_v3, %v4501_v2  ;;  %v3479_v3 = vadd.f32 %v17319_v46, %v17303_v59 }
 0x76b   :  { %v4916_v28 = vpop.f32.mrf.mxu1  ;;  %v5299_v51 = vpop.permute.xlu0 %5298 }
 0x76c   :  { %v4995_v5 = vadd.f32 %v4916_v28, %v4746_v9  ;;  %v13793_v61 = vpop.f32.mrf.mxu0 }
 0x76d   :  { %v13756_v0 = vpop.f32.mrf.mxu1  ;;  %v5245_v52 = vadd.f32 %v13793_v61, %v4996_v29  ;;  %v3756_v29 = vadd.f32 %v17327_v13, %v3469_v15  ;;  %v4751_v13 = vadd.f32 %v17501_v10, %v4502_v24 }
 0x76e   :  { %v5165_v42 = vpop.f32.mrf.mxu0  ;;  %v4998_v22 = vadd.f32 %v13756_v0, %v4749_v40 }
 0x76f   :  { %v5244_v26 = vadd.f32 %v5165_v42, %v4995_v5  ;;  %v4926_v62 = vpop.f32.mrf.mxu1  ;;  %v5357_v6 = vadd.f32 %v5284_v27, %v5245_v52  ;;  %v4005_v41 = vadd.f32 %v17372_v39, %v3756_v29  ;;  %v5294_v42 = vpop.permute.xlu1 %5293 }
 0x770   :  { %v4997_v48 = vadd.f32 %v4926_v62, %v4748_v63  ;;  %v13796_v23 = vpop.f32.mrf.mxu0 }
 0x771   :  { %v5356_v19 = vadd.f32 %v5279_v8, %v5244_v26  ;;  %v13759_v1 = vpop.f32.mrf.mxu1  ;;  %v5373_v33 = vmax.f32 %v5357_v6, 0.0  ;;  %v5247_v37 = vadd.f32 %v13796_v23, %v4998_v22  ;;  %v4254_v0 = vadd.f32 %v17395_v12, %v4005_v41  ;;  %v5309_v22 = vpop.permute.xlu0 %5308 }
 0x772   :  { %v5175_v43 = vpop.f32.mrf.mxu0  ;;  %v5000_v52 = vadd.f32 %v13759_v1, %v4751_v13  ;;  %v3758_v26 = vadd.f32 %v17329_v56, %v3479_v3  ;;  %v20667_v13 = vld [vmem:[#allocation15_spill] sm:$0xff] }
 0x773   :  { %v5372_v45 = vmax.f32 %v5356_v19, 0.0  ;;  %v5246_v9 = vadd.f32 %v5175_v43, %v4997_v48  ;;  %v4936_v28 = vpop.f32.mrf.mxu1  ;;  %v4503_v39 = vadd.f32 %v17503_v53, %v4254_v0  ;;  %v5359_v60 = vadd.f32 %v5294_v42, %v5247_v37  ;;  %v5304_v27 = vpop.permute.xlu1 %5303  ;;  %v20665_v37 = vld [vmem:[#allocation16_spill] sm:$0xff] }
 0x774   :  { %v13799_v54 = vpop.f32.mrf.mxu0  ;;  %v4999_v61 = vadd.f32 %v4936_v28, %v4750_v14  ;;  %v4007_v10 = vadd.f32 %v17390_v36, %v3758_v26  ;;  %v4504_v48 = vadd.f32 %v17499_v11, %v17388_v34  ;;  %v20669_v26 = vld [vmem:[#allocation20_spill] sm:$0xff] }
 0x775   :  { %5420 = vxpose.xlu0.b32.start [1/16] (narrow) %v5372_v45, 8  ;;  %v5358_v5 = vadd.f32 %v5289_v47, %v5246_v9  ;;  %v13762_v35 = vpop.f32.mrf.mxu1  ;;  %v4752_v12 = vadd.f32 %v17513_v7, %v4503_v39  ;;  %v5375_v59 = vmax.f32 %v5359_v60, 0.0  ;;  %v5249_v46 = vadd.f32 %v13799_v54, %v5000_v52  ;;  %v20661_v9 = vld [vmem:[#allocation27_spill] sm:$0xff]  ;;  %v20662_v54 = vld [vmem:[#allocation22_spill] sm:$0xff]  ;;  %v5319_v52 = vpop.permute.xlu0 %5318 }
 0x776   :  { %v5185_v63 = vpop.f32.mrf.mxu0  ;;  %v4256_v40 = vadd.f32 %v17413_v4, %v4007_v10  ;;  %v4753_v56 = vadd.f32 %v17509_v44, %v4504_v48  ;;  %v3489_v7 = vadd.f32 %v17325_v18, %v17307_v32  ;;  %v4506_v29 = vadd.f32 %v20661_v9, %v17406_v25  ;;  %v20677_v9 = vld [vmem:[#allocation23_spill] sm:$0xff] }
 0x777   :  { %v5374_v38 = vmax.f32 %v5358_v5, 0.0  ;;  %v5248_v58 = vadd.f32 %v5185_v63, %v4999_v61  ;;  %v4946_v62 = vpop.f32.mrf.mxu1  ;;  %v5361_v15 = vadd.f32 %v5304_v27, %v5249_v46  ;;  %v20666_v61 = vld [vmem:[#allocation28_spill] sm:$0xff] }
 0x778   :  { %v13802_v8 = vpop.f32.mrf.mxu0  ;;  %v5001_v23 = vadd.f32 %v4946_v62, %v4752_v12  ;;  %v4505_v36 = vadd.f32 %v17511_v30, %v4256_v40  ;;  %v5002_v2 = vadd.f32 %v13762_v35, %v4753_v56  ;;  %v3760_v43 = vadd.f32 %v17333_v20, %v3489_v7  ;;  %v20663_v20 = vld [vmem:[#allocation30_spill] sm:$0xff]  ;;  %v20670_v62 = vld [vmem:[#allocation31_spill] sm:$0xff]  ;;  %v20672_v40 = vld [vmem:[#allocation33_spill] sm:$0xff] }
 0x779   :  { %5421 = vxpose.xlu0.b32.cont [2/16] (narrow) %v5373_v33, 8  ;;  %v5360_v53 = vadd.f32 %v5299_v51, %v5248_v58  ;;  %v13765_v19 = vpop.f32.mrf.mxu1  ;;  %v5377_v32 = vmax.f32 %v5361_v15, 0.0  ;;  %v4755_v24 = vadd.f32 %v20663_v20, %v4506_v29  ;;  %v5314_v33 = vpop.permute.xlu1 %5313  ;;  %v20674_v56 = vld [vmem:[#allocation18_spill] sm:$0xff]  ;;  %v20675_v7 = vld [vmem:[#allocation32_spill] sm:$0xff] }
 0x77a   :  { %v5195_v1 = vpop.f32.mrf.mxu0  ;;  %v4754_v4 = vadd.f32 %v17521_v17, %v4505_v36  ;;  %v4009_v44 = vadd.f32 %v17408_v57, %v3760_v43  ;;  %v5251_v18 = vadd.f32 %v13802_v8, %v5002_v2  ;;  %v20664_v17 = vld [vmem:[#allocation13_spill] sm:$0xff]  ;;  %v4508_v8 = vadd.f32 %v20670_v62, %v20669_v26 }
 0x77b   :  { %v5376_v34 = vmax.f32 %v5360_v53, 0.0  ;;  %v5250_v11 = vadd.f32 %v5195_v1, %v5001_v23  ;;  %v4956_v6 = vpop.f32.mrf.mxu1  ;;  %v3499_v5 = vadd.f32 %v20665_v37, %v20664_v17  ;;  %v5004_v35 = vadd.f32 %v13765_v19, %v4755_v24  ;;  %v20676_v43 = vld [vmem:[#allocation17_spill] sm:$0xff] }
 0x77c   :  { %v13805_v45 = vpop.f32.mrf.mxu0  ;;  %v5003_v28 = vadd.f32 %v4956_v6, %v4754_v4  ;;  %v4258_v14 = vadd.f32 %v20662_v54, %v4009_v44  ;;  %v5363_v0 = vadd.f32 %v5314_v33, %v5251_v18  ;;  %v4757_v19 = vadd.f32 %v20672_v40, %v4508_v8  ;;  %v5329_v44 = vpop.permute.xlu0 %5328  ;;  %v20679_v18 = vld [vmem:[#allocation29_spill] sm:$0xff] }
 0x77d   :  { %5422 = vxpose.xlu0.b32.cont [3/16] (narrow) %v5374_v38, 8  ;;  %v5362_v30 = vadd.f32 %v5309_v22, %v5250_v11  ;;  %v13768_v47 = vpop.f32.mrf.mxu1  ;;  %v3762_v42 = vadd.f32 %v20667_v13, %v3499_v5  ;;  %v20668_v38 = vld [vmem:[#allocation19_spill] sm:$0xff]  ;;  %v5253_v51 = vadd.f32 %v13805_v45, %v5004_v35  ;;  %v5324_v1 = vpop.permute.xlu1 %5323 }
 0x77e   :  { %v5205_v41 = vpop.f32.mrf.mxu0  ;;  %v4507_v57 = vadd.f32 %v20666_v61, %v4258_v14  ;;  %v5379_v12 = vmax.f32 %v5363_v0, 0.0  ;;  %v5006_v2 = vadd.f32 %v13768_v47, %v4757_v19  ;;  %v20680_v47 = vld [vmem:[#allocation26_spill] sm:$0xff] }
 0x77f   :  { %v5378_v25 = vmax.f32 %v5362_v30, 0.0  ;;  %v5252_v63 = vadd.f32 %v5205_v41, %v5003_v28  ;;  %v4966_v3 = vpop.f32.mrf.mxu1  ;;  %v4011_v58 = vadd.f32 %v20668_v38, %v3762_v42  ;;  %v5365_v15 = vadd.f32 %v5324_v1, %v5253_v51  ;;  %v20681_v42 = vld [vmem:[#allocation25_spill] sm:$0xff] }
 0x780   :  { %v13808_v39 = vpop.f32.mrf.mxu0  ;;  %v4756_v60 = vadd.f32 %v17532_v50, %v4507_v57  ;;  %v20673_v50 = vld [vmem:[#allocation14_spill] sm:$0xff]  ;;  %v5339_v13 = vpop.permute.xlu0 %5338 }
 0x781   :  { %5423 = vxpose.xlu0.b32.cont [4/16] (narrow) %v5375_v59, 8  ;;  %v5364_v10 = vadd.f32 %v5319_v52, %v5252_v63  ;;  %v20671_v59 = vld [vmem:[#allocation24_spill] sm:$0xff]  ;;  %v13771_v53 = vpop.f32.mrf.mxu1  ;;  %v3509_v27 = vadd.f32 %v20674_v56, %v20673_v50  ;;  %v5381_v28 = vmax.f32 %v5365_v15, 0.0  ;;  %v5255_v54 = vadd.f32 %v13808_v39, %v5006_v2  ;;  %v5334_v37 = vpop.permute.xlu1 %5333 }
 0x782   :  { %v5005_v48 = vadd.f32 %v4966_v3, %v4756_v60  ;;  %v4260_v46 = vadd.f32 %v20671_v59, %v4011_v58  ;;  %v5215_v23 = vpop.f32.mrf.mxu0  ;;  %v20682_v3 = vld [vmem:[#allocation34_spill] sm:$0xff]  ;;  %v20683_v2 = vld [vmem:[#allocation12_spill] sm:$0xff] }
 0x783   :  { %v3764_v6 = vadd.f32 %v20676_v43, %v3509_v27  ;;  %v4976_v45 = vpop.f32.mrf.mxu1  ;;  %v5367_v5 = vadd.f32 %v5334_v37, %v5255_v54  ;;  %v4512_v39 = vadd.f32 %v20682_v3, %v20681_v42  ;;  %v5571_v54 = vld [vmem:[%s20686_s23 + $0x1] sm:$0x1]  ;;  %v5599_v3 = vld [vmem:[%s20338_s13 + $0x48] sm:$0xff] }
 0x784   :  { %v4509_v36 = vadd.f32 %v20675_v7, %v4260_v46  ;;  %v5254_v11 = vadd.f32 %v5215_v23, %v5005_v48  ;;  %v13811_v4 = vpop.f32.mrf.mxu0  ;;  %v5523_v7 = vld [vmem:[%s20337_s12] sm:$0x1]  ;;  %s14550_s12 = smov 2  }
 0x785   :  { %5424 = vxpose.xlu0.b32.cont [5/16] (narrow) %v5376_v34, 8  ;;  %v5380_v34 = vmax.f32 %v5364_v10, 0.0  ;;  %v4013_v29 = vadd.f32 %v20677_v9, %v3764_v6  ;;  %v13774_v24 = vpop.f32.mrf.mxu1  ;;  %v5383_v60 = vmax.f32 %v5367_v5, 0.0  ;;  %v5344_v26 = vpop.permute.xlu1 %5343  ;;  %v5598_v42 = vld [vmem:[%s20338_s13 + $0x40] sm:$0xff] }
 0x786   :  { %v4758_v22 = vadd.f32 %v17546_v16, %v4509_v36  ;;  %v5366_v14 = vadd.f32 %v5329_v44, %v5254_v11  ;;  %v5225_v33 = vpop.f32.mrf.mxu0 }
 0x787   :  { %v4262_v20 = vadd.f32 %v20680_v47, %v4013_v29  ;;  %v4986_v35 = vpop.f32.mrf.mxu1  ;;  %v5547_v47 = vld [vmem:[%s20686_s23] sm:$0x1] }
 0x788   :  { %v5007_v41 = vadd.f32 %v4976_v45, %v4758_v22  ;;  %v5382_v57 = vmax.f32 %v5366_v14, 0.0 }
 0x789   :  { %5425 = vxpose.xlu0.b32.cont [6/16] (narrow) %v5377_v32, 8  ;;  %v20678_v32 = vld [vmem:[#allocation21_spill] sm:$0xff]  ;;  %v4511_v16 = vadd.f32 %v17548_v21, %v4262_v20  ;;  %v4761_v21 = vadd.f32 %v17551_v49, %v4512_v39  ;;  %v5354_v46 = vpop.permute.xlu1 %5353 }
 0x78a   :  { %v4510_v30 = vadd.f32 %v20679_v18, %v20678_v32  ;;  %v5256_v0 = vadd.f32 %v5225_v33, %v5007_v41  ;;  %v5590_v18 = vld [vmem:[%s20338_s13] sm:$0xff]  ;;  %v5600_v39 = vld [vmem:[%s20338_s13 + $0x50] sm:$0xff] }
 0x78b   :  { %v4760_v63 = vadd.f32 %v17556_v31, %v4511_v16  ;;  %v5010_v8 = vadd.f32 %v13774_v24, %v4761_v21  ;;  %v5349_v31 = vpop.permute.xlu0 %5348  ;;  %v5606_v21 = vld [vmem:[%s20338_s13 + $0x80] sm:$0xff] }
 0x78c   :  { %v4759_v17 = vadd.f32 %v17541_v55, %v4510_v30  ;;  %v5368_v55 = vadd.f32 %v5339_v13, %v5256_v0  ;;  %v5593_v0 = vld [vmem:[%s20338_s13 + $0x18] sm:$0xff] }
 0x78d   :  { %5426 = vxpose.xlu0.b32.cont [7/16] (narrow) %v5378_v25, 8  ;;  %v13814_v25 = vpop.f32.mrf.mxu0  ;;  %v5009_v38 = vadd.f32 %v4986_v35, %v4760_v63  ;;  %v5594_v35 = vld [vmem:[%s20338_s13 + $0x20] sm:$0xff]  ;;  %v5596_v63 = vld [vmem:[%s20338_s13 + $0x30] sm:$0xff]  ;;  %v5597_v13 = vld [vmem:[%s20338_s13 + $0x38] sm:$0xff] }
 0x78e   :  { %v5008_v61 = vadd.f32 %v13771_v53, %v4759_v17  ;;  %v5259_v48 = vadd.f32 %v13814_v25, %v5010_v8  ;;  %v5595_v25 = vld [vmem:[%s20338_s13 + $0x28] sm:$0xff]  ;;  %v5609_v8 = vld [vmem:[%s20338_s13 + $0x98] sm:$0xff] }
 0x78f   :  { %v5235_v58 = vpop.f32.mrf.mxu0 }
 0x790   :  { %v5257_v52 = vadd.f32 %v13811_v4, %v5008_v61  ;;  %v5258_v51 = vadd.f32 %v5235_v58, %v5009_v38  ;;  %v5371_v53 = vadd.f32 %v5354_v46, %v5259_v48  ;;  %v5591_v61 = vld [vmem:[%s20338_s13 + $0x8] sm:$0xff]  ;;  %v5604_v38 = vld [vmem:[%s20338_s13 + $0x70] sm:$0xff]  ;;  %v5605_v58 = vld [vmem:[%s20338_s13 + $0x78] sm:$0xff] }
 0x791   :  { %5427 = vxpose.xlu0.b32.cont [8/16] (narrow) %v5379_v12, 8  ;;  %v5384_v12 = vmax.f32 %v5368_v55, 0.0  ;;  %v5603_v55 = vld [vmem:[%s20338_s13 + $0x68] sm:$0xff]  ;;  %v5614_v48 = vld [vmem:[%s20338_s13 + $0xc0] sm:$0xff]  ;;  %v5616_v46 = vld [vmem:[%s20338_s13 + $0xd0] sm:$0xff] }
 0x792   :  { %v5369_v62 = vadd.f32 %v5344_v26, %v5257_v52  ;;  %v5370_v59 = vadd.f32 %v5349_v31, %v5258_v51  ;;  %v5387_v40 = vmax.f32 %v5371_v53, 0.0  ;;  %v5602_v52 = vld [vmem:[%s20338_s13 + $0x60] sm:$0xff]  ;;  %v5607_v26 = vld [vmem:[%s20338_s13 + $0x88] sm:$0xff]  ;;  %v5612_v31 = vld [vmem:[%s20338_s13 + $0xb0] sm:$0xff] }
 0x793   :  { %v5611_v51 = vld [vmem:[%s20338_s13 + $0xa8] sm:$0xff]  ;;  %v5617_v53 = vld [vmem:[%s20338_s13 + $0xd8] sm:$0xff] }
 0x794   :  { %v5385_v10 = vmax.f32 %v5369_v62, 0.0  ;;  %v5386_v23 = vmax.f32 %v5370_v59, 0.0  ;;  %v5608_v62 = vld [vmem:[%s20338_s13 + $0x90] sm:$0xff]  ;;  %v5615_v59 = vld [vmem:[%s20338_s13 + $0xc8] sm:$0xff] }
 0x795   :  { %5428 = vxpose.xlu0.b32.cont [9/16] (narrow) %v5380_v34, 8  ;;  %v5561_v34 = vrot.slane %v5523_v7, %v20683_v2 }
 0x799   :  { %5429 = vxpose.xlu0.b32.cont [10/16] (narrow) %v5381_v28, 8 }
 0x79d   :  { %5430 = vxpose.xlu0.b32.cont [11/16] (narrow) %v5382_v57, 8  ;;  %v5592_v57 = vld [vmem:[%s20338_s13 + $0x10] sm:$0xff] }
 0x7a1   :  { %5431 = vxpose.xlu0.b32.cont [12/16] (narrow) %v5383_v60, 8  ;;  %v5601_v60 = vld [vmem:[%s20338_s13 + $0x58] sm:$0xff] }
 0x7a5   :  { %5432 = vxpose.xlu0.b32.cont [13/16] (narrow) %v5384_v12, 8  ;;  %v5610_v12 = vld [vmem:[%s20338_s13 + $0xa0] sm:$0xff] }
 0x7a9   :  { %5433 = vxpose.xlu0.b32.cont [14/16] (narrow) %v5385_v10, 8  ;;  %v5613_v10 = vld [vmem:[%s20338_s13 + $0xb8] sm:$0xff] }
 0x7ad   :  { %5434 = vxpose.xlu0.b32.cont [15/16] (narrow) %v5386_v23, 8  ;;  %v5618_v23 = vld [vmem:[%s20338_s13 + $0xe0] sm:$0xff] }
 0x7b1   :  { %5435 = vxpose.xlu0.b32.end [16/16] (narrow) %v5387_v40, 8  ;;  %v5619_v40 = vld [vmem:[%s20338_s13 + $0xe8] sm:$0xff] }
 0x7f1   :  { %v5436_v19 = vpop.trf.xlu0 }
 0x7f2   :  { %5517 = vmatmul.mubr.f32.vlgmr.msra.gmra.mxu1 %v5436_v19  ;;  %v5620_v19 = vld [vmem:[%s20338_s13 + $0xf0] sm:$0xff] }
 0x7f3   :  { %13817 = vmatprep.mubr.msk.f32.mxu1 %vm1544_vm2, %v5590_v18  ;;  %v5638_v18 = vld [vmem:[%s20338_s13 + $0x180] sm:$0xff] }
 0x8b2   :  { %v5518_v49 = vpop.f32.mrf.mxu1 }
 0x8b3   :  { %v5525_v1 = vrot.slane %v5518_v49, 1 }
 0x8b4   :  { %v5520_v50 = vpop.f32.mrf.mxu1 }
 0x8b5   :  { %5526 = vrot.lane.b32.xlu1 %v5525_v1, %s14537_s1  ;;  %v5534_v56 = vrot.slane %v5520_v50, 3  ;;  %v5531_v36 = vrot.slane %v5520_v50, 2  ;;  %v5622_v1 = vld [vmem:[%s20338_s13 + $0x100] sm:$0xff]  ;;  %v5623_v50 = vld [vmem:[%s20338_s13 + $0x108] sm:$0xff] }
 0x8b9   :  { %5535 = vrot.lane.b32.xlu1 %v5534_v56, %s14537_s1  ;;  %v5624_v56 = vld [vmem:[%s20338_s13 + $0x110] sm:$0xff] }
 0x927   :  { %v5527_v27 = vpop.permute.xlu1 %5526 }
 0x928   :  { %v5529_v15 = vadd.f32 %v5527_v27, %v5518_v49  ;;  %v5621_v49 = vld [vmem:[%s20338_s13 + $0xf8] sm:$0xff] }
 0x929   :  { %v5625_v27 = vld [vmem:[%s20338_s13 + $0x118] sm:$0xff] }
 0x92a   :  { %v5533_v11 = vadd.f32 %v5531_v36, %v5529_v15  ;;  %v5627_v36 = vld [vmem:[%s20338_s13 + $0x128] sm:$0xff]  ;;  %v5628_v15 = vld [vmem:[%s20338_s13 + $0x130] sm:$0xff] }
 0x92b   :  { %v5536_v43 = vpop.permute.xlu1 %5535 }
 0x92c   :  { %v5538_v6 = vadd.f32 %v5536_v43, %v5533_v11  ;;  %v5630_v11 = vld [vmem:[%s20338_s13 + $0x140] sm:$0xff]  ;;  %v5631_v43 = vld [vmem:[%s20338_s13 + $0x148] sm:$0xff] }
 0x92e   :  { %v17624_v45 = vadd.f32 %v5538_v6, %v5523_v7  ;;  %v17626_v4 = vadd.f32 %v5561_v34, %v5538_v6  ;;  %v5626_v7 = vld [vmem:[%s20338_s13 + $0x120] sm:$0xff]  ;;  %v5629_v34 = vld [vmem:[%s20338_s13 + $0x138] sm:$0xff]  ;;  %v5632_v6 = vld [vmem:[%s20338_s13 + $0x150] sm:$0xff] }
 0x930   :  { %20684 = vst [vmem:[#allocation27_spill] sm:$0xff] %v17624_v45  ;;  %20685 = vst [vmem:[#allocation22_spill] sm:$0xff] %v17626_v4  ;;  %v5572_v22 = vmul.f32 0.5, %v17626_v4  ;;  %v5548_v9 = vmul.f32 0.5, %v17624_v45 }
 0x931   :  { %5541 = vst.msk [vmem:[#allocation5] sm:$0x1] %vm5540_vm3, %v17624_v45 }
 0x932   :  { %5565 = vst.msk [vmem:[#allocation5 - $0x3] sm:$0x10] %vm5564_vm4, %v17626_v4  ;;  %v5573_v44 = vmul.f32 1.442695, %v5572_v22  ;;  %v5549_v29 = vmul.f32 1.442695, %v5548_v9 }
 0x933   :  { %v5633_v22 = vld [vmem:[%s20338_s13 + $0x158] sm:$0xff]  ;;  %v5635_v9 = vld [vmem:[%s20338_s13 + $0x168] sm:$0xff] }
 0x934   :  { %14468 = vpow2.f32 %v5573_v44  ;;  %v5634_v44 = vld [vmem:[%s20338_s13 + $0x160] sm:$0xff] }
 0x935   :  { %14470 = vpow2.f32 %v5549_v29  ;;  %v5636_v29 = vld [vmem:[%s20338_s13 + $0x170] sm:$0xff] }
 0x941   :  { %v14469_v32 = vpop.eup %14468 }
 0x942   :  { %v5576_v30 = vrot.slane %v14469_v32, 4  ;;  %v14471_v28 = vpop.eup %14470  ;;  %v5637_v32 = vld [vmem:[%s20338_s13 + $0x178] sm:$0xff] }
 0x944   :  { %5577 = vrot.lane.b32.xlu1 %v5576_v30, %s14539_s7  ;;  %v5639_v30 = vld [vmem:[%s20338_s13 + $0x188] sm:$0xff] }
 0x948   :  { %5552 = vrot.lane.b32.xlu1 %v14471_v28, %s14539_s7  ;;  %v5640_v28 = vld [vmem:[%s20338_s13 + $0x190] sm:$0xff] }
 0x9b6   :  { %v5578_v14 = vpop.permute.xlu1 %5577 }
 0x9b7   :  { %v5580_v41 = vmul.f32 %v5578_v14, %v5571_v54  ;;  %v5641_v54 = vld [vmem:[%s20338_s13 + $0x198] sm:$0xff]  ;;  %v5642_v14 = vld [vmem:[%s20338_s13 + $0x1a0] sm:$0xff] }
 0x9b9   :  { %v5582_v20 = vrot.slane %v5580_v41, 4  ;;  %v5643_v41 = vld [vmem:[%s20338_s13 + $0x1a8] sm:$0xff] }
 0x9ba   :  { %v5553_v24 = vpop.permute.xlu1 %5552 }
 0x9bb   :  { %v5584_v33 = vadd.f32 %v5582_v20, %v17626_v4  ;;  %v5555_v17 = vmul.f32 %v5553_v24, %v5547_v47  ;;  %v5644_v47 = vld [vmem:[%s20338_s13 + $0x1b0] sm:$0xff]  ;;  %v5645_v20 = vld [vmem:[%s20338_s13 + $0x1b8] sm:$0xff]  ;;  %v5646_v24 = vld [vmem:[%s20338_s13 + $0x1c0] sm:$0xff] }
 0x9bd   :  { %v5586_v37 = vrot.slane %v5584_v33, 3  ;;  %v5556_v16 = vadd.f32 %v5555_v17, %v17624_v45  ;;  %v5647_v33 = vld [vmem:[%s20338_s13 + $0x1c8] sm:$0xff]  ;;  %v5648_v17 = vld [vmem:[%s20338_s13 + $0x1d0] sm:$0xff] }
 0x9bf   :  { %v5589_v5 = vsel %vm5588_vm5, %v5556_v16, %v5586_v37  ;;  %v5649_v37 = vld [vmem:[%s20338_s13 + $0x1d8] sm:$0xff]  ;;  %v5650_v16 = vld [vmem:[%s20338_s13 + $0x1e0] sm:$0xff] }
 0x9c0   :  { %13815 = vmatprep.subr.msk.mxu1 %vm1544_vm2, %v5589_v5 }
 0x9c1   :  { %13816 = vmatpush3.xpose.msk.msra.mxu1 %vm1544_vm2, %v5589_v5  ;;  %v5651_v5 = vld [vmem:[%s20338_s13 + $0x1e8] sm:$0xff] }
 0x9c4   :  { %13818 = vmatmul.mubr.msk.f32.vlgmr.msra.gmra.mxu1 %vm1544_vm2, %v5591_v61  ;;  %v5652_v61 = vld [vmem:[%s20338_s13 + $0x1f0] sm:$0xff] }
 0x9c5   :  { %13820 = vmatprep.mubr.msk.f32.mxu1 %vm1544_vm2, %v5592_v57  ;;  %v5653_v57 = vld [vmem:[%s20338_s13 + $0x1f8] sm:$0xff]  ;;  %s14548_s13 = smov 1  }
 0x9c8   :  { %13821 = vmatmul.mubr.msk.f32.gmra.mxu1 %vm1544_vm2, %v5593_v0 }
 0x9c9   :  { %13823 = vmatprep.mubr.msk.f32.mxu1 %vm1544_vm2, %v5594_v35 }
 0x9cc   :  { %13824 = vmatmul.mubr.msk.f32.gmra.mxu1 %vm1544_vm2, %v5595_v25 }
 0x9cd   :  { %13826 = vmatprep.mubr.msk.f32.mxu1 %vm1544_vm2, %v5596_v63 }
 0x9d0   :  { %13827 = vmatmul.mubr.msk.f32.gmra.mxu1 %vm1544_vm2, %v5597_v13 }
 0x9d1   :  { %13829 = vmatprep.mubr.msk.f32.mxu1 %vm1544_vm2, %v5598_v42 }
 0x9d4   :  { %13830 = vmatmul.mubr.msk.f32.gmra.mxu1 %vm1544_vm2, %v5599_v3 }
 0x9d5   :  { %13832 = vmatprep.mubr.msk.f32.mxu1 %vm1544_vm2, %v5600_v39 }
 0x9d8   :  { %13833 = vmatmul.mubr.msk.f32.gmra.mxu1 %vm1544_vm2, %v5601_v60 }
 0x9d9   :  { %13835 = vmatprep.mubr.msk.f32.mxu1 %vm1544_vm2, %v5602_v52 }
 0x9dc   :  { %13836 = vmatmul.mubr.msk.f32.gmra.mxu1 %vm1544_vm2, %v5603_v55 }
 0x9dd   :  { %13838 = vmatprep.mubr.msk.f32.mxu1 %vm1544_vm2, %v5604_v38 }
 0x9e0   :  { %13839 = vmatmul.mubr.msk.f32.gmra.mxu1 %vm1544_vm2, %v5605_v58 }
 0x9e1   :  { %13841 = vmatprep.mubr.msk.f32.mxu1 %vm1544_vm2, %v5606_v21 }
 0x9e4   :  { %13842 = vmatmul.mubr.msk.f32.gmra.mxu1 %vm1544_vm2, %v5607_v26 }
 0x9e5   :  { %13844 = vmatprep.mubr.msk.f32.mxu1 %vm1544_vm2, %v5608_v62 }
 0x9e8   :  { %13845 = vmatmul.mubr.msk.f32.gmra.mxu1 %vm1544_vm2, %v5609_v8 }
 0x9e9   :  { %13847 = vmatprep.mubr.msk.f32.mxu1 %vm1544_vm2, %v5610_v12 }
 0x9ec   :  { %13848 = vmatmul.mubr.msk.f32.gmra.mxu1 %vm1544_vm2, %v5611_v51 }
 0x9ed   :  { %13850 = vmatprep.mubr.msk.f32.mxu1 %vm1544_vm2, %v5612_v31 }
 0x9f0   :  { %13851 = vmatmul.mubr.msk.f32.gmra.mxu1 %vm1544_vm2, %v5613_v10 }
 0x9f1   :  { %13853 = vmatprep.mubr.msk.f32.mxu1 %vm1544_vm2, %v5614_v48 }
 0x9f4   :  { %13854 = vmatmul.mubr.msk.f32.gmra.mxu1 %vm1544_vm2, %v5615_v59 }
 0x9f5   :  { %13856 = vmatprep.mubr.msk.f32.mxu1 %vm1544_vm2, %v5616_v46 }
 0x9f8   :  { %13857 = vmatmul.mubr.msk.f32.gmra.mxu1 %vm1544_vm2, %v5617_v53 }
 0x9f9   :  { %13859 = vmatprep.mubr.msk.f32.mxu1 %vm1544_vm2, %v5618_v23 }
 0x9fc   :  { %13860 = vmatmul.mubr.msk.f32.gmra.mxu1 %vm1544_vm2, %v5619_v40 }
 0x9fd   :  { %13862 = vmatprep.mubr.msk.f32.mxu1 %vm1544_vm2, %v5620_v19 }
 0xa00   :  { %13863 = vmatmul.mubr.msk.f32.gmra.mxu1 %vm1544_vm2, %v5621_v49 }
 0xa01   :  { %13865 = vmatprep.mubr.msk.f32.mxu1 %vm1544_vm2, %v5622_v1 }
 0xa04   :  { %13866 = vmatmul.mubr.msk.f32.gmra.mxu1 %vm1544_vm2, %v5623_v50 }
 0xa05   :  { %13868 = vmatprep.mubr.msk.f32.mxu1 %vm1544_vm2, %v5624_v56 }
 0xa08   :  { %13869 = vmatmul.mubr.msk.f32.gmra.mxu1 %vm1544_vm2, %v5625_v27 }
 0xa09   :  { %13871 = vmatprep.mubr.msk.f32.mxu1 %vm1544_vm2, %v5626_v7 }
 0xa0c   :  { %13872 = vmatmul.mubr.msk.f32.gmra.mxu1 %vm1544_vm2, %v5627_v36 }
 0xa0d   :  { %13874 = vmatprep.mubr.msk.f32.mxu1 %vm1544_vm2, %v5628_v15 }
 0xa10   :  { %13875 = vmatmul.mubr.msk.f32.gmra.mxu1 %vm1544_vm2, %v5629_v34 }
 0xa11   :  { %13877 = vmatprep.mubr.msk.f32.mxu1 %vm1544_vm2, %v5630_v11 }
 0xa14   :  { %13878 = vmatmul.mubr.msk.f32.gmra.mxu1 %vm1544_vm2, %v5631_v43 }
 0xa15   :  { %13880 = vmatprep.mubr.msk.f32.mxu1 %vm1544_vm2, %v5632_v6 }
 0xa18   :  { %13881 = vmatmul.mubr.msk.f32.gmra.mxu1 %vm1544_vm2, %v5633_v22 }
 0xa19   :  { %13883 = vmatprep.mubr.msk.f32.mxu1 %vm1544_vm2, %v5634_v44 }
 0xa1c   :  { %13884 = vmatmul.mubr.msk.f32.gmra.mxu1 %vm1544_vm2, %v5635_v9 }
 0xa1d   :  { %13886 = vmatprep.mubr.msk.f32.mxu1 %vm1544_vm2, %v5636_v29 }
 0xa20   :  { %13887 = vmatmul.mubr.msk.f32.gmra.mxu1 %vm1544_vm2, %v5637_v32 }
 0xa21   :  { %13889 = vmatprep.mubr.msk.f32.mxu1 %vm1544_vm2, %v5638_v18 }
 0xa24   :  { %13890 = vmatmul.mubr.msk.f32.gmra.mxu1 %vm1544_vm2, %v5639_v30 }
 0xa25   :  { %13892 = vmatprep.mubr.msk.f32.mxu1 %vm1544_vm2, %v5640_v28 }
 0xa28   :  { %13893 = vmatmul.mubr.msk.f32.gmra.mxu1 %vm1544_vm2, %v5641_v54 }
 0xa29   :  { %13895 = vmatprep.mubr.msk.f32.mxu1 %vm1544_vm2, %v5642_v14 }
 0xa2c   :  { %13896 = vmatmul.mubr.msk.f32.gmra.mxu1 %vm1544_vm2, %v5643_v41 }
 0xa2d   :  { %13898 = vmatprep.mubr.msk.f32.mxu1 %vm1544_vm2, %v5644_v47 }
 0xa30   :  { %13899 = vmatmul.mubr.msk.f32.gmra.mxu1 %vm1544_vm2, %v5645_v20 }
 0xa31   :  { %13901 = vmatprep.mubr.msk.f32.mxu1 %vm1544_vm2, %v5646_v24 }
 0xa34   :  { %13902 = vmatmul.mubr.msk.f32.gmra.mxu1 %vm1544_vm2, %v5647_v33 }
 0xa35   :  { %13904 = vmatprep.mubr.msk.f32.mxu1 %vm1544_vm2, %v5648_v17 }
 0xa38   :  { %13905 = vmatmul.mubr.msk.f32.gmra.mxu1 %vm1544_vm2, %v5649_v37 }
 0xa39   :  { %13907 = vmatprep.mubr.msk.f32.mxu1 %vm1544_vm2, %v5650_v16 }
 0xa3c   :  { %13908 = vmatmul.mubr.msk.f32.gmra.mxu1 %vm1544_vm2, %v5651_v5 }
 0xa3d   :  { %13910 = vmatprep.mubr.msk.f32.mxu1 %vm1544_vm2, %v5652_v61 }
 0xa40   :  { %13911 = vmatmul.mubr.msk.f32.gmra.mxu1 %vm1544_vm2, %v5653_v57 }
 0xa84   :  { %v17902_v0 = vpop.f32.mrf.mxu1 }
 0xa85   :  { %6236 = vst.msk [vmem:[#allocation3 + $0x8] sm:$0xff] %vm6234_vm6, %v17902_v0 }
 0xa86   :  { %v17906_v35 = vpop.f32.mrf.mxu1 }
 0xa87   :  { %6235 = vst.msk [vmem:[#allocation3] sm:$0xff] %vm6234_vm6, %v17906_v35 }
 0xa88   :  { %v13822_v25 = vpop.f32.mrf.mxu1 }
 0xa89   :  { %6238 = vst.msk [vmem:[#allocation3 + $0x18] sm:$0xff] %vm6234_vm6, %v13822_v25  ;;  %6516 = vrot.lane.b32.xlu1 %v13822_v25, %s14547_s11 }
 0xa8a   :  { %v5925_v63 = vpop.f32.mrf.mxu1 }
 0xa8b   :  { %6237 = vst.msk [vmem:[#allocation3 + $0x10] sm:$0xff] %vm6234_vm6, %v5925_v63  ;;  %6514 = vrot.lane.b32.xlu0 %v5925_v63, %s14547_s11 }
 0xa8c   :  { %v13825_v13 = vpop.f32.mrf.mxu1 }
 0xa8d   :  { %6240 = vst.msk [vmem:[#allocation3 + $0x28] sm:$0xff] %vm6234_vm6, %v13825_v13  ;;  %6520 = vrot.lane.b32.xlu1 %v13825_v13, %s14547_s11 }
 0xa8e   :  { %v5935_v42 = vpop.f32.mrf.mxu1 }
 0xa8f   :  { %6239 = vst.msk [vmem:[#allocation3 + $0x20] sm:$0xff] %vm6234_vm6, %v5935_v42  ;;  %6518 = vrot.lane.b32.xlu0 %v5935_v42, %s14547_s11 }
 0xa90   :  { %v13828_v3 = vpop.f32.mrf.mxu1 }
 0xa91   :  { %6242 = vst.msk [vmem:[#allocation3 + $0x38] sm:$0xff] %vm6234_vm6, %v13828_v3  ;;  %6524 = vrot.lane.b32.xlu1 %v13828_v3, %s14547_s11 }
 0xa92   :  { %v5945_v39 = vpop.f32.mrf.mxu1 }
 0xa93   :  { %6241 = vst.msk [vmem:[#allocation3 + $0x30] sm:$0xff] %vm6234_vm6, %v5945_v39  ;;  %6522 = vrot.lane.b32.xlu0 %v5945_v39, %s14547_s11 }
 0xa94   :  { %v13831_v60 = vpop.f32.mrf.mxu1 }
 0xa95   :  { %6244 = vst.msk [vmem:[#allocation3 + $0x48] sm:$0xff] %vm6234_vm6, %v13831_v60  ;;  %6528 = vrot.lane.b32.xlu1 %v13831_v60, %s14547_s11 }
 0xa96   :  { %v5955_v52 = vpop.f32.mrf.mxu1 }
 0xa97   :  { %6243 = vst.msk [vmem:[#allocation3 + $0x40] sm:$0xff] %vm6234_vm6, %v5955_v52  ;;  %6526 = vrot.lane.b32.xlu0 %v5955_v52, %s14547_s11 }
 0xa98   :  { %v13834_v55 = vpop.f32.mrf.mxu1 }
 0xa99   :  { %6246 = vst.msk [vmem:[#allocation3 + $0x58] sm:$0xff] %vm6234_vm6, %v13834_v55  ;;  %6532 = vrot.lane.b32.xlu1 %v13834_v55, %s14547_s11 }
 0xa9a   :  { %v5965_v38 = vpop.f32.mrf.mxu1 }
 0xa9b   :  { %6245 = vst.msk [vmem:[#allocation3 + $0x50] sm:$0xff] %vm6234_vm6, %v5965_v38  ;;  %6530 = vrot.lane.b32.xlu0 %v5965_v38, %s14547_s11 }
 0xa9c   :  { %v13837_v58 = vpop.f32.mrf.mxu1 }
 0xa9d   :  { %6248 = vst.msk [vmem:[#allocation3 + $0x68] sm:$0xff] %vm6234_vm6, %v13837_v58  ;;  %6536 = vrot.lane.b32.xlu1 %v13837_v58, %s14547_s11 }
 0xa9e   :  { %v5975_v21 = vpop.f32.mrf.mxu1 }
 0xa9f   :  { %6247 = vst.msk [vmem:[#allocation3 + $0x60] sm:$0xff] %vm6234_vm6, %v5975_v21 }
 0xaa0   :  { %v13840_v26 = vpop.f32.mrf.mxu1 }
 0xaa1   :  { %6250 = vst.msk [vmem:[#allocation3 + $0x78] sm:$0xff] %vm6234_vm6, %v13840_v26  ;;  %6534 = vrot.lane.b32.xlu1 %v5975_v21, %s14547_s11 }
 0xaa2   :  { %v5985_v62 = vpop.f32.mrf.mxu1 }
 0xaa3   :  { %6249 = vst.msk [vmem:[#allocation3 + $0x70] sm:$0xff] %vm6234_vm6, %v5985_v62 }
 0xaa4   :  { %v17936_v8 = vpop.f32.mrf.mxu1 }
 0xaa5   :  { %6540 = vrot.lane.b32.xlu1 %v13840_v26, %s14547_s11 }
 0xaa6   :  { %v17939_v12 = vpop.f32.mrf.mxu1 }
 0xaa7   :  { %6267 = vrot.lane.b32.xlu0 %v17939_v12, %s14548_s13 }
 0xaa8   :  { %v13846_v51 = vpop.f32.mrf.mxu1 }
 0xaa9   :  { %6538 = vrot.lane.b32.xlu1 %v5985_v62, %s14547_s11 }
 0xaaa   :  { %v6005_v31 = vpop.f32.mrf.mxu1 }
 0xaab   :  { %6271 = vrot.lane.b32.xlu0 %v6005_v31, %s14548_s13 }
 0xaac   :  { %v13849_v10 = vpop.f32.mrf.mxu1 }
 0xaad   :  { %6269 = vrot.lane.b32.xlu1 %v17936_v8, %s14548_s13 }
 0xaae   :  { %v6015_v48 = vpop.f32.mrf.mxu1 }
 0xaaf   :  { %6579 = vrot.lane.b32.xlu0 %v6005_v31, %s14549_s27 }
 0xab0   :  { %v13852_v59 = vpop.f32.mrf.mxu1 }
 0xab1   :  { %6273 = vrot.lane.b32.xlu1 %v13846_v51, %s14548_s13 }
 0xab2   :  { %v6025_v46 = vpop.f32.mrf.mxu1 }
 0xab3   :  { %6275 = vrot.lane.b32.xlu0 %v6015_v48, %s14548_s13 }
 0xab4   :  { %v13855_v53 = vpop.f32.mrf.mxu1 }
 0xab5   :  { %6581 = vrot.lane.b32.xlu1 %v13846_v51, %s14549_s27 }
 0xab6   :  { %v6035_v23 = vpop.f32.mrf.mxu1 }
 0xab7   :  { %6583 = vrot.lane.b32.xlu0 %v6015_v48, %s14549_s27 }
 0xab8   :  { %v13858_v40 = vpop.f32.mrf.mxu1 }
 0xab9   :  { %6277 = vrot.lane.b32.xlu1 %v13849_v10, %s14548_s13 }
 0xaba   :  { %v6045_v19 = vpop.f32.mrf.mxu1 }
 0xabb   :  { %6279 = vrot.lane.b32.xlu0 %v6025_v46, %s14548_s13 }
 0xabc   :  { %v13861_v49 = vpop.f32.mrf.mxu1 }
 0xabd   :  { %6585 = vrot.lane.b32.xlu1 %v13849_v10, %s14549_s27 }
 0xabe   :  { %v6055_v1 = vpop.f32.mrf.mxu1 }
 0xabf   :  { %6587 = vrot.lane.b32.xlu0 %v6025_v46, %s14549_s27 }
 0xac0   :  { %v13864_v50 = vpop.f32.mrf.mxu1 }
 0xac1   :  { %6281 = vrot.lane.b32.xlu1 %v13852_v59, %s14548_s13 }
 0xac2   :  { %v6065_v56 = vpop.f32.mrf.mxu1 }
 0xac3   :  { %6283 = vrot.lane.b32.xlu0 %v6035_v23, %s14548_s13 }
 0xac4   :  { %v17958_v27 = vpop.f32.mrf.mxu1 }
 0xac5   :  { %6589 = vrot.lane.b32.xlu1 %v13852_v59, %s14549_s27 }
 0xac6   :  { %v17961_v7 = vpop.f32.mrf.mxu1 }
 0xac7   :  { %6591 = vrot.lane.b32.xlu0 %v6035_v23, %s14549_s27 }
 0xac8   :  { %v13870_v36 = vpop.f32.mrf.mxu1 }
 0xac9   :  { %6285 = vrot.lane.b32.xlu1 %v13855_v53, %s14548_s13 }
 0xaca   :  { %v17965_v15 = vpop.f32.mrf.mxu1 }
 0xacb   :  { %6289 = vrot.lane.b32.xlu0 %v13858_v40, %s14548_s13 }
 0xacc   :  { %v13873_v34 = vpop.f32.mrf.mxu1 }
 0xacd   :  { %6593 = vrot.lane.b32.xlu1 %v13855_v53, %s14549_s27 }
 0xace   :  { %v6095_v11 = vpop.f32.mrf.mxu1 }
 0xacf   :  { %6595 = vrot.lane.b32.xlu0 %v6045_v19, %s14549_s27 }
 0xad0   :  { %v17970_v43 = vpop.f32.mrf.mxu1 }
 0xad1   :  { %6597 = vrot.lane.b32.xlu1 %v13858_v40, %s14549_s27 }
 0xad2   :  { %v6105_v6 = vpop.f32.mrf.mxu1 }
 0xad3   :  { %6352 = vrot.lane.b32.xlu0 %v17965_v15, %s14550_s12 }
 0xad4   :  { %v17975_v22 = vpop.f32.mrf.mxu1 }
 0xad5   :  { %6287 = vrot.lane.b32.xlu1 %v6045_v19, %s14548_s13 }
 0xad6   :  { %v6115_v44 = vpop.f32.mrf.mxu1 }
 0xad7   :  { %6356 = vrot.lane.b32.xlu0 %v6095_v11, %s14550_s12 }
 0xad8   :  { %v17979_v9 = vpop.f32.mrf.mxu1 }
 0xad9   :  { %6293 = vrot.lane.b32.xlu1 %v13861_v49, %s14548_s13 }
 0xada   :  { %v6125_v29 = vpop.f32.mrf.mxu1 }
 0xadb   :  { %6648 = vrot.lane.b32.xlu0 %v6095_v11, %s14551_s6 }
 0xadc   :  { %v17983_v32 = vpop.f32.mrf.mxu1 }
 0xadd   :  { %6601 = vrot.lane.b32.xlu1 %v13861_v49, %s14549_s27 }
 0xade   :  { %v17986_v18 = vpop.f32.mrf.mxu1 }
 0xadf   :  { %6360 = vrot.lane.b32.xlu0 %v6105_v6, %s14550_s12 }
 0xae0   :  { %v17989_v30 = vpop.f32.mrf.mxu1 }
 0xae1   :  { %6291 = vrot.lane.b32.xlu1 %v6055_v1, %s14548_s13 }
 0xae2   :  { %v17993_v28 = vpop.f32.mrf.mxu1 }
 0xae3   :  { %6652 = vrot.lane.b32.xlu0 %v6105_v6, %s14551_s6 }
 0xae4   :  { %v17997_v54 = vpop.f32.mrf.mxu1 }
 0xae5   :  { %6599 = vrot.lane.b32.xlu1 %v6055_v1, %s14549_s27 }
 0xae6   :  { %v18001_v14 = vpop.f32.mrf.mxu1 }
 0xae7   :  { %6364 = vrot.lane.b32.xlu0 %v6115_v44, %s14550_s12 }
 0xae8   :  { %v18005_v41 = vpop.f32.mrf.mxu1 }
 0xae9   :  { %6297 = vrot.lane.b32.xlu1 %v13864_v50, %s14548_s13 }
 0xaea   :  { %v18009_v47 = vpop.f32.mrf.mxu1 }
 0xaeb   :  { %6656 = vrot.lane.b32.xlu0 %v6115_v44, %s14551_s6  ;;  %v8566_v44 = vld [vmem:[%s20342_s17 + $0x38] sm:$0xff] }
 0xaec   :  { %v18014_v20 = vpop.f32.mrf.mxu1 }
 0xaed   :  { %6605 = vrot.lane.b32.xlu1 %v13864_v50, %s14549_s27 }
 0xaee   :  { %v6175_v33 = vpop.f32.mrf.mxu1 }
 0xaef   :  { %6368 = vrot.lane.b32.xlu0 %v6125_v29, %s14550_s12 }
 0xaf0   :  { %v18028_v16 = vpop.f32.mrf.mxu1 }
 0xaf1   :  { %6295 = vrot.lane.b32.xlu1 %v6065_v56, %s14548_s13 }
 0xaf2   :  { %v6185_v57 = vpop.f32.mrf.mxu1 }
 0xaf3   :  { %6660 = vrot.lane.b32.xlu0 %v6125_v29, %s14551_s6 }
 0xaf4   :  { %v18040_v63 = vpop.f32.mrf.mxu1 }
 0xaf5   :  { %6603 = vrot.lane.b32.xlu1 %v6065_v56, %s14549_s27 }
 0xaf6   :  { %v6195_v3 = vpop.f32.mrf.mxu1 }
 0xaf7   :  { %6664 = vrot.lane.b32.xlu0 %v17986_v18, %s14551_s6 }
 0xaf8   :  { %v18055_v52 = vpop.f32.mrf.mxu1 }
 0xaf9   :  { %6350 = vrot.lane.b32.xlu1 %v17958_v27, %s14550_s12 }
 0xafa   :  { %v6205_v38 = vpop.f32.mrf.mxu1 }
 0xafb   :  { %v18018_v24 = vpop.permute.xlu1 %6516  ;;  %6433 = vrot.lane.b32.xlu0 %v18009_v47, %s14547_s11 }
 0xafc   :  { %v18069_v26 = vpop.f32.mrf.mxu1 }
 0xafd   :  { %6354 = vrot.lane.b32.xlu1 %v13870_v36, %s14550_s12  ;;  %v18023_v17 = vpop.permute.xlu0 %6514 }
 0xafe   :  { %v18077_v31 = vpop.f32.mrf.mxu1 }
 0xaff   :  { %v18025_v37 = vpop.permute.xlu1 %6520  ;;  %6437 = vrot.lane.b32.xlu0 %v6175_v33, %s14547_s11 }
 0xb01   :  { %6646 = vrot.lane.b32.xlu1 %v13870_v36, %s14551_s6  ;;  %v18034_v61 = vpop.permute.xlu0 %6518 }
 0xb03   :  { %v18031_v5 = vpop.permute.xlu1 %6524  ;;  %6713 = vrot.lane.b32.xlu0 %v6175_v33, %s14552_s0 }
 0xb05   :  { %6358 = vrot.lane.b32.xlu1 %v13873_v34, %s14550_s12  ;;  %v18043_v13 = vpop.permute.xlu0 %6522 }
 0xb07   :  { %v18037_v25 = vpop.permute.xlu1 %6528  ;;  %6441 = vrot.lane.b32.xlu0 %v6185_v57, %s14547_s11 }
 0xb09   :  { %6650 = vrot.lane.b32.xlu1 %v13873_v34, %s14551_s6  ;;  %v18053_v60 = vpop.permute.xlu0 %6526 }
 0xb0b   :  { %v18045_v42 = vpop.permute.xlu1 %6532  ;;  %6717 = vrot.lane.b32.xlu0 %v6185_v57, %s14552_s0 }
 0xb0d   :  { %6362 = vrot.lane.b32.xlu1 %v17970_v43, %s14550_s12  ;;  %v18062_v58 = vpop.permute.xlu0 %6530 }
 0xb0f   :  { %v18050_v39 = vpop.permute.xlu1 %6536  ;;  %6445 = vrot.lane.b32.xlu0 %v6195_v3, %s14547_s11 }
 0xb11   :  { %6654 = vrot.lane.b32.xlu1 %v17970_v43, %s14551_s6 }
 0xb13   :  { %v18059_v55 = vpop.permute.xlu1 %6534  ;;  %6721 = vrot.lane.b32.xlu0 %v6195_v3, %s14552_s0  ;;  %v8560_v3 = vld [vmem:[%s20342_s17 + $0x8] sm:$0xff] }
 0xb15   :  { %6366 = vrot.lane.b32.xlu1 %v17975_v22, %s14550_s12 }
 0xb17   :  { %v18066_v21 = vpop.permute.xlu1 %6540  ;;  %6449 = vrot.lane.b32.xlu0 %v6205_v38, %s14547_s11 }
 0xb19   :  { %v6268_v62 = vpop.permute.xlu0 %6267  ;;  %6658 = vrot.lane.b32.xlu1 %v17975_v22, %s14551_s6 }
 0xb1a   :  { %6316 = vst.msk [vmem:[#allocation3] sm:$0xff] %vm6315_vm7, %v6268_v62 }
 0xb1b   :  { %v18074_v51 = vpop.permute.xlu1 %6538  ;;  %6725 = vrot.lane.b32.xlu0 %v6205_v38, %s14552_s0 }
 0xb1d   :  { %v6272_v10 = vpop.permute.xlu0 %6271  ;;  %6370 = vrot.lane.b32.xlu1 %v17979_v9, %s14550_s12 }
 0xb1e   :  { %6318 = vst.msk [vmem:[#allocation3 + $0x10] sm:$0xff] %vm6315_vm7, %v6272_v10 }
 0xb1f   :  { %v6270_v48 = vpop.permute.xlu1 %6269  ;;  %6729 = vrot.lane.b32.xlu0 %v18077_v31, %s14552_s0 }
 0xb20   :  { %6317 = vst.msk [vmem:[#allocation3 + $0x8] sm:$0xff] %vm6315_vm7, %v6270_v48 }
 0xb21   :  { %v18085_v59 = vpop.permute.xlu0 %6579  ;;  %6662 = vrot.lane.b32.xlu1 %v17979_v9, %s14551_s6 }
 0xb23   :  { %v6274_v46 = vpop.permute.xlu1 %6273  ;;  %6348 = vrot.lane.b32.xlu0 %v17961_v7, %s14550_s12 }
 0xb24   :  { %6319 = vst.msk [vmem:[#allocation3 + $0x18] sm:$0xff] %vm6315_vm7, %v6274_v46  ;;  %v9986_v46 = vld [vmem:[%s20345_s20 + $0x8] sm:$0xff] }
 0xb25   :  { %v6276_v53 = vpop.permute.xlu0 %6275  ;;  %6374 = vrot.lane.b32.xlu1 %v17983_v32, %s14550_s12 }
 0xb26   :  { %6320 = vst.msk [vmem:[#allocation3 + $0x20] sm:$0xff] %vm6315_vm7, %v6276_v53 }
 0xb27   :  { %v18095_v23 = vpop.permute.xlu1 %6581  ;;  %6644 = vrot.lane.b32.xlu0 %v17965_v15, %s14551_s6 }
 0xb29   :  { %v18099_v40 = vpop.permute.xlu0 %6583  ;;  %6666 = vrot.lane.b32.xlu1 %v17983_v32, %s14551_s6  ;;  %v8564_v32 = vld [vmem:[%s20342_s17 + $0x28] sm:$0xff] }
 0xb2b   :  { %v6278_v19 = vpop.permute.xlu1 %6277  ;;  %6577 = vrot.lane.b32.xlu0 %v17936_v8, %s14549_s27  ;;  %v7315_v8 = vld [vmem:[%s20340_s15] sm:$0xff]  }
 0xb2c   :  { %6321 = vst.msk [vmem:[#allocation3 + $0x28] sm:$0xff] %vm6315_vm7, %v6278_v19  ;;  %v18130_v15 = vunpack.c.l.bf16 %v7315_v8  ;;  %v18146_v43 = vunpack.c.h.bf16 %v7315_v8 }
 0xb2d   :  { %v6280_v49 = vpop.permute.xlu0 %6279  ;;  %6372 = vrot.lane.b32.xlu1 %v17986_v18, %s14550_s12 }
 0xb2e   :  { %6322 = vst.msk [vmem:[#allocation3 + $0x30] sm:$0xff] %vm6315_vm7, %v6280_v49 }
 0xb2f   :  { %v18109_v1 = vpop.permute.xlu1 %6585  ;;  %6510 = vrot.lane.b32.xlu0 %v17906_v35, %s14547_s11 }
 0xb31   :  { %v18113_v50 = vpop.permute.xlu0 %6587  ;;  %6378 = vrot.lane.b32.xlu1 %v17989_v30, %s14550_s12 }
 0xb33   :  { %v6282_v56 = vpop.permute.xlu1 %6281  ;;  %6575 = vrot.lane.b32.xlu0 %v17939_v12, %s14549_s27 }
 0xb34   :  { %6323 = vst.msk [vmem:[#allocation3 + $0x38] sm:$0xff] %vm6315_vm7, %v6282_v56 }
 0xb35   :  { %v6284_v36 = vpop.permute.xlu0 %6283  ;;  %6670 = vrot.lane.b32.xlu1 %v17989_v30, %s14551_s6 }
 0xb36   :  { %6324 = vst.msk [vmem:[#allocation3 + $0x40] sm:$0xff] %vm6315_vm7, %v6284_v36 }
 0xb37   :  { %v18126_v35 = vpop.permute.xlu1 %6589  ;;  %6640 = vrot.lane.b32.xlu0 %v17961_v7, %s14551_s6 }
 0xb39   :  { %v18132_v12 = vpop.permute.xlu0 %6591  ;;  %6376 = vrot.lane.b32.xlu1 %v17993_v28, %s14550_s12 }
 0xb3b   :  { %v6286_v34 = vpop.permute.xlu1 %6285  ;;  %7318 = vrot.lane.b32.xlu0 %v18130_v15, %s14539_s7 }
 0xb3c   :  { %6325 = vst.msk [vmem:[#allocation3 + $0x48] sm:$0xff] %vm6315_vm7, %v6286_v34 }
 0xb3d   :  { %v6290_v11 = vpop.permute.xlu0 %6289  ;;  %6668 = vrot.lane.b32.xlu1 %v17993_v28, %s14551_s6  ;;  %v8562_v28 = vld [vmem:[%s20342_s17 + $0x18] sm:$0xff] }
 0xb3e   :  { %6327 = vst.msk [vmem:[#allocation3 + $0x58] sm:$0xff] %vm6315_vm7, %v6290_v11 }
 0xb3f   :  { %v18142_v7 = vpop.permute.xlu1 %6593  ;;  %7720 = vrot.lane.b32.xlu0 %v18130_v15, %s14540_s4 }
 0xb41   :  { %v18148_v6 = vpop.permute.xlu0 %6595  ;;  %6431 = vrot.lane.b32.xlu1 %v17997_v54, %s14547_s11 }
 0xb43   :  { %v18152_v22 = vpop.permute.xlu1 %6597  ;;  %8140 = vrot.lane.b32.xlu0 %v18146_v43, %s14537_s1 }
 0xb45   :  { %v6353_v9 = vpop.permute.xlu0 %6352  ;;  %6435 = vrot.lane.b32.xlu1 %v18005_v41, %s14547_s11 }
 0xb46   :  { %6399 = vst.msk [vmem:[#allocation3 + $0x10] sm:$0xff] %vm6396_vm8, %v6353_v9 }
 0xb47   :  { %v6288_v29 = vpop.permute.xlu1 %6287  ;;  %8604 = vperm.xlu0 %14467, %v8566_v44  }
 0xb48   :  { %6326 = vst.msk [vmem:[#allocation3 + $0x50] sm:$0xff] %vm6315_vm7, %v6288_v29 }
 0xb49   :  { %v6357_v18 = vpop.permute.xlu0 %6356  ;;  %6439 = vrot.lane.b32.xlu1 %v18014_v20, %s14547_s11 }
 0xb4a   :  { %6401 = vst.msk [vmem:[#allocation3 + $0x20] sm:$0xff] %vm6396_vm8, %v6357_v18 }
 0xb4b   :  { %v6294_v30 = vpop.permute.xlu1 %6293  ;;  %8594 = vperm.xlu0 %14467, %v8564_v32  }
 0xb4c   :  { %6329 = vst.msk [vmem:[#allocation3 + $0x68] sm:$0xff] %vm6315_vm7, %v6294_v30 }
 0xb4d   :  { %v6649_v33 = vpop.permute.xlu0 %6648  ;;  %6715 = vrot.lane.b32.xlu1 %v18014_v20, %s14552_s0  ;;  %v9988_v20 = vld [vmem:[%s20345_s20 + $0x18] sm:$0xff] }
 0xb4f   :  { %v18175_v57 = vpop.permute.xlu1 %6601  ;;  %8584 = vperm.xlu0 %14467, %v8562_v28  }
 0xb51   :  { %v6361_v38 = vpop.permute.xlu0 %6360  ;;  %6443 = vrot.lane.b32.xlu1 %v18028_v16, %s14547_s11 }
 0xb52   :  { %6403 = vst.msk [vmem:[#allocation3 + $0x30] sm:$0xff] %vm6396_vm8, %v6361_v38 }
 0xb53   :  { %v6292_v62 = vpop.permute.xlu1 %6291  ;;  %8574 = vperm.xlu0 %14467, %v8560_v3  }
 0xb54   :  { %6328 = vst.msk [vmem:[#allocation3 + $0x60] sm:$0xff] %vm6315_vm7, %v6292_v62 }
 0xb55   :  { %v6653_v10 = vpop.permute.xlu0 %6652  ;;  %6719 = vrot.lane.b32.xlu1 %v18028_v16, %s14552_s0 }
 0xb57   :  { %v18189_v48 = vpop.permute.xlu1 %6599  ;;  %10006 = vperm.xlu0 %14467, %v9988_v20  }
 0xb59   :  { %v6365_v53 = vpop.permute.xlu0 %6364  ;;  %6447 = vrot.lane.b32.xlu1 %v18040_v63, %s14547_s11 }
 0xb5a   :  { %6405 = vst.msk [vmem:[#allocation3 + $0x40] sm:$0xff] %vm6396_vm8, %v6365_v53 }
 0xb5b   :  { %v6298_v19 = vpop.permute.xlu1 %6297  ;;  %9996 = vperm.xlu0 %14467, %v9986_v46  }
 0xb5c   :  { %6331 = vst.msk [vmem:[#allocation3 + $0x78] sm:$0xff] %vm6315_vm7, %v6298_v19 }
 0xb5d   :  { %v6657_v49 = vpop.permute.xlu0 %6656  ;;  %6723 = vrot.lane.b32.xlu1 %v18040_v63, %s14552_s0 }
 0xb5f   :  { %v18200_v16 = vpop.permute.xlu1 %6605 }
 0xb61   :  { %v6369_v56 = vpop.permute.xlu0 %6368  ;;  %6451 = vrot.lane.b32.xlu1 %v18055_v52, %s14547_s11 }
 0xb62   :  { %6407 = vst.msk [vmem:[#allocation3 + $0x50] sm:$0xff] %vm6396_vm8, %v6369_v56 }
 0xb63   :  { %v6296_v8 = vpop.permute.xlu1 %6295 }
 0xb64   :  { %6330 = vst.msk [vmem:[#allocation3 + $0x70] sm:$0xff] %vm6315_vm7, %v6296_v8  ;;  %v8563_v8 = vld [vmem:[%s20342_s17 + $0x20] sm:$0xff] }
 0xb65   :  { %v18206_v36 = vpop.permute.xlu0 %6660  ;;  %6727 = vrot.lane.b32.xlu1 %v18055_v52, %s14552_s0 }
 0xb67   :  { %v18210_v34 = vpop.permute.xlu1 %6603 }
 0xb69   :  { %v18212_v11 = vpop.permute.xlu0 %6664  ;;  %6455 = vrot.lane.b32.xlu1 %v18069_v26, %s14547_s11 }
 0xb6b   :  { %v6351_v63 = vpop.permute.xlu1 %6350 }
 0xb6c   :  { %6398 = vst.msk [vmem:[#allocation3 + $0x8] sm:$0xff] %vm6396_vm8, %v6351_v63  ;;  %v8561_v63 = vld [vmem:[%s20342_s17 + $0x10] sm:$0xff] }
 0xb6d   :  { %v6434_v44 = vpop.permute.xlu0 %6433  ;;  %6731 = vrot.lane.b32.xlu1 %v18069_v26, %s14552_s0 }
 0xb6e   :  { %6480 = vst.msk [vmem:[#allocation3 + $0x10] sm:$0xff] %vm6477_vm9, %v6434_v44 }
 0xb6f   :  { %6561 = vst.msk [vmem:[#allocation3 + $0x10] sm:$0xff] %vm6558_vm10, %v18023_v17  ;;  %v6355_v52 = vpop.permute.xlu1 %6354  ;;  %v13912_v17 = vpop.f32.mrf.mxu1 }
 0xb70   :  { %6400 = vst.msk [vmem:[#allocation3 + $0x18] sm:$0xff] %vm6396_vm8, %v6355_v52  ;;  %v8559_v52 = vld [vmem:[%s20342_s17] sm:$0xff] }
 0xb71   :  { %6626 = vst.msk [vmem:[#allocation3 + $0x10] sm:$0xff] %vm6623_vm11, %v18085_v59  ;;  %v6438_v9 = vpop.permute.xlu0 %6437  ;;  %6453 = vrot.lane.b32.xlu1 %v18077_v31, %s14547_s11 }
 0xb72   :  { %6482 = vst.msk [vmem:[#allocation3 + $0x20] sm:$0xff] %vm6477_vm9, %v6438_v9 }
 0xb73   :  { %6563 = vst.msk [vmem:[#allocation3 + $0x20] sm:$0xff] %vm6558_vm10, %v18034_v61  ;;  %v18230_v26 = vpop.permute.xlu1 %6646 }
 0xb74   :  { %6628 = vst.msk [vmem:[#allocation3 + $0x20] sm:$0xff] %vm6623_vm11, %v18099_v40  ;;  %v6225_v40 = vpop.f32.mrf.mxu1 }
 0xb75   :  { %6693 = vst.msk [vmem:[#allocation3 + $0x20] sm:$0xff] %vm6688_vm12, %v6649_v33  ;;  %v6714_v59 = vpop.permute.xlu0 %6713  ;;  %6459 = vrot.lane.b32.xlu1 %v13912_v17, %s14547_s11 }
 0xb76   :  { %6758 = vst.msk [vmem:[#allocation3 + $0x20] sm:$0xff] %vm6753_vm13, %v6714_v59 }
 0xb77   :  { %v6359_v31 = vpop.permute.xlu1 %6358 }
 0xb78   :  { %6402 = vst.msk [vmem:[#allocation3 + $0x28] sm:$0xff] %vm6396_vm8, %v6359_v31 }
 0xb79   :  { %v6442_v29 = vpop.permute.xlu0 %6441  ;;  %6735 = vrot.lane.b32.xlu1 %v13912_v17, %s14552_s0  ;;  %v9987_v17 = vld [vmem:[%s20345_s20 + $0x10] sm:$0xff] }
 0xb7a   :  { %6484 = vst.msk [vmem:[#allocation3 + $0x30] sm:$0xff] %vm6477_vm9, %v6442_v29 }
 0xb7b   :  { %6565 = vst.msk [vmem:[#allocation3 + $0x30] sm:$0xff] %vm6558_vm10, %v18043_v13  ;;  %v18242_v61 = vpop.permute.xlu1 %6650 }
 0xb7c   :  { %6630 = vst.msk [vmem:[#allocation3 + $0x30] sm:$0xff] %vm6623_vm11, %v18113_v50 }
 0xb7d   :  { %6695 = vst.msk [vmem:[#allocation3 + $0x30] sm:$0xff] %vm6688_vm12, %v6653_v10  ;;  %v6718_v32 = vpop.permute.xlu0 %6717  ;;  %6457 = vrot.lane.b32.xlu1 %v6225_v40, %s14547_s11 }
 0xb7e   :  { %6760 = vst.msk [vmem:[#allocation3 + $0x30] sm:$0xff] %vm6753_vm13, %v6718_v32 }
 0xb7f   :  { %v6363_v18 = vpop.permute.xlu1 %6362 }
 0xb80   :  { %6404 = vst.msk [vmem:[#allocation3 + $0x38] sm:$0xff] %vm6396_vm8, %v6363_v18 }
 0xb81   :  { %v6446_v30 = vpop.permute.xlu0 %6445  ;;  %6733 = vrot.lane.b32.xlu1 %v6225_v40, %s14552_s0  ;;  %v6799_v40 = vld [vmem:[%s20339_s14 + $0x68] sm:$0xff] }
 0xb82   :  { %6486 = vst.msk [vmem:[#allocation3 + $0x40] sm:$0xff] %vm6477_vm9, %v6446_v30  ;;  %v6798_v30 = vld [vmem:[%s20339_s14 + $0x60] sm:$0xff] }
 0xb83   :  { %6567 = vst.msk [vmem:[#allocation3 + $0x40] sm:$0xff] %vm6558_vm10, %v18053_v60  ;;  %v18254_v13 = vpop.permute.xlu1 %6654 }
 0xb84   :  { %6632 = vst.msk [vmem:[#allocation3 + $0x40] sm:$0xff] %vm6623_vm11, %v18132_v12 }
 0xb85   :  { %6697 = vst.msk [vmem:[#allocation3 + $0x40] sm:$0xff] %vm6688_vm12, %v6657_v49  ;;  %v6722_v50 = vpop.permute.xlu0 %6721  ;;  %6711 = vrot.lane.b32.xlu1 %v18005_v41, %s14552_s0 }
 0xb86   :  { %6762 = vst.msk [vmem:[#allocation3 + $0x40] sm:$0xff] %vm6753_vm13, %v6722_v50 }
 0xb87   :  { %v6367_v28 = vpop.permute.xlu1 %6366 }
 0xb88   :  { %6406 = vst.msk [vmem:[#allocation3 + $0x48] sm:$0xff] %vm6396_vm8, %v6367_v28 }
 0xb89   :  { %v6450_v33 = vpop.permute.xlu0 %6449  ;;  %6512 = vrot.lane.b32.xlu1 %v17902_v0, %s14547_s11 }
 0xb8a   :  { %6488 = vst.msk [vmem:[#allocation3 + $0x50] sm:$0xff] %vm6477_vm9, %v6450_v33  ;;  %v6797_v33 = vld [vmem:[%s20339_s14 + $0x58] sm:$0xff] }
 0xb8b   :  { %6569 = vst.msk [vmem:[#allocation3 + $0x50] sm:$0xff] %vm6558_vm10, %v18062_v58  ;;  %v18268_v60 = vpop.permute.xlu1 %6658 }
 0xb8c   :  { %6634 = vst.msk [vmem:[#allocation3 + $0x50] sm:$0xff] %vm6623_vm11, %v18148_v6 }
 0xb8d   :  { %6699 = vst.msk [vmem:[#allocation3 + $0x50] sm:$0xff] %vm6688_vm12, %v18206_v36  ;;  %v6726_v41 = vpop.permute.xlu0 %6725  ;;  %6429 = vrot.lane.b32.xlu1 %v18001_v14, %s14547_s11 }
 0xb8e   :  { %6764 = vst.msk [vmem:[#allocation3 + $0x50] sm:$0xff] %vm6753_vm13, %v6726_v41 }
 0xb8f   :  { %v6371_v0 = vpop.permute.xlu1 %6370 }
 0xb90   :  { %6408 = vst.msk [vmem:[#allocation3 + $0x58] sm:$0xff] %vm6396_vm8, %v6371_v0  ;;  %v6796_v0 = vld [vmem:[%s20339_s14 + $0x50] sm:$0xff] }
 0xb91   :  { %v18278_v12 = vpop.permute.xlu0 %6729  ;;  %6709 = vrot.lane.b32.xlu1 %v18009_v47, %s14552_s0  ;;  %v6818_v47 = vld [vmem:[%s20341_s16] sm:$0xff] }
 0xb92   :  { %13945 = vmatprep.mubr.f32.mxu0 %v6818_v47  ;;  %v6778_v47 = vld [vmem:[#allocation3 + $0x40] sm:$0xff] }
 0xb93   :  { %v18282_v58 = vpop.permute.xlu1 %6662 }
 0xb95   :  { %v6349_v6 = vpop.permute.xlu0 %6348  ;;  %6642 = vrot.lane.b32.xlu1 %v17958_v27, %s14551_s6  ;;  %v6780_v41 = vld [vmem:[#allocation3 + $0x50] sm:$0xff] }
 0xb96   :  { %6397 = vst.msk [vmem:[#allocation3] sm:$0xff] %vm6396_vm8, %v6349_v6 }
 0xb97   :  { %v6375_v3 = vpop.permute.xlu1 %6374 }
 0xb98   :  { %6410 = vst.msk [vmem:[#allocation3 + $0x68] sm:$0xff] %vm6396_vm8, %v6375_v3  ;;  %v6795_v3 = vld [vmem:[%s20339_s14 + $0x48] sm:$0xff] }
 0xb99   :  { %v6645_v38 = vpop.permute.xlu0 %6644  ;;  %6707 = vrot.lane.b32.xlu1 %v17997_v54, %s14552_s0 }
 0xb9a   :  { %6691 = vst.msk [vmem:[#allocation3 + $0x10] sm:$0xff] %vm6688_vm12, %v6645_v38  ;;  %v6812_v38 = vadd.f32 %v6796_v0, %v6780_v41  ;;  %v6837_v41 = vld [vmem:[%s20341_s16 + $0x98] sm:$0xff]  ;;  %v6838_v0 = vld [vmem:[%s20341_s16 + $0xa0] sm:$0xff] }
 0xb9b   :  { %v18294_v62 = vpop.permute.xlu1 %6666 }
 0xb9d   :  { %v18296_v20 = vpop.permute.xlu0 %6577  ;;  %6705 = vrot.lane.b32.xlu1 %v18001_v14, %s14552_s0  ;;  %v8565_v14 = vld [vmem:[%s20342_s17 + $0x30] sm:$0xff]  ;;  %s14554_s0 = smov [#allocation7]  }
 0xb9f   :  { %v6373_v27 = vpop.permute.xlu1 %6372 }
 0xba0   :  { %6409 = vst.msk [vmem:[#allocation3 + $0x60] sm:$0xff] %vm6396_vm8, %v6373_v27 }
 0xba1   :  { %v18301_v10 = vpop.permute.xlu0 %6510  ;;  %7580 = vrot.lane.b32.xlu1 %v18130_v15, %s14537_s1 }
 0xba3   :  { %v6379_v54 = vpop.permute.xlu1 %6378 }
 0xba4   :  { %6412 = vst.msk [vmem:[#allocation3 + $0x78] sm:$0xff] %vm6396_vm8, %v6379_v54  ;;  %v6793_v54 = vld [vmem:[%s20339_s14 + $0x38] sm:$0xff] }
 0xba5   :  { %v18306_v46 = vpop.permute.xlu0 %6575  ;;  %8000 = vrot.lane.b32.xlu1 %v18146_v43, %s14539_s7 }
 0xba7   :  { %v18310_v53 = vpop.permute.xlu1 %6670 }
 0xba9   :  { %v18312_v19 = vpop.permute.xlu0 %6640  ;;  %8280 = vrot.lane.b32.xlu1 %v18146_v43, %s14540_s4 }
 0xbab   :  { %v6377_v49 = vpop.permute.xlu1 %6376 }
 0xbac   :  { %6411 = vst.msk [vmem:[#allocation3 + $0x70] sm:$0xff] %vm6396_vm8, %v6377_v49 }
 0xbad   :  { %8599 = vperm.xlu1 %14466, %v8565_v14   ;;  %v7319_v56 = vpop.permute.xlu0 %7318 }
 0xbae   :  { %14053 = vmatprep.subr.mxu1 %v7319_v56 }
 0xbaf   :  { %v18323_v36 = vpop.permute.xlu1 %6668  ;;  %14054 = vmatpush3.msra.mxu1 %v7319_v56 }
 0xbb0   :  { %14067 = vmatprep.subr.mxu1 %v18130_v15 }
 0xbb1   :  { %8589 = vperm.xlu1 %14466, %v8563_v8   ;;  %v6791_v8 = vld [vmem:[%s20339_s14 + $0x28] sm:$0xff] }
 0xbb3   :  { %v6432_v44 = vpop.permute.xlu1 %6431 }
 0xbb4   :  { %6479 = vst.msk [vmem:[#allocation3 + $0x8] sm:$0xff] %vm6477_vm9, %v6432_v44  ;;  %v6790_v44 = vld [vmem:[%s20339_s14 + $0x20] sm:$0xff] }
 0xbb5   :  { %8579 = vperm.xlu1 %14466, %v8561_v63   ;;  %v6774_v63 = vld [vmem:[#allocation3 + $0x20] sm:$0xff] }
 0xbb7   :  { %v6436_v9 = vpop.permute.xlu1 %6435 }
 0xbb8   :  { %6481 = vst.msk [vmem:[#allocation3 + $0x18] sm:$0xff] %vm6477_vm9, %v6436_v9 }
 0xbb9   :  { %6562 = vst.msk [vmem:[#allocation3 + $0x18] sm:$0xff] %vm6558_vm10, %v18018_v24  ;;  %8569 = vperm.xlu1 %14466, %v8559_v52   ;;  %v9985_v24 = vld [vmem:[%s20345_s20] sm:$0xff] }
 0xbba   :  { %6627 = vst.msk [vmem:[#allocation3 + $0x18] sm:$0xff] %vm6623_vm11, %v18095_v23 }
 0xbbb   :  { %6692 = vst.msk [vmem:[#allocation3 + $0x18] sm:$0xff] %vm6688_vm12, %v18230_v26  ;;  %v6440_v59 = vpop.permute.xlu1 %6439 }
 0xbbc   :  { %6483 = vst.msk [vmem:[#allocation3 + $0x28] sm:$0xff] %vm6477_vm9, %v6440_v59  ;;  %v6789_v59 = vld [vmem:[%s20339_s14 + $0x18] sm:$0xff] }
 0xbbd   :  { %6564 = vst.msk [vmem:[#allocation3 + $0x28] sm:$0xff] %vm6558_vm10, %v18025_v37  ;;  %10001 = vperm.xlu1 %14466, %v9987_v17  }
 0xbbe   :  { %6629 = vst.msk [vmem:[#allocation3 + $0x28] sm:$0xff] %vm6623_vm11, %v18109_v1 }
 0xbbf   :  { %6694 = vst.msk [vmem:[#allocation3 + $0x28] sm:$0xff] %vm6688_vm12, %v18242_v61  ;;  %v6716_v23 = vpop.permute.xlu1 %6715 }
 0xbc0   :  { %6759 = vst.msk [vmem:[#allocation3 + $0x28] sm:$0xff] %vm6753_vm13, %v6716_v23 }
 0xbc1   :  { %9991 = vperm.xlu1 %14466, %v9985_v24   ;;  %v6806_v24 = vadd.f32 %v6790_v44, %v6774_v63  ;;  %v6858_v63 = vld [vmem:[%s20341_s16 + $0x140] sm:$0xff]  ;;  %v6859_v44 = vld [vmem:[%s20341_s16 + $0x148] sm:$0xff] }
 0xbc3   :  { %v6444_v26 = vpop.permute.xlu1 %6443 }
 0xbc4   :  { %6485 = vst.msk [vmem:[#allocation3 + $0x38] sm:$0xff] %vm6477_vm9, %v6444_v26  ;;  %v6788_v26 = vld [vmem:[%s20339_s14 + $0x10] sm:$0xff] }
 0xbc5   :  { %6566 = vst.msk [vmem:[#allocation3 + $0x38] sm:$0xff] %vm6558_vm10, %v18031_v5 }
 0xbc6   :  { %6631 = vst.msk [vmem:[#allocation3 + $0x38] sm:$0xff] %vm6623_vm11, %v18126_v35 }
 0xbc7   :  { %6696 = vst.msk [vmem:[#allocation3 + $0x38] sm:$0xff] %vm6688_vm12, %v18254_v13  ;;  %v6720_v37 = vpop.permute.xlu1 %6719  ;;  %v6775_v56 = vld [vmem:[#allocation3 + $0x28] sm:$0xff] }
 0xbc8   :  { %6761 = vst.msk [vmem:[#allocation3 + $0x38] sm:$0xff] %vm6753_vm13, %v6720_v37  ;;  %v6807_v52 = vadd.f32 %v6791_v8, %v6775_v56  ;;  %v6855_v56 = vld [vmem:[%s20341_s16 + $0x128] sm:$0xff]  ;;  %v6856_v8 = vld [vmem:[%s20341_s16 + $0x130] sm:$0xff] }
 0xbcb   :  { %v6448_v1 = vpop.permute.xlu1 %6447 }
 0xbcc   :  { %6487 = vst.msk [vmem:[#allocation3 + $0x48] sm:$0xff] %vm6477_vm9, %v6448_v1 }
 0xbcd   :  { %6568 = vst.msk [vmem:[#allocation3 + $0x48] sm:$0xff] %vm6558_vm10, %v18037_v25 }
 0xbce   :  { %6633 = vst.msk [vmem:[#allocation3 + $0x48] sm:$0xff] %vm6623_vm11, %v18142_v7 }
 0xbcf   :  { %6698 = vst.msk [vmem:[#allocation3 + $0x48] sm:$0xff] %vm6688_vm12, %v18268_v60  ;;  %v6724_v5 = vpop.permute.xlu1 %6723 }
 0xbd0   :  { %6763 = vst.msk [vmem:[#allocation3 + $0x48] sm:$0xff] %vm6753_vm13, %v6724_v5  ;;  %v6787_v5 = vld [vmem:[%s20339_s14 + $0x8] sm:$0xff] }
 0xbd3   :  { %v6452_v35 = vpop.permute.xlu1 %6451 }
 0xbd4   :  { %6489 = vst.msk [vmem:[#allocation3 + $0x58] sm:$0xff] %vm6477_vm9, %v6452_v35 }
 0xbd5   :  { %6570 = vst.msk [vmem:[#allocation3 + $0x58] sm:$0xff] %vm6558_vm10, %v18045_v42 }
 0xbd6   :  { %6635 = vst.msk [vmem:[#allocation3 + $0x58] sm:$0xff] %vm6623_vm11, %v18152_v22 }
 0xbd7   :  { %6700 = vst.msk [vmem:[#allocation3 + $0x58] sm:$0xff] %vm6688_vm12, %v18282_v58  ;;  %v6728_v25 = vpop.permute.xlu1 %6727  ;;  %v6779_v6 = vld [vmem:[#allocation3 + $0x48] sm:$0xff] }
 0xbd8   :  { %6765 = vst.msk [vmem:[#allocation3 + $0x58] sm:$0xff] %vm6753_vm13, %v6728_v25  ;;  %v6786_v25 = vld [vmem:[%s20339_s14] sm:$0xff] }
 0xbdb   :  { %v6456_v7 = vpop.permute.xlu1 %6455 }
 0xbdc   :  { %6491 = vst.msk [vmem:[#allocation3 + $0x68] sm:$0xff] %vm6477_vm9, %v6456_v7 }
 0xbdd   :  { %6572 = vst.msk [vmem:[#allocation3 + $0x68] sm:$0xff] %vm6558_vm10, %v18050_v39 }
 0xbde   :  { %6637 = vst.msk [vmem:[#allocation3 + $0x68] sm:$0xff] %vm6623_vm11, %v18175_v57 }
 0xbdf   :  { %6702 = vst.msk [vmem:[#allocation3 + $0x68] sm:$0xff] %vm6688_vm12, %v18294_v62  ;;  %v6732_v42 = vpop.permute.xlu1 %6731  ;;  %v6781_v28 = vld [vmem:[#allocation3 + $0x58] sm:$0xff]  ;;  %v6794_v62 = vld [vmem:[%s20339_s14 + $0x40] sm:$0xff] }
 0xbe0   :  { %6767 = vst.msk [vmem:[#allocation3 + $0x68] sm:$0xff] %vm6753_vm13, %v6732_v42 }
 0xbe3   :  { %v6454_v22 = vpop.permute.xlu1 %6453 }
 0xbe4   :  { %6490 = vst.msk [vmem:[#allocation3 + $0x60] sm:$0xff] %vm6477_vm9, %v6454_v22 }
 0xbe5   :  { %6571 = vst.msk [vmem:[#allocation3 + $0x60] sm:$0xff] %vm6558_vm10, %v18059_v55 }
 0xbe6   :  { %6636 = vst.msk [vmem:[#allocation3 + $0x60] sm:$0xff] %vm6623_vm11, %v18189_v48  ;;  %v6801_v48 = vld [vmem:[%s20339_s14 + $0x78] sm:$0xff] }
 0xbe7   :  { %6701 = vst.msk [vmem:[#allocation3 + $0x60] sm:$0xff] %vm6688_vm12, %v18212_v11  ;;  %v6460_v39 = vpop.permute.xlu1 %6459 }
 0xbe8   :  { %6766 = vst.msk [vmem:[#allocation3 + $0x60] sm:$0xff] %vm6753_vm13, %v18278_v12  ;;  %v6813_v12 = vadd.f32 %v6797_v33, %v6781_v28  ;;  %v6834_v28 = vld [vmem:[%s20341_s16 + $0x80] sm:$0xff]  ;;  %v6835_v33 = vld [vmem:[%s20341_s16 + $0x88] sm:$0xff] }
 0xbe9   :  { %6493 = vst.msk [vmem:[#allocation3 + $0x78] sm:$0xff] %vm6477_vm9, %v6460_v39 }
 0xbea   :  { %6574 = vst.msk [vmem:[#allocation3 + $0x78] sm:$0xff] %vm6558_vm10, %v18066_v21 }
 0xbeb   :  { %6639 = vst.msk [vmem:[#allocation3 + $0x78] sm:$0xff] %vm6623_vm11, %v18200_v16  ;;  %v6736_v55 = vpop.permute.xlu1 %6735 }
 0xbec   :  { %6704 = vst.msk [vmem:[#allocation3 + $0x78] sm:$0xff] %vm6688_vm12, %v18310_v53  ;;  %v6776_v53 = vld [vmem:[#allocation3 + $0x30] sm:$0xff] }
 0xbed   :  { %6769 = vst.msk [vmem:[#allocation3 + $0x78] sm:$0xff] %vm6753_vm13, %v6736_v55  ;;  %v6819_v55 = vld [vmem:[%s20341_s16 + $0x8] sm:$0xff] }
 0xbef   :  { %v6458_v57 = vpop.permute.xlu1 %6457  ;;  %v6782_v18 = vld [vmem:[#allocation3 + $0x60] sm:$0xff] }
 0xbf0   :  { %6492 = vst.msk [vmem:[#allocation3 + $0x70] sm:$0xff] %vm6477_vm9, %v6458_v57  ;;  %v6814_v60 = vadd.f32 %v6798_v30, %v6782_v18  ;;  %v6820_v57 = vld [vmem:[%s20341_s16 + $0x10] sm:$0xff]  ;;  %v6830_v18 = vld [vmem:[%s20341_s16 + $0x60] sm:$0xff]  ;;  %v6831_v30 = vld [vmem:[%s20341_s16 + $0x68] sm:$0xff] }
 0xbf1   :  { %6573 = vst.msk [vmem:[#allocation3 + $0x70] sm:$0xff] %vm6558_vm10, %v18074_v51  ;;  %v6800_v51 = vld [vmem:[%s20339_s14 + $0x70] sm:$0xff] }
 0xbf2   :  { %6638 = vst.msk [vmem:[#allocation3 + $0x70] sm:$0xff] %vm6623_vm11, %v18210_v34  ;;  %v6783_v34 = vld [vmem:[#allocation3 + $0x68] sm:$0xff] }
 0xbf3   :  { %6703 = vst.msk [vmem:[#allocation3 + $0x70] sm:$0xff] %vm6688_vm12, %v18323_v36  ;;  %v6734_v21 = vpop.permute.xlu1 %6733  ;;  %v6815_v13 = vadd.f32 %v6799_v40, %v6783_v34  ;;  %v6827_v34 = vld [vmem:[%s20341_s16 + $0x48] sm:$0xff]  ;;  %v6828_v40 = vld [vmem:[%s20341_s16 + $0x50] sm:$0xff] }
 0xbf4   :  { %v6785_v16 = vld [vmem:[#allocation3 + $0x78] sm:$0xff]  ;;  %6768 = vst.msk [vmem:[#allocation3 + $0x70] sm:$0xff] %vm6753_vm13, %v6734_v21 }
 0xbf5   :  { %v6817_v11 = vadd.f32 %v6801_v48, %v6785_v16  ;;  %v7721_v48 = vpop.permute.xlu0 %7720  ;;  %v6821_v21 = vld [vmem:[%s20341_s16 + $0x18] sm:$0xff] }
 0xbf7   :  { %13913 = vmatprep.subr.mxu0 %v6817_v11  ;;  %v6712_v31 = vpop.permute.xlu1 %6711 }
 0xbf8   :  { %13914 = vmatpush3.msra.mxu0 %v6817_v11  ;;  %6757 = vst.msk [vmem:[#allocation3 + $0x18] sm:$0xff] %vm6753_vm13, %v6712_v31  ;;  %v6822_v11 = vld [vmem:[%s20341_s16 + $0x20] sm:$0xff]  ;;  %v6823_v31 = vld [vmem:[%s20341_s16 + $0x28] sm:$0xff] }
 0xbfb   :  { %v6513_v29 = vpop.permute.xlu1 %6512  ;;  %v6784_v61 = vld [vmem:[#allocation3 + $0x70] sm:$0xff] }
 0xbfc   :  { %6560 = vst.msk [vmem:[#allocation3 + $0x8] sm:$0xff] %vm6558_vm10, %v6513_v29  ;;  %v6816_v32 = vadd.f32 %v6800_v51, %v6784_v61  ;;  %v6824_v51 = vld [vmem:[%s20341_s16 + $0x30] sm:$0xff]  ;;  %v6825_v29 = vld [vmem:[%s20341_s16 + $0x38] sm:$0xff]  ;;  %v6826_v61 = vld [vmem:[%s20341_s16 + $0x40] sm:$0xff] }
 0xbfd   :  { %6625 = vst.msk [vmem:[#allocation3 + $0x8] sm:$0xff] %vm6623_vm11, %v18296_v20  ;;  %v6811_v20 = vadd.f32 %v6795_v3, %v6779_v6  ;;  %v6841_v6 = vld [vmem:[%s20341_s16 + $0xb8] sm:$0xff]  ;;  %v6842_v3 = vld [vmem:[%s20341_s16 + $0xc0] sm:$0xff] }
 0xbfe   :  { %13915 = vmatprep.subr.mxu0 %v6816_v32 }
 0xbff   :  { %13916 = vmatpush3.msra.mxu0 %v6816_v32  ;;  %v6430_v50 = vpop.permute.xlu1 %6429  ;;  %v6773_v17 = vld [vmem:[#allocation3 + $0x18] sm:$0xff] }
 0xc00   :  { %6478 = vst.msk [vmem:[#allocation3] sm:$0xff] %vm6477_vm9, %v6430_v50  ;;  %13917 = vmatprep.subr.mxu0 %v6815_v13  ;;  %v6805_v37 = vadd.f32 %v6789_v59, %v6773_v17  ;;  %v6829_v32 = vld [vmem:[%s20341_s16 + $0x58] sm:$0xff]  ;;  %v6862_v17 = vld [vmem:[%s20341_s16 + $0x160] sm:$0xff]  ;;  %v6863_v59 = vld [vmem:[%s20341_s16 + $0x168] sm:$0xff] }
 0xc01   :  { %6559 = vst.msk [vmem:[#allocation3] sm:$0xff] %vm6558_vm10, %v18301_v10  ;;  %13918 = vmatpush3.msra.mxu0 %v6815_v13  ;;  %v6777_v10 = vld [vmem:[#allocation3 + $0x38] sm:$0xff]  ;;  %v6832_v13 = vld [vmem:[%s20341_s16 + $0x70] sm:$0xff] }
 0xc02   :  { %6624 = vst.msk [vmem:[#allocation3] sm:$0xff] %vm6623_vm11, %v18306_v46  ;;  %13919 = vmatprep.subr.mxu0 %v6814_v60  ;;  %v6810_v46 = vadd.f32 %v6794_v62, %v6778_v47  ;;  %v6809_v14 = vadd.f32 %v6793_v54, %v6777_v10  ;;  %v6833_v50 = vld [vmem:[%s20341_s16 + $0x78] sm:$0xff]  ;;  %v6844_v47 = vld [vmem:[%s20341_s16 + $0xd0] sm:$0xff] }
 0xc03   :  { %6689 = vst.msk [vmem:[#allocation3] sm:$0xff] %vm6688_vm12, %v18312_v19  ;;  %13920 = vmatpush3.msra.mxu0 %v6814_v60  ;;  %v6710_v58 = vpop.permute.xlu1 %6709  ;;  %v6792_v19 = vld [vmem:[%s20339_s14 + $0x30] sm:$0xff]  ;;  %v6845_v62 = vld [vmem:[%s20341_s16 + $0xd8] sm:$0xff] }
 0xc04   :  { %6756 = vst.msk [vmem:[#allocation3 + $0x10] sm:$0xff] %vm6753_vm13, %v6710_v58  ;;  %13921 = vmatprep.subr.mxu0 %v6813_v12  ;;  %v6808_v36 = vadd.f32 %v6792_v19, %v6776_v53  ;;  %v6836_v60 = vld [vmem:[%s20341_s16 + $0x90] sm:$0xff]  ;;  %v6849_v54 = vld [vmem:[%s20341_s16 + $0xf8] sm:$0xff]  ;;  %v6851_v53 = vld [vmem:[%s20341_s16 + $0x108] sm:$0xff] }
 0xc05   :  { %13922 = vmatpush3.msra.mxu0 %v6813_v12  ;;  %v6839_v12 = vld [vmem:[%s20341_s16 + $0xa8] sm:$0xff]  ;;  %v6840_v58 = vld [vmem:[%s20341_s16 + $0xb0] sm:$0xff] }
 0xc06   :  { %13923 = vmatprep.subr.mxu0 %v6812_v38  ;;  %v6848_v10 = vld [vmem:[%s20341_s16 + $0xf0] sm:$0xff] }
 0xc07   :  { %13924 = vmatpush3.msra.mxu0 %v6812_v38  ;;  %v6643_v27 = vpop.permute.xlu1 %6642  ;;  %v6843_v38 = vld [vmem:[%s20341_s16 + $0xc8] sm:$0xff]  ;;  %v6852_v19 = vld [vmem:[%s20341_s16 + $0x110] sm:$0xff] }
 0xc08   :  { %6690 = vst.msk [vmem:[#allocation3 + $0x8] sm:$0xff] %vm6688_vm12, %v6643_v27  ;;  %13925 = vmatprep.subr.mxu0 %v6811_v20  ;;  %v6847_v27 = vld [vmem:[%s20341_s16 + $0xe8] sm:$0xff] }
 0xc09   :  { %13926 = vmatpush3.msra.mxu0 %v6811_v20  ;;  %v6846_v20 = vld [vmem:[%s20341_s16 + $0xe0] sm:$0xff] }
 0xc0a   :  { %13927 = vmatprep.subr.mxu0 %v6810_v46 }
 0xc0b   :  { %13928 = vmatpush3.msra.mxu0 %v6810_v46  ;;  %v6708_v49 = vpop.permute.xlu1 %6707  ;;  %v6772_v23 = vld [vmem:[#allocation3 + $0x10] sm:$0xff]  ;;  %v6850_v46 = vld [vmem:[%s20341_s16 + $0x100] sm:$0xff] }
 0xc0c   :  { %6755 = vst.msk [vmem:[#allocation3 + $0x8] sm:$0xff] %vm6753_vm13, %v6708_v49  ;;  %13929 = vmatprep.subr.mxu0 %v6809_v14  ;;  %v6804_v35 = vadd.f32 %v6788_v26, %v6772_v23  ;;  %v6854_v49 = vld [vmem:[%s20341_s16 + $0x120] sm:$0xff]  ;;  %v6865_v23 = vld [vmem:[%s20341_s16 + $0x178] sm:$0xff] }
 0xc0d   :  { %13930 = vmatpush3.msra.mxu0 %v6809_v14  ;;  %v6853_v14 = vld [vmem:[%s20341_s16 + $0x118] sm:$0xff]  ;;  %v6866_v26 = vld [vmem:[%s20341_s16 + $0x180] sm:$0xff] }
 0xc0e   :  { %13931 = vmatprep.subr.mxu0 %v6808_v36 }
 0xc0f   :  { %13932 = vmatpush3.msra.mxu0 %v6808_v36  ;;  %v6706_v9 = vpop.permute.xlu1 %6705  ;;  %v6857_v36 = vld [vmem:[%s20341_s16 + $0x138] sm:$0xff] }
 0xc10   :  { %6754 = vst.msk [vmem:[#allocation3] sm:$0xff] %vm6753_vm13, %v6706_v9  ;;  %13933 = vmatprep.subr.mxu0 %v6807_v52  ;;  %v6861_v9 = vld [vmem:[%s20341_s16 + $0x158] sm:$0xff] }
 0xc11   :  { %13934 = vmatpush3.msra.mxu0 %v6807_v52  ;;  %v6860_v52 = vld [vmem:[%s20341_s16 + $0x150] sm:$0xff] }
 0xc12   :  { %13935 = vmatprep.subr.mxu0 %v6806_v24 }
 0xc13   :  { %13936 = vmatpush3.msra.mxu0 %v6806_v24  ;;  %v6771_v1 = vld [vmem:[#allocation3 + $0x8] sm:$0xff]  ;;  %v18474_v22 = vpop.permute.xlu1 %7580  ;;  %v6864_v24 = vld [vmem:[%s20341_s16 + $0x170] sm:$0xff] }
 0xc14   :  { %13937 = vmatprep.subr.mxu0 %v6805_v37  ;;  %v6803_v7 = vadd.f32 %v6787_v5, %v6771_v1  ;;  %v6868_v1 = vld [vmem:[%s20341_s16 + $0x190] sm:$0xff]  ;;  %v6869_v5 = vld [vmem:[%s20341_s16 + $0x198] sm:$0xff] }
 0xc15   :  { %13938 = vmatpush3.msra.mxu0 %v6805_v37  ;;  %v6867_v37 = vld [vmem:[%s20341_s16 + $0x188] sm:$0xff] }
 0xc16   :  { %13939 = vmatprep.subr.mxu0 %v6804_v35 }
 0xc17   :  { %13940 = vmatpush3.msra.mxu0 %v6804_v35  ;;  %v6770_v42 = vld [vmem:[#allocation3] sm:$0xff]  ;;  %v18485_v16 = vpop.permute.xlu1 %8000 }
 0xc18   :  { %13941 = vmatprep.subr.mxu0 %v6803_v7  ;;  %v6802_v39 = vadd.f32 %v6786_v25, %v6770_v42  ;;  %v6870_v35 = vld [vmem:[%s20341_s16 + $0x1a0] sm:$0xff]  ;;  %v6871_v25 = vld [vmem:[%s20341_s16 + $0x1a8] sm:$0xff]  ;;  %v6873_v42 = vld [vmem:[%s20341_s16 + $0x1b8] sm:$0xff] }
 0xc19   :  { %13942 = vmatpush3.msra.mxu0 %v6803_v7  ;;  %v6872_v7 = vld [vmem:[%s20341_s16 + $0x1b0] sm:$0xff] }
 0xc1a   :  { %13943 = vmatprep.subr.mxu0 %v6802_v39 }
 0xc1b   :  { %13944 = vmatpush3.msra.mxu0 %v6802_v39  ;;  %v6874_v39 = vld [vmem:[%s20341_s16 + $0x1c0] sm:$0xff] }
 0xc1c   :  { %13946 = vmatmul.mubr.f32.vlgmr.msra.gmra.mxu0 %v6819_v55  ;;  %14095 = vmatprep.subr.mxu0 %v7721_v48  ;;  %v6875_v55 = vld [vmem:[%s20341_s16 + $0x1c8] sm:$0xff] }
 0xc1d   :  { %13948 = vmatprep.mubr.f32.mxu0 %v6820_v57  ;;  %14096 = vmatpush3.msra.mxu0 %v7721_v48  ;;  %v6876_v57 = vld [vmem:[%s20341_s16 + $0x1d0] sm:$0xff]  ;;  %v6877_v48 = vld [vmem:[%s20341_s16 + $0x1d8] sm:$0xff] }
 0xc1e   :  { %14123 = vmatprep.subr.mxu0 %v18485_v16 }
 0xc20   :  { %13949 = vmatmul.mubr.f32.gmra.mxu0 %v6821_v21  ;;  %v6878_v21 = vld [vmem:[%s20341_s16 + $0x1e0] sm:$0xff] }
 0xc21   :  { %13951 = vmatprep.mubr.f32.mxu0 %v6822_v11  ;;  %v6879_v11 = vld [vmem:[%s20341_s16 + $0x1e8] sm:$0xff] }
 0xc24   :  { %13952 = vmatmul.mubr.f32.gmra.mxu0 %v6823_v31  ;;  %v6880_v31 = vld [vmem:[%s20341_s16 + $0x1f0] sm:$0xff] }
 0xc25   :  { %13954 = vmatprep.mubr.f32.mxu0 %v6824_v51  ;;  %v6881_v51 = vld [vmem:[%s20341_s16 + $0x1f8] sm:$0xff] }
 0xc28   :  { %13955 = vmatmul.mubr.f32.gmra.mxu0 %v6825_v29  ;;  %v6882_v29 = vld [vmem:[%s20341_s16 + $0x200] sm:$0xff] }
 0xc29   :  { %13957 = vmatprep.mubr.f32.mxu0 %v6826_v61  ;;  %v6883_v61 = vld [vmem:[%s20341_s16 + $0x208] sm:$0xff] }
 0xc2c   :  { %13958 = vmatmul.mubr.f32.gmra.mxu0 %v6827_v34  ;;  %v6884_v34 = vld [vmem:[%s20341_s16 + $0x210] sm:$0xff] }
 0xc2d   :  { %13960 = vmatprep.mubr.f32.mxu0 %v6828_v40  ;;  %v6885_v40 = vld [vmem:[%s20341_s16 + $0x218] sm:$0xff] }
 0xc30   :  { %13961 = vmatmul.mubr.f32.gmra.mxu0 %v6829_v32  ;;  %v6886_v32 = vld [vmem:[%s20341_s16 + $0x220] sm:$0xff] }
 0xc31   :  { %13963 = vmatprep.mubr.f32.mxu0 %v6830_v18  ;;  %v6887_v18 = vld [vmem:[%s20341_s16 + $0x228] sm:$0xff] }
 0xc34   :  { %13964 = vmatmul.mubr.f32.gmra.mxu0 %v6831_v30  ;;  %v6888_v30 = vld [vmem:[%s20341_s16 + $0x230] sm:$0xff] }
 0xc35   :  { %13966 = vmatprep.mubr.f32.mxu0 %v6832_v13  ;;  %v6889_v13 = vld [vmem:[%s20341_s16 + $0x238] sm:$0xff] }
 0xc38   :  { %13967 = vmatmul.mubr.f32.gmra.mxu0 %v6833_v50 }
 0xc39   :  { %13969 = vmatprep.mubr.f32.mxu0 %v6834_v28 }
 0xc3c   :  { %13970 = vmatmul.mubr.f32.gmra.mxu0 %v6835_v33 }
 0xc3d   :  { %13972 = vmatprep.mubr.f32.mxu0 %v6836_v60 }
 0xc40   :  { %13973 = vmatmul.mubr.f32.gmra.mxu0 %v6837_v41 }
 0xc41   :  { %13975 = vmatprep.mubr.f32.mxu0 %v6838_v0 }
 0xc44   :  { %13976 = vmatmul.mubr.f32.gmra.mxu0 %v6839_v12 }
 0xc45   :  { %13978 = vmatprep.mubr.f32.mxu0 %v6840_v58 }
 0xc48   :  { %13979 = vmatmul.mubr.f32.gmra.mxu0 %v6841_v6 }
 0xc49   :  { %13981 = vmatprep.mubr.f32.mxu0 %v6842_v3 }
 0xc4c   :  { %13982 = vmatmul.mubr.f32.gmra.mxu0 %v6843_v38 }
 0xc4d   :  { %13984 = vmatprep.mubr.f32.mxu0 %v6844_v47 }
 0xc50   :  { %13985 = vmatmul.mubr.f32.gmra.mxu0 %v6845_v62 }
 0xc51   :  { %13987 = vmatprep.mubr.f32.mxu0 %v6846_v20 }
 0xc54   :  { %13988 = vmatmul.mubr.f32.gmra.mxu0 %v6847_v27 }
 0xc55   :  { %13990 = vmatprep.mubr.f32.mxu0 %v6848_v10 }
 0xc58   :  { %13991 = vmatmul.mubr.f32.gmra.mxu0 %v6849_v54 }
 0xc59   :  { %13993 = vmatprep.mubr.f32.mxu0 %v6850_v46 }
 0xc5c   :  { %13994 = vmatmul.mubr.f32.gmra.mxu0 %v6851_v53 }
 0xc5d   :  { %13996 = vmatprep.mubr.f32.mxu0 %v6852_v19 }
 0xc60   :  { %13997 = vmatmul.mubr.f32.gmra.mxu0 %v6853_v14 }
 0xc61   :  { %13999 = vmatprep.mubr.f32.mxu0 %v6854_v49 }
 0xc64   :  { %14000 = vmatmul.mubr.f32.gmra.mxu0 %v6855_v56 }
 0xc65   :  { %14002 = vmatprep.mubr.f32.mxu0 %v6856_v8 }
 0xc68   :  { %14003 = vmatmul.mubr.f32.gmra.mxu0 %v6857_v36 }
 0xc69   :  { %14005 = vmatprep.mubr.f32.mxu0 %v6858_v63  ;;  %v8141_v63 = vpop.permute.xlu0 %8140 }
 0xc6c   :  { %14006 = vmatmul.mubr.f32.gmra.mxu0 %v6859_v44  ;;  %v8281_v44 = vpop.permute.xlu1 %8280 }
 0xc6d   :  { %14008 = vmatprep.mubr.f32.mxu0 %v6860_v52 }
 0xc70   :  { %14009 = vmatmul.mubr.f32.gmra.mxu0 %v6861_v9 }
 0xc71   :  { %14011 = vmatprep.mubr.f32.mxu0 %v6862_v17 }
 0xc74   :  { %14012 = vmatmul.mubr.f32.gmra.mxu0 %v6863_v59 }
 0xc75   :  { %14014 = vmatprep.mubr.f32.mxu0 %v6864_v24 }
 0xc78   :  { %14015 = vmatmul.mubr.f32.gmra.mxu0 %v6865_v23 }
 0xc79   :  { %14017 = vmatprep.mubr.f32.mxu0 %v6866_v26 }
 0xc7c   :  { %14018 = vmatmul.mubr.f32.gmra.mxu0 %v6867_v37 }
 0xc7d   :  { %14020 = vmatprep.mubr.f32.mxu0 %v6868_v1 }
 0xc80   :  { %14021 = vmatmul.mubr.f32.gmra.mxu0 %v6869_v5 }
 0xc81   :  { %14023 = vmatprep.mubr.f32.mxu0 %v6870_v35 }
 0xc84   :  { %14024 = vmatmul.mubr.f32.gmra.mxu0 %v6871_v25 }
 0xc85   :  { %14026 = vmatprep.mubr.f32.mxu0 %v6872_v7 }
 0xc88   :  { %14027 = vmatmul.mubr.f32.gmra.mxu0 %v6873_v42 }
 0xc89   :  { %14029 = vmatprep.mubr.f32.mxu0 %v6874_v39 }
 0xc8c   :  { %14030 = vmatmul.mubr.f32.gmra.mxu0 %v6875_v55 }
 0xc8d   :  { %14032 = vmatprep.mubr.f32.mxu0 %v6876_v57 }
 0xc90   :  { %14033 = vmatmul.mubr.f32.gmra.mxu0 %v6877_v48 }
 0xc91   :  { %14035 = vmatprep.mubr.f32.mxu0 %v6878_v21 }
 0xc94   :  { %14036 = vmatmul.mubr.f32.gmra.mxu0 %v6879_v11 }
 0xc95   :  { %14038 = vmatprep.mubr.f32.mxu0 %v6880_v31 }
 0xc98   :  { %14039 = vmatmul.mubr.f32.gmra.mxu0 %v6881_v51 }
 0xc99   :  { %14041 = vmatprep.mubr.f32.mxu0 %v6882_v29 }
 0xc9c   :  { %14042 = vmatmul.mubr.f32.gmra.mxu0 %v6883_v61 }
 0xc9d   :  { %14044 = vmatprep.mubr.f32.mxu0 %v6884_v34 }
 0xca0   :  { %14045 = vmatmul.mubr.f32.gmra.mxu0 %v6885_v40 }
 0xca1   :  { %14047 = vmatprep.mubr.f32.mxu0 %v6886_v32 }
 0xca4   :  { %14048 = vmatmul.mubr.f32.gmra.mxu0 %v6887_v18 }
 0xca5   :  { %14050 = vmatprep.mubr.f32.mxu0 %v6888_v30 }
 0xca8   :  { %14051 = vmatmul.mubr.f32.gmra.mxu0 %v6889_v13 }
 0xcdc   :  { %v13947_v50 = vpop.f32.mrf.mxu0 }
 0xcde   :  { %v6956_v28 = vpop.f32.mrf.mxu0 }
 0xce0   :  { %v13950_v33 = vpop.f32.mrf.mxu0 }
 0xce2   :  { %v6966_v60 = vpop.f32.mrf.mxu0 }
 0xce4   :  { %v13953_v41 = vpop.f32.mrf.mxu0 }
 0xce6   :  { %v6976_v0 = vpop.f32.mrf.mxu0 }
 0xce8   :  { %v13956_v12 = vpop.f32.mrf.mxu0 }
 0xcea   :  { %v6986_v58 = vpop.f32.mrf.mxu0 }
 0xcec   :  { %v13959_v6 = vpop.f32.mrf.mxu0 }
 0xcee   :  { %v6996_v3 = vpop.f32.mrf.mxu0 }
 0xcef   :  { %14055 = vmatprep.mubr.msk.f32.mxu1 %vm7321_vm14, %v6996_v3 }
 0xcf0   :  { %v13962_v38 = vpop.f32.mrf.mxu0  ;;  %14056 = vmatmul.mubr.msk.f32.vlgmr.msra.gmra.mxu1 %vm7321_vm14, %v13959_v6 }
 0xcf1   :  { %14068 = vmatpush3.msra.mxu1 %v18130_v15 }
 0xcf2   :  { %v7006_v47 = vpop.f32.mrf.mxu0  ;;  %14081 = vmatprep.subr.mxu1 %v18474_v22 }
 0xcf3   :  { %14058 = vmatprep.mubr.msk.f32.mxu1 %vm7321_vm14, %v7006_v47 }
 0xcf4   :  { %v13965_v62 = vpop.f32.mrf.mxu0  ;;  %14059 = vmatmul.mubr.msk.f32.gmra.mxu1 %vm7321_vm14, %v13962_v38 }
 0xcf6   :  { %v7016_v20 = vpop.f32.mrf.mxu0 }
 0xcf7   :  { %14061 = vmatprep.mubr.msk.f32.mxu1 %vm7321_vm14, %v7016_v20 }
 0xcf8   :  { %v13968_v27 = vpop.f32.mrf.mxu0  ;;  %14062 = vmatmul.mubr.msk.f32.gmra.mxu1 %vm7321_vm14, %v13965_v62 }
 0xcfa   :  { %v7026_v10 = vpop.f32.mrf.mxu0 }
 0xcfb   :  { %14064 = vmatprep.mubr.msk.f32.mxu1 %vm7321_vm14, %v7026_v10 }
 0xcfc   :  { %v13971_v54 = vpop.f32.mrf.mxu0  ;;  %14065 = vmatmul.mubr.msk.f32.gmra.mxu1 %vm7321_vm14, %v13968_v27 }
 0xcfd   :  { %14069 = vmatprep.mubr.msk.f32.mxu1 %vm7321_vm14, %v6956_v28 }
 0xcfe   :  { %v7036_v15 = vpop.f32.mrf.mxu0 }
 0xd00   :  { %v13974_v46 = vpop.f32.mrf.mxu0  ;;  %14070 = vmatmul.mubr.msk.f32.vlgmr.msra.gmra.mxu1 %vm7321_vm14, %v13947_v50 }
 0xd01   :  { %14072 = vmatprep.mubr.msk.f32.mxu1 %vm7321_vm14, %v6966_v60  ;;  %14082 = vmatpush3.msra.mxu1 %v18474_v22 }
 0xd02   :  { %v7046_v53 = vpop.f32.mrf.mxu0  ;;  %14109 = vmatprep.subr.mxu1 %v18146_v43 }
 0xd04   :  { %v13977_v19 = vpop.f32.mrf.mxu0  ;;  %14073 = vmatmul.mubr.msk.f32.gmra.mxu1 %vm7321_vm14, %v13950_v33 }
 0xd05   :  { %14075 = vmatprep.mubr.msk.f32.mxu1 %vm7321_vm14, %v6976_v0 }
 0xd06   :  { %v7056_v14 = vpop.f32.mrf.mxu0 }
 0xd08   :  { %v13980_v49 = vpop.f32.mrf.mxu0  ;;  %14076 = vmatmul.mubr.msk.f32.gmra.mxu1 %vm7321_vm14, %v13953_v41 }
 0xd09   :  { %14078 = vmatprep.mubr.msk.f32.mxu1 %vm7321_vm14, %v6986_v58 }
 0xd0a   :  { %v7066_v56 = vpop.f32.mrf.mxu0 }
 0xd0c   :  { %v13983_v8 = vpop.f32.mrf.mxu0  ;;  %14079 = vmatmul.mubr.msk.f32.gmra.mxu1 %vm7321_vm14, %v13956_v12 }
 0xd0d   :  { %14083 = vmatprep.mubr.msk.f32.mxu1 %vm7321_vm14, %v7036_v15 }
 0xd0e   :  { %v7076_v22 = vpop.f32.mrf.mxu0 }
 0xd0f   :  { %14097 = vmatprep.mubr.msk.f32.mxu0 %vm7321_vm14, %v7076_v22  ;;  %v8623_v22 = vld [vmem:[%s20344_s19] sm:$0xff] }
 0xd10   :  { %v13986_v36 = vpop.f32.mrf.mxu0  ;;  %14084 = vmatmul.mubr.msk.f32.vlgmr.msra.gmra.mxu1 %vm7321_vm14, %v13971_v54  ;;  %14098 = vmatmul.mubr.msk.f32.vlgmr.msra.gmra.mxu0 %vm7321_vm14, %v13983_v8 }
 0xd11   :  { %14086 = vmatprep.mubr.msk.f32.mxu1 %vm7321_vm14, %v7046_v53  ;;  %14110 = vmatpush3.msra.mxu1 %v18146_v43 }
 0xd12   :  { %v7086_v52 = vpop.f32.mrf.mxu0  ;;  %14124 = vmatpush3.msra.mxu0 %v18485_v16  ;;  %14137 = vmatprep.subr.mxu1 %v8141_v63  ;;  %v8420_v16 = vld [vmem:[%s20340_s15 + $0x8] sm:$0xf] }
 0xd13   :  { %14100 = vmatprep.mubr.msk.f32.mxu0 %vm7321_vm14, %v7086_v52  ;;  %14151 = vmatprep.subr.mxu0 %v8281_v44  ;;  %v8421_v26 = vunpack.c.l.bf16 %v8420_v16 }
 0xd14   :  { %v13989_v9 = vpop.f32.mrf.mxu0  ;;  %14087 = vmatmul.mubr.msk.f32.gmra.mxu1 %vm7321_vm14, %v13974_v46  ;;  %14101 = vmatmul.mubr.msk.f32.gmra.mxu0 %vm7321_vm14, %v13986_v36 }
 0xd15   :  { %14089 = vmatprep.mubr.msk.f32.mxu1 %vm7321_vm14, %v7056_v14 }
 0xd16   :  { %v7096_v17 = vpop.f32.mrf.mxu0 }
 0xd17   :  { %14103 = vmatprep.mubr.msk.f32.mxu0 %vm7321_vm14, %v7096_v17 }
 0xd18   :  { %v13992_v59 = vpop.f32.mrf.mxu0  ;;  %14090 = vmatmul.mubr.msk.f32.gmra.mxu1 %vm7321_vm14, %v13977_v19  ;;  %14104 = vmatmul.mubr.msk.f32.gmra.mxu0 %vm7321_vm14, %v13989_v9 }
 0xd19   :  { %14092 = vmatprep.mubr.msk.f32.mxu1 %vm7321_vm14, %v7066_v56 }
 0xd1a   :  { %v7106_v43 = vpop.f32.mrf.mxu0 }
 0xd1b   :  { %14106 = vmatprep.mubr.msk.f32.mxu0 %vm7321_vm14, %v7106_v43 }
 0xd1c   :  { %v13995_v24 = vpop.f32.mrf.mxu0  ;;  %14093 = vmatmul.mubr.msk.f32.gmra.mxu1 %vm7321_vm14, %v13980_v49  ;;  %14107 = vmatmul.mubr.msk.f32.gmra.mxu0 %vm7321_vm14, %v13992_v59 }
 0xd1e   :  { %v7116_v23 = vpop.f32.mrf.mxu0 }
 0xd1f   :  { %14111 = vmatprep.mubr.msk.f32.mxu1 %vm7321_vm14, %v7116_v23 }
 0xd20   :  { %v13998_v37 = vpop.f32.mrf.mxu0  ;;  %14112 = vmatmul.mubr.msk.f32.vlgmr.msra.gmra.mxu1 %vm7321_vm14, %v13995_v24 }
 0xd21   :  { %14138 = vmatpush3.msra.mxu1 %v8141_v63 }
 0xd22   :  { %v7126_v1 = vpop.f32.mrf.mxu0  ;;  %14165 = vmatprep.subr.mxu1 %v8421_v26 }
 0xd23   :  { %14114 = vmatprep.mubr.msk.f32.mxu1 %vm7321_vm14, %v7126_v1 }
 0xd24   :  { %v14001_v5 = vpop.f32.mrf.mxu0  ;;  %14115 = vmatmul.mubr.msk.f32.gmra.mxu1 %vm7321_vm14, %v13998_v37 }
 0xd26   :  { %v7136_v35 = vpop.f32.mrf.mxu0 }
 0xd27   :  { %14117 = vmatprep.mubr.msk.f32.mxu1 %vm7321_vm14, %v7136_v35 }
 0xd28   :  { %v14004_v25 = vpop.f32.mrf.mxu0  ;;  %14118 = vmatmul.mubr.msk.f32.gmra.mxu1 %vm7321_vm14, %v14001_v5 }
 0xd2a   :  { %v7146_v7 = vpop.f32.mrf.mxu0 }
 0xd2b   :  { %14120 = vmatprep.mubr.msk.f32.mxu1 %vm7321_vm14, %v7146_v7 }
 0xd2c   :  { %v14007_v42 = vpop.f32.mrf.mxu0  ;;  %14121 = vmatmul.mubr.msk.f32.gmra.mxu1 %vm7321_vm14, %v14004_v25 }
 0xd2e   :  { %v7156_v39 = vpop.f32.mrf.mxu0 }
 0xd2f   :  { %14125 = vmatprep.mubr.msk.f32.mxu0 %vm7321_vm14, %v7156_v39 }
 0xd30   :  { %v14010_v55 = vpop.f32.mrf.mxu0  ;;  %14126 = vmatmul.mubr.msk.f32.vlgmr.msra.gmra.mxu0 %vm7321_vm14, %v14007_v42 }
 0xd31   :  { %14152 = vmatpush3.msra.mxu0 %v8281_v44 }
 0xd32   :  { %v7166_v57 = vpop.f32.mrf.mxu0 }
 0xd33   :  { %14128 = vmatprep.mubr.msk.f32.mxu0 %vm7321_vm14, %v7166_v57 }
 0xd34   :  { %v14013_v48 = vpop.f32.mrf.mxu0  ;;  %14129 = vmatmul.mubr.msk.f32.gmra.mxu0 %vm7321_vm14, %v14010_v55 }
 0xd36   :  { %v7176_v21 = vpop.f32.mrf.mxu0 }
 0xd37   :  { %14131 = vmatprep.mubr.msk.f32.mxu0 %vm7321_vm14, %v7176_v21 }
 0xd38   :  { %v14016_v11 = vpop.f32.mrf.mxu0  ;;  %14132 = vmatmul.mubr.msk.f32.gmra.mxu0 %vm7321_vm14, %v14013_v48 }
 0xd3a   :  { %v7186_v31 = vpop.f32.mrf.mxu0 }
 0xd3b   :  { %14134 = vmatprep.mubr.msk.f32.mxu0 %vm7321_vm14, %v7186_v31 }
 0xd3c   :  { %v14019_v51 = vpop.f32.mrf.mxu0  ;;  %14135 = vmatmul.mubr.msk.f32.gmra.mxu0 %vm7321_vm14, %v14016_v11 }
 0xd3e   :  { %v7196_v29 = vpop.f32.mrf.mxu0 }
 0xd3f   :  { %14139 = vmatprep.mubr.msk.f32.mxu1 %vm7321_vm14, %v7196_v29 }
 0xd40   :  { %v14022_v61 = vpop.f32.mrf.mxu0  ;;  %14140 = vmatmul.mubr.msk.f32.vlgmr.msra.gmra.mxu1 %vm7321_vm14, %v14019_v51 }
 0xd41   :  { %14166 = vmatpush3.msra.mxu1 %v8421_v26 }
 0xd42   :  { %v7206_v34 = vpop.f32.mrf.mxu0 }
 0xd43   :  { %14142 = vmatprep.mubr.msk.f32.mxu1 %vm7321_vm14, %v7206_v34 }
 0xd44   :  { %v14025_v40 = vpop.f32.mrf.mxu0  ;;  %14143 = vmatmul.mubr.msk.f32.gmra.mxu1 %vm7321_vm14, %v14022_v61 }
 0xd46   :  { %v7216_v32 = vpop.f32.mrf.mxu0 }
 0xd47   :  { %14145 = vmatprep.mubr.msk.f32.mxu1 %vm7321_vm14, %v7216_v32 }
 0xd48   :  { %v14028_v18 = vpop.f32.mrf.mxu0  ;;  %14146 = vmatmul.mubr.msk.f32.gmra.mxu1 %vm7321_vm14, %v14025_v40 }
 0xd4a   :  { %v7226_v30 = vpop.f32.mrf.mxu0 }
 0xd4b   :  { %14148 = vmatprep.mubr.msk.f32.mxu1 %vm7321_vm14, %v7226_v30 }
 0xd4c   :  { %v14031_v13 = vpop.f32.mrf.mxu0  ;;  %14149 = vmatmul.mubr.msk.f32.gmra.mxu1 %vm7321_vm14, %v14028_v18 }
 0xd4e   :  { %v7236_v50 = vpop.f32.mrf.mxu0 }
 0xd4f   :  { %14153 = vmatprep.mubr.msk.f32.mxu0 %vm7321_vm14, %v7236_v50 }
 0xd50   :  { %v14034_v28 = vpop.f32.mrf.mxu0  ;;  %14154 = vmatmul.mubr.msk.f32.vlgmr.msra.gmra.mxu0 %vm7321_vm14, %v14031_v13 }
 0xd52   :  { %v7246_v33 = vpop.f32.mrf.mxu0 }
 0xd53   :  { %14156 = vmatprep.mubr.msk.f32.mxu0 %vm7321_vm14, %v7246_v33 }
 0xd54   :  { %v14037_v60 = vpop.f32.mrf.mxu0  ;;  %14157 = vmatmul.mubr.msk.f32.gmra.mxu0 %vm7321_vm14, %v14034_v28 }
 0xd56   :  { %v7256_v41 = vpop.f32.mrf.mxu0 }
 0xd57   :  { %14159 = vmatprep.mubr.msk.f32.mxu0 %vm7321_vm14, %v7256_v41 }
 0xd58   :  { %v14040_v0 = vpop.f32.mrf.mxu0  ;;  %14160 = vmatmul.mubr.msk.f32.gmra.mxu0 %vm7321_vm14, %v14037_v60 }
 0xd5a   :  { %v7266_v12 = vpop.f32.mrf.mxu0 }
 0xd5b   :  { %14162 = vmatprep.mubr.msk.f32.mxu0 %vm7321_vm14, %v7266_v12 }
 0xd5c   :  { %v14043_v58 = vpop.f32.mrf.mxu0  ;;  %14163 = vmatmul.mubr.msk.f32.gmra.mxu0 %vm7321_vm14, %v14040_v0 }
 0xd5d   :  { %14195 = vmatprep.mubr.msk.f32.mxu0 %vm900_vm0, %v8623_v22 }
 0xd5e   :  { %v7276_v6 = vpop.f32.mrf.mxu0 }
 0xd5f   :  { %14167 = vmatprep.mubr.msk.f32.mxu1 %vm7321_vm14, %v7276_v6 }
 0xd60   :  { %v14046_v3 = vpop.f32.mrf.mxu0  ;;  %14168 = vmatmul.mubr.msk.f32.vlgmr.msra.gmra.mxu1 %vm7321_vm14, %v14043_v58 }
 0xd62   :  { %v7286_v38 = vpop.f32.mrf.mxu0 }
 0xd63   :  { %14170 = vmatprep.mubr.msk.f32.mxu1 %vm7321_vm14, %v7286_v38 }
 0xd64   :  { %v14049_v47 = vpop.f32.mrf.mxu0  ;;  %14171 = vmatmul.mubr.msk.f32.gmra.mxu1 %vm7321_vm14, %v14046_v3 }
 0xd66   :  { %v7296_v62 = vpop.f32.mrf.mxu0 }
 0xd67   :  { %14173 = vmatprep.mubr.msk.f32.mxu1 %vm7321_vm14, %v7296_v62 }
 0xd68   :  { %v14052_v20 = vpop.f32.mrf.mxu0  ;;  %14174 = vmatmul.mubr.msk.f32.gmra.mxu1 %vm7321_vm14, %v14049_v47 }
 0xd6a   :  { %v7306_v27 = vpop.f32.mrf.mxu0 }
 0xd6b   :  { %14176 = vmatprep.mubr.msk.f32.mxu1 %vm7321_vm14, %v7306_v27 }
 0xd6c   :  { %14177 = vmatmul.mubr.msk.f32.gmra.mxu1 %vm7321_vm14, %v14052_v20 }
 0xdb0   :  { %v14057_v10 = vpop.f32.mrf.mxu1 }
 0xdb2   :  { %v7412_v54 = vpop.f32.mrf.mxu1 }
 0xdb4   :  { %v14060_v15 = vpop.f32.mrf.mxu1 }
 0xdb6   :  { %v7422_v46 = vpop.f32.mrf.mxu1 }
 0xdb8   :  { %v14063_v53 = vpop.f32.mrf.mxu1 }
 0xdba   :  { %v18773_v19 = vpop.f32.mrf.mxu1 }
 0xdbc   :  { %v14066_v14 = vpop.f32.mrf.mxu1 }
 0xdbe   :  { %v18775_v49 = vpop.f32.mrf.mxu1 }
 0xdc0   :  { %v14071_v56 = vpop.f32.mrf.mxu1 }
 0xdc1   :  { %v18777_v8 = vadd.f32 %v14071_v56, %v14057_v10 }
 0xdc2   :  { %v7541_v36 = vpop.f32.mrf.mxu1 }
 0xdc3   :  { %v18783_v63 = vadd.f32 %v7541_v36, %v7412_v54 }
 0xdc4   :  { %v14074_v44 = vpop.f32.mrf.mxu1 }
 0xdc5   :  { %v7557_v52 = vadd.f32 %v14074_v44, %v14060_v15 }
 0xdc6   :  { %v7551_v9 = vpop.f32.mrf.mxu1 }
 0xdc7   :  { %v18785_v17 = vadd.f32 %v7551_v9, %v7422_v46 }
 0xdc8   :  { %v14077_v59 = vpop.f32.mrf.mxu1 }
 0xdc9   :  { %v7567_v46 = vadd.f32 %v14077_v59, %v14063_v53  ;;  %v8605_v59 = vpop.permute.xlu0 %8604 }
 0xdca   :  { %v7561_v43 = vpop.f32.mrf.mxu1 }
 0xdcb   :  { %v7562_v44 = vadd.f32 %v7561_v43, %v18773_v19 }
 0xdcc   :  { %v14080_v16 = vpop.f32.mrf.mxu1 }
 0xdcd   :  { %v7577_v56 = vadd.f32 %v14080_v16, %v14066_v14 }
 0xdce   :  { %v7571_v24 = vpop.f32.mrf.mxu1 }
 0xdcf   :  { %v7572_v9 = vadd.f32 %v7571_v24, %v18775_v49 }
 0xdd0   :  { %v18787_v23 = vpop.f32.mrf.mxu1  ;;  %v18791_v37 = vpop.f32.mrf.mxu0 }
 0xdd1   :  { %v7713_v24 = vadd.f32 %v18787_v23, %v18777_v8 }
 0xdd2   :  { %v18789_v26 = vpop.f32.mrf.mxu1  ;;  %v18793_v35 = vpop.f32.mrf.mxu0 }
 0xdd3   :  { %v7853_v8 = vadd.f32 %v18791_v37, %v7713_v24 }
 0xdd4   :  { %v14088_v1 = vpop.f32.mrf.mxu1  ;;  %v14102_v42 = vpop.f32.mrf.mxu0 }
 0xdd6   :  { %v7683_v5 = vpop.f32.mrf.mxu1  ;;  %v18795_v55 = vpop.f32.mrf.mxu0 }
 0xdd7   :  { %v7714_v53 = vadd.f32 %v7683_v5, %v18785_v17 }
 0xdd8   :  { %v14091_v25 = vpop.f32.mrf.mxu1  ;;  %v14105_v48 = vpop.f32.mrf.mxu0 }
 0xdd9   :  { %v7717_v2 = vadd.f32 %v14091_v25, %v7567_v46  ;;  %v7854_v17 = vadd.f32 %v18795_v55, %v7714_v53 }
 0xdda   :  { %v7693_v7 = vpop.f32.mrf.mxu1  ;;  %v7833_v11 = vpop.f32.mrf.mxu0 }
 0xddc   :  { %v14094_v39 = vpop.f32.mrf.mxu1  ;;  %v14108_v51 = vpop.f32.mrf.mxu0 }
 0xddd   :  { %v7719_v45 = vadd.f32 %v14094_v39, %v7577_v56 }
 0xdde   :  { %v7703_v57 = vpop.f32.mrf.mxu1  ;;  %v7843_v61 = vpop.f32.mrf.mxu0 }
 0xde0   :  { %v18797_v21 = vpop.f32.mrf.mxu1 }
 0xde1   :  { %v7992_v55 = vadd.f32 %v18797_v21, %v7853_v8 }
 0xde2   :  { %v18799_v31 = vpop.f32.mrf.mxu1 }
 0xde4   :  { %v14116_v29 = vpop.f32.mrf.mxu1 }
 0xde6   :  { %v18801_v34 = vpop.f32.mrf.mxu1 }
 0xde7   :  { %v7993_v23 = vadd.f32 %v18801_v34, %v7854_v17 }
 0xde8   :  { %v14119_v32 = vpop.f32.mrf.mxu1 }
 0xdea   :  { %v7972_v30 = vpop.f32.mrf.mxu1 }
 0xdec   :  { %v14122_v50 = vpop.f32.mrf.mxu1 }
 0xdee   :  { %v7982_v33 = vpop.f32.mrf.mxu1 }
 0xdf0   :  { %v18803_v40 = vpop.f32.mrf.mxu0 }
 0xdf2   :  { %v18805_v18 = vpop.f32.mrf.mxu0 }
 0xdf3   :  { %20687 = vst [vmem:[#allocation30_spill] sm:$0xff] %v18805_v18 }
 0xdf4   :  { %v14130_v13 = vpop.f32.mrf.mxu0 }
 0xdf6   :  { %v18807_v28 = vpop.f32.mrf.mxu0 }
 0xdf8   :  { %v14133_v60 = vpop.f32.mrf.mxu0 }
 0xdfa   :  { %v8113_v0 = vpop.f32.mrf.mxu0 }
 0xdfc   :  { %v14136_v58 = vpop.f32.mrf.mxu0 }
 0xdfe   :  { %v8123_v3 = vpop.f32.mrf.mxu0 }
 0xe00   :  { %v18809_v41 = vpop.f32.mrf.mxu1 }
 0xe01   :  { %20688 = vst [vmem:[#allocation13_spill] sm:$0xff] %v18809_v41 }
 0xe02   :  { %v18811_v12 = vpop.f32.mrf.mxu1 }
 0xe03   :  { %20689 = vst [vmem:[#allocation16_spill] sm:$0xff] %v18811_v12  ;;  %v7715_v12 = vadd.f32 %v14088_v1, %v7557_v52 }
 0xe04   :  { %v18813_v6 = vpop.f32.mrf.mxu1 }
 0xe05   :  { %v7855_v25 = vadd.f32 %v14102_v42, %v7715_v12 }
 0xe06   :  { %v18815_v38 = vpop.f32.mrf.mxu1 }
 0xe07   :  { %v7994_v5 = vadd.f32 %v14116_v29, %v7855_v25  ;;  %v8134_v29 = vadd.f32 %v18807_v28, %v7993_v23  ;;  %v8625_v23 = vld [vmem:[%s20344_s19 + $0x10] sm:$0xff] }
 0xe08   :  { %v14147_v62 = vpop.f32.mrf.mxu1 }
 0xe09   :  { %v8135_v42 = vadd.f32 %v14130_v13, %v7994_v5 }
 0xe0a   :  { %v8253_v27 = vpop.f32.mrf.mxu1 }
 0xe0c   :  { %v14150_v54 = vpop.f32.mrf.mxu1 }
 0xe0e   :  { %v8263_v22 = vpop.f32.mrf.mxu1 }
 0xe10   :  { %v18817_v47 = vpop.f32.mrf.mxu0 }
 0xe11   :  { %20690 = vst [vmem:[#allocation28_spill] sm:$0xff] %v18817_v47  ;;  %v7716_v47 = vadd.f32 %v7693_v7, %v7562_v44 }
 0xe12   :  { %v18819_v20 = vpop.f32.mrf.mxu0 }
 0xe13   :  { %20691 = vst [vmem:[#allocation15_spill] sm:$0xff] %v18819_v20  ;;  %v7718_v20 = vadd.f32 %v7703_v57, %v7572_v9  ;;  %v7856_v16 = vadd.f32 %v7833_v11, %v7716_v47 }
 0xe14   :  { %v18821_v10 = vpop.f32.mrf.mxu0 }
 0xe15   :  { %20692 = vst [vmem:[#allocation19_spill] sm:$0xff] %v18821_v10  ;;  %v7857_v10 = vadd.f32 %v14105_v48, %v7717_v2  ;;  %v7858_v19 = vadd.f32 %v7843_v61, %v7718_v20  ;;  %v7995_v52 = vadd.f32 %v7972_v30, %v7856_v16  ;;  %v8600_v2 = vpop.permute.xlu1 %8599 }
 0xe16   :  { %v18823_v15 = vpop.f32.mrf.mxu0 }
 0xe17   :  { %20693 = vst [vmem:[#allocation20_spill] sm:$0xff] %v18823_v15  ;;  %v7859_v15 = vadd.f32 %v14108_v51, %v7719_v45  ;;  %v7996_v43 = vadd.f32 %v14119_v32, %v7857_v10  ;;  %v7997_v1 = vadd.f32 %v7982_v33, %v7858_v19  ;;  %v7712_v45 = vadd.f32 %v18789_v26, %v18783_v63  ;;  %v8595_v63 = vpop.permute.xlu0 %8594 }
 0xe18   :  { %v14161_v36 = vpop.f32.mrf.mxu0  ;;  %v8136_v11 = vadd.f32 %v8113_v0, %v7995_v52  ;;  %v8275_v0 = vadd.f32 %v18813_v6, %v8135_v42  ;;  %v8274_v10 = vadd.f32 %v18815_v38, %v8134_v29  ;;  %v20699_v38 = vld [vmem:[#allocation28_spill] sm:$0xff]  ;;  %v8626_v42 = vld [vmem:[%s20344_s19 + $0x18] sm:$0xff] }
 0xe19   :  { %v7998_v49 = vadd.f32 %v14122_v50, %v7859_v15  ;;  %v8137_v57 = vadd.f32 %v14133_v60, %v7996_v43  ;;  %v8138_v51 = vadd.f32 %v8123_v3, %v7997_v1  ;;  %v7852_v26 = vadd.f32 %v18793_v35, %v7712_v45  ;;  %v8636_v29 = vld [vmem:[%s20344_s19 + $0x68] sm:$0xff] }
 0xe1a   :  { %v8393_v41 = vpop.f32.mrf.mxu0  ;;  %v8276_v33 = vadd.f32 %v8253_v27, %v8136_v11  ;;  %v8133_v27 = vadd.f32 %v18803_v40, %v7992_v55  ;;  %v20698_v40 = vld [vmem:[#allocation16_spill] sm:$0xff]  ;;  %v20700_v1 = vld [vmem:[#allocation15_spill] sm:$0xff] }
 0xe1b   :  { %v8139_v46 = vadd.f32 %v14136_v58, %v7998_v49  ;;  %v8277_v61 = vadd.f32 %v14147_v62, %v8137_v57  ;;  %v8278_v60 = vadd.f32 %v8263_v22, %v8138_v51  ;;  %v8590_v62 = vpop.permute.xlu1 %8589  ;;  %v7991_v20 = vadd.f32 %v18799_v31, %v7852_v26  ;;  %v20695_v22 = vld [vmem:[#allocation30_spill] sm:$0xff]  ;;  %v8585_v43 = vpop.permute.xlu0 %8584 }
 0xe1c   :  { %v14164_v7 = vpop.f32.mrf.mxu0  ;;  %v8416_v37 = vadd.f32 %v8393_v41, %v8276_v33  ;;  %v20694_v35 = vld [vmem:[#allocation19_spill] sm:$0xff]  ;;  %v8629_v33 = vld [vmem:[%s20344_s19 + $0x30] sm:$0xff]  ;;  %v8634_v26 = vld [vmem:[%s20344_s19 + $0x58] sm:$0xff] }
 0xe1d   :  { %v8279_v32 = vadd.f32 %v14150_v54, %v8139_v46  ;;  %v8417_v12 = vadd.f32 %v14161_v36, %v8277_v61  ;;  %v8415_v15 = vadd.f32 %v20694_v35, %v8275_v0  ;;  %v8132_v6 = vadd.f32 %v20695_v22, %v7991_v20  ;;  %v20696_v36 = vld [vmem:[#allocation13_spill] sm:$0xff]  ;;  %v8635_v55 = vld [vmem:[%s20344_s19 + $0x60] sm:$0xff]  ;;  %v8644_v20 = vld [vmem:[%s20344_s19 + $0xa8] sm:$0xff] }
 0xe1e   :  { %v8403_v30 = vpop.f32.mrf.mxu0  ;;  %v8273_v41 = vadd.f32 %v20696_v36, %v8133_v27  ;;  %v20697_v44 = vld [vmem:[#allocation20_spill] sm:$0xff]  ;;  %v8655_v36 = vld [vmem:[%s20344_s19 + $0x100] sm:$0xff] }
 0xe1f   :  { %v8419_v58 = vadd.f32 %v14164_v7, %v8279_v32  ;;  %v8418_v47 = vadd.f32 %v8403_v30, %v8278_v60  ;;  %v8414_v9 = vadd.f32 %v20697_v44, %v8274_v10  ;;  %v8272_v49 = vadd.f32 %v20698_v40, %v8132_v6  ;;  %v8627_v30 = vld [vmem:[%s20344_s19 + $0x20] sm:$0xff]  ;;  %v8630_v60 = vld [vmem:[%s20344_s19 + $0x38] sm:$0xff]  ;;  %v8637_v0 = vld [vmem:[%s20344_s19 + $0x70] sm:$0xff] }
 0xe20   :  { %v18827_v4 = vpop.f32.mrf.mxu1  ;;  %v8413_v24 = vadd.f32 %v20699_v38, %v8273_v41  ;;  %v8645_v27 = vld [vmem:[%s20344_s19 + $0xb0] sm:$0xff]  ;;  %v8646_v10 = vld [vmem:[%s20344_s19 + $0xb8] sm:$0xff]  ;;  %v8648_v35 = vld [vmem:[%s20344_s19 + $0xc8] sm:$0xff] }
 0xe21   :  { %v8412_v57 = vadd.f32 %v20700_v1, %v8272_v49  ;;  %v8653_v22 = vld [vmem:[%s20344_s19 + $0xf0] sm:$0xff]  ;;  %v8654_v6 = vld [vmem:[%s20344_s19 + $0xf8] sm:$0xff]  ;;  %v8656_v41 = vld [vmem:[%s20344_s19 + $0x108] sm:$0xff] }
 0xe22   :  { %v18829_v18 = vpop.f32.mrf.mxu1  ;;  %v8552_v46 = vadd.f32 %v18827_v4, %v8413_v24  ;;  %v8657_v44 = vld [vmem:[%s20344_s19 + $0x110] sm:$0xff]  ;;  %v19016_v49 = vld [vmem:[%s20343_s18 + $0x4] sm:$0xff]  }
 0xe23   :  { %v9024_v38 = vunpack.c.l.bf16 %v19016_v49  ;;  %v9015_v24 = vld [vmem:[%s20343_s18 + $0x68] sm:$0xff]  }
 0xe24   :  { %v14172_v14 = vpop.f32.mrf.mxu1  ;;  %v9014_v1 = vld [vmem:[%s20343_s18 + $0x44] sm:$0xff]  }
 0xe25   :  { %v8554_v53 = vadd.f32 %v14172_v14, %v8415_v15  ;;  %v8649_v15 = vld [vmem:[%s20344_s19 + $0xd0] sm:$0xff] }
 0xe26   :  { %v8522_v39 = vpop.f32.mrf.mxu1 }
 0xe27   :  { %v8553_v25 = vadd.f32 %v8522_v39, %v8414_v9  ;;  %v8610_v45 = vadd.f32 %v8585_v43, %v8554_v53  ;;  %v8658_v9 = vld [vmem:[%s20344_s19 + $0x118] sm:$0xff]  ;;  %v18997_v53 = vld [vmem:[%s20343_s18 + $0x70] sm:$0xff]   ;;  %v19010_v43 = vld [vmem:[%s20343_s18 + $0x28] sm:$0xff]  }
 0xe28   :  { %v14175_v48 = vpop.f32.mrf.mxu1  ;;  %v9025_v40 = vunpack.c.l.bf16 %v19010_v43 }
 0xe29   :  { %v8556_v34 = vadd.f32 %v14175_v48, %v8417_v12  ;;  %v8575_v48 = vpop.permute.xlu0 %8574  ;;  %v8618_v11 = vmax.f32 %v8610_v45, 0.0  ;;  %v8631_v12 = vld [vmem:[%s20344_s19 + $0x40] sm:$0xff] }
 0xe2a   :  { %v8532_v50 = vpop.f32.mrf.mxu1  ;;  %v8608_v39 = vadd.f32 %v8575_v48, %v8552_v46  ;;  %v19034_v46 = vld [vmem:[%s20343_s18 + $0x1c] sm:$0xff]  }
 0xe2b   :  { %v8555_v21 = vadd.f32 %v8532_v50, %v8416_v37  ;;  %v8612_v16 = vadd.f32 %v8595_v63, %v8556_v34  ;;  %v8628_v50 = vld [vmem:[%s20344_s19 + $0x28] sm:$0xff]  ;;  %v8633_v63 = vld [vmem:[%s20344_s19 + $0x50] sm:$0xff]  ;;  %v8639_v37 = vld [vmem:[%s20344_s19 + $0x80] sm:$0xff]  ;;  %v9880_v45 = vunpack.c.h.bf16 %v19034_v46 }
 0xe2c   :  { %v14178_v3 = vpop.f32.mrf.mxu1  ;;  %v8616_v4 = vmax.f32 %v8608_v39, 0.0  ;;  %v8641_v34 = vld [vmem:[%s20344_s19 + $0x90] sm:$0xff]  ;;  %v9013_v39 = vld [vmem:[%s20343_s18] ss:$36 sps:$4 sm:$0xff]  }
 0xe2d   :  { %v8558_v13 = vadd.f32 %v14178_v3, %v8419_v58  ;;  %v8611_v7 = vadd.f32 %v8590_v62, %v8555_v21  ;;  %v8620_v14 = vmax.f32 %v8612_v16, 0.0  ;;  %v8632_v58 = vld [vmem:[%s20344_s19 + $0x48] sm:$0xff]  ;;  %v8638_v3 = vld [vmem:[%s20344_s19 + $0x78] sm:$0xff]  ;;  %v8643_v62 = vld [vmem:[%s20344_s19 + $0xa0] sm:$0xff]  ;;  %v9027_v16 = vunpack.c.l.bf16 %v18997_v53 }
 0xe2e   :  { %v8542_v54 = vpop.f32.mrf.mxu1  ;;  %v8650_v21 = vld [vmem:[%s20344_s19 + $0xd8] sm:$0xff] }
 0xe2f   :  { %v8614_v56 = vadd.f32 %v8605_v59, %v8558_v13  ;;  %v8557_v28 = vadd.f32 %v8542_v54, %v8418_v47  ;;  %v8580_v59 = vpop.permute.xlu1 %8579  ;;  %v8619_v5 = vmax.f32 %v8611_v7, 0.0  ;;  %v8640_v47 = vld [vmem:[%s20344_s19 + $0x88] sm:$0xff]  ;;  %v8642_v13 = vld [vmem:[%s20344_s19 + $0x98] sm:$0xff]  ;;  %v8647_v54 = vld [vmem:[%s20344_s19 + $0xc0] sm:$0xff]  ;;  %14249 = vmatprep.subr.mxu1 %v9027_v16 }
 0xe30   :  { %v8609_v17 = vadd.f32 %v8580_v59, %v8553_v25  ;;  %14250 = vmatpush3.msra.mxu1 %v9027_v16  ;;  %v9019_v25 = vunpack.c.h.bf16 %v9015_v24  ;;  %v19025_v7 = vld [vmem:[%s20343_s18 + $0x88] sm:$0xff]   ;;  %v9882_v59 = vunpack.c.l.bf16 %v9015_v24 }
 0xe31   :  { %v8622_v19 = vmax.f32 %v8614_v56, 0.0  ;;  %v8613_v31 = vadd.f32 %v8600_v2, %v8557_v28  ;;  %v8551_v2 = vadd.f32 %v18829_v18, %v8412_v57  ;;  %v8624_v18 = vld [vmem:[%s20344_s19 + $0x8] sm:$0xff]  ;;  %v8651_v56 = vld [vmem:[%s20344_s19 + $0xe0] sm:$0xff]  ;;  %v9881_v57 = vunpack.c.l.bf16 %v9014_v1 }
 0xe32   :  { %v8617_v32 = vmax.f32 %v8609_v17, 0.0  ;;  %v8652_v28 = vld [vmem:[%s20344_s19 + $0xe8] sm:$0xff] }
 0xe33   :  { %v8621_v52 = vmax.f32 %v8613_v31, 0.0  ;;  %14179 = vmatprep.subr.mxu0 %v8622_v19  ;;  %v8570_v51 = vpop.permute.xlu1 %8569 }
 0xe34   :  { %14180 = vmatpush3.msra.mxu0 %v8622_v19  ;;  %v8607_v61 = vadd.f32 %v8570_v51, %v8551_v2  ;;  %v19003_v19 = vld [vmem:[%s20343_s18 + $0x4c] sm:$0xff]   ;;  %v9018_v51 = vunpack.c.h.bf16 %v9014_v1 }
 0xe35   :  { %14181 = vmatprep.subr.mxu0 %v8621_v52  ;;  %v9026_v31 = vunpack.c.l.bf16 %v19003_v19 }
 0xe36   :  { %14182 = vmatpush3.msra.mxu0 %v8621_v52  ;;  %v8615_v8 = vmax.f32 %v8607_v61, 0.0  ;;  %v9883_v52 = vunpack.c.h.bf16 %v19025_v7 }
 0xe37   :  { %14183 = vmatprep.subr.mxu0 %v8620_v14  ;;  %14251 = vmatprep.subr.mxu1 %v9026_v31 }
 0xe38   :  { %14184 = vmatpush3.msra.mxu0 %v8620_v14  ;;  %14252 = vmatpush3.msra.mxu1 %v9026_v31 }
 0xe39   :  { %14185 = vmatprep.subr.mxu0 %v8619_v5  ;;  %14253 = vmatprep.subr.mxu1 %v9025_v40 }
 0xe3a   :  { %14186 = vmatpush3.msra.mxu0 %v8619_v5  ;;  %14254 = vmatpush3.msra.mxu1 %v9025_v40 }
 0xe3b   :  { %14187 = vmatprep.subr.mxu0 %v8618_v11  ;;  %14255 = vmatprep.subr.mxu1 %v9024_v38 }
 0xe3c   :  { %14188 = vmatpush3.msra.mxu0 %v8618_v11  ;;  %14256 = vmatpush3.msra.mxu1 %v9024_v38 }
 0xe3d   :  { %14189 = vmatprep.subr.mxu0 %v8617_v32  ;;  %14263 = vmatprep.subr.mxu1 %v9019_v25 }
 0xe3e   :  { %14190 = vmatpush3.msra.mxu0 %v8617_v32  ;;  %v9017_v32 = vunpack.c.h.bf16 %v9013_v39 }
 0xe3f   :  { %14191 = vmatprep.subr.mxu0 %v8616_v4 }
 0xe40   :  { %14192 = vmatpush3.msra.mxu0 %v8616_v4 }
 0xe41   :  { %14193 = vmatprep.subr.mxu0 %v8615_v8 }
 0xe42   :  { %14194 = vmatpush3.msra.mxu0 %v8615_v8  ;;  %v9016_v8 = vunpack.c.l.bf16 %v9013_v39 }
 0xe43   :  { %14196 = vmatmul.mubr.msk.f32.vlgmr.msra.gmra.mxu0 %vm900_vm0, %v8624_v18  ;;  %14361 = vmatprep.subr.mxu0 %v9883_v52 }
 0xe44   :  { %14198 = vmatprep.mubr.msk.f32.mxu0 %vm900_vm0, %v8625_v23  ;;  %14362 = vmatpush3.msra.mxu0 %v9883_v52  ;;  %v9229_v23 = vunpack.c.h.bf16 %v18997_v53  ;;  %v9549_v53 = vld [vmem:[%s20343_s18 + $0x14] sm:$0xff]  }
 0xe45   :  { %14363 = vmatprep.subr.mxu0 %v9882_v59  ;;  %v9662_v1 = vunpack.c.h.bf16 %v9549_v53 }
 0xe46   :  { %14364 = vmatpush3.msra.mxu0 %v9882_v59 }
 0xe47   :  { %14199 = vmatmul.mubr.msk.f32.gmra.mxu0 %vm900_vm0, %v8626_v42  ;;  %14365 = vmatprep.subr.mxu0 %v9881_v57 }
 0xe48   :  { %14201 = vmatprep.mubr.msk.f32.mxu0 %vm900_vm0, %v8627_v30  ;;  %14366 = vmatpush3.msra.mxu0 %v9881_v57  ;;  %v9228_v30 = vunpack.c.h.bf16 %v19003_v19  ;;  %v9769_v57 = vld [vmem:[%s20343_s18 + $0x40] ss:$36 sps:$4 sm:$0xff]  }
 0xe49   :  { %14367 = vmatprep.subr.mxu0 %v9880_v45 }
 0xe4a   :  { %14368 = vmatpush3.msra.mxu0 %v9880_v45 }
 0xe4b   :  { %14202 = vmatmul.mubr.msk.f32.gmra.mxu0 %vm900_vm0, %v8628_v50 }
 0xe4c   :  { %14204 = vmatprep.mubr.msk.f32.mxu0 %vm900_vm0, %v8629_v33  ;;  %v9227_v33 = vunpack.c.h.bf16 %v19010_v43  ;;  %v9553_v43 = vunpack.c.l.bf16 %v9549_v53 }
 0xe4f   :  { %14205 = vmatmul.mubr.msk.f32.gmra.mxu0 %vm900_vm0, %v8630_v60  ;;  %v9334_v60 = vld [vmem:[%s20343_s18 + $0x78] sm:$0xff]  }
 0xe50   :  { %14207 = vmatprep.mubr.msk.f32.mxu0 %vm900_vm0, %v8631_v12 }
 0xe53   :  { %14208 = vmatmul.mubr.msk.f32.gmra.mxu0 %vm900_vm0, %v8632_v58  ;;  %v9226_v58 = vunpack.c.h.bf16 %v19016_v49 }
 0xe54   :  { %14210 = vmatprep.mubr.msk.f32.mxu0 %vm900_vm0, %v8633_v63  ;;  %v9333_v63 = vld [vmem:[%s20343_s18 + $0x54] sm:$0xff]  }
 0xe57   :  { %14211 = vmatmul.mubr.msk.f32.gmra.mxu0 %vm900_vm0, %v8634_v26 }
 0xe58   :  { %14213 = vmatprep.mubr.msk.f32.mxu0 %vm900_vm0, %v8635_v55  ;;  %v9338_v55 = vunpack.c.l.bf16 %v9334_v60 }
 0xe5b   :  { %14214 = vmatmul.mubr.msk.f32.gmra.mxu0 %vm900_vm0, %v8636_v29  ;;  %v9332_v29 = vld [vmem:[%s20343_s18 + $0x30] sm:$0xff]  }
 0xe5c   :  { %14216 = vmatprep.mubr.msk.f32.mxu0 %vm900_vm0, %v8637_v0 }
 0xe5f   :  { %14217 = vmatmul.mubr.msk.f32.gmra.mxu0 %vm900_vm0, %v8638_v3  ;;  %v9337_v3 = vunpack.c.l.bf16 %v9333_v63 }
 0xe60   :  { %14219 = vmatprep.mubr.msk.f32.mxu0 %vm900_vm0, %v8639_v37  ;;  %v9331_v37 = vld [vmem:[%s20343_s18 + $0xc] sm:$0xff]  }
 0xe63   :  { %14220 = vmatmul.mubr.msk.f32.gmra.mxu0 %vm900_vm0, %v8640_v47 }
 0xe64   :  { %14222 = vmatprep.mubr.msk.f32.mxu0 %vm900_vm0, %v8641_v34  ;;  %v9336_v34 = vunpack.c.l.bf16 %v9332_v29 }
 0xe67   :  { %14223 = vmatmul.mubr.msk.f32.gmra.mxu0 %vm900_vm0, %v8642_v13 }
 0xe68   :  { %14225 = vmatprep.mubr.msk.f32.mxu0 %vm900_vm0, %v8643_v62  ;;  %v9335_v62 = vunpack.c.l.bf16 %v9331_v37 }
 0xe6b   :  { %14226 = vmatmul.mubr.msk.f32.gmra.mxu0 %vm900_vm0, %v8644_v20 }
 0xe6c   :  { %14228 = vmatprep.mubr.msk.f32.mxu0 %vm900_vm0, %v8645_v27  ;;  %v9447_v27 = vunpack.c.h.bf16 %v9334_v60 }
 0xe6f   :  { %14229 = vmatmul.mubr.msk.f32.gmra.mxu0 %vm900_vm0, %v8646_v10 }
 0xe70   :  { %14231 = vmatprep.mubr.msk.f32.mxu0 %vm900_vm0, %v8647_v54  ;;  %v9446_v54 = vunpack.c.h.bf16 %v9333_v63 }
 0xe73   :  { %14232 = vmatmul.mubr.msk.f32.gmra.mxu0 %vm900_vm0, %v8648_v35 }
 0xe74   :  { %14234 = vmatprep.mubr.msk.f32.mxu0 %vm900_vm0, %v8649_v15  ;;  %v9445_v15 = vunpack.c.h.bf16 %v9332_v29 }
 0xe77   :  { %14235 = vmatmul.mubr.msk.f32.gmra.mxu0 %vm900_vm0, %v8650_v21  ;;  %v9552_v21 = vld [vmem:[%s20343_s18 + $0x80] sm:$0xff]  }
 0xe78   :  { %14237 = vmatprep.mubr.msk.f32.mxu0 %vm900_vm0, %v8651_v56  ;;  %v9665_v49 = vunpack.c.h.bf16 %v9552_v21 }
 0xe7b   :  { %14238 = vmatmul.mubr.msk.f32.gmra.mxu0 %vm900_vm0, %v8652_v28  ;;  %v9444_v28 = vunpack.c.h.bf16 %v9331_v37 }
 0xe7c   :  { %14240 = vmatprep.mubr.msk.f32.mxu0 %vm900_vm0, %v8653_v22  ;;  %v9551_v22 = vld [vmem:[%s20343_s18 + $0x5c] sm:$0xff]  }
 0xe7d   :  { %v9664_v24 = vunpack.c.h.bf16 %v9551_v22 }
 0xe7f   :  { %14241 = vmatmul.mubr.msk.f32.gmra.mxu0 %vm900_vm0, %v8654_v6 }
 0xe80   :  { %14243 = vmatprep.mubr.msk.f32.mxu0 %vm900_vm0, %v8655_v36  ;;  %v9556_v36 = vunpack.c.l.bf16 %v9552_v21 }
 0xe83   :  { %14244 = vmatmul.mubr.msk.f32.gmra.mxu0 %vm900_vm0, %v8656_v41  ;;  %v9550_v41 = vld [vmem:[%s20343_s18 + $0x38] sm:$0xff]  }
 0xe84   :  { %14246 = vmatprep.mubr.msk.f32.mxu0 %vm900_vm0, %v8657_v44  ;;  %v9554_v19 = vunpack.c.l.bf16 %v9550_v41  ;;  %v9663_v52 = vunpack.c.h.bf16 %v9550_v41 }
 0xe87   :  { %14247 = vmatmul.mubr.msk.f32.gmra.mxu0 %vm900_vm0, %v8658_v9  ;;  %v9555_v9 = vunpack.c.l.bf16 %v9551_v22 }
 0xf03   :  { %v14197_v14 = vpop.f32.mrf.mxu0 }
 0xf05   :  { %v8833_v2 = vpop.f32.mrf.mxu0 }
 0xf07   :  { %v14200_v17 = vpop.f32.mrf.mxu0 }
 0xf09   :  { %v8843_v5 = vpop.f32.mrf.mxu0 }
 0xf0b   :  { %v14203_v48 = vpop.f32.mrf.mxu0 }
 0xf0d   :  { %v8853_v11 = vpop.f32.mrf.mxu0 }
 0xf0e   :  { %14257 = vmatprep.mubr.msk.f32.mxu1 %vm1544_vm2, %v8853_v11  ;;  %v9771_v11 = vunpack.c.l.bf16 %v19034_v46 }
 0xf0f   :  { %v14206_v61 = vpop.f32.mrf.mxu0  ;;  %14258 = vmatmul.mubr.msk.f32.vlgmr.msra.gmra.mxu1 %vm1544_vm2, %v14203_v48  ;;  %v9772_v48 = vunpack.c.l.bf16 %v9769_v57 }
 0xf10   :  { %14264 = vmatpush3.msra.mxu1 %v9019_v25 }
 0xf11   :  { %v8863_v4 = vpop.f32.mrf.mxu0  ;;  %14265 = vmatprep.subr.mxu1 %v9018_v51 }
 0xf12   :  { %14260 = vmatprep.mubr.msk.f32.mxu1 %vm1544_vm2, %v8863_v4  ;;  %14266 = vmatpush3.msra.mxu1 %v9018_v51  ;;  %v10017_v4 = vld [vmem:[%s20347_s22] sm:$0xff] }
 0xf13   :  { %14261 = vmatmul.mubr.msk.f32.gmra.mxu1 %vm1544_vm2, %v14206_v61  ;;  %14267 = vmatprep.subr.mxu1 %v9017_v32  ;;  %v14209_v18 = vpop.f32.mrf.mxu0 }
 0xf14   :  { %14268 = vmatpush3.msra.mxu1 %v9017_v32  ;;  %14271 = vmatprep.mubr.msk.f32.mxu1 %vm1544_vm2, %v8833_v2  ;;  %v20701_v32 = vmov 0.0  }
 0xf15   :  { %14269 = vmatprep.subr.mxu1 %v9016_v8  ;;  %v8873_v42 = vpop.f32.mrf.mxu0 }
 0xf16   :  { %14270 = vmatpush3.msra.mxu1 %v9016_v8  ;;  %v19117_v8 = vld [vmem:[%s20346_s21 + $0x200] sm:$0xff] }
 0xf17   :  { %14272 = vmatmul.mubr.msk.f32.vlgmr.msra.gmra.mxu1 %vm1544_vm2, %v14197_v14  ;;  %14277 = vmatprep.subr.mxu1 %v9229_v23  ;;  %v14212_v50 = vpop.f32.mrf.mxu0  ;;  %v9774_v14 = vunpack.c.l.bf16 %v19025_v7 }
 0xf18   :  { %14274 = vmatprep.mubr.msk.f32.mxu1 %vm1544_vm2, %v8843_v5  ;;  %14278 = vmatpush3.msra.mxu1 %v9229_v23  ;;  %v20482_v23 = vunpack.c.h.bf16 %v19117_v8 }
 0xf19   :  { %14279 = vmatprep.subr.mxu1 %v9228_v30  ;;  %v8883_v12 = vpop.f32.mrf.mxu0 }
 0xf1a   :  { %14280 = vmatpush3.msra.mxu1 %v9228_v30  ;;  %10169 = vmatprep.subr.mxu0 %v20482_v23 }
 0xf1b   :  { %14275 = vmatmul.mubr.msk.f32.gmra.mxu1 %vm1544_vm2, %v14200_v17  ;;  %14281 = vmatprep.subr.mxu1 %v9227_v33  ;;  %v14215_v26 = vpop.f32.mrf.mxu0  ;;  %v9773_v17 = vunpack.c.h.bf16 %v9769_v57 }
 0xf1c   :  { %14282 = vmatpush3.msra.mxu1 %v9227_v33  ;;  %14285 = vmatprep.mubr.msk.f32.mxu1 %vm1544_vm2, %v8873_v42  ;;  %v19124_v42 = vld [vmem:[%s20346_s21 + $0x1b8] sm:$0xff]  ;;  %v19135_v33 = vld [vmem:[%s20346_s21 + $0x170] sm:$0xff] }
 0xf1d   :  { %14283 = vmatprep.subr.mxu1 %v9226_v58  ;;  %v8893_v0 = vpop.f32.mrf.mxu0  ;;  %v20476_v30 = vunpack.c.l.bf16 %v19124_v42  ;;  %v20470_v60 = vunpack.c.l.bf16 %v19135_v33 }
 0xf1e   :  { %14284 = vmatpush3.msra.mxu1 %v9226_v58  ;;  %v19146_v58 = vld [vmem:[%s20346_s21 + $0x128] sm:$0xff] }
 0xf1f   :  { %14286 = vmatmul.mubr.msk.f32.vlgmr.msra.gmra.mxu1 %vm1544_vm2, %v14209_v18  ;;  %14291 = vmatprep.subr.mxu1 %v9338_v55  ;;  %v14218_v47 = vpop.f32.mrf.mxu0  ;;  %v20481_v18 = vunpack.c.l.bf16 %v19117_v8  ;;  %v20466_v63 = vunpack.c.l.bf16 %v19146_v58 }
 0xf20   :  { %14292 = vmatpush3.msra.mxu1 %v9338_v55  ;;  %14288 = vmatprep.mubr.msk.f32.mxu1 %vm1544_vm2, %v8883_v12  ;;  %v20475_v12 = vunpack.c.h.bf16 %v19135_v33  ;;  %v19157_v55 = vld [vmem:[%s20346_s21 + $0xe0] sm:$0xff] }
 0xf21   :  { %14293 = vmatprep.subr.mxu1 %v9337_v3  ;;  %v8903_v13 = vpop.f32.mrf.mxu0  ;;  %v20460_v29 = vunpack.c.l.bf16 %v19157_v55 }
 0xf22   :  { %14294 = vmatpush3.msra.mxu1 %v9337_v3  ;;  %v19168_v3 = vld [vmem:[%s20346_s21 + $0x98] sm:$0xff] }
 0xf23   :  { %14289 = vmatmul.mubr.msk.f32.gmra.mxu1 %vm1544_vm2, %v14212_v50  ;;  %14295 = vmatprep.subr.mxu1 %v9336_v34  ;;  %v14221_v20 = vpop.f32.mrf.mxu0  ;;  %v20480_v50 = vunpack.c.h.bf16 %v19124_v42  ;;  %v20457_v37 = vunpack.c.l.bf16 %v19168_v3 }
 0xf24   :  { %14296 = vmatpush3.msra.mxu1 %v9336_v34  ;;  %14299 = vmatprep.mubr.msk.f32.mxu1 %vm1544_vm2, %v8893_v0  ;;  %v20465_v0 = vunpack.c.h.bf16 %v19157_v55 }
 0xf25   :  { %14297 = vmatprep.subr.mxu1 %v9335_v62  ;;  %v8913_v10 = vpop.f32.mrf.mxu0 }
 0xf26   :  { %14298 = vmatpush3.msra.mxu1 %v9335_v62 }
 0xf27   :  { %14300 = vmatmul.mubr.msk.f32.vlgmr.msra.gmra.mxu1 %vm1544_vm2, %v14215_v26  ;;  %14305 = vmatprep.subr.mxu1 %v9447_v27  ;;  %v14224_v35 = vpop.f32.mrf.mxu0  ;;  %v20469_v26 = vunpack.c.h.bf16 %v19146_v58 }
 0xf28   :  { %14306 = vmatpush3.msra.mxu1 %v9447_v27  ;;  %14302 = vmatprep.mubr.msk.f32.mxu1 %vm1544_vm2, %v8903_v13 }
 0xf29   :  { %14307 = vmatprep.subr.mxu1 %v9446_v54  ;;  %v8923_v56 = vpop.f32.mrf.mxu0 }
 0xf2a   :  { %14308 = vmatpush3.msra.mxu1 %v9446_v54 }
 0xf2b   :  { %14303 = vmatmul.mubr.msk.f32.gmra.mxu1 %vm1544_vm2, %v14218_v47  ;;  %14309 = vmatprep.subr.mxu1 %v9445_v15  ;;  %v14227_v6 = vpop.f32.mrf.mxu0  ;;  %v20459_v47 = vunpack.c.h.bf16 %v19168_v3 }
 0xf2c   :  { %14310 = vmatpush3.msra.mxu1 %v9445_v15  ;;  %14313 = vmatprep.mubr.msk.f32.mxu1 %vm1544_vm2, %v8913_v10 }
 0xf2d   :  { %14311 = vmatprep.subr.mxu1 %v9444_v28  ;;  %v8933_v44 = vpop.f32.mrf.mxu0 }
 0xf2e   :  { %14312 = vmatpush3.msra.mxu1 %v9444_v28 }
 0xf2f   :  { %14314 = vmatmul.mubr.msk.f32.vlgmr.msra.gmra.mxu1 %vm1544_vm2, %v14221_v20  ;;  %14319 = vmatprep.subr.mxu1 %v9556_v36  ;;  %v14230_v16 = vpop.f32.mrf.mxu0 }
 0xf30   :  { %14320 = vmatpush3.msra.mxu1 %v9556_v36  ;;  %14316 = vmatprep.mubr.msk.f32.mxu1 %vm1544_vm2, %v8923_v56 }
 0xf31   :  { %14321 = vmatprep.subr.mxu1 %v9555_v9  ;;  %v8943_v31 = vpop.f32.mrf.mxu0 }
 0xf32   :  { %14322 = vmatpush3.msra.mxu1 %v9555_v9 }
 0xf33   :  { %14317 = vmatmul.mubr.msk.f32.gmra.mxu1 %vm1544_vm2, %v14224_v35  ;;  %14323 = vmatprep.subr.mxu1 %v9554_v19  ;;  %v14233_v40 = vpop.f32.mrf.mxu0 }
 0xf34   :  { %14324 = vmatpush3.msra.mxu1 %v9554_v19  ;;  %14327 = vmatprep.mubr.msk.f32.mxu1 %vm1544_vm2, %v8933_v44 }
 0xf35   :  { %14325 = vmatprep.subr.mxu1 %v9553_v43  ;;  %v8953_v38 = vpop.f32.mrf.mxu0 }
 0xf36   :  { %14326 = vmatpush3.msra.mxu1 %v9553_v43 }
 0xf37   :  { %14328 = vmatmul.mubr.msk.f32.vlgmr.msra.gmra.mxu1 %vm1544_vm2, %v14227_v6  ;;  %14333 = vmatprep.subr.mxu1 %v9665_v49  ;;  %v14236_v25 = vpop.f32.mrf.mxu0 }
 0xf38   :  { %14334 = vmatpush3.msra.mxu1 %v9665_v49  ;;  %14330 = vmatprep.mubr.msk.f32.mxu1 %vm1544_vm2, %v8943_v31 }
 0xf39   :  { %14335 = vmatprep.subr.mxu1 %v9664_v24  ;;  %v8963_v59 = vpop.f32.mrf.mxu0 }
 0xf3a   :  { %14336 = vmatpush3.msra.mxu1 %v9664_v24 }
 0xf3b   :  { %14331 = vmatmul.mubr.msk.f32.gmra.mxu1 %vm1544_vm2, %v14230_v16  ;;  %14337 = vmatprep.subr.mxu1 %v9663_v52  ;;  %v14239_v45 = vpop.f32.mrf.mxu0 }
 0xf3c   :  { %14338 = vmatpush3.msra.mxu1 %v9663_v52  ;;  %14341 = vmatprep.mubr.msk.f32.mxu1 %vm1544_vm2, %v8953_v38 }
 0xf3d   :  { %14339 = vmatprep.subr.mxu1 %v9662_v1  ;;  %v8973_v2 = vpop.f32.mrf.mxu0 }
 0xf3e   :  { %14340 = vmatpush3.msra.mxu1 %v9662_v1 }
 0xf3f   :  { %14342 = vmatmul.mubr.msk.f32.vlgmr.msra.gmra.mxu1 %vm1544_vm2, %v14233_v40  ;;  %14347 = vmatprep.subr.mxu1 %v9774_v14  ;;  %v14242_v5 = vpop.f32.mrf.mxu0 }
 0xf40   :  { %14348 = vmatpush3.msra.mxu1 %v9774_v14  ;;  %14344 = vmatprep.mubr.msk.f32.mxu1 %vm1544_vm2, %v8963_v59 }
 0xf41   :  { %14349 = vmatprep.subr.mxu1 %v9773_v17  ;;  %v8983_v39 = vpop.f32.mrf.mxu0 }
 0xf42   :  { %14350 = vmatpush3.msra.mxu1 %v9773_v17 }
 0xf43   :  { %14345 = vmatmul.mubr.msk.f32.gmra.mxu1 %vm1544_vm2, %v14236_v25  ;;  %14351 = vmatprep.subr.mxu1 %v9772_v48  ;;  %v14245_v7 = vpop.f32.mrf.mxu0 }
 0xf44   :  { %14352 = vmatpush3.msra.mxu1 %v9772_v48  ;;  %14355 = vmatprep.mubr.msk.f32.mxu1 %vm1544_vm2, %v8973_v2 }
 0xf45   :  { %14353 = vmatprep.subr.mxu1 %v9771_v11  ;;  %v8993_v51 = vpop.f32.mrf.mxu0 }
 0xf46   :  { %14354 = vmatpush3.msra.mxu1 %v9771_v11  ;;  %14369 = vmatprep.mubr.msk.f32.mxu0 %vm1544_vm2, %v8993_v51 }
 0xf47   :  { %14356 = vmatmul.mubr.msk.f32.vlgmr.msra.gmra.mxu1 %vm1544_vm2, %v14239_v45  ;;  %v14248_v61 = vpop.f32.mrf.mxu0  ;;  %14370 = vmatmul.mubr.msk.f32.vlgmr.msra.gmra.mxu0 %vm1544_vm2, %v14245_v7 }
 0xf48   :  { %14358 = vmatprep.mubr.msk.f32.mxu1 %vm1544_vm2, %v8983_v39  ;;  %10170 = vmatpush1.msra.mxu0 %v20481_v18 }
 0xf49   :  { %v9003_v46 = vpop.f32.mrf.mxu0  ;;  %10171 = vmatprep.subr.mxu0 %v20480_v50 }
 0xf4a   :  { %14372 = vmatprep.mubr.msk.f32.mxu0 %vm1544_vm2, %v9003_v46  ;;  %10172 = vmatpush1.msra.mxu0 %v20476_v30 }
 0xf4b   :  { %14359 = vmatmul.mubr.msk.f32.gmra.mxu1 %vm1544_vm2, %v14242_v5  ;;  %14373 = vmatmul.mubr.msk.f32.gmra.mxu0 %vm1544_vm2, %v14248_v61 }
 0xf4c   :  { %10217 = vmatprep.mubr.f32.mxu0 %v20701_v32  ;;  %14383 = vmatprep.mubr.msk.f32.mxu1 %vm1544_vm2, %v10017_v4 }
 0xf4d   :  { %10173 = vmatprep.subr.mxu0 %v20475_v12 }
 0xf4e   :  { %10174 = vmatpush1.msra.mxu0 %v20470_v60  ;;  %v19594_v60 = vld [vmem:[%s20346_s21 + $0xf8] sm:$0xff] }
 0xf4f   :  { %10175 = vmatprep.subr.mxu0 %v20469_v26  ;;  %v20496_v18 = vunpack.c.l.bf16 %v19594_v60 }
 0xf50   :  { %10176 = vmatpush1.msra.mxu0 %v20466_v63  ;;  %v19573_v63 = vld [vmem:[%s20346_s21 + $0x140] sm:$0xff] }
 0xf51   :  { %10177 = vmatprep.subr.mxu0 %v20465_v0  ;;  %v20489_v12 = vunpack.c.l.bf16 %v19573_v63 }
 0xf52   :  { %10178 = vmatpush1.msra.mxu0 %v20460_v29  ;;  %v19546_v29 = vld [vmem:[%s20346_s21 + $0x188] sm:$0xff] }
 0xf53   :  { %10179 = vmatprep.subr.mxu0 %v20459_v47  ;;  %v20479_v0 = vunpack.c.h.bf16 %v19546_v29 }
 0xf54   :  { %10180 = vmatpush1.msra.mxu0 %v20457_v37  ;;  %v19532_v37 = vld [vmem:[%s20346_s21 + $0x190] sm:$0xff] }
 0xfcf   :  { %v14259_v34 = vpop.f32.mrf.mxu1 }
 0xfd1   :  { %v9106_v13 = vpop.f32.mrf.mxu1 }
 0xfd3   :  { %v14262_v62 = vpop.f32.mrf.mxu1 }
 0xfd5   :  { %v9116_v20 = vpop.f32.mrf.mxu1 }
 0xfd7   :  { %v14273_v27 = vpop.f32.mrf.mxu1 }
 0xfd8   :  { %v9209_v49 = vadd.f32 %v14273_v27, %v14259_v34 }
 0xfd9   :  { %v9203_v10 = vpop.f32.mrf.mxu1 }
 0xfda   :  { %v9204_v24 = vadd.f32 %v9203_v10, %v9106_v13 }
 0xfdb   :  { %v14276_v54 = vpop.f32.mrf.mxu1 }
 0xfdc   :  { %v9219_v25 = vadd.f32 %v14276_v54, %v14262_v62 }
 0xfdd   :  { %v9213_v35 = vpop.f32.mrf.mxu1 }
 0xfde   :  { %v9214_v1 = vadd.f32 %v9213_v35, %v9116_v20  ;;  %v10007_v35 = vpop.permute.xlu0 %10006 }
 0xfdf   :  { %v14287_v15 = vpop.f32.mrf.mxu1 }
 0xfe0   :  { %v9328_v52 = vadd.f32 %v14287_v15, %v9209_v49 }
 0xfe1   :  { %v9308_v21 = vpop.f32.mrf.mxu1 }
 0xfe2   :  { %v9327_v57 = vadd.f32 %v9308_v21, %v9204_v24 }
 0xfe3   :  { %v14290_v56 = vpop.f32.mrf.mxu1 }
 0xfe4   :  { %v9330_v45 = vadd.f32 %v14290_v56, %v9219_v25  ;;  %v9997_v25 = vpop.permute.xlu0 %9996 }
 0xfe5   :  { %v9318_v28 = vpop.f32.mrf.mxu1 }
 0xfe6   :  { %v9329_v17 = vadd.f32 %v9318_v28, %v9214_v1 }
 0xfe7   :  { %v14301_v22 = vpop.f32.mrf.mxu1 }
 0xfe8   :  { %v9437_v14 = vadd.f32 %v14301_v22, %v9328_v52 }
 0xfe9   :  { %v9417_v6 = vpop.f32.mrf.mxu1 }
 0xfea   :  { %v9436_v5 = vadd.f32 %v9417_v6, %v9327_v57 }
 0xfeb   :  { %v14304_v36 = vpop.f32.mrf.mxu1 }
 0xfec   :  { %v9439_v48 = vadd.f32 %v14304_v36, %v9330_v45 }
 0xfed   :  { %v9427_v41 = vpop.f32.mrf.mxu1 }
 0xfee   :  { %v9438_v7 = vadd.f32 %v9427_v41, %v9329_v17  ;;  %v19188_v17 = vld [vmem:[%s20346_s21 + $0x1b0] sm:$0xff] }
 0xfef   :  { %v14315_v44 = vpop.f32.mrf.mxu1 }
 0xff0   :  { %v9546_v39 = vadd.f32 %v14315_v44, %v9437_v14  ;;  %v19183_v14 = vld [vmem:[%s20346_s21 + $0x1f8] sm:$0xff] }
 0xff1   :  { %v9526_v9 = vpop.f32.mrf.mxu1 }
 0xff2   :  { %v9545_v51 = vadd.f32 %v9526_v9, %v9436_v5  ;;  %v10002_v9 = vpop.permute.xlu1 %10001 }
 0xff3   :  { %v14318_v53 = vpop.f32.mrf.mxu1 }
 0xff4   :  { %v9548_v61 = vadd.f32 %v14318_v53, %v9439_v48  ;;  %v20444_v48 = vunpack.c.h.bf16 %v19183_v14 }
 0xff5   :  { %v9536_v16 = vpop.f32.mrf.mxu1 }
 0xff6   :  { %v9547_v13 = vadd.f32 %v9536_v16, %v9438_v7  ;;  %v9992_v1 = vpop.permute.xlu1 %9991  ;;  %v19198_v7 = vld [vmem:[%s20346_s21 + $0x168] sm:$0xff] }
 0xff7   :  { %v14329_v19 = vpop.f32.mrf.mxu1 }
 0xff8   :  { %v9655_v46 = vadd.f32 %v14329_v19, %v9546_v39  ;;  %v10018_v39 = vld [vmem:[%s20347_s22 + $0x8] sm:$0x1] }
 0xff9   :  { %v9635_v31 = vpop.f32.mrf.mxu1 }
 0xffa   :  { %v9654_v62 = vadd.f32 %v9635_v31, %v9545_v51  ;;  %v20438_v51 = vunpack.c.h.bf16 %v19188_v17 }
 0xffb   :  { %v14332_v43 = vpop.f32.mrf.mxu1 }
 0xffc   :  { %v9657_v27 = vadd.f32 %v14332_v43, %v9548_v61  ;;  %v20433_v61 = vunpack.c.l.bf16 %v19188_v17 }
 0xffd   :  { %v9645_v40 = vpop.f32.mrf.mxu1 }
 0xffe   :  { %v9656_v15 = vadd.f32 %v9645_v40, %v9547_v13  ;;  %v19217_v13 = vld [vmem:[%s20346_s21 + $0xd8] sm:$0xff] }
 0xfff   :  { %v14343_v38 = vpop.f32.mrf.mxu1 }
0x1000   :  { %v9764_v10 = vadd.f32 %v14343_v38, %v9655_v46  ;;  %v19205_v46 = vld [vmem:[%s20346_s21 + $0x120] sm:$0xff] }
0x1001   :  { %v9744_v59 = vpop.f32.mrf.mxu1 }
0x1002   :  { %v9763_v21 = vadd.f32 %v9744_v59, %v9654_v62  ;;  %v20424_v62 = vunpack.c.h.bf16 %v19205_v46 }
0x1003   :  { %v14346_v2 = vpop.f32.mrf.mxu1 }
0x1004   :  { %v9766_v56 = vadd.f32 %v14346_v2, %v9657_v27  ;;  %v20423_v27 = vunpack.c.l.bf16 %v19205_v46 }
0x1005   :  { %v9754_v11 = vpop.f32.mrf.mxu1 }
0x1006   :  { %v9765_v36 = vadd.f32 %v9754_v11, %v9656_v15  ;;  %v20439_v11 = vunpack.c.l.bf16 %v19183_v14 }
0x1007   :  { %v14357_v4 = vpop.f32.mrf.mxu1  ;;  %v14371_v34 = vpop.f32.mrf.mxu0 }
0x1008   :  { %v9873_v28 = vadd.f32 %v14357_v4, %v9764_v10  ;;  %v20432_v4 = vunpack.c.h.bf16 %v19198_v7  ;;  %v19229_v10 = vld [vmem:[%s20346_s21 + $0x90] sm:$0xff] }
0x1009   :  { %v9853_v20 = vpop.f32.mrf.mxu1  ;;  %v9962_v54 = vpop.f32.mrf.mxu0  ;;  %v20416_v15 = vunpack.c.h.bf16 %v19229_v10 }
0x100a   :  { %v9872_v41 = vadd.f32 %v9853_v20, %v9763_v21  ;;  %v9982_v19 = vadd.f32 %v14371_v34, %v9873_v28  ;;  %v20425_v34 = vunpack.c.l.bf16 %v19198_v7  ;;  %v20419_v20 = vunpack.c.h.bf16 %v19217_v13 }
0x100b   :  { %v14360_v22 = vpop.f32.mrf.mxu1  ;;  %v14374_v6 = vpop.f32.mrf.mxu0  ;;  %v20413_v21 = vunpack.c.l.bf16 %v19229_v10 }
0x100c   :  { %v9875_v44 = vadd.f32 %v14360_v22, %v9766_v56  ;;  %v9981_v43 = vadd.f32 %v9962_v54, %v9872_v41  ;;  %v10010_v52 = vadd.f32 %v9997_v25, %v9982_v19  ;;  %v20417_v54 = vunpack.c.l.bf16 %v19217_v13  ;;  %v19265_v22 = vld [vmem:[%s20346_s21 + $0x50] sm:$0xff] }
0x100d   :  { %v9863_v53 = vpop.f32.mrf.mxu1  ;;  %v9972_v31 = vpop.f32.mrf.mxu0  ;;  %v19284_v19 = vld [vmem:[%s20346_s21 + $0x210] sm:$0xff] }
0x100e   :  { %v9874_v49 = vadd.f32 %v9863_v53, %v9765_v36  ;;  %v9984_v16 = vadd.f32 %v14374_v6, %v9875_v44  ;;  %v10009_v57 = vadd.f32 %v9992_v1, %v9981_v43  ;;  %v10014_v2 = vmax.f32 %v10010_v52, 0.0  ;;  %v19270_v6 = vld [vmem:[%s20346_s21] sm:$0xff]  ;;  %v19279_v53 = vld [vmem:[%s20346_s21 + $0x8] sm:$0xff] }
0x100f   :  { %v20453_v36 = vunpack.c.h.bf16 %v19265_v22  ;;  %v20410_v41 = vunpack.c.h.bf16 %v19270_v6  ;;  %v20449_v44 = vunpack.c.l.bf16 %v19265_v22  ;;  %v19304_v43 = vld [vmem:[%s20346_s21 + $0x208] sm:$0xff]  ;;  %v20414_v52 = vunpack.c.l.bf16 %v19284_v19  ;;  %v19328_v1 = vld [vmem:[%s20346_s21 + $0x1c0] sm:$0xff] }
0x1010   :  { %v10012_v38 = vadd.f32 %v10007_v35, %v9984_v16  ;;  %v9983_v24 = vadd.f32 %v9972_v31, %v9874_v49  ;;  %v10013_v5 = vmax.f32 %v10009_v57, 0.0  ;;  %v19240_v35 = vld [vmem:[%s20346_s21 + $0x48] sm:$0xff]  ;;  %v20446_v49 = vunpack.c.h.bf16 %v19279_v53 }
0x1011   :  { %v20412_v56 = vunpack.c.h.bf16 %v19240_v35  ;;  %v20411_v28 = vunpack.c.l.bf16 %v19240_v35  ;;  %10181 = vmatprep.subr.mxu0 %v20453_v36  ;;  %v20408_v16 = vunpack.c.h.bf16 %v19284_v19  ;;  %v20437_v31 = vunpack.c.l.bf16 %v19279_v53 }
0x1012   :  { %v10016_v40 = vmax.f32 %v10012_v38, 0.0  ;;  %v10011_v59 = vadd.f32 %v10002_v9, %v9983_v24  ;;  %v20409_v9 = vunpack.c.l.bf16 %v19270_v6  ;;  %10182 = vmatpush1.msra.mxu0 %v20449_v44  ;;  %v20430_v38 = vunpack.c.h.bf16 %v19304_v43  ;;  %v19314_v24 = vld [vmem:[%s20346_s21 + $0x1c8] sm:$0xff] }
0x1013   :  { %10183 = vmatprep.subr.mxu0 %v20446_v49 }
0x1014   :  { %v10015_v45 = vmax.f32 %v10011_v59, 0.0  ;;  %14375 = vmatprep.subr.mxu1 %v10016_v40  ;;  %10184 = vmatpush1.msra.mxu0 %v20437_v31  ;;  %v20415_v59 = vunpack.c.h.bf16 %v19314_v24 }
0x1015   :  { %14376 = vmatpush3.msra.mxu1 %v10016_v40  ;;  %10340 = vmatprep.subr.mxu0 %v20430_v38  ;;  %v19322_v40 = vld [vmem:[%s20346_s21 + $0x180] sm:$0xff] }
0x1016   :  { %14377 = vmatprep.subr.mxu1 %v10015_v45  ;;  %v19425_v38 = vld [vmem:[%s20346_s21 + $0xa0] sm:$0xff] }
0x1017   :  { %14378 = vmatpush3.msra.mxu1 %v10015_v45  ;;  %v20418_v45 = vunpack.c.l.bf16 %v19314_v24  ;;  %v20450_v31 = vunpack.c.h.bf16 %v19425_v38 }
0x1018   :  { %14379 = vmatprep.subr.mxu1 %v10014_v2 }
0x1019   :  { %14380 = vmatpush3.msra.mxu1 %v10014_v2  ;;  %v20420_v2 = vunpack.c.l.bf16 %v19304_v43 }
0x101a   :  { %14381 = vmatprep.subr.mxu1 %v10013_v5 }
0x101b   :  { %14382 = vmatpush3.msra.mxu1 %v10013_v5 }
0x101c   :  { %14384 = vmatmul.mubr.msk.f32.vlgmr.msra.gmra.mxu1 %vm1544_vm2, %v10018_v39  ;;  %10242 = vmatprep.subr.mxu1 %v20444_v48  ;;  %v20421_v39 = vunpack.c.h.bf16 %v19322_v40  ;;  %v19477_v48 = vld [vmem:[%s20346_s21 + $0x220] sm:$0xff] }
0x101d   :  { %10243 = vmatpush1.msra.mxu1 %v20439_v11  ;;  %10290 = vmatprep.mubr.f32.mxu1 %v20701_v32  ;;  %v20461_v44 = vunpack.c.h.bf16 %v19477_v48  ;;  %v20464_v36 = vunpack.c.l.bf16 %v19477_v48 }
0x101e   :  { %10244 = vmatprep.subr.mxu1 %v20438_v51  ;;  %v20451_v51 = vunpack.c.l.bf16 %v19425_v38 }
0x101f   :  { %10245 = vmatpush1.msra.mxu1 %v20433_v61 }
0x1020   :  { %10246 = vmatprep.subr.mxu1 %v20432_v4 }
0x1021   :  { %10247 = vmatpush1.msra.mxu1 %v20425_v34 }
0x1022   :  { %10248 = vmatprep.subr.mxu1 %v20424_v62 }
0x1023   :  { %10249 = vmatpush1.msra.mxu1 %v20423_v27 }
0x1024   :  { %10250 = vmatprep.subr.mxu1 %v20419_v20 }
0x1025   :  { %10251 = vmatpush1.msra.mxu1 %v20417_v54  ;;  %v19373_v54 = vld [vmem:[%s20346_s21 + $0x130] sm:$0xff] }
0x1026   :  { %10252 = vmatprep.subr.mxu1 %v20416_v15  ;;  %v20436_v27 = vunpack.c.h.bf16 %v19373_v54  ;;  %v20441_v62 = vunpack.c.l.bf16 %v19373_v54 }
0x1027   :  { %10253 = vmatpush1.msra.mxu1 %v20413_v21  ;;  %v19362_v21 = vld [vmem:[%s20346_s21 + $0xf0] sm:$0xff] }
0x1028   :  { %10254 = vmatprep.subr.mxu1 %v20412_v56  ;;  %v20429_v56 = vunpack.c.l.bf16 %v19322_v40  ;;  %v20435_v20 = vunpack.c.h.bf16 %v19362_v21  ;;  %v20440_v34 = vunpack.c.l.bf16 %v19362_v21 }
0x1029   :  { %10255 = vmatpush1.msra.mxu1 %v20411_v28  ;;  %v20426_v28 = vunpack.c.l.bf16 %v19328_v1 }
0x102a   :  { %10256 = vmatprep.subr.mxu1 %v20410_v41  ;;  %v20422_v41 = vunpack.c.h.bf16 %v19328_v1 }
0x102b   :  { %10257 = vmatpush1.msra.mxu1 %v20409_v9  ;;  %v19348_v9 = vld [vmem:[%s20346_s21 + $0x138] sm:$0xff] }
0x102c   :  { %10440 = vmatprep.subr.mxu1 %v20408_v16  ;;  %v19343_v16 = vld [vmem:[%s20346_s21 + $0x178] sm:$0xff]  ;;  %v20428_v15 = vunpack.c.h.bf16 %v19348_v9 }
0x10dc   :  { %v19316_v25 = vpop.f32.mrf.mxu1 }
0x10de   :  { %v19330_v57 = vpop.f32.mrf.mxu1 }
0x10df   :  { %11162 = vrot.lane.b32.xlu1 %v19330_v57, %s14537_s1  ;;  %12443 = vmatmul.mubr.msk.f32.vlgmr.msra.gmra.mxu1 %vm900_vm0, %v19330_v57  ;;  %v10150_v5 = vrot.slane %v19330_v57, 1 }
0x10e0   :  { %10441 = vmatpush1.msra.mxu1 %v20414_v52  ;;  %10488 = vmatprep.mubr.f32.mxu1 %v20701_v32  ;;  %v10421_v52 = vrot.slane %v19330_v57, 3 }
0x10e1   :  { %10442 = vmatprep.subr.mxu1 %v20415_v59  ;;  %11087 = vrot.lane.b32.xlu0 %v10150_v5, %s14537_s1  ;;  %v20427_v59 = vunpack.c.h.bf16 %v19343_v16 }
0x10e2   :  { %10443 = vmatpush1.msra.mxu1 %v20418_v45  ;;  %12442 = vmatmul.mubr.msk.f32.vlgmr.msra.gmra.mxu0 %vm900_vm0, %v10150_v5  ;;  %v20431_v45 = vunpack.c.l.bf16 %v19348_v9  ;;  %v20434_v5 = vunpack.c.l.bf16 %v19343_v16 }
0x10e3   :  { %10341 = vmatpush1.msra.mxu0 %v20420_v2  ;;  %10444 = vmatprep.subr.mxu1 %v20421_v39  ;;  %v19390_v2 = vld [vmem:[%s20346_s21 + $0xe8] sm:$0xff] }
0x10e4   :  { %10342 = vmatprep.subr.mxu0 %v20422_v41  ;;  %11362 = vrot.lane.b32.xlu1 %v10421_v52, %s14537_s1  ;;  %v19395_v39 = vld [vmem:[%s20346_s21 + $0xa8] sm:$0xff]  ;;  %v10321_v41 = vrot.slane %v19330_v57, 2  ;;  %v20447_v4 = vunpack.c.l.bf16 %v19390_v2 }
0x10e5   :  { %10343 = vmatpush1.msra.mxu0 %v20426_v28  ;;  %10445 = vmatpush1.msra.mxu1 %v20429_v56  ;;  %v19412_v28 = vld [vmem:[%s20346_s21 + $0x60] sm:$0xff]  ;;  %v20443_v56 = vunpack.c.h.bf16 %v19395_v39 }
0x10e6   :  { %10344 = vmatprep.subr.mxu0 %v20427_v59  ;;  %10446 = vmatprep.subr.mxu1 %v20428_v15  ;;  %v10621_v59 = vrot.slane %v19330_v57, 5  ;;  %v20442_v15 = vunpack.c.h.bf16 %v19390_v2  ;;  %v20448_v61 = vunpack.c.h.bf16 %v19412_v28  ;;  %v20452_v11 = vunpack.c.l.bf16 %v19412_v28 }
0x10e7   :  { %10447 = vmatpush1.msra.mxu1 %v20431_v45  ;;  %11261 = vrot.lane.b32.xlu0 %v10321_v41, %s14537_s1  ;;  %v20445_v45 = vunpack.c.l.bf16 %v19395_v39 }
0x10e8   :  { %10345 = vmatpush1.msra.mxu0 %v20434_v5  ;;  %10448 = vmatprep.subr.mxu1 %v20435_v20  ;;  %v19442_v5 = vld [vmem:[%s20346_s21 + $0x58] sm:$0xff] }
0x10e9   :  { %10346 = vmatprep.subr.mxu0 %v20436_v27  ;;  %11564 = vrot.lane.b32.xlu1 %v10621_v59, %s14537_s1  ;;  %v19447_v20 = vld [vmem:[%s20346_s21 + $0x18] sm:$0xff]  ;;  %v20493_v27 = vrot.slane %v19330_v57, 4  ;;  %v20458_v49 = vunpack.c.l.bf16 %v19442_v5 }
0x10ea   :  { %10347 = vmatpush1.msra.mxu0 %v20441_v62  ;;  %10449 = vmatpush1.msra.mxu1 %v20440_v34  ;;  %v20487_v34 = vrot.slane %v19330_v57, 7  ;;  %v20454_v62 = vunpack.c.h.bf16 %v19442_v5 }
0x10eb   :  { %10348 = vmatprep.subr.mxu0 %v20442_v15  ;;  %10450 = vmatprep.subr.mxu1 %v20443_v56  ;;  %v20455_v15 = vunpack.c.h.bf16 %v19447_v20  ;;  %v19472_v56 = vld [vmem:[%s20346_s21 + $0x10] sm:$0xff] }
0x10ec   :  { %10451 = vmatpush1.msra.mxu1 %v20445_v45  ;;  %11463 = vrot.lane.b32.xlu0 %v20493_v27, %s14537_s1  ;;  %v20456_v45 = vunpack.c.l.bf16 %v19447_v20 }
0x10ed   :  { %10349 = vmatpush1.msra.mxu0 %v20447_v4  ;;  %10452 = vmatprep.subr.mxu1 %v20448_v61  ;;  %v20486_v4 = vrot.slane %v19330_v57, 6  ;;  %v20463_v61 = vunpack.c.h.bf16 %v19472_v56 }
0x10ee   :  { %10350 = vmatprep.subr.mxu0 %v20450_v31  ;;  %11766 = vrot.lane.b32.xlu1 %v20487_v34, %s14537_s1  ;;  %v19500_v31 = vld [vmem:[%s20346_s21 + $0x218] sm:$0xff] }
0x10ef   :  { %10351 = vmatpush1.msra.mxu0 %v20451_v51  ;;  %10453 = vmatpush1.msra.mxu1 %v20452_v11  ;;  %v20462_v51 = vunpack.c.l.bf16 %v19472_v56  ;;  %v19510_v11 = vld [vmem:[%s20346_s21 + $0x1d8] sm:$0xff] }
0x10f0   :  { %10352 = vmatprep.subr.mxu0 %v20454_v62  ;;  %10454 = vmatprep.subr.mxu1 %v20455_v15  ;;  %v10100_v62 = vld [vmem:[#allocation4] sm:$0x1]  ;;  %v20468_v15 = vunpack.c.h.bf16 %v19500_v31  ;;  %v20471_v47 = vunpack.c.l.bf16 %v19510_v11 }
0x10f1   :  { %10455 = vmatpush1.msra.mxu1 %v20456_v45  ;;  %11665 = vrot.lane.b32.xlu0 %v20486_v4, %s14537_s1  ;;  %v19527_v45 = vld [vmem:[%s20346_s21 + $0x1d0] sm:$0xff] }
0x10f2   :  { %10353 = vmatpush1.msra.mxu0 %v20458_v49  ;;  %12445 = vmatmul.mubr.msk.f32.vlgmr.msra.gmra.mxu1 %vm900_vm0, %v10421_v52  ;;  %v20467_v52 = vunpack.c.h.bf16 %v19510_v11  ;;  %v20472_v49 = vunpack.c.l.bf16 %v19500_v31 }
0x10f3   :  { %10354 = vmatprep.subr.mxu0 %v20463_v61  ;;  %10640 = vmatprep.subr.mxu1 %v20461_v44  ;;  %v20474_v44 = vunpack.c.h.bf16 %v19527_v45  ;;  %v20477_v61 = vunpack.c.l.bf16 %v19527_v45 }
0x10f4   :  { %10999 = vperm.xlu1 %14466, %v10100_v62   ;;  %10355 = vmatpush1.msra.mxu0 %v20462_v51  ;;  %v20473_v62 = vunpack.c.h.bf16 %v19532_v37  ;;  %v19556_v51 = vld [vmem:[%s20346_s21 + $0x148] sm:$0xff] }
0x10f5   :  { %10388 = vmatprep.mubr.f32.mxu0 %v20701_v32  ;;  %10641 = vmatpush1.msra.mxu1 %v20464_v36  ;;  %v20478_v36 = vunpack.c.l.bf16 %v19532_v37  ;;  %v20484_v26 = vunpack.c.l.bf16 %v19556_v51 }
0x10f6   :  { %12444 = vmatmul.mubr.msk.f32.vlgmr.msra.gmra.mxu0 %vm900_vm0, %v10321_v41  ;;  %10540 = vmatprep.subr.mxu0 %v20468_v15  ;;  %v19578_v41 = vld [vmem:[%s20346_s21 + $0x100] sm:$0xff]  ;;  %v20485_v15 = vunpack.c.l.bf16 %v19546_v29 }
0x10f7   :  { %10642 = vmatprep.subr.mxu1 %v20467_v52  ;;  %11867 = vrot.lane.b32.xlu0 %v19316_v25, %s14537_s1  ;;  %v20483_v52 = vunpack.c.h.bf16 %v19556_v51  ;;  %v20491_v30 = vunpack.c.l.bf16 %v19578_v41 }
0x10f8   :  { %10643 = vmatpush1.msra.mxu1 %v20471_v47  ;;  %10541 = vmatpush1.msra.mxu0 %v20472_v49  ;;  %v19599_v47 = vld [vmem:[%s20346_s21 + $0xb8] sm:$0xff] }
0x10f9   :  { %10542 = vmatprep.subr.mxu0 %v20474_v44  ;;  %10644 = vmatprep.subr.mxu1 %v20473_v62  ;;  %v20702_v49 = vld [vmem:[#allocation22_spill] sm:$0xff]  ;;  %v20488_v62 = vunpack.c.h.bf16 %v19573_v63  ;;  %v20490_v44 = vunpack.c.h.bf16 %v19578_v41  ;;  %v20494_v50 = vunpack.c.h.bf16 %v19599_v47  ;;  %v20495_v23 = vunpack.c.l.bf16 %v19599_v47 }
0x10fa   :  { %5567 = vrot.lane.b32.xlu1 %v20702_v49, %s14539_s7  ;;  %10543 = vmatpush1.msra.mxu0 %v20477_v61  ;;  %v19616_v49 = vld [vmem:[%s20346_s21 + $0xb0] sm:$0xff] }
0x10fb   :  { %10645 = vmatpush1.msra.mxu1 %v20478_v36  ;;  %10544 = vmatprep.subr.mxu0 %v20479_v0  ;;  %v19621_v61 = vld [vmem:[%s20346_s21 + $0x70] sm:$0xff]  ;;  %v20703_v36 = vld [vmem:[#allocation27_spill] sm:$0xff]  ;;  %v20492_v0 = vunpack.c.h.bf16 %v19594_v60  ;;  %v20499_v4 = vunpack.c.l.bf16 %v19616_v49 }
0x10fc   :  { %10646 = vmatprep.subr.mxu1 %v20483_v52  ;;  %5543 = vrot.lane.b32.xlu0 %v20703_v36, %s14539_s7  ;;  %v19638_v52 = vld [vmem:[%s20346_s21 + $0x68] sm:$0xff]  ;;  %v20498_v34 = vunpack.c.l.bf16 %v19621_v61  ;;  %s11992_s7 = sshll.u32 %s14554_s0, 4  ;;  %s11993_s7 = int_to_ptr.vmem [resolvable:$true] %s11992_s7 }
0x10fd   :  { %10647 = vmatpush1.msra.mxu1 %v20484_v26  ;;  %10545 = vmatpush1.msra.mxu0 %v20485_v15  ;;  %20704 = vst [vmem:[#allocation31_spill] sm:$0xff] %v19638_v52  ;;  %v19643_v36 = vld [vmem:[%s20346_s21 + $0x28] sm:$0xff]  ;;  %v20497_v26 = vunpack.c.h.bf16 %v19616_v49  ;;  %v20500_v15 = vunpack.c.h.bf16 %v19621_v61 }
0x10fe   :  { %20705 = vst [vmem:[#allocation24_spill] sm:$0xff] %v19643_v36  ;;  %10546 = vmatprep.subr.mxu0 %v20488_v62  ;;  %10648 = vmatprep.subr.mxu1 %v20490_v44  ;;  %v19660_v62 = vld [vmem:[%s20346_s21 + $0x20] sm:$0xff]  ;;  %v20504_v44 = vunpack.c.h.bf16 %v19643_v36  ;;  %v20503_v27 = vunpack.c.l.bf16 %v19643_v36 }
0x10ff   :  { %10547 = vmatpush1.msra.mxu0 %v20489_v12  ;;  %10649 = vmatpush1.msra.mxu1 %v20491_v30  ;;  %20706 = vst [vmem:[#allocation33_spill] sm:$0xff] %v19660_v62  ;;  %v20501_v12 = vunpack.c.h.bf16 %v19638_v52  ;;  %v19671_v30 = vld [vmem:[%s20346_s21 + $0x230] sm:$0xff] }
0x1100   :  { %10548 = vmatprep.subr.mxu0 %v20492_v0  ;;  %10650 = vmatprep.subr.mxu1 %v20494_v50  ;;  %20707 = vst [vmem:[#allocation14_spill] sm:$0xff] %v19671_v30  ;;  %v20502_v0 = vunpack.c.l.bf16 %v19638_v52  ;;  %v20505_v50 = vunpack.c.h.bf16 %v19660_v62 }
0x1101   :  { %10549 = vmatpush1.msra.mxu0 %v20496_v18  ;;  %10651 = vmatpush1.msra.mxu1 %v20495_v23  ;;  %v20506_v23 = vunpack.c.h.bf16 %v19671_v30  ;;  %v19692_v18 = vld [vmem:[%s20346_s21 + $0x228] sm:$0xff] }
0x1102   :  { %10550 = vmatprep.subr.mxu0 %v20497_v26  ;;  %10652 = vmatprep.subr.mxu1 %v20500_v15  ;;  %20708 = vst [vmem:[#allocation18_spill] sm:$0xff] %v19692_v18  ;;  %v19697_v26 = vld [vmem:[%s20346_s21 + $0x1e8] sm:$0xff]  ;;  %v19712_v15 = vld [vmem:[%s20346_s21 + $0x1e0] sm:$0xff] }
0x1103   :  { %10551 = vmatpush1.msra.mxu0 %v20499_v4  ;;  %10653 = vmatpush1.msra.mxu1 %v20498_v34  ;;  %20709 = vst [vmem:[#allocation32_spill] sm:$0xff] %v19697_v26  ;;  %20710 = vst [vmem:[#allocation17_spill] sm:$0xff] %v19712_v15  ;;  %v19734_v34 = vld [vmem:[%s20346_s21 + $0x198] sm:$0xff]  ;;  %v20715_v4 = vunpack.c.l.bf16 %v19671_v30  ;;  %v20721_v30 = vunpack.c.l.bf16 %v19697_v26  ;;  %v20723_v36 = vunpack.c.h.bf16 %v19712_v15 }
0x1104   :  { %10552 = vmatprep.subr.mxu0 %v20501_v12  ;;  %10654 = vmatprep.subr.mxu1 %v20504_v44  ;;  %v19717_v12 = vld [vmem:[%s20346_s21 + $0x1a0] sm:$0xff]  ;;  %20712 = vst [vmem:[#allocation21_spill] sm:$0xff] %v19734_v34  ;;  %v20716_v44 = vrot.slane %v19330_v57, 4  ;;  %v20727_v52 = vunpack.c.h.bf16 %v19734_v34 }
0x1105   :  { %10553 = vmatpush1.msra.mxu0 %v20502_v0  ;;  %10655 = vmatpush1.msra.mxu1 %v20503_v27  ;;  %20711 = vst [vmem:[#allocation23_spill] sm:$0xff] %v19717_v12  ;;  %v20714_v27 = vunpack.c.l.bf16 %v19660_v62  ;;  %v20720_v0 = vunpack.c.l.bf16 %v19692_v18  ;;  %v20725_v62 = vunpack.c.l.bf16 %v19712_v15 }
0x1106   :  { %10688 = vmatprep.mubr.f32.mxu1 %v20701_v32  ;;  %10554 = vmatprep.subr.mxu0 %v20505_v50  ;;  %v19739_v50 = vld [vmem:[%s20346_s21 + $0x158] sm:$0xff] }
0x1107   :  { %12447 = vmatmul.mubr.msk.f32.vlgmr.msra.gmra.mxu1 %vm900_vm0, %v10621_v59  ;;  %10840 = vmatprep.subr.mxu1 %v20506_v23  ;;  %20713 = vst [vmem:[#allocation29_spill] sm:$0xff] %v19739_v50  ;;  %v19761_v23 = vld [vmem:[%s20346_s21 + $0x110] sm:$0xff]  ;;  %v20719_v59 = vunpack.c.h.bf16 %v19697_v26  ;;  %v20729_v26 = vunpack.c.l.bf16 %v19734_v34 }
0x1108   :  { %10555 = vmatpush1.msra.mxu0 %v20714_v27  ;;  %10588 = vmatprep.mubr.f32.mxu0 %v20701_v32  ;;  %v19756_v27 = vld [vmem:[%s20346_s21 + $0x150] sm:$0xff]  ;;  %20717 = vst [vmem:[#allocation26_spill] sm:$0xff] %v19761_v23 }
0x1109   :  { %10841 = vmatpush1.msra.mxu1 %v20715_v4  ;;  %12446 = vmatmul.mubr.msk.f32.vlgmr.msra.gmra.mxu0 %vm900_vm0, %v20716_v44  ;;  %v20718_v4 = vunpack.c.h.bf16 %v19692_v18  ;;  %v20726_v44 = vunpack.c.l.bf16 %v19717_v12  ;;  %v20732_v18 = vunpack.c.h.bf16 %v19756_v27 }
0x110a   :  { %10842 = vmatprep.subr.mxu1 %v20719_v59  ;;  %v19783_v59 = vld [vmem:[%s20346_s21 + $0xc8] sm:$0xff]  ;;  %10888 = vmatprep.mubr.f32.mxu1 %v20701_v32 }
0x110b   :  { %10740 = vmatprep.subr.mxu0 %v20718_v4  ;;  %10843 = vmatpush1.msra.mxu1 %v20721_v30  ;;  %v19778_v4 = vld [vmem:[%s20346_s21 + $0x108] sm:$0xff]  ;;  %20722 = vst [vmem:[#allocation25_spill] sm:$0xff] %v19783_v59  ;;  %v20730_v30 = vunpack.c.l.bf16 %v19739_v50  ;;  %v20737_v15 = vunpack.c.h.bf16 %v19783_v59  ;;  %v20739_v34 = vunpack.c.l.bf16 %v19783_v59 }
0x110c   :  { %10741 = vmatpush1.msra.mxu0 %v20720_v0  ;;  %v20724_v0 = vunpack.c.h.bf16 %v19717_v12  ;;  %v20734_v12 = vunpack.c.l.bf16 %v19756_v27  ;;  %10788 = vmatprep.mubr.f32.mxu0 %v20701_v32 }
0x110d   :  { %10742 = vmatprep.subr.mxu0 %v20723_v36  ;;  %v19800_v36 = vld [vmem:[%s20346_s21 + $0xc0] sm:$0xff] }
0x110e   :  { %10844 = vmatprep.subr.mxu1 %v20724_v0  ;;  %10743 = vmatpush1.msra.mxu0 %v20725_v62  ;;  %v19805_v0 = vld [vmem:[%s20346_s21 + $0x80] sm:$0xff]  ;;  %v20728_v62 = vunpack.c.h.bf16 %v19739_v50 }
0x110f   :  { %10845 = vmatpush1.msra.mxu1 %v20726_v44  ;;  %10744 = vmatprep.subr.mxu0 %v20727_v52  ;;  %v19822_v52 = vld [vmem:[%s20346_s21 + $0x78] sm:$0xff]  ;;  %v20735_v44 = vunpack.c.l.bf16 %v19761_v23 }
0x1110   :  { %10846 = vmatprep.subr.mxu1 %v20728_v62  ;;  %10745 = vmatpush1.msra.mxu0 %v20729_v26  ;;  %v19827_v62 = vld [vmem:[%s20346_s21 + $0x38] sm:$0xff]  ;;  %v20733_v26 = vunpack.c.h.bf16 %v19761_v23  ;;  %v20745_v50 = vunpack.c.h.bf16 %v19822_v52 }
0x1111   :  { %10847 = vmatpush1.msra.mxu1 %v20730_v30  ;;  %20731 = vst [vmem:[#allocation34_spill] sm:$0xff] %v19827_v62  ;;  %10746 = vmatprep.subr.mxu0 %v20732_v18  ;;  %v19844_v18 = vld [vmem:[%s20346_s21 + $0x30] sm:$0xff]  ;;  %v20742_v30 = vunpack.c.h.bf16 %v19805_v0  ;;  %v20746_v59 = vunpack.c.h.bf16 %v19827_v62 }
0x1112   :  { %10848 = vmatprep.subr.mxu1 %v20733_v26  ;;  %10747 = vmatpush1.msra.mxu0 %v20734_v12  ;;  %v20736_v26 = vunpack.c.h.bf16 %v19778_v4  ;;  %v20743_v12 = vunpack.c.l.bf16 %v19800_v36  ;;  %v20534_v23 = vunpack.c.l.bf16 %v19844_v18 }
0x1113   :  { %10849 = vmatpush1.msra.mxu1 %v20735_v44  ;;  %v20738_v44 = vunpack.c.l.bf16 %v19778_v4 }
0x1114   :  { %10748 = vmatprep.subr.mxu0 %v20736_v26  ;;  %10850 = vmatprep.subr.mxu1 %v20737_v15  ;;  %v19861_v26 = vld [vmem:[%s20346_s21 + $0x238] sm:$0xff]  ;;  %v20741_v15 = vunpack.c.h.bf16 %v19800_v36 }
0x1115   :  { %10749 = vmatpush1.msra.mxu0 %v20738_v44  ;;  %10851 = vmatpush1.msra.mxu1 %v20739_v34  ;;  %20740 = vst [vmem:[#allocation19_spill] sm:$0xff] %v19861_v26  ;;  %v20531_v44 = vunpack.c.h.bf16 %v19844_v18  ;;  %v20744_v34 = vunpack.c.l.bf16 %v19805_v0 }
0x1116   :  { %10750 = vmatprep.subr.mxu0 %v20741_v15  ;;  %10852 = vmatprep.subr.mxu1 %v20742_v30  ;;  %v19881_v30 = vld [vmem:[%s20346_s21 + $0x1f0] sm:$0xff]  ;;  %v20749_v15 = vrot.slane %v19330_v57, 7 }
0x1117   :  { %10751 = vmatpush1.msra.mxu0 %v20743_v12  ;;  %10853 = vmatpush1.msra.mxu1 %v20744_v34  ;;  %v20747_v12 = vunpack.c.l.bf16 %v19822_v52  ;;  %v20748_v34 = vunpack.c.l.bf16 %v19827_v62  ;;  %v20752_v62 = vrot.slane %v19330_v57, 6  ;;  %v20755_v57 = vunpack.c.h.bf16 %v19881_v30 }
0x1118   :  { %10752 = vmatprep.subr.mxu0 %v20745_v50  ;;  %10854 = vmatprep.subr.mxu1 %v20746_v59  ;;  %v19894_v59 = vld [vmem:[%s20346_s21 + $0x1a8] sm:$0xff]  ;;  %v19909_v50 = vld [vmem:[%s20346_s21 + $0x160] sm:$0xff] }
0x1119   :  { %10753 = vmatpush1.msra.mxu0 %v20747_v12  ;;  %10855 = vmatpush1.msra.mxu1 %v20748_v34  ;;  %v20750_v34 = vunpack.c.h.bf16 %v19861_v26  ;;  %20751 = vst [vmem:[#allocation30_spill] sm:$0xff] %v19909_v50  ;;  %v20754_v12 = vunpack.c.l.bf16 %v19861_v26  ;;  %v20758_v26 = vunpack.c.h.bf16 %v19124_v42 }
0x111a   :  { %10754 = vmatprep.subr.mxu0 %v20531_v44  ;;  %12449 = vmatmul.mubr.msk.f32.vlgmr.msra.gmra.mxu1 %vm900_vm0, %v20749_v15  ;;  %v19923_v44 = vld [vmem:[%s20346_s21 + $0x118] sm:$0xff]  ;;  %v20756_v15 = vunpack.c.l.bf16 %v19117_v8 }
0x111b   :  { %10755 = vmatpush1.msra.mxu0 %v20534_v23  ;;  %v20753_v23 = vunpack.c.h.bf16 %v19117_v8  ;;  %v20760_v8 = vunpack.c.l.bf16 %v19124_v42  ;;  %v20764_v42 = vunpack.c.l.bf16 %v19135_v33  ;;  %11155 = vmatprep.mubr.f32.mxu1 %v20701_v32 }
0x111c   :  { %10940 = vmatprep.subr.mxu0 %v20750_v34  ;;  %12448 = vmatmul.mubr.msk.f32.vlgmr.msra.gmra.mxu0 %vm900_vm0, %v20752_v62  ;;  %v19937_v34 = vld [vmem:[%s20346_s21 + $0xd0] sm:$0xff] }
0x111d   :  { %11107 = vmatprep.subr.mxu1 %v20753_v23  ;;  %10941 = vmatpush1.msra.mxu0 %v20754_v12  ;;  %v20757_v23 = vunpack.c.l.bf16 %v19881_v30  ;;  %v19952_v12 = vld [vmem:[%s20346_s21 + $0x88] sm:$0xff]  ;;  %v20773_v62 = vunpack.c.l.bf16 %v19937_v34 }
0x111e   :  { %10988 = vmatprep.mubr.f32.mxu0 %v20701_v32  ;;  %10942 = vmatprep.subr.mxu0 %v20755_v57  ;;  %v20759_v57 = vunpack.c.h.bf16 %v19894_v59 }
0x111f   :  { %11108 = vmatpush1.msra.mxu1 %v20756_v15  ;;  %10943 = vmatpush1.msra.mxu0 %v20757_v23  ;;  %v20761_v15 = vunpack.c.l.bf16 %v19894_v59  ;;  %v19967_v23 = vld [vmem:[%s20346_s21 + $0x40] sm:$0xff]  ;;  %s14553_s21 = smov [#allocation5]  }
0x1120   :  { %11109 = vmatprep.subr.mxu1 %v20758_v26  ;;  %10944 = vmatprep.subr.mxu0 %v20759_v57  ;;  %v20762_v26 = vunpack.c.h.bf16 %v19135_v33  ;;  %v20763_v57 = vunpack.c.h.bf16 %v19909_v50  ;;  %v20768_v33 = vunpack.c.l.bf16 %v19146_v58  ;;  %s11982_s6 = sshll.u32 %s14553_s21, 4  ;;  %s11983_s6 = int_to_ptr.vmem [resolvable:$true] %s11982_s6 }
0x1121   :  { %11110 = vmatpush1.msra.mxu1 %v20760_v8  ;;  %10945 = vmatpush1.msra.mxu0 %v20761_v15  ;;  %v20765_v8 = vunpack.c.l.bf16 %v19909_v50  ;;  %v20770_v15 = vunpack.c.h.bf16 %v19157_v55  ;;  %v20771_v50 = vunpack.c.h.bf16 %v19937_v34  ;;  %s14484_s29 = scalar_lea.vmem %s11983_s6, 32  ;;  %p14489_p1 = scmp.lt.s32.totalorder %s11983_s6, %s11983_s6 }
0x1122   :  { %11111 = vmatprep.subr.mxu1 %v20762_v26  ;;  %10946 = vmatprep.subr.mxu0 %v20763_v57  ;;  %v20766_v26 = vunpack.c.h.bf16 %v19146_v58  ;;  %v20767_v57 = vunpack.c.h.bf16 %v19923_v44  ;;  %v10905_v58 = vunpack.c.l.bf16 %v19967_v23  ;;  %p14485_p0 = scmp.ne.s32.totalorder %s11983_s6, %s14484_s29  ;;  %p14490_p2 = scmp.lt.s32.totalorder %s14484_s29, %s14484_s29 }
0x1123   :  { %11112 = vmatpush1.msra.mxu1 %v20764_v42  ;;  %10947 = vmatpush1.msra.mxu0 %v20765_v8  ;;  %v20769_v42 = vunpack.c.l.bf16 %v19923_v44  ;;  %v10907_v8 = vunpack.c.l.bf16 %v19952_v12 }
0x1124   :  { %11113 = vmatprep.subr.mxu1 %v20766_v26  ;;  %10948 = vmatprep.subr.mxu0 %v20767_v57  ;;  %v10906_v26 = vunpack.c.h.bf16 %v19967_v23  ;;  %v20772_v57 = vunpack.c.l.bf16 %v19157_v55  ;;  %v20777_v55 = vunpack.c.h.bf16 %v19265_v22  ;;  %p14491_p3 = por %p14490_p2, %p14489_p1 }
0x1125   :  { %11114 = vmatpush1.msra.mxu1 %v20768_v33  ;;  %10949 = vmatpush1.msra.mxu0 %v20769_v42  ;;  %v20774_v33 = vunpack.c.h.bf16 %v19168_v3  ;;  %v20775_v42 = vunpack.c.h.bf16 %v19952_v12 }
0x1126   :  { %11115 = vmatprep.subr.mxu1 %v20770_v15  ;;  %10950 = vmatprep.subr.mxu0 %v20771_v50  ;;  %v20776_v15 = vunpack.c.l.bf16 %v19168_v3  ;;  %v20778_v50 = vunpack.c.l.bf16 %v19265_v22  ;;  %v20780_v3 = vunpack.c.h.bf16 %v19183_v14  ;;  %v20782_v22 = vunpack.c.h.bf16 %v19188_v17  ;;  %p14492_p4 = pnand %p14491_p3, %p14485_p0 }
0x1127   :  { %11116 = vmatpush1.msra.mxu1 %v20772_v57  ;;  %10951 = vmatpush1.msra.mxu0 %v20773_v62  ;;  %v20779_v62 = vunpack.c.h.bf16 %v19279_v53  ;;  %v20781_v57 = vunpack.c.l.bf16 %v19183_v14  ;;  %v20787_v14 = vunpack.c.l.bf16 %v19198_v7 }
0x1128   :  { %11117 = vmatprep.subr.mxu1 %v20774_v33  ;;  %10952 = vmatprep.subr.mxu0 %v20775_v42  ;;  %v20783_v33 = vunpack.c.l.bf16 %v19279_v53  ;;  %v20784_v42 = vunpack.c.l.bf16 %v19188_v17  ;;  %v20789_v53 = vunpack.c.l.bf16 %v19205_v46  ;;  %v20790_v17 = vunpack.c.h.bf16 %v19217_v13 }
0x1129   :  { %11118 = vmatpush1.msra.mxu1 %v20776_v15  ;;  %10953 = vmatpush1.msra.mxu0 %v10907_v8  ;;  %v20786_v15 = vunpack.c.h.bf16 %v19304_v43 }
0x112a   :  { %11119 = vmatprep.subr.mxu1 %v20777_v55  ;;  %10954 = vmatprep.subr.mxu0 %v10906_v26  ;;  %v20788_v55 = vunpack.c.h.bf16 %v19205_v46  ;;  %v20796_v46 = vunpack.c.h.bf16 %v19270_v6 }
0x112b   :  { %11120 = vmatpush1.msra.mxu1 %v20778_v50  ;;  %10955 = vmatpush1.msra.mxu0 %v10905_v58  ;;  %v20791_v50 = vunpack.c.l.bf16 %v19217_v13  ;;  %v20798_v13 = vunpack.c.h.bf16 %v19284_v19 }
0x112c   :  { %11121 = vmatprep.subr.mxu1 %v20779_v62  ;;  %12450 = vmatmul.mubr.msk.f32.vlgmr.msra.gmra.mxu0 %vm900_vm0, %v19316_v25  ;;  %v20785_v25 = vunpack.c.h.bf16 %v19198_v7  ;;  %v20792_v62 = vunpack.c.h.bf16 %v19229_v10  ;;  %v20794_v7 = vunpack.c.h.bf16 %v19240_v35 }
0x112d   :  { %11182 = vmatprep.subr.mxu0 %v20780_v3  ;;  %11230 = vmatprep.mubr.f32.mxu0 %v20701_v32  ;;  %v20793_v3 = vunpack.c.l.bf16 %v19229_v10  ;;  %v20799_v10 = vunpack.c.l.bf16 %v19284_v19  ;;  %v20804_v19 = vunpack.c.h.bf16 %v19322_v40 }
0x112e   :  { %11183 = vmatpush1.msra.mxu0 %v20781_v57  ;;  %11122 = vmatpush1.msra.mxu1 %v20783_v33  ;;  %v20795_v57 = vunpack.c.l.bf16 %v19240_v35  ;;  %v20800_v35 = vunpack.c.h.bf16 %v19314_v24 }
0x112f   :  { %11184 = vmatprep.subr.mxu0 %v20782_v22  ;;  %11281 = vmatprep.subr.mxu1 %v20786_v15  ;;  %v20797_v22 = vunpack.c.l.bf16 %v19270_v6  ;;  %v20801_v6 = vunpack.c.l.bf16 %v19304_v43  ;;  %v20803_v15 = vunpack.c.h.bf16 %v19328_v1  ;;  %v20808_v43 = vunpack.c.h.bf16 %v19348_v9 }
0x1130   :  { %11185 = vmatpush1.msra.mxu0 %v20784_v42 }
0x1131   :  { %11186 = vmatprep.subr.mxu0 %v20785_v25  ;;  %v20802_v25 = vunpack.c.l.bf16 %v19314_v24 }
0x1132   :  { %11187 = vmatpush1.msra.mxu0 %v20787_v14  ;;  %v20805_v14 = vunpack.c.l.bf16 %v19328_v1  ;;  %v20812_v1 = vunpack.c.h.bf16 %v19362_v21 }
0x1133   :  { %11188 = vmatprep.subr.mxu0 %v20788_v55  ;;  %v20806_v55 = vunpack.c.l.bf16 %v19322_v40  ;;  %v20813_v40 = vunpack.c.l.bf16 %v19373_v54 }
0x1134   :  { %11189 = vmatpush1.msra.mxu0 %v20789_v53  ;;  %v20807_v53 = vunpack.c.h.bf16 %v19343_v16 }
0x1135   :  { %11190 = vmatprep.subr.mxu0 %v20790_v17  ;;  %v20809_v17 = vunpack.c.l.bf16 %v19343_v16  ;;  %v20816_v16 = vunpack.c.h.bf16 %v19395_v39 }
0x1136   :  { %11191 = vmatpush1.msra.mxu0 %v20791_v50  ;;  %v20810_v50 = vunpack.c.l.bf16 %v19348_v9  ;;  %v20817_v9 = vunpack.c.l.bf16 %v19390_v2 }
0x1137   :  { %11192 = vmatprep.subr.mxu0 %v20792_v62  ;;  %v20811_v62 = vunpack.c.h.bf16 %v19373_v54  ;;  %v20820_v54 = vunpack.c.h.bf16 %v19412_v28 }
0x1138   :  { %11193 = vmatpush1.msra.mxu0 %v20793_v3  ;;  %v20814_v3 = vunpack.c.l.bf16 %v19362_v21 }
0x1139   :  { %11194 = vmatprep.subr.mxu0 %v20794_v7  ;;  %v20815_v7 = vunpack.c.h.bf16 %v19390_v2  ;;  %v20823_v2 = vunpack.c.h.bf16 %v19442_v5 }
0x113a   :  { %11195 = vmatpush1.msra.mxu0 %v20795_v57  ;;  %v20818_v57 = vunpack.c.l.bf16 %v19395_v39  ;;  %v20824_v39 = vunpack.c.h.bf16 %v19447_v20 }
0x113b   :  { %11196 = vmatprep.subr.mxu0 %v20796_v46 }
0x113c   :  { %11197 = vmatpush1.msra.mxu0 %v20797_v22  ;;  %v20819_v22 = vunpack.c.h.bf16 %v19425_v38 }
0x113d   :  { %11382 = vmatprep.subr.mxu0 %v20798_v13  ;;  %v20821_v13 = vunpack.c.l.bf16 %v19425_v38 }
0x1151   :  { %v11163_v33 = vpop.permute.xlu1 %11162 }
0x1152   :  { %12452 = vmatmul.mubr.msk.f32.vlgmr.msra.gmra.mxu0 %vm900_vm0, %v11163_v33  ;;  %v20822_v33 = vunpack.c.l.bf16 %v19412_v28  ;;  %v20828_v28 = vunpack.c.h.bf16 %v19477_v48 }
0x1153   :  { %11383 = vmatpush1.msra.mxu0 %v20799_v10  ;;  %v11088_v42 = vpop.permute.xlu0 %11087  ;;  %11430 = vmatprep.mubr.f32.mxu0 %v20701_v32  ;;  %v20825_v10 = vunpack.c.l.bf16 %v19442_v5  ;;  %v20830_v5 = vunpack.c.l.bf16 %v19477_v48  ;;  %v20836_v48 = vunpack.c.h.bf16 %v19532_v37 }
0x1154   :  { %11384 = vmatprep.subr.mxu0 %v20800_v35  ;;  %12451 = vmatmul.mubr.msk.f32.vlgmr.msra.gmra.mxu1 %vm900_vm0, %v11088_v42  ;;  %v20826_v42 = vunpack.c.l.bf16 %v19447_v20  ;;  %v20827_v35 = vunpack.c.h.bf16 %v19472_v56 }
0x1155   :  { %11282 = vmatpush1.msra.mxu1 %v20801_v6  ;;  %11385 = vmatpush1.msra.mxu0 %v20802_v25  ;;  %v20829_v6 = vunpack.c.l.bf16 %v19472_v56  ;;  %v20831_v25 = vunpack.c.h.bf16 %v19500_v31  ;;  %v20834_v56 = vunpack.c.l.bf16 %v19510_v11 }
0x1156   :  { %11283 = vmatprep.subr.mxu1 %v20803_v15  ;;  %11386 = vmatprep.subr.mxu0 %v20804_v19  ;;  %v11363_v21 = vpop.permute.xlu1 %11362  ;;  %v20832_v15 = vunpack.c.h.bf16 %v19510_v11  ;;  %v20833_v19 = vunpack.c.l.bf16 %v19500_v31  ;;  %v20839_v31 = vunpack.c.h.bf16 %v19546_v29  ;;  %v20840_v11 = vunpack.c.h.bf16 %v19556_v51 }
0x1157   :  { %11284 = vmatpush1.msra.mxu1 %v20805_v14  ;;  %11387 = vmatpush1.msra.mxu0 %v20806_v55  ;;  %v20835_v14 = vunpack.c.h.bf16 %v19527_v45  ;;  %v20837_v55 = vunpack.c.l.bf16 %v19527_v45  ;;  %v20843_v45 = vunpack.c.h.bf16 %v19573_v63 }
0x1158   :  { %11285 = vmatprep.subr.mxu1 %v20807_v53  ;;  %11388 = vmatprep.subr.mxu0 %v20808_v43  ;;  %v20838_v43 = vunpack.c.l.bf16 %v19532_v37  ;;  %v20845_v37 = vunpack.c.l.bf16 %v19573_v63  ;;  %v20850_v63 = vunpack.c.l.bf16 %v19599_v47 }
0x1159   :  { %v11262_v24 = vpop.permute.xlu0 %11261  ;;  %11286 = vmatpush1.msra.mxu1 %v20809_v17  ;;  %11389 = vmatpush1.msra.mxu0 %v20810_v50  ;;  %v20842_v50 = vunpack.c.l.bf16 %v19556_v51  ;;  %v20849_v51 = vunpack.c.l.bf16 %v19594_v60 }
0x115a   :  { %11287 = vmatprep.subr.mxu1 %v20811_v62  ;;  %11390 = vmatprep.subr.mxu0 %v20812_v1  ;;  %v20844_v62 = vunpack.c.h.bf16 %v19578_v41  ;;  %v20846_v1 = vunpack.c.l.bf16 %v19578_v41  ;;  %v20851_v41 = vunpack.c.h.bf16 %v19616_v49 }
0x115b   :  { %11288 = vmatpush1.msra.mxu1 %v20813_v40  ;;  %11391 = vmatpush1.msra.mxu0 %v20814_v3  ;;  %v11565_v20 = vpop.permute.xlu1 %11564  ;;  %v20847_v40 = vunpack.c.h.bf16 %v19594_v60  ;;  %v20848_v3 = vunpack.c.h.bf16 %v19599_v47  ;;  %v20855_v60 = vld [vmem:[#allocation31_spill] sm:$0xff] }
0x115c   :  { %11289 = vmatprep.subr.mxu1 %v20815_v7  ;;  %11392 = vmatprep.subr.mxu0 %v20816_v16  ;;  %v20852_v16 = vunpack.c.h.bf16 %v19621_v61  ;;  %v20859_v47 = vunpack.c.l.bf16 %v20855_v60 }
0x115d   :  { %11290 = vmatpush1.msra.mxu1 %v20817_v9  ;;  %11393 = vmatpush1.msra.mxu0 %v20818_v57  ;;  %v20853_v9 = vunpack.c.l.bf16 %v19616_v49  ;;  %v20854_v57 = vunpack.c.l.bf16 %v19621_v61  ;;  %v20861_v49 = vld [vmem:[#allocation33_spill] sm:$0xff] }
0x115e   :  { %v11464_v46 = vpop.permute.xlu0 %11463  ;;  %11291 = vmatprep.subr.mxu1 %v20819_v22  ;;  %11394 = vmatprep.subr.mxu0 %v20820_v54  ;;  %v20856_v22 = vunpack.c.h.bf16 %v20855_v60  ;;  %v20857_v54 = vld [vmem:[#allocation24_spill] sm:$0xff]  ;;  %v20862_v61 = vunpack.c.h.bf16 %v20861_v49  ;;  %v20899_v60 = vunpack.c.h.bf16 %v19822_v52 }
0x115f   :  { %11292 = vmatpush1.msra.mxu1 %v20821_v13  ;;  %11395 = vmatpush1.msra.mxu0 %v20822_v33  ;;  %v20860_v33 = vunpack.c.l.bf16 %v20857_v54 }
0x1160   :  { %11293 = vmatprep.subr.mxu1 %v20823_v2  ;;  %11396 = vmatprep.subr.mxu0 %v20824_v39  ;;  %v11767_v17 = vpop.permute.xlu1 %11766  ;;  %v20863_v2 = vld [vmem:[#allocation14_spill] sm:$0xff] }
0x1161   :  { %11294 = vmatpush1.msra.mxu1 %v20825_v10  ;;  %11397 = vmatpush1.msra.mxu0 %v20826_v42  ;;  %v20864_v39 = vunpack.c.h.bf16 %v20863_v2  ;;  %v20865_v10 = vunpack.c.l.bf16 %v20861_v49  ;;  %v20866_v42 = vunpack.c.l.bf16 %v20863_v2  ;;  %v20912_v49 = vunpack.c.l.bf16 %v19894_v59 }
0x1162   :  { %11295 = vmatprep.subr.mxu1 %v20827_v35  ;;  %12454 = vmatmul.mubr.msk.f32.vlgmr.msra.gmra.mxu0 %vm900_vm0, %v11363_v21  ;;  %v20858_v21 = vunpack.c.h.bf16 %v20857_v54  ;;  %v20867_v35 = vld [vmem:[#allocation18_spill] sm:$0xff]  ;;  %v20902_v54 = vunpack.c.l.bf16 %v19822_v52  ;;  %v20906_v52 = vld [vmem:[#allocation19_spill] sm:$0xff] }
0x1163   :  { %v20111_v38 = vpop.permute.xlu0 %11665  ;;  %11584 = vmatprep.subr.mxu0 %v20828_v28  ;;  %11296 = vmatpush1.msra.mxu1 %v20829_v6  ;;  %v20868_v28 = vunpack.c.h.bf16 %v20867_v35  ;;  %v20869_v6 = vld [vmem:[#allocation32_spill] sm:$0xff] }
0x1164   :  { %11329 = vmatprep.mubr.f32.mxu1 %v20701_v32  ;;  %11585 = vmatpush1.msra.mxu0 %v20830_v5  ;;  %v20870_v5 = vunpack.c.h.bf16 %v20869_v6 }
0x1165   :  { %12453 = vmatmul.mubr.msk.f32.vlgmr.msra.gmra.mxu1 %vm900_vm0, %v11262_v24  ;;  %11483 = vmatprep.subr.mxu1 %v20831_v25  ;;  %v20841_v24 = vunpack.c.l.bf16 %v19546_v29  ;;  %v20872_v25 = vunpack.c.l.bf16 %v20869_v6 }
0x1166   :  { %11586 = vmatprep.subr.mxu0 %v20832_v15  ;;  %11484 = vmatpush1.msra.mxu1 %v20833_v19  ;;  %v20873_v15 = vld [vmem:[#allocation17_spill] sm:$0xff] }
0x1167   :  { %11587 = vmatpush1.msra.mxu0 %v20834_v56  ;;  %11485 = vmatprep.subr.mxu1 %v20835_v14  ;;  %v20874_v19 = vunpack.c.h.bf16 %v20873_v15  ;;  %v20875_v56 = vld [vmem:[#allocation23_spill] sm:$0xff] }
0x1168   :  { %11588 = vmatprep.subr.mxu0 %v20836_v48  ;;  %11486 = vmatpush1.msra.mxu1 %v20837_v55  ;;  %v20876_v14 = vunpack.c.h.bf16 %v20875_v56  ;;  %v20878_v48 = vunpack.c.l.bf16 %v20875_v56  ;;  %v20879_v55 = vld [vmem:[#allocation21_spill] sm:$0xff] }
0x1169   :  { %v20135_v53 = vpop.permute.xlu0 %11867  ;;  %11589 = vmatpush1.msra.mxu0 %v20838_v43  ;;  %11487 = vmatprep.subr.mxu1 %v20839_v31  ;;  %v20880_v43 = vunpack.c.h.bf16 %v20879_v55  ;;  %v20881_v31 = vld [vmem:[#allocation29_spill] sm:$0xff] }
0x116a   :  { %11590 = vmatprep.subr.mxu0 %v20840_v11  ;;  %11488 = vmatpush1.msra.mxu1 %v20841_v24  ;;  %v20882_v11 = vunpack.c.h.bf16 %v20881_v31  ;;  %v20883_v24 = vunpack.c.l.bf16 %v20879_v55 }
0x116b   :  { %11591 = vmatpush1.msra.mxu0 %v20842_v50  ;;  %11489 = vmatprep.subr.mxu1 %v20843_v45  ;;  %v20884_v50 = vunpack.c.l.bf16 %v20881_v31  ;;  %v20885_v45 = vunpack.c.h.bf16 %v19756_v27 }
0x116c   :  { %11592 = vmatprep.subr.mxu0 %v20844_v62  ;;  %11490 = vmatpush1.msra.mxu1 %v20845_v37  ;;  %v20886_v62 = vld [vmem:[#allocation26_spill] sm:$0xff] }
0x116d   :  { %11593 = vmatpush1.msra.mxu0 %v20846_v1  ;;  %11491 = vmatprep.subr.mxu1 %v20847_v40  ;;  %v20887_v37 = vunpack.c.h.bf16 %v20886_v62  ;;  %v20888_v1 = vunpack.c.l.bf16 %v19756_v27  ;;  %v20889_v40 = vunpack.c.l.bf16 %v20886_v62  ;;  %v20896_v27 = vunpack.c.h.bf16 %v19805_v0 }
0x116e   :  { %v5544_v29 = vpop.permute.xlu0 %5543  ;;  %11594 = vmatprep.subr.mxu0 %v20848_v3  ;;  %11492 = vmatpush1.msra.mxu1 %v20849_v51  ;;  %v20891_v3 = vld [vmem:[#allocation25_spill] sm:$0xff] }
0x116f   :  { %5546 = vst.msk [vmem:[#allocation7] sm:$0x1] %vm5540_vm3, %v5544_v29  ;;  %v20162_v7 = vpop.permute.xlu1 %10999  ;;  %11595 = vmatpush1.msra.mxu0 %v20850_v63  ;;  %11493 = vmatprep.subr.mxu1 %v20851_v41  ;;  %v20890_v29 = vunpack.c.h.bf16 %v19778_v4  ;;  %v20892_v51 = vunpack.c.h.bf16 %v20891_v3  ;;  %v20893_v63 = vunpack.c.l.bf16 %v19778_v4  ;;  %v20894_v41 = vunpack.c.l.bf16 %v20891_v3  ;;  %v20900_v4 = vld [vmem:[#allocation34_spill] sm:$0xff] }
0x1170   :  { %11596 = vmatprep.subr.mxu0 %v20852_v16  ;;  %11494 = vmatpush1.msra.mxu1 %v20853_v9  ;;  %v20895_v16 = vunpack.c.h.bf16 %v19800_v36  ;;  %v20897_v9 = vunpack.c.l.bf16 %v19800_v36  ;;  %v20904_v36 = vunpack.c.h.bf16 %v19844_v18 }
0x1171   :  { %11597 = vmatpush1.msra.mxu0 %v20854_v57  ;;  %11495 = vmatprep.subr.mxu1 %v20856_v22  ;;  %v20898_v57 = vunpack.c.l.bf16 %v19805_v0  ;;  %v20901_v22 = vunpack.c.h.bf16 %v20900_v4  ;;  %v20905_v0 = vunpack.c.l.bf16 %v19844_v18  ;;  %v20911_v18 = vunpack.c.h.bf16 %v19894_v59 }
0x1172   :  { %11598 = vmatprep.subr.mxu0 %v20858_v21  ;;  %11496 = vmatpush1.msra.mxu1 %v20859_v47  ;;  %v20903_v21 = vunpack.c.l.bf16 %v20900_v4  ;;  %v20907_v47 = vunpack.c.h.bf16 %v20906_v52  ;;  %v20920_v59 = vunpack.c.h.bf16 %v19952_v12 }
0x1173   :  { %v5568_v13 = vpop.permute.xlu1 %5567  ;;  %11599 = vmatpush1.msra.mxu0 %v20860_v33  ;;  %11632 = vmatprep.mubr.f32.mxu0 %v20701_v32  ;;  %v20909_v33 = vunpack.c.h.bf16 %v19881_v30 }
0x1174   :  { %5570 = vst.msk [vmem:[#allocation7 - $0x3] sm:$0x10] %vm5564_vm4, %v5568_v13  ;;  %11497 = vmatprep.subr.mxu1 %v20862_v61  ;;  %12456 = vmatmul.mubr.msk.f32.vlgmr.msra.gmra.mxu0 %vm900_vm0, %v11565_v20  ;;  %v20871_v20 = vunpack.c.l.bf16 %v20867_v35  ;;  %v20908_v13 = vunpack.c.l.bf16 %v20906_v52 }
0x1175   :  { %11786 = vmatprep.subr.mxu0 %v20864_v39  ;;  %11498 = vmatpush1.msra.mxu1 %v20865_v10  ;;  %v20917_v39 = vunpack.c.l.bf16 %v19923_v44  ;;  %v20919_v10 = vunpack.c.l.bf16 %v19937_v34 }
0x1176   :  { %11531 = vmatprep.mubr.f32.mxu1 %v20701_v32  ;;  %11787 = vmatpush1.msra.mxu0 %v20866_v42 }
0x1177   :  { %12455 = vmatmul.mubr.msk.f32.vlgmr.msra.gmra.mxu1 %vm900_vm0, %v11464_v46  ;;  %11685 = vmatprep.subr.mxu1 %v20868_v28  ;;  %v20877_v46 = vunpack.c.l.bf16 %v20873_v15 }
0x1178   :  { %11788 = vmatprep.subr.mxu0 %v20870_v5  ;;  %11686 = vmatpush1.msra.mxu1 %v20871_v20 }
0x1179   :  { %11789 = vmatpush1.msra.mxu0 %v20872_v25  ;;  %11687 = vmatprep.subr.mxu1 %v20874_v19 }
0x117a   :  { %11790 = vmatprep.subr.mxu0 %v20876_v14  ;;  %11688 = vmatpush1.msra.mxu1 %v20877_v46 }
0x117b   :  { %11791 = vmatpush1.msra.mxu0 %v20878_v48  ;;  %11689 = vmatprep.subr.mxu1 %v20880_v43 }
0x117c   :  { %11792 = vmatprep.subr.mxu0 %v20882_v11  ;;  %11690 = vmatpush1.msra.mxu1 %v20883_v24 }
0x117d   :  { %11793 = vmatpush1.msra.mxu0 %v20884_v50  ;;  %11691 = vmatprep.subr.mxu1 %v20885_v45 }
0x117e   :  { %11794 = vmatprep.subr.mxu0 %v20887_v37  ;;  %11692 = vmatpush1.msra.mxu1 %v20888_v1  ;;  %v20921_v1 = vld [vmem:[#allocation12_spill] sm:$0xff] }
0x117f   :  { %11795 = vmatpush1.msra.mxu0 %v20889_v40  ;;  %11693 = vmatprep.subr.mxu1 %v20890_v29  ;;  %v20297_v40 = vrot.slane %v20162_v7, %v20921_v1  ;;  %v14555_v7 = vmov 1966171168  }
0x1180   :  { %11796 = vmatprep.subr.mxu0 %v20892_v51  ;;  %11694 = vmatpush1.msra.mxu1 %v20893_v63 }
0x1181   :  { %11797 = vmatpush1.msra.mxu0 %v20894_v41  ;;  %11695 = vmatprep.subr.mxu1 %v20895_v16 }
0x1182   :  { %11798 = vmatprep.subr.mxu0 %v20896_v27  ;;  %11696 = vmatpush1.msra.mxu1 %v20897_v9 }
0x1183   :  { %11799 = vmatpush1.msra.mxu0 %v20898_v57  ;;  %11697 = vmatprep.subr.mxu1 %v20899_v60  ;;  %v11020_v57 = vunpack.c.l.s4 %v14555_v7 }
0x1184   :  { %11800 = vmatprep.subr.mxu0 %v20901_v22  ;;  %11698 = vmatpush1.msra.mxu1 %v20902_v54 }
0x1185   :  { %11801 = vmatpush1.msra.mxu0 %v20903_v21  ;;  %11834 = vmatprep.mubr.f32.mxu0 %v20701_v32 }
0x1186   :  { %11699 = vmatprep.subr.mxu1 %v20904_v36  ;;  %12458 = vmatmul.mubr.msk.f32.vlgmr.msra.gmra.mxu0 %vm900_vm0, %v11767_v17  ;;  %v20910_v17 = vunpack.c.l.bf16 %v19881_v30  ;;  %v20918_v30 = vunpack.c.h.bf16 %v19937_v34 }
0x1187   :  { %11700 = vmatpush1.msra.mxu1 %v20905_v0  ;;  %11733 = vmatprep.mubr.f32.mxu1 %v20701_v32 }
0x1188   :  { %12457 = vmatmul.mubr.msk.f32.vlgmr.msra.gmra.mxu1 %vm900_vm0, %v20111_v38  ;;  %11887 = vmatprep.subr.mxu1 %v20907_v47  ;;  %v20913_v38 = vld [vmem:[#allocation30_spill] sm:$0xff] }
0x1189   :  { %11888 = vmatpush1.msra.mxu1 %v20908_v13  ;;  %11935 = vmatprep.mubr.f32.mxu1 %v20701_v32  ;;  %v20914_v61 = vunpack.c.h.bf16 %v20913_v38  ;;  %v20915_v2 = vunpack.c.l.bf16 %v20913_v38  ;;  %v20916_v32 = vunpack.c.h.bf16 %v19923_v44 }
0x118a   :  { %11889 = vmatprep.subr.mxu1 %v20909_v33 }
0x118b   :  { %11890 = vmatpush1.msra.mxu1 %v20910_v17 }
0x118c   :  { %11891 = vmatprep.subr.mxu1 %v20911_v18 }
0x118d   :  { %11892 = vmatpush1.msra.mxu1 %v20912_v49 }
0x118e   :  { %11893 = vmatprep.subr.mxu1 %v20914_v61 }
0x118f   :  { %11894 = vmatpush1.msra.mxu1 %v20915_v2 }
0x1190   :  { %11895 = vmatprep.subr.mxu1 %v20916_v32 }
0x1191   :  { %11896 = vmatpush1.msra.mxu1 %v20917_v39 }
0x1192   :  { %11897 = vmatprep.subr.mxu1 %v20918_v30 }
0x1193   :  { %11898 = vmatpush1.msra.mxu1 %v20919_v10 }
0x1194   :  { %11899 = vmatprep.subr.mxu1 %v20920_v59 }
0x1195   :  { %11900 = vmatpush1.msra.mxu1 %v10907_v8 }
0x1196   :  { %11901 = vmatprep.subr.mxu1 %v10906_v26 }
0x1197   :  { %11902 = vmatpush1.msra.mxu1 %v10905_v58 }
0x1198   :  { %12459 = vmatmul.mubr.msk.f32.vlgmr.msra.gmra.mxu1 %vm900_vm0, %v20135_v53 }
0x119f   :  { %v10292_v35 = vpop.f32.mrf.mxu1 }
0x11a1   :  { %v10294_v6 = vpop.f32.mrf.mxu1 }
0x11a2   :  { %v10219_v44 = vpop.f32.mrf.mxu0 }
0x11a3   :  { %v10293_v28 = vadd.f32 %v10292_v35, %v10219_v44 }
0x11a4   :  { %v10221_v42 = vpop.f32.mrf.mxu0 }
0x11a5   :  { %v10295_v20 = vadd.f32 %v10294_v6, %v10221_v42 }
0x11b2   :  { %v10490_v12 = vpop.f32.mrf.mxu1 }
0x11b4   :  { %v10492_v26 = vpop.f32.mrf.mxu1 }
0x11b6   :  { %v10390_v34 = vpop.f32.mrf.mxu0 }
0x11b7   :  { %v10395_v25 = vadd.f32 %v10390_v34, %v10293_v28 }
0x11b8   :  { %v10392_v5 = vpop.f32.mrf.mxu0 }
0x11b9   :  { %v10396_v15 = vadd.f32 %v10392_v5, %v10295_v20  ;;  %v10495_v19 = vadd.f32 %v10490_v12, %v10395_v25 }
0x11bb   :  { %v10496_v58 = vadd.f32 %v10492_v26, %v10396_v15 }
0x11c7   :  { %v10690_v14 = vpop.f32.mrf.mxu1 }
0x11c9   :  { %v10590_v8 = vpop.f32.mrf.mxu0  ;;  %v10692_v55 = vpop.f32.mrf.mxu1 }
0x11ca   :  { %v10595_v23 = vadd.f32 %v10590_v8, %v10495_v19 }
0x11cb   :  { %v10592_v56 = vpop.f32.mrf.mxu0 }
0x11cc   :  { %v10596_v53 = vadd.f32 %v10592_v56, %v10496_v58  ;;  %v10695_v48 = vadd.f32 %v10690_v14, %v10595_v23 }
0x11ce   :  { %v10696_v11 = vadd.f32 %v10692_v55, %v10596_v53 }
0x11da   :  { %v10890_v24 = vpop.f32.mrf.mxu1 }
0x11dc   :  { %v10790_v46 = vpop.f32.mrf.mxu0  ;;  %v10892_v62 = vpop.f32.mrf.mxu1 }
0x11dd   :  { %v10795_v31 = vadd.f32 %v10790_v46, %v10695_v48 }
0x11de   :  { %v10792_v43 = vpop.f32.mrf.mxu0 }
0x11df   :  { %v10796_v50 = vadd.f32 %v10792_v43, %v10696_v11  ;;  %v10895_v45 = vadd.f32 %v10890_v24, %v10795_v31 }
0x11e1   :  { %v10896_v3 = vadd.f32 %v10892_v62, %v10796_v50 }
0x11ec   :  { %v10990_v37 = vpop.f32.mrf.mxu0 }
0x11ed   :  { %v10995_v29 = vadd.f32 %v10990_v37, %v10895_v45 }
0x11ee   :  { %v10992_v51 = vpop.f32.mrf.mxu0 }
0x11ef   :  { %v11006_v63 = vadd.f32 %v20297_v40, %v10995_v29  ;;  %v10996_v41 = vadd.f32 %v10992_v51, %v10896_v3 }
0x11f1   :  { %v11008_v16 = vmul.f32 0.5, %v11006_v63  ;;  %v11007_v27 = vadd.f32 %v20297_v40, %v10996_v41 }
0x11f3   :  { %14472 = vtanh.f32 %v11008_v16  ;;  %v11009_v9 = vmul.f32 0.5, %v11007_v27 }
0x11f5   :  { %14474 = vtanh.f32 %v11009_v9 }
0x11f6   :  { %14495 = shalt.err (!%p14492_p4)
}
0x11f7   :  { %11985 = dma.vmem_to_hbm [thread:$0]  %s11983_s6, 32, %s20350_s25, [#allocation6]  }
0x11f8   :  { %s14504_s9 = scalar_lea.vmem %s11993_s7, 32  ;;  %p14509_p6 = scmp.lt.s32.totalorder %s11993_s7, %s11993_s7 }
0x11f9   :  { %p14505_p5 = scmp.ne.s32.totalorder %s11993_s7, %s14504_s9  ;;  %p14510_p7 = scmp.lt.s32.totalorder %s14504_s9, %s14504_s9 }
0x11fb   :  { %p14511_p8 = por %p14510_p7, %p14509_p6 }
0x11fd   :  { %p14512_p9 = pnand %p14511_p8, %p14505_p5 }
0x11ff   :  { %14515 = shalt.err (!%p14512_p9)
}
0x1200   :  { %11995 = dma.vmem_to_hbm [thread:$0]  %s11993_s7, 32, %s20351_s26, [#allocation8]   ;;  %v14473_v60 = vpop.eup %14472  ;;  %v11021_v22 = vunpack.c.0.s8 %v11020_v57  ;;  %v20922_v52 = vld [vmem:[#allocation11_spill] sm:$0xff]  ;;  %v20923_v17 = vlaneseq }
0x1201   :  { %v11012_v4 = vadd.f32 1.0, %v14473_v60 }
0x1202   :  { %v14475_v54 = vpop.eup %14474  ;;  %v11024_v47 = vsub.s32 %v11021_v22, %v20922_v52  ;;  %vm20309_vm15 = vcmp.lt.s32.totalorder %v20923_v17, 256 }
0x1203   :  { %v11013_v21 = vadd.f32 1.0, %v14475_v54  ;;  %v11014_v36 = vmul.f32 0.5, %v11012_v4 }
0x1205   :  { %v11015_v0 = vmul.f32 0.5, %v11013_v21 }
0x1207   :  { %v11018_v13 = vcombine.low %v11014_v36, %v11015_v0 }
0x1209   :  { %v11025_v33 = vrot.slane %v11018_v13, %v11024_v47 }
0x120b   :  { %v11032_v49 = vrot.slane %v11025_v33, %v11024_v47 }
0x120d   :  { %11038 = vst.msk [vmem:[%s20349_s24] ss:$2 sm:$0x3] %vm20309_vm15, %v11032_v49 }
0x1212   :  { %v11232_v2 = vpop.f32.mrf.mxu0 }
0x1214   :  { %v11157_v38 = vpop.f32.mrf.mxu1  ;;  %v11234_v30 = vpop.f32.mrf.mxu0 }
0x1215   :  { %v11233_v39 = vadd.f32 %v11232_v2, %v11157_v38 }
0x1216   :  { %v11159_v61 = vpop.f32.mrf.mxu1 }
0x1217   :  { %v11235_v59 = vadd.f32 %v11234_v30, %v11159_v61 }
0x1222   :  { %v11432_v42 = vpop.f32.mrf.mxu0 }
0x1224   :  { %v11434_v6 = vpop.f32.mrf.mxu0 }
0x1225   :  { %v11331_v32 = vpop.f32.mrf.mxu1 }
0x1226   :  { %v11336_v44 = vadd.f32 %v11331_v32, %v11233_v39 }
0x1227   :  { %v11333_v10 = vpop.f32.mrf.mxu1 }
0x1228   :  { %v11337_v34 = vadd.f32 %v11333_v10, %v11235_v59  ;;  %v11437_v28 = vadd.f32 %v11432_v42, %v11336_v44 }
0x122a   :  { %v11438_v25 = vadd.f32 %v11434_v6, %v11337_v34 }
0x1234   :  { %v11634_v12 = vpop.f32.mrf.mxu0 }
0x1236   :  { %v11636_v26 = vpop.f32.mrf.mxu0 }
0x1237   :  { %v11533_v35 = vpop.f32.mrf.mxu1 }
0x1238   :  { %v11538_v20 = vadd.f32 %v11533_v35, %v11437_v28 }
0x1239   :  { %v11535_v5 = vpop.f32.mrf.mxu1 }
0x123a   :  { %v11539_v15 = vadd.f32 %v11535_v5, %v11438_v25  ;;  %v11639_v19 = vadd.f32 %v11634_v12, %v11538_v20 }
0x123c   :  { %v11640_v58 = vadd.f32 %v11636_v26, %v11539_v15 }
0x1246   :  { %v11836_v14 = vpop.f32.mrf.mxu0 }
0x1248   :  { %v11735_v8 = vpop.f32.mrf.mxu1  ;;  %v11838_v48 = vpop.f32.mrf.mxu0 }
0x1249   :  { %v11740_v23 = vadd.f32 %v11735_v8, %v11639_v19 }
0x124a   :  { %v11737_v56 = vpop.f32.mrf.mxu1 }
0x124b   :  { %v11741_v46 = vadd.f32 %v11737_v56, %v11640_v58  ;;  %v11841_v53 = vadd.f32 %v11836_v14, %v11740_v23 }
0x124d   :  { %v11842_v31 = vadd.f32 %v11838_v48, %v11741_v46 }
0x1258   :  { %v11937_v55 = vpop.f32.mrf.mxu1 }
0x1259   :  { %v11942_v43 = vadd.f32 %v11937_v55, %v11841_v53 }
0x125a   :  { %v11939_v11 = vpop.f32.mrf.mxu1 }
0x125b   :  { %v11944_v24 = vadd.f32 %v11942_v43, %v20297_v40  ;;  %v11943_v50 = vadd.f32 %v11939_v11, %v11842_v31 }
0x125d   :  { %v11946_v45 = vmul.f32 0.5, %v11944_v24  ;;  %v11945_v62 = vadd.f32 %v11943_v50, %v20297_v40 }
0x125f   :  { %14476 = vtanh.f32 %v11946_v45  ;;  %v11947_v37 = vmul.f32 0.5, %v11945_v62 }
0x1261   :  { %14478 = vtanh.f32 %v11947_v37 }
0x126c   :  { %v14477_v1 = vpop.eup %14476 }
0x126d   :  { %v11950_v29 = vadd.f32 1.0, %v14477_v1 }
0x126e   :  { %v14479_v3 = vpop.eup %14478 }
0x126f   :  { %v11951_v51 = vadd.f32 1.0, %v14479_v3  ;;  %v11952_v63 = vmul.f32 0.5, %v11950_v29 }
0x1271   :  { %v11953_v41 = vmul.f32 0.5, %v11951_v51 }
0x1273   :  { %v11956_v16 = vcombine.low %v11952_v63, %v11953_v41 }
0x1275   :  { %v11963_v27 = vrot.slane %v11956_v16, %v11024_v47 }
0x1277   :  { %v11970_v9 = vrot.slane %v11963_v27, %v11024_v47 }
0x1279   :  { %12460 = vst.msk [vmem:[%s20349_s24 + $0x1] ss:$2 sm:$0x3] %vm20309_vm15, %v11970_v9 }
0x127a   :  { %14524 = dma.done.wait [#allocation6], 32  }
0x127b   :  { %14525 = vsyncadd [#allocation6], 4294967264 }
0x127c   :  { %14526 = dma.done.wait [#allocation8], 32  }
0x127d   :  { %14527 = vsyncadd [#allocation8], 4294967264 }
0x127e   :  { %12004 = vsyncpa [#allocation6], 1 }
0x127f   :  { %12005 = vsyncpa [#allocation8], 1 }

</bundles_post_ra>
